<compile_context>
chip_gen: v7x
topology: tpu7x:2x2x1
jax: 0.10.0
libtpu: 0.0.40
codegen_flags: <defaults>
</compile_context>

<pallas_src>
import functools

import jax
import jax.numpy as jnp
from jax.experimental import pallas as pl
from jax.experimental.pallas import tpu as pltpu

_PARALLEL_1D = pltpu.CompilerParams(dimension_semantics=("parallel",))
_HEAD_LANES = 128  # lane-dense head output slabs; real columns sliced in wrapper

_GMLP_KEYS = ("ln1g", "ln1b", "w1u", "b1u", "w1v", "b1v",
              "ln2g", "ln2b", "ws", "bs", "w2", "b2")          # 12 params
_HEAD_KEYS = ("wa", "ta", "w12", "b12", "w22", "b22")           # 6 params


# ---------------------------------------------------------------------------
# In-kernel building blocks (operate on loaded arrays / refs)
# ---------------------------------------------------------------------------
def _mlp_chain(h, layer_refs):
    """Chained (1x1 conv -> folded BN -> ReLU). layer_refs = [w0,t0,w1,t1,...]."""
    for li in range(len(layer_refs) // 2):
        w = layer_refs[2 * li][...]
        t = layer_refs[2 * li + 1][...]
        h = jnp.dot(h.astype(jnp.bfloat16), w, preferred_element_type=jnp.float32) + t
        h = jnp.maximum(h, 0.0)
    return h


def _gmlp_block(x, ln1g, ln1b, w1u, b1u, w1v, b1v, ln2g, ln2b, ws, bs, w2, b2):
    """One gMLP block on a [N, d_model] f32 tile (LayerNorm/GELU math in f32)."""
    mu = jnp.mean(x, axis=-1, keepdims=True)
    var = jnp.mean(jnp.square(x - mu), axis=-1, keepdims=True)
    xn = ((x - mu) * jax.lax.rsqrt(var + 1e-5) * ln1g + ln1b).astype(jnp.bfloat16)
    # proj_1 split into the u/v halves (avoids non-aligned lane slicing).
    u = jax.nn.gelu(jnp.dot(xn, w1u, preferred_element_type=jnp.float32) + b1u,
                    approximate=True)
    v = jax.nn.gelu(jnp.dot(xn, w1v, preferred_element_type=jnp.float32) + b1v,
                    approximate=True)
    # Spatial Gating Unit: LayerNorm(v) then Conv1d over the sequence axis.
    mu2 = jnp.mean(v, axis=-1, keepdims=True)
    var2 = jnp.mean(jnp.square(v - mu2), axis=-1, keepdims=True)
    vn = ((v - mu2) * jax.lax.rsqrt(var2 + 1e-5) * ln2g + ln2b).astype(jnp.bfloat16)
    vs = jnp.dot(ws, vn, preferred_element_type=jnp.float32) + bs
    gated = (u * vs).astype(jnp.bfloat16)
    y = jnp.dot(gated, w2, preferred_element_type=jnp.float32) + b2
    return y + x


# ---------------------------------------------------------------------------
# Fused Pallas kernels
# ---------------------------------------------------------------------------
def _sa_gmlp_kernel(*refs, n_layers, nsample):
    # refs = x, (w,t)*n_layers, 12 gMLP params, out
    x_ref, o_ref = refs[0], refs[-1]
    layer_refs = refs[1:1 + 2 * n_layers]
    g = [r[...] for r in refs[1 + 2 * n_layers:-1]]
    h = _mlp_chain(x_ref[0], layer_refs)                         # [S*K, Cout]
    S = h.shape[0] // nsample
    # torch.max(new_points, 2)[0]: single vectorized reduce + one block store.
    h = jnp.max(h.reshape(S, nsample, h.shape[-1]), axis=1)      # [S, Cout]
    o_ref[0] = _gmlp_block(h, *g)


def _fp_gmlp_kernel(*refs, n_layers):
    # refs = x, (w,t)*n_layers, 12 gMLP params, out
    x_ref, o_ref = refs[0], refs[-1]
    layer_refs = refs[1:1 + 2 * n_layers]
    g = [r[...] for r in refs[1 + 2 * n_layers:-1]]
    h = _mlp_chain(x_ref[0], layer_refs)                         # [N, Cout]
    o_ref[0] = _gmlp_block(h, *g)


def _fp_gmlp_heads_kernel(*refs, n_layers):
    # refs = x, (w,t)*n_layers, 12 gMLP params, 6 head params, sem_out, shift_out
    x_ref = refs[0]
    sem_ref, shift_ref = refs[-2], refs[-1]
    base = 1
    layer_refs = refs[base:base + 2 * n_layers]; base += 2 * n_layers
    g = [r[...] for r in refs[base:base + 12]]; base += 12
    wa, ta, w12, b12, w22, b22 = refs[base:base + 6]

    h = _mlp_chain(x_ref[0], layer_refs)                         # [N, 16]
    feat = _gmlp_block(h, *g)                                    # [N, 16] f32

    # Both heads' first layers merged into one [16,32] matmul (+folded BN+ReLU).
    ha = jnp.maximum(
        jnp.dot(feat.astype(jnp.bfloat16), wa[...],
                preferred_element_type=jnp.float32) + ta[...], 0.0)   # [N, 32]
    hb = ha.astype(jnp.bfloat16)
    # Second layers act on the concatenated hidden via zero-padded weights
    # (rows of the other head are zero), lane-padded to 128 output columns.
    z = jnp.dot(hb, w12[...], preferred_element_type=jnp.float32) + b12[...]
    zmax = jnp.max(z, axis=-1, keepdims=True)
    lse = jnp.log(jnp.sum(jnp.exp(z - zmax), axis=-1, keepdims=True)) + zmax
    sem_ref[0] = z - lse                                         # log_softmax
    shift_ref[0] = jnp.dot(hb, w22[...], preferred_element_type=jnp.float32) + b22[...]


def _const_spec(p):
    return pl.BlockSpec(p.shape, lambda b, _nd=p.ndim: (0,) * _nd)


def fused_sa_gmlp(grouped, sa_layers, gmlp_p):
    """grouped [B,S,K,Cin] -> MLP chain -> max over K -> gMLP -> [B,S,Cout]."""
    B, S, K, Cin = grouped.shape
    Cout = sa_layers[-1][0].shape[1]
    x = grouped.reshape(B, S * K, Cin).astype(jnp.bfloat16)
    args, specs = [x], [pl.BlockSpec((1, S * K, Cin), lambda b: (b, 0, 0))]
    for (w, t) in sa_layers:
        args += [w, t]; specs += [_const_spec(w), _const_spec(t)]
    for k in _GMLP_KEYS:
        p = gmlp_p[k]; args.append(p); specs.append(_const_spec(p))
    return pl.pallas_call(
        functools.partial(_sa_gmlp_kernel, n_layers=len(sa_layers), nsample=K),
        out_shape=jax.ShapeDtypeStruct((B, S, Cout), jnp.float32),
        grid=(B,),
        in_specs=specs,
        out_specs=pl.BlockSpec((1, S, Cout), lambda b: (b, 0, 0)),
        compiler_params=_PARALLEL_1D,
    )(*args)


def fused_fp_gmlp(x, fp_layers, gmlp_p):
    """x [B,N,Cin] -> MLP chain -> gMLP -> [B,N,Cout]."""
    B, N, Cin = x.shape
    Cout = fp_layers[-1][0].shape[1]
    args = [x.astype(jnp.bfloat16)]
    specs = [pl.BlockSpec((1, N, Cin), lambda b: (b, 0, 0))]
    for (w, t) in fp_layers:
        args += [w, t]; specs += [_const_spec(w), _const_spec(t)]
    for k in _GMLP_KEYS:
        p = gmlp_p[k]; args.append(p); specs.append(_const_spec(p))
    return pl.pallas_call(
        functools.partial(_fp_gmlp_kernel, n_layers=len(fp_layers)),
        out_shape=jax.ShapeDtypeStruct((B, N, Cout), jnp.float32),
        grid=(B,),
        in_specs=specs,
        out_specs=pl.BlockSpec((1, N, Cout), lambda b: (b, 0, 0)),
        compiler_params=_PARALLEL_1D,
    )(*args)


def fused_fp_gmlp_heads(x, fp_layers, gmlp_p, head_p):
    """x [B,N,Cin] -> MLP chain -> gMLP -> both heads -> two [B,N,128] slabs."""
    B, N, Cin = x.shape
    args = [x.astype(jnp.bfloat16)]
    specs = [pl.BlockSpec((1, N, Cin), lambda b: (b, 0, 0))]
    for (w, t) in fp_layers:
        args += [w, t]; specs += [_const_spec(w), _const_spec(t)]
    for k in _GMLP_KEYS:
        p = gmlp_p[k]; args.append(p); specs.append(_const_spec(p))
    for k in _HEAD_KEYS:
        p = head_p[k]; args.append(p); specs.append(_const_spec(p))
    return pl.pallas_call(
        functools.partial(_fp_gmlp_heads_kernel, n_layers=len(fp_layers)),
        out_shape=(jax.ShapeDtypeStruct((B, N, _HEAD_LANES), jnp.float32),
                   jax.ShapeDtypeStruct((B, N, _HEAD_LANES), jnp.float32)),
        grid=(B,),
        in_specs=specs,
        out_specs=(pl.BlockSpec((1, N, _HEAD_LANES), lambda b: (b, 0, 0)),
                   pl.BlockSpec((1, N, _HEAD_LANES), lambda b: (b, 0, 0))),
        compiler_params=_PARALLEL_1D,
    )(*args)


# ---------------------------------------------------------------------------
# Plain-JAX glue (data-dependent sampling / grouping / gathers)
# ---------------------------------------------------------------------------
def square_distance(src, dst):
    return (jnp.sum(src ** 2, -1)[:, :, None]
            + jnp.sum(dst ** 2, -1)[:, None, :]
            - 2.0 * jnp.einsum("bmc,bnc->bmn", src, dst))


def index_points(points, idx):
    return jax.vmap(lambda p, i: p[i])(points, idx)


def farthest_point_sample(xyz, npoint):
    # Deterministic FPS (starts from index 0 instead of torch.randint).
    B, N, _ = xyz.shape

    def body(i, state):
        dist, farthest, idxs = state
        idxs = idxs.at[:, i].set(farthest)
        centroid = index_points(xyz, farthest[:, None])
        d = jnp.sum((xyz - centroid) ** 2, axis=-1)
        dist = jnp.minimum(dist, d)
        farthest = jnp.argmax(dist, axis=-1).astype(jnp.int32)
        return dist, farthest, idxs

    state = (jnp.full((B, N), 1e10, jnp.float32),
             jnp.zeros((B,), jnp.int32),
             jnp.zeros((B, npoint), jnp.int32))
    _, _, idxs = jax.lax.fori_loop(0, npoint, body, state)
    return idxs


def query_ball_point(radius, nsample, xyz, new_xyz):
    # O(N*k) top-k selection (same result as PyTorch's sort-then-slice).
    B, N, _ = xyz.shape
    S = new_xyz.shape[1]
    sqrdists = square_distance(new_xyz, xyz)
    idx = jnp.broadcast_to(jnp.arange(N, dtype=jnp.int32), (B, S, N))
    masked = jnp.where(sqrdists > radius ** 2, N, idx)
    neg_top, _ = jax.lax.top_k(-masked, nsample)      # nsample smallest indices
    group_idx = -neg_top
    group_first = jnp.broadcast_to(group_idx[:, :, :1], group_idx.shape)
    group_idx = jnp.where(group_idx == N, group_first, group_idx)
    return group_idx


def set_abstraction_gmlp(xyz, points, npoint, radius, nsample, layers, gmlp_p):
    fps_idx = farthest_point_sample(xyz, npoint)
    new_xyz = index_points(xyz, fps_idx)                           # [B,S,3]
    idx = query_ball_point(radius, nsample, xyz, new_xyz)          # [B,S,K]
    grouped_xyz = index_points(xyz, idx) - new_xyz[:, :, None, :]  # [B,S,K,3]
    if points is not None:
        grouped = jnp.concatenate([grouped_xyz, index_points(points, idx)], axis=-1)
    else:
        grouped = grouped_xyz
    # Pad nsample to a multiple of 8 (sublane) with duplicates of the first
    # neighbour; duplicates do not change the per-row MLP -> max result.
    K = grouped.shape[2]
    pad = (-K) % 8
    if pad:
        grouped = jnp.concatenate(
            [grouped, jnp.repeat(grouped[:, :, :1, :], pad, axis=2)], axis=2)
    feat = fused_sa_gmlp(grouped, layers, gmlp_p)                  # [B,S,Cout]
    return new_xyz, feat


def _fp_interp(xyz1, xyz2, points1, points2):
    B, N, _ = xyz1.shape
    S = xyz2.shape[1]
    if S == 1:
        interp = jnp.broadcast_to(points2, (B, N, points2.shape[-1]))
    else:
        d = square_distance(xyz1, xyz2)
        neg, idx = jax.lax.top_k(-d, 3)
        dists = -neg
        w = 1.0 / (dists + 1e-8)
        w = w / jnp.sum(w, axis=-1, keepdims=True)
        gathered = index_points(points2, idx)
        interp = jnp.sum(gathered * w[..., None], axis=2)
    if points1 is None:
        return interp
    return jnp.concatenate([points1, interp], axis=-1)


def feature_propagation_gmlp(xyz1, xyz2, points1, points2, layers, gmlp_p):
    return fused_fp_gmlp(_fp_interp(xyz1, xyz2, points1, points2), layers, gmlp_p)


def feature_propagation_gmlp_heads(xyz1, xyz2, points1, points2, layers, gmlp_p, head_p):
    return fused_fp_gmlp_heads(_fp_interp(xyz1, xyz2, points1, points2),
                               layers, gmlp_p, head_p)


# ---------------------------------------------------------------------------
# Parameter construction (deterministic, synthetic; BN folded, scale into W)
# ---------------------------------------------------------------------------
def fold_bn(bias, gamma, beta, mean, var, eps=1e-5):
    s = gamma / jnp.sqrt(var + eps)
    t = beta + (bias - mean) * s
    return s, t


def init_conv(key, cin, cout, scale=0.1):
    k1, k2 = jax.random.split(key)
    return (jax.random.normal(k1, (cin, cout), jnp.float32) * scale,
            jax.random.normal(k2, (cout,), jnp.float32) * scale)


def init_mlp_layers(key, cin, channels):
    layers, c = [], cin
    for cout in channels:
        key, kc = jax.random.split(key)
        w, b = init_conv(kc, c, cout)
        s, t = fold_bn(b, jnp.ones(cout), jnp.zeros(cout), jnp.zeros(cout), jnp.ones(cout))
        layers.append(((w * s[None, :]).astype(jnp.bfloat16),          # BN scale folded
                       t.reshape(1, cout).astype(jnp.float32)))
        c = cout
    return layers


def init_gmlp(key, d_model, d_ffn, seq):
    k1, k2, k3, k4, k5 = jax.random.split(key, 5)
    w1 = jax.random.normal(k1, (d_model, 2 * d_ffn), jnp.float32) * 0.1
    b1 = jax.random.normal(k2, (2 * d_ffn,), jnp.float32) * 0.1
    return dict(
        ln1g=jnp.ones((1, d_model), jnp.float32),
        ln1b=jnp.zeros((1, d_model), jnp.float32),
        w1u=w1[:, :d_ffn].astype(jnp.bfloat16),
        b1u=b1[:d_ffn].reshape(1, d_ffn).astype(jnp.float32),
        w1v=w1[:, d_ffn:].astype(jnp.bfloat16),
        b1v=b1[d_ffn:].reshape(1, d_ffn).astype(jnp.float32),
        ln2g=jnp.ones((1, d_ffn), jnp.float32),
        ln2b=jnp.zeros((1, d_ffn), jnp.float32),
        ws=(jax.random.normal(k3, (seq, seq), jnp.float32) * 0.01).astype(jnp.bfloat16),
        bs=jnp.ones((seq, 1), jnp.float32),                            # spatial bias init = 1
        w2=(jax.random.normal(k4, (d_ffn, d_model), jnp.float32) * 0.1).astype(jnp.bfloat16),
        b2=jax.random.normal(k5, (1, d_model), jnp.float32) * 0.1,
    )


def init_heads(key, num_class):
    k1, k2, k3, k4 = jax.random.split(key, 4)
    w11, b11 = init_conv(k1, 16, 16)
    s1, t1 = fold_bn(b11, jnp.ones(16), jnp.zeros(16), jnp.zeros(16), jnp.ones(16))
    w12, b12 = init_conv(k2, 16, num_class)
    w21, b21 = init_conv(k3, 16, 16)
    s2, t2 = fold_bn(b21, jnp.ones(16), jnp.zeros(16), jnp.zeros(16), jnp.ones(16))
    w22, b22 = init_conv(k4, 16, 3)
    # Merge the two first layers into one [16,32] matmul (BN scale folded).
    wa = jnp.concatenate([w11 * s1[None, :], w21 * s2[None, :]], axis=1).astype(jnp.bfloat16)
    ta = jnp.concatenate([t1, t2]).reshape(1, 32).astype(jnp.float32)
    # Second layers lifted to the concatenated 32-wide hidden (zero rows for the
    # other head) and zero-padded to 128 output lanes (lane-dense stores).
    w12f = jnp.zeros((32, _HEAD_LANES), jnp.float32).at[:16, :num_class].set(w12)
    w22f = jnp.zeros((32, _HEAD_LANES), jnp.float32).at[16:, :3].set(w22)
    b12p = jnp.full((1, _HEAD_LANES), -1e9, jnp.float32).at[0, :num_class].set(b12)
    b22p = jnp.zeros((1, _HEAD_LANES), jnp.float32).at[0, :3].set(b22)
    return dict(wa=wa, ta=ta,
                w12=w12f.astype(jnp.bfloat16), b12=b12p,
                w22=w22f.astype(jnp.bfloat16), b22=b22p)


def init_model(key, num_class, D, C, np1, ns1, np2, ns2, nframe):
    ks = jax.random.split(key, 9)
    p = {}
    p["sa1"] = init_mlp_layers(ks[0], C + D, [ns1, 32, 64])
    p["gmlp1"] = init_gmlp(ks[1], 64, 32, np1)
    p["sa2"] = init_mlp_layers(ks[2], 64 + D, [64, 128, 256])
    p["gmlp2"] = init_gmlp(ks[3], 256, 128, np2)
    p["fp2"] = init_mlp_layers(ks[4], 256 + 64, [64, 32])
    p["gmlp3"] = init_gmlp(ks[5], 32, 16, np1)
    p["fp1"] = init_mlp_layers(ks[6], 32 + C, [32, 32, 16])
    p["gmlp4"] = init_gmlp(ks[7], 16, 8, nframe)
    p["heads"] = init_heads(ks[8], num_class)
    return p


# ---------------------------------------------------------------------------
# Full forward pass
# ---------------------------------------------------------------------------
def forward(params, xyz, dataset_D, num_class, np1, r1, ns1, np2, r2, ns2):
    # xyz: [B, D+C, N] (PyTorch NCW) -> channel-last internally.
    x = jnp.transpose(xyz, (0, 2, 1)).astype(jnp.float32)        # [B, N, D+C]
    l0_xyz = x[:, :, :dataset_D]
    l0_points = x[:, :, dataset_D:]

    # SA1 (+gmlp1) and SA2 (+gmlp2): shared-MLP chain, max-pool and gMLP fused.
    l1_xyz, l1_points = set_abstraction_gmlp(
        l0_xyz, l0_points, np1, r1, ns1, params["sa1"], params["gmlp1"])
    l2_xyz, l2_points = set_abstraction_gmlp(
        l1_xyz, l1_points, np2, r2, ns2, params["sa2"], params["gmlp2"])

    # FP2 (+gmlp3) fused.
    l1_points = feature_propagation_gmlp(
        l1_xyz, l2_xyz, l1_points, l2_points, params["fp2"], params["gmlp3"])

    # FP1 (+gmlp4 + both heads) fused; lane-dense [B,N,128] slabs out.
    sem_pad, shift_pad = feature_propagation_gmlp_heads(
        l0_xyz, l1_xyz, l0_points, l1_points,
        params["fp1"], params["gmlp4"], params["heads"])

    pred_sem_mat = sem_pad[:, :, :num_class]
    pred_center_shift_vectors = shift_pad[:, :, :3]
    return pred_sem_mat, pred_center_shift_vectors


# ---------------------------------------------------------------------------
if __name__ == "__main__":
    B = 2
    dataset_D, dataset_C = 3, 2          # module hardcodes fp1 in_channel = 32 + 2
    num_class = 5
    np1, r1, ns1 = 32, 0.4, 16           # first SA layer
    np2, r2, ns2 = 16, 0.8, 8            # second SA layer
    nframe = 64                          # number_of_points_in_a_frame

    key = jax.random.PRNGKey(0)
    kx, kp = jax.random.split(key)
    xyz = jax.random.uniform(kx, (B, dataset_D + dataset_C, nframe), jnp.float32)

    params = init_model(kp, num_class, dataset_D, dataset_C, np1, ns1, np2, ns2, nframe)

    fwd = jax.jit(functools.partial(
        forward, dataset_D=dataset_D, num_class=num_class,
        np1=np1, r1=r1, ns1=ns1, np2=np2, r2=r2, ns2=ns2))

    pred_sem, pred_shift = jax.block_until_ready(fwd(params, xyz))

    assert pred_sem.shape == (B, nframe, num_class)
    assert pred_shift.shape == (B, nframe, 3)
    assert bool(jnp.all(jnp.isfinite(pred_sem))) and bool(jnp.all(jnp.isfinite(pred_shift)))
    print("KERNEL_OK")
</pallas_src>

<mosaic_0001>
module attributes {stable_mosaic.version = 11 : i64} {
  func.func @_sa_gmlp_kernel(%arg0: i32, %arg1: memref<1x512x5xbf16, #tpu.memory_space<vmem>>, %arg2: memref<5x16xbf16, #tpu.memory_space<vmem>>, %arg3: memref<1x16xf32, #tpu.memory_space<vmem>>, %arg4: memref<16x32xbf16, #tpu.memory_space<vmem>>, %arg5: memref<1x32xf32, #tpu.memory_space<vmem>>, %arg6: memref<32x64xbf16, #tpu.memory_space<vmem>>, %arg7: memref<1x64xf32, #tpu.memory_space<vmem>>, %arg8: memref<1x64xf32, #tpu.memory_space<vmem>>, %arg9: memref<1x64xf32, #tpu.memory_space<vmem>>, %arg10: memref<64x32xbf16, #tpu.memory_space<vmem>>, %arg11: memref<1x32xf32, #tpu.memory_space<vmem>>, %arg12: memref<64x32xbf16, #tpu.memory_space<vmem>>, %arg13: memref<1x32xf32, #tpu.memory_space<vmem>>, %arg14: memref<1x32xf32, #tpu.memory_space<vmem>>, %arg15: memref<1x32xf32, #tpu.memory_space<vmem>>, %arg16: memref<32x32xbf16, #tpu.memory_space<vmem>>, %arg17: memref<32x1xf32, #tpu.memory_space<vmem>>, %arg18: memref<32x64xbf16, #tpu.memory_space<vmem>>, %arg19: memref<1x64xf32, #tpu.memory_space<vmem>>, %arg20: memref<1x32x64xf32, #tpu.memory_space<vmem>>) attributes {dimension_semantics = [#tpu.dimension_semantics<parallel>], iteration_bounds = array<i64: 2>, scalar_prefetch = 0 : i64, scratch_operands = 0 : i64, tpu.core_type = #tpu.core_type<tc>, window_params = [{transform_indices = @transform_0, window_bounds = array<i64: 1, 512, 5>}, {pipeline_mode = #tpu.pipeline_mode<synchronous>, transform_indices = @transform_1, window_bounds = array<i64: 5, 16>}, {pipeline_mode = #tpu.pipeline_mode<synchronous>, transform_indices = @transform_2, window_bounds = array<i64: 1, 16>}, {pipeline_mode = #tpu.pipeline_mode<synchronous>, transform_indices = @transform_3, window_bounds = array<i64: 16, 32>}, {pipeline_mode = #tpu.pipeline_mode<synchronous>, transform_indices = @transform_4, window_bounds = array<i64: 1, 32>}, {pipeline_mode = #tpu.pipeline_mode<synchronous>, transform_indices = @transform_5, window_bounds = array<i64: 32, 64>}, {pipeline_mode = #tpu.pipeline_mode<synchronous>, transform_indices = @transform_6, window_bounds = array<i64: 1, 64>}, {pipeline_mode = #tpu.pipeline_mode<synchronous>, transform_indices = @transform_7, window_bounds = array<i64: 1, 64>}, {pipeline_mode = #tpu.pipeline_mode<synchronous>, transform_indices = @transform_8, window_bounds = array<i64: 1, 64>}, {pipeline_mode = #tpu.pipeline_mode<synchronous>, transform_indices = @transform_9, window_bounds = array<i64: 64, 32>}, {pipeline_mode = #tpu.pipeline_mode<synchronous>, transform_indices = @transform_10, window_bounds = array<i64: 1, 32>}, {pipeline_mode = #tpu.pipeline_mode<synchronous>, transform_indices = @transform_11, window_bounds = array<i64: 64, 32>}, {pipeline_mode = #tpu.pipeline_mode<synchronous>, transform_indices = @transform_12, window_bounds = array<i64: 1, 32>}, {pipeline_mode = #tpu.pipeline_mode<synchronous>, transform_indices = @transform_13, window_bounds = array<i64: 1, 32>}, {pipeline_mode = #tpu.pipeline_mode<synchronous>, transform_indices = @transform_14, window_bounds = array<i64: 1, 32>}, {pipeline_mode = #tpu.pipeline_mode<synchronous>, transform_indices = @transform_15, window_bounds = array<i64: 32, 32>}, {pipeline_mode = #tpu.pipeline_mode<synchronous>, transform_indices = @transform_16, window_bounds = array<i64: 32, 1>}, {pipeline_mode = #tpu.pipeline_mode<synchronous>, transform_indices = @transform_17, window_bounds = array<i64: 32, 64>}, {pipeline_mode = #tpu.pipeline_mode<synchronous>, transform_indices = @transform_18, window_bounds = array<i64: 1, 64>}, {transform_indices = @transform_19, window_bounds = array<i64: 1, 32, 64>}]} {
    %c0 = arith.constant 0 : index
    %c0_0 = arith.constant 0 : index
    %0 = vector.load %arg8[%c0, %c0_0] : memref<1x64xf32, #tpu.memory_space<vmem>>, vector<1x64xf32>
    %c0_1 = arith.constant 0 : index
    %c0_2 = arith.constant 0 : index
    %1 = vector.load %arg9[%c0_1, %c0_2] : memref<1x64xf32, #tpu.memory_space<vmem>>, vector<1x64xf32>
    %c0_3 = arith.constant 0 : index
    %c0_4 = arith.constant 0 : index
    %2 = vector.load %arg10[%c0_3, %c0_4] : memref<64x32xbf16, #tpu.memory_space<vmem>>, vector<64x32xbf16>
    %c0_5 = arith.constant 0 : index
    %c0_6 = arith.constant 0 : index
    %3 = vector.load %arg11[%c0_5, %c0_6] : memref<1x32xf32, #tpu.memory_space<vmem>>, vector<1x32xf32>
    %c0_7 = arith.constant 0 : index
    %c0_8 = arith.constant 0 : index
    %4 = vector.load %arg12[%c0_7, %c0_8] : memref<64x32xbf16, #tpu.memory_space<vmem>>, vector<64x32xbf16>
    %c0_9 = arith.constant 0 : index
    %c0_10 = arith.constant 0 : index
    %5 = vector.load %arg13[%c0_9, %c0_10] : memref<1x32xf32, #tpu.memory_space<vmem>>, vector<1x32xf32>
    %c0_11 = arith.constant 0 : index
    %c0_12 = arith.constant 0 : index
    %6 = vector.load %arg14[%c0_11, %c0_12] : memref<1x32xf32, #tpu.memory_space<vmem>>, vector<1x32xf32>
    %c0_13 = arith.constant 0 : index
    %c0_14 = arith.constant 0 : index
    %7 = vector.load %arg15[%c0_13, %c0_14] : memref<1x32xf32, #tpu.memory_space<vmem>>, vector<1x32xf32>
    %c0_15 = arith.constant 0 : index
    %c0_16 = arith.constant 0 : index
    %8 = vector.load %arg16[%c0_15, %c0_16] : memref<32x32xbf16, #tpu.memory_space<vmem>>, vector<32x32xbf16>
    %c0_17 = arith.constant 0 : index
    %c0_18 = arith.constant 0 : index
    %9 = vector.load %arg17[%c0_17, %c0_18] : memref<32x1xf32, #tpu.memory_space<vmem>>, vector<32x1xf32>
    %c0_19 = arith.constant 0 : index
    %c0_20 = arith.constant 0 : index
    %10 = vector.load %arg18[%c0_19, %c0_20] : memref<32x64xbf16, #tpu.memory_space<vmem>>, vector<32x64xbf16>
    %c0_21 = arith.constant 0 : index
    %c0_22 = arith.constant 0 : index
    %11 = vector.load %arg19[%c0_21, %c0_22] : memref<1x64xf32, #tpu.memory_space<vmem>>, vector<1x64xf32>
    %c0_23 = arith.constant 0 : index
    %c0_24 = arith.constant 0 : index
    %c0_25 = arith.constant 0 : index
    %12 = vector.load %arg1[%c0_23, %c0_24, %c0_25] : memref<1x512x5xbf16, #tpu.memory_space<vmem>>, vector<1x512x5xbf16>
    %13 = vector.shape_cast %12 : vector<1x512x5xbf16> to vector<512x5xbf16>
    %c0_26 = arith.constant 0 : index
    %c0_27 = arith.constant 0 : index
    %14 = vector.load %arg2[%c0_26, %c0_27] : memref<5x16xbf16, #tpu.memory_space<vmem>>, vector<5x16xbf16>
    %c0_28 = arith.constant 0 : index
    %c0_29 = arith.constant 0 : index
    %15 = vector.load %arg3[%c0_28, %c0_29] : memref<1x16xf32, #tpu.memory_space<vmem>>, vector<1x16xf32>
    %cst = arith.constant dense<0.000000e+00> : vector<512x16xf32>
    %16 = tpu.matmul %13, %14, %cst {dimension_numbers = #tpu.dot_dimension_numbers<[1], [0], [0], [1], [0, 0, 1, 1], [], []>} : vector<512x5xbf16>, vector<5x16xbf16>, vector<512x16xf32> -> vector<512x16xf32>
    %17 = vector.broadcast %15 : vector<1x16xf32> to vector<512x16xf32>
    %18 = arith.addf %16, %17 : vector<512x16xf32>
    %cst_30 = arith.constant 0.000000e+00 : f32
    %19 = vector.broadcast %cst_30 : f32 to vector<512x16xf32>
    %20 = arith.maximumf %18, %19 : vector<512x16xf32>
    %c0_31 = arith.constant 0 : index
    %c0_32 = arith.constant 0 : index
    %21 = vector.load %arg4[%c0_31, %c0_32] : memref<16x32xbf16, #tpu.memory_space<vmem>>, vector<16x32xbf16>
    %c0_33 = arith.constant 0 : index
    %c0_34 = arith.constant 0 : index
    %22 = vector.load %arg5[%c0_33, %c0_34] : memref<1x32xf32, #tpu.memory_space<vmem>>, vector<1x32xf32>
    %23 = arith.truncf %20 : vector<512x16xf32> to vector<512x16xbf16>
    %cst_35 = arith.constant dense<0.000000e+00> : vector<512x32xf32>
    %24 = tpu.matmul %23, %21, %cst_35 {dimension_numbers = #tpu.dot_dimension_numbers<[1], [0], [0], [1], [0, 0, 1, 1], [], []>} : vector<512x16xbf16>, vector<16x32xbf16>, vector<512x32xf32> -> vector<512x32xf32>
    %25 = vector.broadcast %22 : vector<1x32xf32> to vector<512x32xf32>
    %26 = arith.addf %24, %25 : vector<512x32xf32>
    %cst_36 = arith.constant 0.000000e+00 : f32
    %27 = vector.broadcast %cst_36 : f32 to vector<512x32xf32>
    %28 = arith.maximumf %26, %27 : vector<512x32xf32>
    %c0_37 = arith.constant 0 : index
    %c0_38 = arith.constant 0 : index
    %29 = vector.load %arg6[%c0_37, %c0_38] : memref<32x64xbf16, #tpu.memory_space<vmem>>, vector<32x64xbf16>
    %c0_39 = arith.constant 0 : index
    %c0_40 = arith.constant 0 : index
    %30 = vector.load %arg7[%c0_39, %c0_40] : memref<1x64xf32, #tpu.memory_space<vmem>>, vector<1x64xf32>
    %31 = arith.truncf %28 : vector<512x32xf32> to vector<512x32xbf16>
    %cst_41 = arith.constant dense<0.000000e+00> : vector<512x64xf32>
    %32 = tpu.matmul %31, %29, %cst_41 {dimension_numbers = #tpu.dot_dimension_numbers<[1], [0], [0], [1], [0, 0, 1, 1], [], []>} : vector<512x32xbf16>, vector<32x64xbf16>, vector<512x64xf32> -> vector<512x64xf32>
    %33 = vector.broadcast %30 : vector<1x64xf32> to vector<512x64xf32>
    %34 = arith.addf %32, %33 : vector<512x64xf32>
    %cst_42 = arith.constant 0.000000e+00 : f32
    %35 = vector.broadcast %cst_42 : f32 to vector<512x64xf32>
    %36 = arith.maximumf %34, %35 : vector<512x64xf32>
    %37 = vector.shape_cast %36 : vector<512x64xf32> to vector<32x16x64xf32>
    %cst_43 = arith.constant dense<0xFF800000> : vector<32x64xf32>
    %38 = vector.multi_reduction <maximumf>, %37, %cst_43 [1] : vector<32x16x64xf32> to vector<32x64xf32>
    %cst_44 = arith.constant dense<0.000000e+00> : vector<32xf32>
    %39 = vector.multi_reduction <add>, %38, %cst_44 [1] : vector<32x64xf32> to vector<32xf32>
    %40 = vector.shape_cast %39 : vector<32xf32> to vector<32x1xf32>
    %cst_45 = arith.constant 6.400000e+01 : f32
    %41 = vector.broadcast %cst_45 : f32 to vector<32x1xf32>
    %42 = arith.divf %40, %41 : vector<32x1xf32>
    %43 = vector.broadcast %42 : vector<32x1xf32> to vector<32x64xf32>
    %44 = arith.subf %38, %43 : vector<32x64xf32>
    %45 = arith.mulf %44, %44 : vector<32x64xf32>
    %cst_46 = arith.constant dense<0.000000e+00> : vector<32xf32>
    %46 = vector.multi_reduction <add>, %45, %cst_46 [1] : vector<32x64xf32> to vector<32xf32>
    %47 = vector.shape_cast %46 : vector<32xf32> to vector<32x1xf32>
    %cst_47 = arith.constant 6.400000e+01 : f32
    %48 = vector.broadcast %cst_47 : f32 to vector<32x1xf32>
    %49 = arith.divf %47, %48 : vector<32x1xf32>
    %50 = vector.broadcast %42 : vector<32x1xf32> to vector<32x64xf32>
    %51 = arith.subf %38, %50 : vector<32x64xf32>
    %cst_48 = arith.constant 9.99999974E-6 : f32
    %52 = vector.broadcast %cst_48 : f32 to vector<32x1xf32>
    %53 = arith.addf %49, %52 : vector<32x1xf32>
    %54 = math.rsqrt %53 : vector<32x1xf32>
    %55 = vector.broadcast %54 : vector<32x1xf32> to vector<32x64xf32>
    %56 = arith.mulf %51, %55 : vector<32x64xf32>
    %57 = vector.broadcast %0 : vector<1x64xf32> to vector<32x64xf32>
    %58 = arith.mulf %56, %57 : vector<32x64xf32>
    %59 = vector.broadcast %1 : vector<1x64xf32> to vector<32x64xf32>
    %60 = arith.addf %58, %59 : vector<32x64xf32>
    %61 = arith.truncf %60 : vector<32x64xf32> to vector<32x64xbf16>
    %cst_49 = arith.constant dense<0.000000e+00> : vector<32x32xf32>
    %62 = tpu.matmul %61, %2, %cst_49 {dimension_numbers = #tpu.dot_dimension_numbers<[1], [0], [0], [1], [0, 0, 1, 1], [], []>} : vector<32x64xbf16>, vector<64x32xbf16>, vector<32x32xf32> -> vector<32x32xf32>
    %63 = vector.broadcast %3 : vector<1x32xf32> to vector<32x32xf32>
    %64 = arith.addf %62, %63 : vector<32x32xf32>
    %65 = arith.mulf %64, %64 : vector<32x32xf32>
    %66 = arith.mulf %64, %65 : vector<32x32xf32>
    %cst_50 = arith.constant 4.471500e-02 : f32
    %67 = vector.broadcast %cst_50 : f32 to vector<32x32xf32>
    %68 = arith.mulf %67, %66 : vector<32x32xf32>
    %69 = arith.addf %64, %68 : vector<32x32xf32>
    %cst_51 = arith.constant 0.797884583 : f32
    %70 = vector.broadcast %cst_51 : f32 to vector<32x32xf32>
    %71 = arith.mulf %70, %69 : vector<32x32xf32>
    %72 = math.tanh %71 : vector<32x32xf32>
    %cst_52 = arith.constant 1.000000e+00 : f32
    %73 = vector.broadcast %cst_52 : f32 to vector<32x32xf32>
    %74 = arith.addf %73, %72 : vector<32x32xf32>
    %cst_53 = arith.constant 5.000000e-01 : f32
    %75 = vector.broadcast %cst_53 : f32 to vector<32x32xf32>
    %76 = arith.mulf %75, %74 : vector<32x32xf32>
    %77 = arith.mulf %64, %76 : vector<32x32xf32>
    %cst_54 = arith.constant dense<0.000000e+00> : vector<32x32xf32>
    %78 = tpu.matmul %61, %4, %cst_54 {dimension_numbers = #tpu.dot_dimension_numbers<[1], [0], [0], [1], [0, 0, 1, 1], [], []>} : vector<32x64xbf16>, vector<64x32xbf16>, vector<32x32xf32> -> vector<32x32xf32>
    %79 = vector.broadcast %5 : vector<1x32xf32> to vector<32x32xf32>
    %80 = arith.addf %78, %79 : vector<32x32xf32>
    %81 = arith.mulf %80, %80 : vector<32x32xf32>
    %82 = arith.mulf %80, %81 : vector<32x32xf32>
    %cst_55 = arith.constant 4.471500e-02 : f32
    %83 = vector.broadcast %cst_55 : f32 to vector<32x32xf32>
    %84 = arith.mulf %83, %82 : vector<32x32xf32>
    %85 = arith.addf %80, %84 : vector<32x32xf32>
    %cst_56 = arith.constant 0.797884583 : f32
    %86 = vector.broadcast %cst_56 : f32 to vector<32x32xf32>
    %87 = arith.mulf %86, %85 : vector<32x32xf32>
    %88 = math.tanh %87 : vector<32x32xf32>
    %cst_57 = arith.constant 1.000000e+00 : f32
    %89 = vector.broadcast %cst_57 : f32 to vector<32x32xf32>
    %90 = arith.addf %89, %88 : vector<32x32xf32>
    %cst_58 = arith.constant 5.000000e-01 : f32
    %91 = vector.broadcast %cst_58 : f32 to vector<32x32xf32>
    %92 = arith.mulf %91, %90 : vector<32x32xf32>
    %93 = arith.mulf %80, %92 : vector<32x32xf32>
    %cst_59 = arith.constant dense<0.000000e+00> : vector<32xf32>
    %94 = vector.multi_reduction <add>, %93, %cst_59 [1] : vector<32x32xf32> to vector<32xf32>
    %95 = vector.shape_cast %94 : vector<32xf32> to vector<32x1xf32>
    %cst_60 = arith.constant 3.200000e+01 : f32
    %96 = vector.broadcast %cst_60 : f32 to vector<32x1xf32>
    %97 = arith.divf %95, %96 : vector<32x1xf32>
    %98 = vector.broadcast %97 : vector<32x1xf32> to vector<32x32xf32>
    %99 = arith.subf %93, %98 : vector<32x32xf32>
    %100 = arith.mulf %99, %99 : vector<32x32xf32>
    %cst_61 = arith.constant dense<0.000000e+00> : vector<32xf32>
    %101 = vector.multi_reduction <add>, %100, %cst_61 [1] : vector<32x32xf32> to vector<32xf32>
    %102 = vector.shape_cast %101 : vector<32xf32> to vector<32x1xf32>
    %cst_62 = arith.constant 3.200000e+01 : f32
    %103 = vector.broadcast %cst_62 : f32 to vector<32x1xf32>
    %104 = arith.divf %102, %103 : vector<32x1xf32>
    %105 = vector.broadcast %97 : vector<32x1xf32> to vector<32x32xf32>
    %106 = arith.subf %93, %105 : vector<32x32xf32>
    %cst_63 = arith.constant 9.99999974E-6 : f32
    %107 = vector.broadcast %cst_63 : f32 to vector<32x1xf32>
    %108 = arith.addf %104, %107 : vector<32x1xf32>
    %109 = math.rsqrt %108 : vector<32x1xf32>
    %110 = vector.broadcast %109 : vector<32x1xf32> to vector<32x32xf32>
    %111 = arith.mulf %106, %110 : vector<32x32xf32>
    %112 = vector.broadcast %6 : vector<1x32xf32> to vector<32x32xf32>
    %113 = arith.mulf %111, %112 : vector<32x32xf32>
    %114 = vector.broadcast %7 : vector<1x32xf32> to vector<32x32xf32>
    %115 = arith.addf %113, %114 : vector<32x32xf32>
    %116 = arith.truncf %115 : vector<32x32xf32> to vector<32x32xbf16>
    %cst_64 = arith.constant dense<0.000000e+00> : vector<32x32xf32>
    %117 = tpu.matmul %8, %116, %cst_64 {dimension_numbers = #tpu.dot_dimension_numbers<[1], [0], [0], [1], [0, 0, 1, 1], [], []>} : vector<32x32xbf16>, vector<32x32xbf16>, vector<32x32xf32> -> vector<32x32xf32>
    %118 = vector.broadcast %9 : vector<32x1xf32> to vector<32x32xf32>
    %119 = arith.addf %117, %118 : vector<32x32xf32>
    %120 = arith.mulf %77, %119 : vector<32x32xf32>
    %121 = arith.truncf %120 : vector<32x32xf32> to vector<32x32xbf16>
    %cst_65 = arith.constant dense<0.000000e+00> : vector<32x64xf32>
    %122 = tpu.matmul %121, %10, %cst_65 {dimension_numbers = #tpu.dot_dimension_numbers<[1], [0], [0], [1], [0, 0, 1, 1], [], []>} : vector<32x32xbf16>, vector<32x64xbf16>, vector<32x64xf32> -> vector<32x64xf32>
    %123 = vector.broadcast %11 : vector<1x64xf32> to vector<32x64xf32>
    %124 = arith.addf %122, %123 : vector<32x64xf32>
    %125 = arith.addf %124, %38 : vector<32x64xf32>
    %c0_66 = arith.constant 0 : index
    %c0_67 = arith.constant 0 : index
    %c0_68 = arith.constant 0 : index
    %126 = vector.load %arg20[%c0_66, %c0_67, %c0_68] : memref<1x32x64xf32, #tpu.memory_space<vmem>>, vector<1x32x64xf32>
    %127 = vector.shape_cast %126 : vector<1x32x64xf32> to vector<32x64xf32>
    %128 = vector.shape_cast %125 : vector<32x64xf32> to vector<1x32x64xf32>
    tpu.vector_store %arg20[%c0_66, %c0_67, %c0_68], %128 {strides = array<i32>} : memref<1x32x64xf32, #tpu.memory_space<vmem>>, vector<1x32x64xf32>,
    return
  }
  func.func @transform_0(%arg0: i32) -> (i32, i32, i32) {
    %c0_i32 = arith.constant 0 : i32
    %c0_i32_0 = arith.constant 0 : i32
    %c0_i32_1 = arith.constant 0 : i32
    return %arg0, %c0_i32, %c0_i32_0 : i32, i32, i32
  }
  func.func @transform_1(%arg0: i32) -> (i32, i32) {
    %c0_i32 = arith.constant 0 : i32
    %c0_i32_0 = arith.constant 0 : i32
    %c0_i32_1 = arith.constant 0 : i32
    return %c0_i32, %c0_i32_0 : i32, i32
  }
  func.func @transform_2(%arg0: i32) -> (i32, i32) {
    %c0_i32 = arith.constant 0 : i32
    %c0_i32_0 = arith.constant 0 : i32
    %c0_i32_1 = arith.constant 0 : i32
    return %c0_i32, %c0_i32_0 : i32, i32
  }
  func.func @transform_3(%arg0: i32) -> (i32, i32) {
    %c0_i32 = arith.constant 0 : i32
    %c0_i32_0 = arith.constant 0 : i32
    %c0_i32_1 = arith.constant 0 : i32
    return %c0_i32, %c0_i32_0 : i32, i32
  }
  func.func @transform_4(%arg0: i32) -> (i32, i32) {
    %c0_i32 = arith.constant 0 : i32
    %c0_i32_0 = arith.constant 0 : i32
    %c0_i32_1 = arith.constant 0 : i32
    return %c0_i32, %c0_i32_0 : i32, i32
  }
  func.func @transform_5(%arg0: i32) -> (i32, i32) {
    %c0_i32 = arith.constant 0 : i32
    %c0_i32_0 = arith.constant 0 : i32
    %c0_i32_1 = arith.constant 0 : i32
    return %c0_i32, %c0_i32_0 : i32, i32
  }
  func.func @transform_6(%arg0: i32) -> (i32, i32) {
    %c0_i32 = arith.constant 0 : i32
    %c0_i32_0 = arith.constant 0 : i32
    %c0_i32_1 = arith.constant 0 : i32
    return %c0_i32, %c0_i32_0 : i32, i32
  }
  func.func @transform_7(%arg0: i32) -> (i32, i32) {
    %c0_i32 = arith.constant 0 : i32
    %c0_i32_0 = arith.constant 0 : i32
    %c0_i32_1 = arith.constant 0 : i32
    return %c0_i32, %c0_i32_0 : i32, i32
  }
  func.func @transform_8(%arg0: i32) -> (i32, i32) {
    %c0_i32 = arith.constant 0 : i32
    %c0_i32_0 = arith.constant 0 : i32
    %c0_i32_1 = arith.constant 0 : i32
    return %c0_i32, %c0_i32_0 : i32, i32
  }
  func.func @transform_9(%arg0: i32) -> (i32, i32) {
    %c0_i32 = arith.constant 0 : i32
    %c0_i32_0 = arith.constant 0 : i32
    %c0_i32_1 = arith.constant 0 : i32
    return %c0_i32, %c0_i32_0 : i32, i32
  }
  func.func @transform_10(%arg0: i32) -> (i32, i32) {
    %c0_i32 = arith.constant 0 : i32
    %c0_i32_0 = arith.constant 0 : i32
    %c0_i32_1 = arith.constant 0 : i32
    return %c0_i32, %c0_i32_0 : i32, i32
  }
  func.func @transform_11(%arg0: i32) -> (i32, i32) {
    %c0_i32 = arith.constant 0 : i32
    %c0_i32_0 = arith.constant 0 : i32
    %c0_i32_1 = arith.constant 0 : i32
    return %c0_i32, %c0_i32_0 : i32, i32
  }
  func.func @transform_12(%arg0: i32) -> (i32, i32) {
    %c0_i32 = arith.constant 0 : i32
    %c0_i32_0 = arith.constant 0 : i32
    %c0_i32_1 = arith.constant 0 : i32
    return %c0_i32, %c0_i32_0 : i32, i32
  }
  func.func @transform_13(%arg0: i32) -> (i32, i32) {
    %c0_i32 = arith.constant 0 : i32
    %c0_i32_0 = arith.constant 0 : i32
    %c0_i32_1 = arith.constant 0 : i32
    return %c0_i32, %c0_i32_0 : i32, i32
  }
  func.func @transform_14(%arg0: i32) -> (i32, i32) {
    %c0_i32 = arith.constant 0 : i32
    %c0_i32_0 = arith.constant 0 : i32
    %c0_i32_1 = arith.constant 0 : i32
    return %c0_i32, %c0_i32_0 : i32, i32
  }
  func.func @transform_15(%arg0: i32) -> (i32, i32) {
    %c0_i32 = arith.constant 0 : i32
    %c0_i32_0 = arith.constant 0 : i32
    %c0_i32_1 = arith.constant 0 : i32
    return %c0_i32, %c0_i32_0 : i32, i32
  }
  func.func @transform_16(%arg0: i32) -> (i32, i32) {
    %c0_i32 = arith.constant 0 : i32
    %c0_i32_0 = arith.constant 0 : i32
    %c0_i32_1 = arith.constant 0 : i32
    return %c0_i32, %c0_i32_0 : i32, i32
  }
  func.func @transform_17(%arg0: i32) -> (i32, i32) {
    %c0_i32 = arith.constant 0 : i32
    %c0_i32_0 = arith.constant 0 : i32
    %c0_i32_1 = arith.constant 0 : i32
    return %c0_i32, %c0_i32_0 : i32, i32
  }
  func.func @transform_18(%arg0: i32) -> (i32, i32) {
    %c0_i32 = arith.constant 0 : i32
    %c0_i32_0 = arith.constant 0 : i32
    %c0_i32_1 = arith.constant 0 : i32
    return %c0_i32, %c0_i32_0 : i32, i32
  }
  func.func @transform_19(%arg0: i32) -> (i32, i32, i32) {
    %c0_i32 = arith.constant 0 : i32
    %c0_i32_0 = arith.constant 0 : i32
    %c0_i32_1 = arith.constant 0 : i32
    return %arg0, %c0_i32, %c0_i32_0 : i32, i32, i32
  }
}

module attributes {stable_mosaic.version = 11 : i64} {
  func.func @_sa_gmlp_kernel(%arg0: i32, %arg1: memref<1x128x67xbf16, #tpu.memory_space<vmem>>, %arg2: memref<67x64xbf16, #tpu.memory_space<vmem>>, %arg3: memref<1x64xf32, #tpu.memory_space<vmem>>, %arg4: memref<64x128xbf16, #tpu.memory_space<vmem>>, %arg5: memref<1x128xf32, #tpu.memory_space<vmem>>, %arg6: memref<128x256xbf16, #tpu.memory_space<vmem>>, %arg7: memref<1x256xf32, #tpu.memory_space<vmem>>, %arg8: memref<1x256xf32, #tpu.memory_space<vmem>>, %arg9: memref<1x256xf32, #tpu.memory_space<vmem>>, %arg10: memref<256x128xbf16, #tpu.memory_space<vmem>>, %arg11: memref<1x128xf32, #tpu.memory_space<vmem>>, %arg12: memref<256x128xbf16, #tpu.memory_space<vmem>>, %arg13: memref<1x128xf32, #tpu.memory_space<vmem>>, %arg14: memref<1x128xf32, #tpu.memory_space<vmem>>, %arg15: memref<1x128xf32, #tpu.memory_space<vmem>>, %arg16: memref<16x16xbf16, #tpu.memory_space<vmem>>, %arg17: memref<16x1xf32, #tpu.memory_space<vmem>>, %arg18: memref<128x256xbf16, #tpu.memory_space<vmem>>, %arg19: memref<1x256xf32, #tpu.memory_space<vmem>>, %arg20: memref<1x16x256xf32, #tpu.memory_space<vmem>>) attributes {dimension_semantics = [#tpu.dimension_semantics<parallel>], iteration_bounds = array<i64: 2>, scalar_prefetch = 0 : i64, scratch_operands = 0 : i64, tpu.core_type = #tpu.core_type<tc>, window_params = [{transform_indices = @transform_0, window_bounds = array<i64: 1, 128, 67>}, {pipeline_mode = #tpu.pipeline_mode<synchronous>, transform_indices = @transform_1, window_bounds = array<i64: 67, 64>}, {pipeline_mode = #tpu.pipeline_mode<synchronous>, transform_indices = @transform_2, window_bounds = array<i64: 1, 64>}, {pipeline_mode = #tpu.pipeline_mode<synchronous>, transform_indices = @transform_3, window_bounds = array<i64: 64, 128>}, {pipeline_mode = #tpu.pipeline_mode<synchronous>, transform_indices = @transform_4, window_bounds = array<i64: 1, 128>}, {pipeline_mode = #tpu.pipeline_mode<synchronous>, transform_indices = @transform_5, window_bounds = array<i64: 128, 256>}, {pipeline_mode = #tpu.pipeline_mode<synchronous>, transform_indices = @transform_6, window_bounds = array<i64: 1, 256>}, {pipeline_mode = #tpu.pipeline_mode<synchronous>, transform_indices = @transform_7, window_bounds = array<i64: 1, 256>}, {pipeline_mode = #tpu.pipeline_mode<synchronous>, transform_indices = @transform_8, window_bounds = array<i64: 1, 256>}, {pipeline_mode = #tpu.pipeline_mode<synchronous>, transform_indices = @transform_9, window_bounds = array<i64: 256, 128>}, {pipeline_mode = #tpu.pipeline_mode<synchronous>, transform_indices = @transform_10, window_bounds = array<i64: 1, 128>}, {pipeline_mode = #tpu.pipeline_mode<synchronous>, transform_indices = @transform_11, window_bounds = array<i64: 256, 128>}, {pipeline_mode = #tpu.pipeline_mode<synchronous>, transform_indices = @transform_12, window_bounds = array<i64: 1, 128>}, {pipeline_mode = #tpu.pipeline_mode<synchronous>, transform_indices = @transform_13, window_bounds = array<i64: 1, 128>}, {pipeline_mode = #tpu.pipeline_mode<synchronous>, transform_indices = @transform_14, window_bounds = array<i64: 1, 128>}, {pipeline_mode = #tpu.pipeline_mode<synchronous>, transform_indices = @transform_15, window_bounds = array<i64: 16, 16>}, {pipeline_mode = #tpu.pipeline_mode<synchronous>, transform_indices = @transform_16, window_bounds = array<i64: 16, 1>}, {pipeline_mode = #tpu.pipeline_mode<synchronous>, transform_indices = @transform_17, window_bounds = array<i64: 128, 256>}, {pipeline_mode = #tpu.pipeline_mode<synchronous>, transform_indices = @transform_18, window_bounds = array<i64: 1, 256>}, {transform_indices = @transform_19, window_bounds = array<i64: 1, 16, 256>}]} {
    %c0 = arith.constant 0 : index
    %c0_0 = arith.constant 0 : index
    %0 = vector.load %arg8[%c0, %c0_0] : memref<1x256xf32, #tpu.memory_space<vmem>>, vector<1x256xf32>
    %c0_1 = arith.constant 0 : index
    %c0_2 = arith.constant 0 : index
    %1 = vector.load %arg9[%c0_1, %c0_2] : memref<1x256xf32, #tpu.memory_space<vmem>>, vector<1x256xf32>
    %c0_3 = arith.constant 0 : index
    %c0_4 = arith.constant 0 : index
    %2 = vector.load %arg10[%c0_3, %c0_4] : memref<256x128xbf16, #tpu.memory_space<vmem>>, vector<256x128xbf16>
    %c0_5 = arith.constant 0 : index
    %c0_6 = arith.constant 0 : index
    %3 = vector.load %arg11[%c0_5, %c0_6] : memref<1x128xf32, #tpu.memory_space<vmem>>, vector<1x128xf32>
    %c0_7 = arith.constant 0 : index
    %c0_8 = arith.constant 0 : index
    %4 = vector.load %arg12[%c0_7, %c0_8] : memref<256x128xbf16, #tpu.memory_space<vmem>>, vector<256x128xbf16>
    %c0_9 = arith.constant 0 : index
    %c0_10 = arith.constant 0 : index
    %5 = vector.load %arg13[%c0_9, %c0_10] : memref<1x128xf32, #tpu.memory_space<vmem>>, vector<1x128xf32>
    %c0_11 = arith.constant 0 : index
    %c0_12 = arith.constant 0 : index
    %6 = vector.load %arg14[%c0_11, %c0_12] : memref<1x128xf32, #tpu.memory_space<vmem>>, vector<1x128xf32>
    %c0_13 = arith.constant 0 : index
    %c0_14 = arith.constant 0 : index
    %7 = vector.load %arg15[%c0_13, %c0_14] : memref<1x128xf32, #tpu.memory_space<vmem>>, vector<1x128xf32>
    %c0_15 = arith.constant 0 : index
    %c0_16 = arith.constant 0 : index
    %8 = vector.load %arg16[%c0_15, %c0_16] : memref<16x16xbf16, #tpu.memory_space<vmem>>, vector<16x16xbf16>
    %c0_17 = arith.constant 0 : index
    %c0_18 = arith.constant 0 : index
    %9 = vector.load %arg17[%c0_17, %c0_18] : memref<16x1xf32, #tpu.memory_space<vmem>>, vector<16x1xf32>
    %c0_19 = arith.constant 0 : index
    %c0_20 = arith.constant 0 : index
    %10 = vector.load %arg18[%c0_19, %c0_20] : memref<128x256xbf16, #tpu.memory_space<vmem>>, vector<128x256xbf16>
    %c0_21 = arith.constant 0 : index
    %c0_22 = arith.constant 0 : index
    %11 = vector.load %arg19[%c0_21, %c0_22] : memref<1x256xf32, #tpu.memory_space<vmem>>, vector<1x256xf32>
    %c0_23 = arith.constant 0 : index
    %c0_24 = arith.constant 0 : index
    %c0_25 = arith.constant 0 : index
    %12 = vector.load %arg1[%c0_23, %c0_24, %c0_25] : memref<1x128x67xbf16, #tpu.memory_space<vmem>>, vector<1x128x67xbf16>
    %13 = vector.shape_cast %12 : vector<1x128x67xbf16> to vector<128x67xbf16>
    %c0_26 = arith.constant 0 : index
    %c0_27 = arith.constant 0 : index
    %14 = vector.load %arg2[%c0_26, %c0_27] : memref<67x64xbf16, #tpu.memory_space<vmem>>, vector<67x64xbf16>
    %c0_28 = arith.constant 0 : index
    %c0_29 = arith.constant 0 : index
    %15 = vector.load %arg3[%c0_28, %c0_29] : memref<1x64xf32, #tpu.memory_space<vmem>>, vector<1x64xf32>
    %cst = arith.constant dense<0.000000e+00> : vector<128x64xf32>
    %16 = tpu.matmul %13, %14, %cst {dimension_numbers = #tpu.dot_dimension_numbers<[1], [0], [0], [1], [0, 0, 1, 1], [], []>} : vector<128x67xbf16>, vector<67x64xbf16>, vector<128x64xf32> -> vector<128x64xf32>
    %17 = vector.broadcast %15 : vector<1x64xf32> to vector<128x64xf32>
    %18 = arith.addf %16, %17 : vector<128x64xf32>
    %cst_30 = arith.constant 0.000000e+00 : f32
    %19 = vector.broadcast %cst_30 : f32 to vector<128x64xf32>
    %20 = arith.maximumf %18, %19 : vector<128x64xf32>
    %c0_31 = arith.constant 0 : index
    %c0_32 = arith.constant 0 : index
    %21 = vector.load %arg4[%c0_31, %c0_32] : memref<64x128xbf16, #tpu.memory_space<vmem>>, vector<64x128xbf16>
    %c0_33 = arith.constant 0 : index
    %c0_34 = arith.constant 0 : index
    %22 = vector.load %arg5[%c0_33, %c0_34] : memref<1x128xf32, #tpu.memory_space<vmem>>, vector<1x128xf32>
    %23 = arith.truncf %20 : vector<128x64xf32> to vector<128x64xbf16>
    %cst_35 = arith.constant dense<0.000000e+00> : vector<128x128xf32>
    %24 = tpu.matmul %23, %21, %cst_35 {dimension_numbers = #tpu.dot_dimension_numbers<[1], [0], [0], [1], [0, 0, 1, 1], [], []>} : vector<128x64xbf16>, vector<64x128xbf16>, vector<128x128xf32> -> vector<128x128xf32>
    %25 = vector.broadcast %22 : vector<1x128xf32> to vector<128x128xf32>
    %26 = arith.addf %24, %25 : vector<128x128xf32>
    %cst_36 = arith.constant 0.000000e+00 : f32
    %27 = vector.broadcast %cst_36 : f32 to vector<128x128xf32>
    %28 = arith.maximumf %26, %27 : vector<128x128xf32>
    %c0_37 = arith.constant 0 : index
    %c0_38 = arith.constant 0 : index
    %29 = vector.load %arg6[%c0_37, %c0_38] : memref<128x256xbf16, #tpu.memory_space<vmem>>, vector<128x256xbf16>
    %c0_39 = arith.constant 0 : index
    %c0_40 = arith.constant 0 : index
    %30 = vector.load %arg7[%c0_39, %c0_40] : memref<1x256xf32, #tpu.memory_space<vmem>>, vector<1x256xf32>
    %31 = arith.truncf %28 : vector<128x128xf32> to vector<128x128xbf16>
    %cst_41 = arith.constant dense<0.000000e+00> : vector<128x256xf32>
    %32 = tpu.matmul %31, %29, %cst_41 {dimension_numbers = #tpu.dot_dimension_numbers<[1], [0], [0], [1], [0, 0, 1, 1], [], []>} : vector<128x128xbf16>, vector<128x256xbf16>, vector<128x256xf32> -> vector<128x256xf32>
    %33 = vector.broadcast %30 : vector<1x256xf32> to vector<128x256xf32>
    %34 = arith.addf %32, %33 : vector<128x256xf32>
    %cst_42 = arith.constant 0.000000e+00 : f32
    %35 = vector.broadcast %cst_42 : f32 to vector<128x256xf32>
    %36 = arith.maximumf %34, %35 : vector<128x256xf32>
    %37 = vector.shape_cast %36 : vector<128x256xf32> to vector<16x8x256xf32>
    %cst_43 = arith.constant dense<0xFF800000> : vector<16x256xf32>
    %38 = vector.multi_reduction <maximumf>, %37, %cst_43 [1] : vector<16x8x256xf32> to vector<16x256xf32>
    %cst_44 = arith.constant dense<0.000000e+00> : vector<16xf32>
    %39 = vector.multi_reduction <add>, %38, %cst_44 [1] : vector<16x256xf32> to vector<16xf32>
    %40 = vector.shape_cast %39 : vector<16xf32> to vector<16x1xf32>
    %cst_45 = arith.constant 2.560000e+02 : f32
    %41 = vector.broadcast %cst_45 : f32 to vector<16x1xf32>
    %42 = arith.divf %40, %41 : vector<16x1xf32>
    %43 = vector.broadcast %42 : vector<16x1xf32> to vector<16x256xf32>
    %44 = arith.subf %38, %43 : vector<16x256xf32>
    %45 = arith.mulf %44, %44 : vector<16x256xf32>
    %cst_46 = arith.constant dense<0.000000e+00> : vector<16xf32>
    %46 = vector.multi_reduction <add>, %45, %cst_46 [1] : vector<16x256xf32> to vector<16xf32>
    %47 = vector.shape_cast %46 : vector<16xf32> to vector<16x1xf32>
    %cst_47 = arith.constant 2.560000e+02 : f32
    %48 = vector.broadcast %cst_47 : f32 to vector<16x1xf32>
    %49 = arith.divf %47, %48 : vector<16x1xf32>
    %50 = vector.broadcast %42 : vector<16x1xf32> to vector<16x256xf32>
    %51 = arith.subf %38, %50 : vector<16x256xf32>
    %cst_48 = arith.constant 9.99999974E-6 : f32
    %52 = vector.broadcast %cst_48 : f32 to vector<16x1xf32>
    %53 = arith.addf %49, %52 : vector<16x1xf32>
    %54 = math.rsqrt %53 : vector<16x1xf32>
    %55 = vector.broadcast %54 : vector<16x1xf32> to vector<16x256xf32>
    %56 = arith.mulf %51, %55 : vector<16x256xf32>
    %57 = vector.broadcast %0 : vector<1x256xf32> to vector<16x256xf32>
    %58 = arith.mulf %56, %57 : vector<16x256xf32>
    %59 = vector.broadcast %1 : vector<1x256xf32> to vector<16x256xf32>
    %60 = arith.addf %58, %59 : vector<16x256xf32>
    %61 = arith.truncf %60 : vector<16x256xf32> to vector<16x256xbf16>
    %cst_49 = arith.constant dense<0.000000e+00> : vector<16x128xf32>
    %62 = tpu.matmul %61, %2, %cst_49 {dimension_numbers = #tpu.dot_dimension_numbers<[1], [0], [0], [1], [0, 0, 1, 1], [], []>} : vector<16x256xbf16>, vector<256x128xbf16>, vector<16x128xf32> -> vector<16x128xf32>
    %63 = vector.broadcast %3 : vector<1x128xf32> to vector<16x128xf32>
    %64 = arith.addf %62, %63 : vector<16x128xf32>
    %65 = arith.mulf %64, %64 : vector<16x128xf32>
    %66 = arith.mulf %64, %65 : vector<16x128xf32>
    %cst_50 = arith.constant 4.471500e-02 : f32
    %67 = vector.broadcast %cst_50 : f32 to vector<16x128xf32>
    %68 = arith.mulf %67, %66 : vector<16x128xf32>
    %69 = arith.addf %64, %68 : vector<16x128xf32>
    %cst_51 = arith.constant 0.797884583 : f32
    %70 = vector.broadcast %cst_51 : f32 to vector<16x128xf32>
    %71 = arith.mulf %70, %69 : vector<16x128xf32>
    %72 = math.tanh %71 : vector<16x128xf32>
    %cst_52 = arith.constant 1.000000e+00 : f32
    %73 = vector.broadcast %cst_52 : f32 to vector<16x128xf32>
    %74 = arith.addf %73, %72 : vector<16x128xf32>
    %cst_53 = arith.constant 5.000000e-01 : f32
    %75 = vector.broadcast %cst_53 : f32 to vector<16x128xf32>
    %76 = arith.mulf %75, %74 : vector<16x128xf32>
    %77 = arith.mulf %64, %76 : vector<16x128xf32>
    %cst_54 = arith.constant dense<0.000000e+00> : vector<16x128xf32>
    %78 = tpu.matmul %61, %4, %cst_54 {dimension_numbers = #tpu.dot_dimension_numbers<[1], [0], [0], [1], [0, 0, 1, 1], [], []>} : vector<16x256xbf16>, vector<256x128xbf16>, vector<16x128xf32> -> vector<16x128xf32>
    %79 = vector.broadcast %5 : vector<1x128xf32> to vector<16x128xf32>
    %80 = arith.addf %78, %79 : vector<16x128xf32>
    %81 = arith.mulf %80, %80 : vector<16x128xf32>
    %82 = arith.mulf %80, %81 : vector<16x128xf32>
    %cst_55 = arith.constant 4.471500e-02 : f32
    %83 = vector.broadcast %cst_55 : f32 to vector<16x128xf32>
    %84 = arith.mulf %83, %82 : vector<16x128xf32>
    %85 = arith.addf %80, %84 : vector<16x128xf32>
    %cst_56 = arith.constant 0.797884583 : f32
    %86 = vector.broadcast %cst_56 : f32 to vector<16x128xf32>
    %87 = arith.mulf %86, %85 : vector<16x128xf32>
    %88 = math.tanh %87 : vector<16x128xf32>
    %cst_57 = arith.constant 1.000000e+00 : f32
    %89 = vector.broadcast %cst_57 : f32 to vector<16x128xf32>
    %90 = arith.addf %89, %88 : vector<16x128xf32>
    %cst_58 = arith.constant 5.000000e-01 : f32
    %91 = vector.broadcast %cst_58 : f32 to vector<16x128xf32>
    %92 = arith.mulf %91, %90 : vector<16x128xf32>
    %93 = arith.mulf %80, %92 : vector<16x128xf32>
    %cst_59 = arith.constant dense<0.000000e+00> : vector<16xf32>
    %94 = vector.multi_reduction <add>, %93, %cst_59 [1] : vector<16x128xf32> to vector<16xf32>
    %95 = vector.shape_cast %94 : vector<16xf32> to vector<16x1xf32>
    %cst_60 = arith.constant 1.280000e+02 : f32
    %96 = vector.broadcast %cst_60 : f32 to vector<16x1xf32>
    %97 = arith.divf %95, %96 : vector<16x1xf32>
    %98 = vector.broadcast %97 : vector<16x1xf32> to vector<16x128xf32>
    %99 = arith.subf %93, %98 : vector<16x128xf32>
    %100 = arith.mulf %99, %99 : vector<16x128xf32>
    %cst_61 = arith.constant dense<0.000000e+00> : vector<16xf32>
    %101 = vector.multi_reduction <add>, %100, %cst_61 [1] : vector<16x128xf32> to vector<16xf32>
    %102 = vector.shape_cast %101 : vector<16xf32> to vector<16x1xf32>
    %cst_62 = arith.constant 1.280000e+02 : f32
    %103 = vector.broadcast %cst_62 : f32 to vector<16x1xf32>
    %104 = arith.divf %102, %103 : vector<16x1xf32>
    %105 = vector.broadcast %97 : vector<16x1xf32> to vector<16x128xf32>
    %106 = arith.subf %93, %105 : vector<16x128xf32>
    %cst_63 = arith.constant 9.99999974E-6 : f32
    %107 = vector.broadcast %cst_63 : f32 to vector<16x1xf32>
    %108 = arith.addf %104, %107 : vector<16x1xf32>
    %109 = math.rsqrt %108 : vector<16x1xf32>
    %110 = vector.broadcast %109 : vector<16x1xf32> to vector<16x128xf32>
    %111 = arith.mulf %106, %110 : vector<16x128xf32>
    %112 = vector.broadcast %6 : vector<1x128xf32> to vector<16x128xf32>
    %113 = arith.mulf %111, %112 : vector<16x128xf32>
    %114 = vector.broadcast %7 : vector<1x128xf32> to vector<16x128xf32>
    %115 = arith.addf %113, %114 : vector<16x128xf32>
    %116 = arith.truncf %115 : vector<16x128xf32> to vector<16x128xbf16>
    %cst_64 = arith.constant dense<0.000000e+00> : vector<16x128xf32>
    %117 = tpu.matmul %8, %116, %cst_64 {dimension_numbers = #tpu.dot_dimension_numbers<[1], [0], [0], [1], [0, 0, 1, 1], [], []>} : vector<16x16xbf16>, vector<16x128xbf16>, vector<16x128xf32> -> vector<16x128xf32>
    %118 = vector.broadcast %9 : vector<16x1xf32> to vector<16x128xf32>
    %119 = arith.addf %117, %118 : vector<16x128xf32>
    %120 = arith.mulf %77, %119 : vector<16x128xf32>
    %121 = arith.truncf %120 : vector<16x128xf32> to vector<16x128xbf16>
    %cst_65 = arith.constant dense<0.000000e+00> : vector<16x256xf32>
    %122 = tpu.matmul %121, %10, %cst_65 {dimension_numbers = #tpu.dot_dimension_numbers<[1], [0], [0], [1], [0, 0, 1, 1], [], []>} : vector<16x128xbf16>, vector<128x256xbf16>, vector<16x256xf32> -> vector<16x256xf32>
    %123 = vector.broadcast %11 : vector<1x256xf32> to vector<16x256xf32>
    %124 = arith.addf %122, %123 : vector<16x256xf32>
    %125 = arith.addf %124, %38 : vector<16x256xf32>
    %c0_66 = arith.constant 0 : index
    %c0_67 = arith.constant 0 : index
    %c0_68 = arith.constant 0 : index
    %126 = vector.load %arg20[%c0_66, %c0_67, %c0_68] : memref<1x16x256xf32, #tpu.memory_space<vmem>>, vector<1x16x256xf32>
    %127 = vector.shape_cast %126 : vector<1x16x256xf32> to vector<16x256xf32>
    %128 = vector.shape_cast %125 : vector<16x256xf32> to vector<1x16x256xf32>
    tpu.vector_store %arg20[%c0_66, %c0_67, %c0_68], %128 {strides = array<i32>} : memref<1x16x256xf32, #tpu.memory_space<vmem>>, vector<1x16x256xf32>,
    return
  }
  func.func @transform_0(%arg0: i32) -> (i32, i32, i32) {
    %c0_i32 = arith.constant 0 : i32
    %c0_i32_0 = arith.constant 0 : i32
    %c0_i32_1 = arith.constant 0 : i32
    return %arg0, %c0_i32, %c0_i32_0 : i32, i32, i32
  }
  func.func @transform_1(%arg0: i32) -> (i32, i32) {
    %c0_i32 = arith.constant 0 : i32
    %c0_i32_0 = arith.constant 0 : i32
    %c0_i32_1 = arith.constant 0 : i32
    return %c0_i32, %c0_i32_0 : i32, i32
  }
  func.func @transform_2(%arg0: i32) -> (i32, i32) {
    %c0_i32 = arith.constant 0 : i32
    %c0_i32_0 = arith.constant 0 : i32
    %c0_i32_1 = arith.constant 0 : i32
    return %c0_i32, %c0_i32_0 : i32, i32
  }
  func.func @transform_3(%arg0: i32) -> (i32, i32) {
    %c0_i32 = arith.constant 0 : i32
    %c0_i32_0 = arith.constant 0 : i32
    %c0_i32_1 = arith.constant 0 : i32
    return %c0_i32, %c0_i32_0 : i32, i32
  }
  func.func @transform_4(%arg0: i32) -> (i32, i32) {
    %c0_i32 = arith.constant 0 : i32
    %c0_i32_0 = arith.constant 0 : i32
    %c0_i32_1 = arith.constant 0 : i32
    return %c0_i32, %c0_i32_0 : i32, i32
  }
  func.func @transform_5(%arg0: i32) -> (i32, i32) {
    %c0_i32 = arith.constant 0 : i32
    %c0_i32_0 = arith.constant 0 : i32
    %c0_i32_1 = arith.constant 0 : i32
    return %c0_i32, %c0_i32_0 : i32, i32
  }
  func.func @transform_6(%arg0: i32) -> (i32, i32) {
    %c0_i32 = arith.constant 0 : i32
    %c0_i32_0 = arith.constant 0 : i32
    %c0_i32_1 = arith.constant 0 : i32
    return %c0_i32, %c0_i32_0 : i32, i32
  }
  func.func @transform_7(%arg0: i32) -> (i32, i32) {
    %c0_i32 = arith.constant 0 : i32
    %c0_i32_0 = arith.constant 0 : i32
    %c0_i32_1 = arith.constant 0 : i32
    return %c0_i32, %c0_i32_0 : i32, i32
  }
  func.func @transform_8(%arg0: i32) -> (i32, i32) {
    %c0_i32 = arith.constant 0 : i32
    %c0_i32_0 = arith.constant 0 : i32
    %c0_i32_1 = arith.constant 0 : i32
    return %c0_i32, %c0_i32_0 : i32, i32
  }
  func.func @transform_9(%arg0: i32) -> (i32, i32) {
    %c0_i32 = arith.constant 0 : i32
    %c0_i32_0 = arith.constant 0 : i32
    %c0_i32_1 = arith.constant 0 : i32
    return %c0_i32, %c0_i32_0 : i32, i32
  }
  func.func @transform_10(%arg0: i32) -> (i32, i32) {
    %c0_i32 = arith.constant 0 : i32
    %c0_i32_0 = arith.constant 0 : i32
    %c0_i32_1 = arith.constant 0 : i32
    return %c0_i32, %c0_i32_0 : i32, i32
  }
  func.func @transform_11(%arg0: i32) -> (i32, i32) {
    %c0_i32 = arith.constant 0 : i32
    %c0_i32_0 = arith.constant 0 : i32
    %c0_i32_1 = arith.constant 0 : i32
    return %c0_i32, %c0_i32_0 : i32, i32
  }
  func.func @transform_12(%arg0: i32) -> (i32, i32) {
    %c0_i32 = arith.constant 0 : i32
    %c0_i32_0 = arith.constant 0 : i32
    %c0_i32_1 = arith.constant 0 : i32
    return %c0_i32, %c0_i32_0 : i32, i32
  }
  func.func @transform_13(%arg0: i32) -> (i32, i32) {
    %c0_i32 = arith.constant 0 : i32
    %c0_i32_0 = arith.constant 0 : i32
    %c0_i32_1 = arith.constant 0 : i32
    return %c0_i32, %c0_i32_0 : i32, i32
  }
  func.func @transform_14(%arg0: i32) -> (i32, i32) {
    %c0_i32 = arith.constant 0 : i32
    %c0_i32_0 = arith.constant 0 : i32
    %c0_i32_1 = arith.constant 0 : i32
    return %c0_i32, %c0_i32_0 : i32, i32
  }
  func.func @transform_15(%arg0: i32) -> (i32, i32) {
    %c0_i32 = arith.constant 0 : i32
    %c0_i32_0 = arith.constant 0 : i32
    %c0_i32_1 = arith.constant 0 : i32
    return %c0_i32, %c0_i32_0 : i32, i32
  }
  func.func @transform_16(%arg0: i32) -> (i32, i32) {
    %c0_i32 = arith.constant 0 : i32
    %c0_i32_0 = arith.constant 0 : i32
    %c0_i32_1 = arith.constant 0 : i32
    return %c0_i32, %c0_i32_0 : i32, i32
  }
  func.func @transform_17(%arg0: i32) -> (i32, i32) {
    %c0_i32 = arith.constant 0 : i32
    %c0_i32_0 = arith.constant 0 : i32
    %c0_i32_1 = arith.constant 0 : i32
    return %c0_i32, %c0_i32_0 : i32, i32
  }
  func.func @transform_18(%arg0: i32) -> (i32, i32) {
    %c0_i32 = arith.constant 0 : i32
    %c0_i32_0 = arith.constant 0 : i32
    %c0_i32_1 = arith.constant 0 : i32
    return %c0_i32, %c0_i32_0 : i32, i32
  }
  func.func @transform_19(%arg0: i32) -> (i32, i32, i32) {
    %c0_i32 = arith.constant 0 : i32
    %c0_i32_0 = arith.constant 0 : i32
    %c0_i32_1 = arith.constant 0 : i32
    return %arg0, %c0_i32, %c0_i32_0 : i32, i32, i32
  }
}

module attributes {stable_mosaic.version = 11 : i64} {
  func.func @_fp_gmlp_kernel(%arg0: i32, %arg1: memref<1x32x320xbf16, #tpu.memory_space<vmem>>, %arg2: memref<320x64xbf16, #tpu.memory_space<vmem>>, %arg3: memref<1x64xf32, #tpu.memory_space<vmem>>, %arg4: memref<64x32xbf16, #tpu.memory_space<vmem>>, %arg5: memref<1x32xf32, #tpu.memory_space<vmem>>, %arg6: memref<1x32xf32, #tpu.memory_space<vmem>>, %arg7: memref<1x32xf32, #tpu.memory_space<vmem>>, %arg8: memref<32x16xbf16, #tpu.memory_space<vmem>>, %arg9: memref<1x16xf32, #tpu.memory_space<vmem>>, %arg10: memref<32x16xbf16, #tpu.memory_space<vmem>>, %arg11: memref<1x16xf32, #tpu.memory_space<vmem>>, %arg12: memref<1x16xf32, #tpu.memory_space<vmem>>, %arg13: memref<1x16xf32, #tpu.memory_space<vmem>>, %arg14: memref<32x32xbf16, #tpu.memory_space<vmem>>, %arg15: memref<32x1xf32, #tpu.memory_space<vmem>>, %arg16: memref<16x32xbf16, #tpu.memory_space<vmem>>, %arg17: memref<1x32xf32, #tpu.memory_space<vmem>>, %arg18: memref<1x32x32xf32, #tpu.memory_space<vmem>>) attributes {dimension_semantics = [#tpu.dimension_semantics<parallel>], iteration_bounds = array<i64: 2>, scalar_prefetch = 0 : i64, scratch_operands = 0 : i64, tpu.core_type = #tpu.core_type<tc>, window_params = [{transform_indices = @transform_0, window_bounds = array<i64: 1, 32, 320>}, {pipeline_mode = #tpu.pipeline_mode<synchronous>, transform_indices = @transform_1, window_bounds = array<i64: 320, 64>}, {pipeline_mode = #tpu.pipeline_mode<synchronous>, transform_indices = @transform_2, window_bounds = array<i64: 1, 64>}, {pipeline_mode = #tpu.pipeline_mode<synchronous>, transform_indices = @transform_3, window_bounds = array<i64: 64, 32>}, {pipeline_mode = #tpu.pipeline_mode<synchronous>, transform_indices = @transform_4, window_bounds = array<i64: 1, 32>}, {pipeline_mode = #tpu.pipeline_mode<synchronous>, transform_indices = @transform_5, window_bounds = array<i64: 1, 32>}, {pipeline_mode = #tpu.pipeline_mode<synchronous>, transform_indices = @transform_6, window_bounds = array<i64: 1, 32>}, {pipeline_mode = #tpu.pipeline_mode<synchronous>, transform_indices = @transform_7, window_bounds = array<i64: 32, 16>}, {pipeline_mode = #tpu.pipeline_mode<synchronous>, transform_indices = @transform_8, window_bounds = array<i64: 1, 16>}, {pipeline_mode = #tpu.pipeline_mode<synchronous>, transform_indices = @transform_9, window_bounds = array<i64: 32, 16>}, {pipeline_mode = #tpu.pipeline_mode<synchronous>, transform_indices = @transform_10, window_bounds = array<i64: 1, 16>}, {pipeline_mode = #tpu.pipeline_mode<synchronous>, transform_indices = @transform_11, window_bounds = array<i64: 1, 16>}, {pipeline_mode = #tpu.pipeline_mode<synchronous>, transform_indices = @transform_12, window_bounds = array<i64: 1, 16>}, {pipeline_mode = #tpu.pipeline_mode<synchronous>, transform_indices = @transform_13, window_bounds = array<i64: 32, 32>}, {pipeline_mode = #tpu.pipeline_mode<synchronous>, transform_indices = @transform_14, window_bounds = array<i64: 32, 1>}, {pipeline_mode = #tpu.pipeline_mode<synchronous>, transform_indices = @transform_15, window_bounds = array<i64: 16, 32>}, {pipeline_mode = #tpu.pipeline_mode<synchronous>, transform_indices = @transform_16, window_bounds = array<i64: 1, 32>}, {transform_indices = @transform_17, window_bounds = array<i64: 1, 32, 32>}]} {
    %c0 = arith.constant 0 : index
    %c0_0 = arith.constant 0 : index
    %0 = vector.load %arg6[%c0, %c0_0] : memref<1x32xf32, #tpu.memory_space<vmem>>, vector<1x32xf32>
    %c0_1 = arith.constant 0 : index
    %c0_2 = arith.constant 0 : index
    %1 = vector.load %arg7[%c0_1, %c0_2] : memref<1x32xf32, #tpu.memory_space<vmem>>, vector<1x32xf32>
    %c0_3 = arith.constant 0 : index
    %c0_4 = arith.constant 0 : index
    %2 = vector.load %arg8[%c0_3, %c0_4] : memref<32x16xbf16, #tpu.memory_space<vmem>>, vector<32x16xbf16>
    %c0_5 = arith.constant 0 : index
    %c0_6 = arith.constant 0 : index
    %3 = vector.load %arg9[%c0_5, %c0_6] : memref<1x16xf32, #tpu.memory_space<vmem>>, vector<1x16xf32>
    %c0_7 = arith.constant 0 : index
    %c0_8 = arith.constant 0 : index
    %4 = vector.load %arg10[%c0_7, %c0_8] : memref<32x16xbf16, #tpu.memory_space<vmem>>, vector<32x16xbf16>
    %c0_9 = arith.constant 0 : index
    %c0_10 = arith.constant 0 : index
    %5 = vector.load %arg11[%c0_9, %c0_10] : memref<1x16xf32, #tpu.memory_space<vmem>>, vector<1x16xf32>
    %c0_11 = arith.constant 0 : index
    %c0_12 = arith.constant 0 : index
    %6 = vector.load %arg12[%c0_11, %c0_12] : memref<1x16xf32, #tpu.memory_space<vmem>>, vector<1x16xf32>
    %c0_13 = arith.constant 0 : index
    %c0_14 = arith.constant 0 : index
    %7 = vector.load %arg13[%c0_13, %c0_14] : memref<1x16xf32, #tpu.memory_space<vmem>>, vector<1x16xf32>
    %c0_15 = arith.constant 0 : index
    %c0_16 = arith.constant 0 : index
    %8 = vector.load %arg14[%c0_15, %c0_16] : memref<32x32xbf16, #tpu.memory_space<vmem>>, vector<32x32xbf16>
    %c0_17 = arith.constant 0 : index
    %c0_18 = arith.constant 0 : index
    %9 = vector.load %arg15[%c0_17, %c0_18] : memref<32x1xf32, #tpu.memory_space<vmem>>, vector<32x1xf32>
    %c0_19 = arith.constant 0 : index
    %c0_20 = arith.constant 0 : index
    %10 = vector.load %arg16[%c0_19, %c0_20] : memref<16x32xbf16, #tpu.memory_space<vmem>>, vector<16x32xbf16>
    %c0_21 = arith.constant 0 : index
    %c0_22 = arith.constant 0 : index
    %11 = vector.load %arg17[%c0_21, %c0_22] : memref<1x32xf32, #tpu.memory_space<vmem>>, vector<1x32xf32>
    %c0_23 = arith.constant 0 : index
    %c0_24 = arith.constant 0 : index
    %c0_25 = arith.constant 0 : index
    %12 = vector.load %arg1[%c0_23, %c0_24, %c0_25] : memref<1x32x320xbf16, #tpu.memory_space<vmem>>, vector<1x32x320xbf16>
    %13 = vector.shape_cast %12 : vector<1x32x320xbf16> to vector<32x320xbf16>
    %c0_26 = arith.constant 0 : index
    %c0_27 = arith.constant 0 : index
    %14 = vector.load %arg2[%c0_26, %c0_27] : memref<320x64xbf16, #tpu.memory_space<vmem>>, vector<320x64xbf16>
    %c0_28 = arith.constant 0 : index
    %c0_29 = arith.constant 0 : index
    %15 = vector.load %arg3[%c0_28, %c0_29] : memref<1x64xf32, #tpu.memory_space<vmem>>, vector<1x64xf32>
    %cst = arith.constant dense<0.000000e+00> : vector<32x64xf32>
    %16 = tpu.matmul %13, %14, %cst {dimension_numbers = #tpu.dot_dimension_numbers<[1], [0], [0], [1], [0, 0, 1, 1], [], []>} : vector<32x320xbf16>, vector<320x64xbf16>, vector<32x64xf32> -> vector<32x64xf32>
    %17 = vector.broadcast %15 : vector<1x64xf32> to vector<32x64xf32>
    %18 = arith.addf %16, %17 : vector<32x64xf32>
    %cst_30 = arith.constant 0.000000e+00 : f32
    %19 = vector.broadcast %cst_30 : f32 to vector<32x64xf32>
    %20 = arith.maximumf %18, %19 : vector<32x64xf32>
    %c0_31 = arith.constant 0 : index
    %c0_32 = arith.constant 0 : index
    %21 = vector.load %arg4[%c0_31, %c0_32] : memref<64x32xbf16, #tpu.memory_space<vmem>>, vector<64x32xbf16>
    %c0_33 = arith.constant 0 : index
    %c0_34 = arith.constant 0 : index
    %22 = vector.load %arg5[%c0_33, %c0_34] : memref<1x32xf32, #tpu.memory_space<vmem>>, vector<1x32xf32>
    %23 = arith.truncf %20 : vector<32x64xf32> to vector<32x64xbf16>
    %cst_35 = arith.constant dense<0.000000e+00> : vector<32x32xf32>
    %24 = tpu.matmul %23, %21, %cst_35 {dimension_numbers = #tpu.dot_dimension_numbers<[1], [0], [0], [1], [0, 0, 1, 1], [], []>} : vector<32x64xbf16>, vector<64x32xbf16>, vector<32x32xf32> -> vector<32x32xf32>
    %25 = vector.broadcast %22 : vector<1x32xf32> to vector<32x32xf32>
    %26 = arith.addf %24, %25 : vector<32x32xf32>
    %cst_36 = arith.constant 0.000000e+00 : f32
    %27 = vector.broadcast %cst_36 : f32 to vector<32x32xf32>
    %28 = arith.maximumf %26, %27 : vector<32x32xf32>
    %cst_37 = arith.constant dense<0.000000e+00> : vector<32xf32>
    %29 = vector.multi_reduction <add>, %28, %cst_37 [1] : vector<32x32xf32> to vector<32xf32>
    %30 = vector.shape_cast %29 : vector<32xf32> to vector<32x1xf32>
    %cst_38 = arith.constant 3.200000e+01 : f32
    %31 = vector.broadcast %cst_38 : f32 to vector<32x1xf32>
    %32 = arith.divf %30, %31 : vector<32x1xf32>
    %33 = vector.broadcast %32 : vector<32x1xf32> to vector<32x32xf32>
    %34 = arith.subf %28, %33 : vector<32x32xf32>
    %35 = arith.mulf %34, %34 : vector<32x32xf32>
    %cst_39 = arith.constant dense<0.000000e+00> : vector<32xf32>
    %36 = vector.multi_reduction <add>, %35, %cst_39 [1] : vector<32x32xf32> to vector<32xf32>
    %37 = vector.shape_cast %36 : vector<32xf32> to vector<32x1xf32>
    %cst_40 = arith.constant 3.200000e+01 : f32
    %38 = vector.broadcast %cst_40 : f32 to vector<32x1xf32>
    %39 = arith.divf %37, %38 : vector<32x1xf32>
    %40 = vector.broadcast %32 : vector<32x1xf32> to vector<32x32xf32>
    %41 = arith.subf %28, %40 : vector<32x32xf32>
    %cst_41 = arith.constant 9.99999974E-6 : f32
    %42 = vector.broadcast %cst_41 : f32 to vector<32x1xf32>
    %43 = arith.addf %39, %42 : vector<32x1xf32>
    %44 = math.rsqrt %43 : vector<32x1xf32>
    %45 = vector.broadcast %44 : vector<32x1xf32> to vector<32x32xf32>
    %46 = arith.mulf %41, %45 : vector<32x32xf32>
    %47 = vector.broadcast %0 : vector<1x32xf32> to vector<32x32xf32>
    %48 = arith.mulf %46, %47 : vector<32x32xf32>
    %49 = vector.broadcast %1 : vector<1x32xf32> to vector<32x32xf32>
    %50 = arith.addf %48, %49 : vector<32x32xf32>
    %51 = arith.truncf %50 : vector<32x32xf32> to vector<32x32xbf16>
    %cst_42 = arith.constant dense<0.000000e+00> : vector<32x16xf32>
    %52 = tpu.matmul %51, %2, %cst_42 {dimension_numbers = #tpu.dot_dimension_numbers<[1], [0], [0], [1], [0, 0, 1, 1], [], []>} : vector<32x32xbf16>, vector<32x16xbf16>, vector<32x16xf32> -> vector<32x16xf32>
    %53 = vector.broadcast %3 : vector<1x16xf32> to vector<32x16xf32>
    %54 = arith.addf %52, %53 : vector<32x16xf32>
    %55 = arith.mulf %54, %54 : vector<32x16xf32>
    %56 = arith.mulf %54, %55 : vector<32x16xf32>
    %cst_43 = arith.constant 4.471500e-02 : f32
    %57 = vector.broadcast %cst_43 : f32 to vector<32x16xf32>
    %58 = arith.mulf %57, %56 : vector<32x16xf32>
    %59 = arith.addf %54, %58 : vector<32x16xf32>
    %cst_44 = arith.constant 0.797884583 : f32
    %60 = vector.broadcast %cst_44 : f32 to vector<32x16xf32>
    %61 = arith.mulf %60, %59 : vector<32x16xf32>
    %62 = math.tanh %61 : vector<32x16xf32>
    %cst_45 = arith.constant 1.000000e+00 : f32
    %63 = vector.broadcast %cst_45 : f32 to vector<32x16xf32>
    %64 = arith.addf %63, %62 : vector<32x16xf32>
    %cst_46 = arith.constant 5.000000e-01 : f32
    %65 = vector.broadcast %cst_46 : f32 to vector<32x16xf32>
    %66 = arith.mulf %65, %64 : vector<32x16xf32>
    %67 = arith.mulf %54, %66 : vector<32x16xf32>
    %cst_47 = arith.constant dense<0.000000e+00> : vector<32x16xf32>
    %68 = tpu.matmul %51, %4, %cst_47 {dimension_numbers = #tpu.dot_dimension_numbers<[1], [0], [0], [1], [0, 0, 1, 1], [], []>} : vector<32x32xbf16>, vector<32x16xbf16>, vector<32x16xf32> -> vector<32x16xf32>
    %69 = vector.broadcast %5 : vector<1x16xf32> to vector<32x16xf32>
    %70 = arith.addf %68, %69 : vector<32x16xf32>
    %71 = arith.mulf %70, %70 : vector<32x16xf32>
    %72 = arith.mulf %70, %71 : vector<32x16xf32>
    %cst_48 = arith.constant 4.471500e-02 : f32
    %73 = vector.broadcast %cst_48 : f32 to vector<32x16xf32>
    %74 = arith.mulf %73, %72 : vector<32x16xf32>
    %75 = arith.addf %70, %74 : vector<32x16xf32>
    %cst_49 = arith.constant 0.797884583 : f32
    %76 = vector.broadcast %cst_49 : f32 to vector<32x16xf32>
    %77 = arith.mulf %76, %75 : vector<32x16xf32>
    %78 = math.tanh %77 : vector<32x16xf32>
    %cst_50 = arith.constant 1.000000e+00 : f32
    %79 = vector.broadcast %cst_50 : f32 to vector<32x16xf32>
    %80 = arith.addf %79, %78 : vector<32x16xf32>
    %cst_51 = arith.constant 5.000000e-01 : f32
    %81 = vector.broadcast %cst_51 : f32 to vector<32x16xf32>
    %82 = arith.mulf %81, %80 : vector<32x16xf32>
    %83 = arith.mulf %70, %82 : vector<32x16xf32>
    %cst_52 = arith.constant dense<0.000000e+00> : vector<32xf32>
    %84 = vector.multi_reduction <add>, %83, %cst_52 [1] : vector<32x16xf32> to vector<32xf32>
    %85 = vector.shape_cast %84 : vector<32xf32> to vector<32x1xf32>
    %cst_53 = arith.constant 1.600000e+01 : f32
    %86 = vector.broadcast %cst_53 : f32 to vector<32x1xf32>
    %87 = arith.divf %85, %86 : vector<32x1xf32>
    %88 = vector.broadcast %87 : vector<32x1xf32> to vector<32x16xf32>
    %89 = arith.subf %83, %88 : vector<32x16xf32>
    %90 = arith.mulf %89, %89 : vector<32x16xf32>
    %cst_54 = arith.constant dense<0.000000e+00> : vector<32xf32>
    %91 = vector.multi_reduction <add>, %90, %cst_54 [1] : vector<32x16xf32> to vector<32xf32>
    %92 = vector.shape_cast %91 : vector<32xf32> to vector<32x1xf32>
    %cst_55 = arith.constant 1.600000e+01 : f32
    %93 = vector.broadcast %cst_55 : f32 to vector<32x1xf32>
    %94 = arith.divf %92, %93 : vector<32x1xf32>
    %95 = vector.broadcast %87 : vector<32x1xf32> to vector<32x16xf32>
    %96 = arith.subf %83, %95 : vector<32x16xf32>
    %cst_56 = arith.constant 9.99999974E-6 : f32
    %97 = vector.broadcast %cst_56 : f32 to vector<32x1xf32>
    %98 = arith.addf %94, %97 : vector<32x1xf32>
    %99 = math.rsqrt %98 : vector<32x1xf32>
    %100 = vector.broadcast %99 : vector<32x1xf32> to vector<32x16xf32>
    %101 = arith.mulf %96, %100 : vector<32x16xf32>
    %102 = vector.broadcast %6 : vector<1x16xf32> to vector<32x16xf32>
    %103 = arith.mulf %101, %102 : vector<32x16xf32>
    %104 = vector.broadcast %7 : vector<1x16xf32> to vector<32x16xf32>
    %105 = arith.addf %103, %104 : vector<32x16xf32>
    %106 = arith.truncf %105 : vector<32x16xf32> to vector<32x16xbf16>
    %cst_57 = arith.constant dense<0.000000e+00> : vector<32x16xf32>
    %107 = tpu.matmul %8, %106, %cst_57 {dimension_numbers = #tpu.dot_dimension_numbers<[1], [0], [0], [1], [0, 0, 1, 1], [], []>} : vector<32x32xbf16>, vector<32x16xbf16>, vector<32x16xf32> -> vector<32x16xf32>
    %108 = vector.broadcast %9 : vector<32x1xf32> to vector<32x16xf32>
    %109 = arith.addf %107, %108 : vector<32x16xf32>
    %110 = arith.mulf %67, %109 : vector<32x16xf32>
    %111 = arith.truncf %110 : vector<32x16xf32> to vector<32x16xbf16>
    %cst_58 = arith.constant dense<0.000000e+00> : vector<32x32xf32>
    %112 = tpu.matmul %111, %10, %cst_58 {dimension_numbers = #tpu.dot_dimension_numbers<[1], [0], [0], [1], [0, 0, 1, 1], [], []>} : vector<32x16xbf16>, vector<16x32xbf16>, vector<32x32xf32> -> vector<32x32xf32>
    %113 = vector.broadcast %11 : vector<1x32xf32> to vector<32x32xf32>
    %114 = arith.addf %112, %113 : vector<32x32xf32>
    %115 = arith.addf %114, %28 : vector<32x32xf32>
    %c0_59 = arith.constant 0 : index
    %c0_60 = arith.constant 0 : index
    %c0_61 = arith.constant 0 : index
    %116 = vector.load %arg18[%c0_59, %c0_60, %c0_61] : memref<1x32x32xf32, #tpu.memory_space<vmem>>, vector<1x32x32xf32>
    %117 = vector.shape_cast %116 : vector<1x32x32xf32> to vector<32x32xf32>
    %118 = vector.shape_cast %115 : vector<32x32xf32> to vector<1x32x32xf32>
    tpu.vector_store %arg18[%c0_59, %c0_60, %c0_61], %118 {strides = array<i32>} : memref<1x32x32xf32, #tpu.memory_space<vmem>>, vector<1x32x32xf32>,
    return
  }
  func.func @transform_0(%arg0: i32) -> (i32, i32, i32) {
    %c0_i32 = arith.constant 0 : i32
    %c0_i32_0 = arith.constant 0 : i32
    %c0_i32_1 = arith.constant 0 : i32
    return %arg0, %c0_i32, %c0_i32_0 : i32, i32, i32
  }
  func.func @transform_1(%arg0: i32) -> (i32, i32) {
    %c0_i32 = arith.constant 0 : i32
    %c0_i32_0 = arith.constant 0 : i32
    %c0_i32_1 = arith.constant 0 : i32
    return %c0_i32, %c0_i32_0 : i32, i32
  }
  func.func @transform_2(%arg0: i32) -> (i32, i32) {
    %c0_i32 = arith.constant 0 : i32
    %c0_i32_0 = arith.constant 0 : i32
    %c0_i32_1 = arith.constant 0 : i32
    return %c0_i32, %c0_i32_0 : i32, i32
  }
  func.func @transform_3(%arg0: i32) -> (i32, i32) {
    %c0_i32 = arith.constant 0 : i32
    %c0_i32_0 = arith.constant 0 : i32
    %c0_i32_1 = arith.constant 0 : i32
    return %c0_i32, %c0_i32_0 : i32, i32
  }
  func.func @transform_4(%arg0: i32) -> (i32, i32) {
    %c0_i32 = arith.constant 0 : i32
    %c0_i32_0 = arith.constant 0 : i32
    %c0_i32_1 = arith.constant 0 : i32
    return %c0_i32, %c0_i32_0 : i32, i32
  }
  func.func @transform_5(%arg0: i32) -> (i32, i32) {
    %c0_i32 = arith.constant 0 : i32
    %c0_i32_0 = arith.constant 0 : i32
    %c0_i32_1 = arith.constant 0 : i32
    return %c0_i32, %c0_i32_0 : i32, i32
  }
  func.func @transform_6(%arg0: i32) -> (i32, i32) {
    %c0_i32 = arith.constant 0 : i32
    %c0_i32_0 = arith.constant 0 : i32
    %c0_i32_1 = arith.constant 0 : i32
    return %c0_i32, %c0_i32_0 : i32, i32
  }
  func.func @transform_7(%arg0: i32) -> (i32, i32) {
    %c0_i32 = arith.constant 0 : i32
    %c0_i32_0 = arith.constant 0 : i32
    %c0_i32_1 = arith.constant 0 : i32
    return %c0_i32, %c0_i32_0 : i32, i32
  }
  func.func @transform_8(%arg0: i32) -> (i32, i32) {
    %c0_i32 = arith.constant 0 : i32
    %c0_i32_0 = arith.constant 0 : i32
    %c0_i32_1 = arith.constant 0 : i32
    return %c0_i32, %c0_i32_0 : i32, i32
  }
  func.func @transform_9(%arg0: i32) -> (i32, i32) {
    %c0_i32 = arith.constant 0 : i32
    %c0_i32_0 = arith.constant 0 : i32
    %c0_i32_1 = arith.constant 0 : i32
    return %c0_i32, %c0_i32_0 : i32, i32
  }
  func.func @transform_10(%arg0: i32) -> (i32, i32) {
    %c0_i32 = arith.constant 0 : i32
    %c0_i32_0 = arith.constant 0 : i32
    %c0_i32_1 = arith.constant 0 : i32
    return %c0_i32, %c0_i32_0 : i32, i32
  }
  func.func @transform_11(%arg0: i32) -> (i32, i32) {
    %c0_i32 = arith.constant 0 : i32
    %c0_i32_0 = arith.constant 0 : i32
    %c0_i32_1 = arith.constant 0 : i32
    return %c0_i32, %c0_i32_0 : i32, i32
  }
  func.func @transform_12(%arg0: i32) -> (i32, i32) {
    %c0_i32 = arith.constant 0 : i32
    %c0_i32_0 = arith.constant 0 : i32
    %c0_i32_1 = arith.constant 0 : i32
    return %c0_i32, %c0_i32_0 : i32, i32
  }
  func.func @transform_13(%arg0: i32) -> (i32, i32) {
    %c0_i32 = arith.constant 0 : i32
    %c0_i32_0 = arith.constant 0 : i32
    %c0_i32_1 = arith.constant 0 : i32
    return %c0_i32, %c0_i32_0 : i32, i32
  }
  func.func @transform_14(%arg0: i32) -> (i32, i32) {
    %c0_i32 = arith.constant 0 : i32
    %c0_i32_0 = arith.constant 0 : i32
    %c0_i32_1 = arith.constant 0 : i32
    return %c0_i32, %c0_i32_0 : i32, i32
  }
  func.func @transform_15(%arg0: i32) -> (i32, i32) {
    %c0_i32 = arith.constant 0 : i32
    %c0_i32_0 = arith.constant 0 : i32
    %c0_i32_1 = arith.constant 0 : i32
    return %c0_i32, %c0_i32_0 : i32, i32
  }
  func.func @transform_16(%arg0: i32) -> (i32, i32) {
    %c0_i32 = arith.constant 0 : i32
    %c0_i32_0 = arith.constant 0 : i32
    %c0_i32_1 = arith.constant 0 : i32
    return %c0_i32, %c0_i32_0 : i32, i32
  }
  func.func @transform_17(%arg0: i32) -> (i32, i32, i32) {
    %c0_i32 = arith.constant 0 : i32
    %c0_i32_0 = arith.constant 0 : i32
    %c0_i32_1 = arith.constant 0 : i32
    return %arg0, %c0_i32, %c0_i32_0 : i32, i32, i32
  }
}

module attributes {stable_mosaic.version = 11 : i64} {
  func.func @_fp_gmlp_heads_kernel(%arg0: i32, %arg1: memref<1x64x34xbf16, #tpu.memory_space<vmem>>, %arg2: memref<34x32xbf16, #tpu.memory_space<vmem>>, %arg3: memref<1x32xf32, #tpu.memory_space<vmem>>, %arg4: memref<32x32xbf16, #tpu.memory_space<vmem>>, %arg5: memref<1x32xf32, #tpu.memory_space<vmem>>, %arg6: memref<32x16xbf16, #tpu.memory_space<vmem>>, %arg7: memref<1x16xf32, #tpu.memory_space<vmem>>, %arg8: memref<1x16xf32, #tpu.memory_space<vmem>>, %arg9: memref<1x16xf32, #tpu.memory_space<vmem>>, %arg10: memref<16x8xbf16, #tpu.memory_space<vmem>>, %arg11: memref<1x8xf32, #tpu.memory_space<vmem>>, %arg12: memref<16x8xbf16, #tpu.memory_space<vmem>>, %arg13: memref<1x8xf32, #tpu.memory_space<vmem>>, %arg14: memref<1x8xf32, #tpu.memory_space<vmem>>, %arg15: memref<1x8xf32, #tpu.memory_space<vmem>>, %arg16: memref<64x64xbf16, #tpu.memory_space<vmem>>, %arg17: memref<64x1xf32, #tpu.memory_space<vmem>>, %arg18: memref<8x16xbf16, #tpu.memory_space<vmem>>, %arg19: memref<1x16xf32, #tpu.memory_space<vmem>>, %arg20: memref<16x32xbf16, #tpu.memory_space<vmem>>, %arg21: memref<1x32xf32, #tpu.memory_space<vmem>>, %arg22: memref<32x128xbf16, #tpu.memory_space<vmem>>, %arg23: memref<1x128xf32, #tpu.memory_space<vmem>>, %arg24: memref<32x128xbf16, #tpu.memory_space<vmem>>, %arg25: memref<1x128xf32, #tpu.memory_space<vmem>>, %arg26: memref<1x64x128xf32, #tpu.memory_space<vmem>>, %arg27: memref<1x64x128xf32, #tpu.memory_space<vmem>>) attributes {dimension_semantics = [#tpu.dimension_semantics<parallel>], iteration_bounds = array<i64: 2>, scalar_prefetch = 0 : i64, scratch_operands = 0 : i64, tpu.core_type = #tpu.core_type<tc>, window_params = [{transform_indices = @transform_0, window_bounds = array<i64: 1, 64, 34>}, {pipeline_mode = #tpu.pipeline_mode<synchronous>, transform_indices = @transform_1, window_bounds = array<i64: 34, 32>}, {pipeline_mode = #tpu.pipeline_mode<synchronous>, transform_indices = @transform_2, window_bounds = array<i64: 1, 32>}, {pipeline_mode = #tpu.pipeline_mode<synchronous>, transform_indices = @transform_3, window_bounds = array<i64: 32, 32>}, {pipeline_mode = #tpu.pipeline_mode<synchronous>, transform_indices = @transform_4, window_bounds = array<i64: 1, 32>}, {pipeline_mode = #tpu.pipeline_mode<synchronous>, transform_indices = @transform_5, window_bounds = array<i64: 32, 16>}, {pipeline_mode = #tpu.pipeline_mode<synchronous>, transform_indices = @transform_6, window_bounds = array<i64: 1, 16>}, {pipeline_mode = #tpu.pipeline_mode<synchronous>, transform_indices = @transform_7, window_bounds = array<i64: 1, 16>}, {pipeline_mode = #tpu.pipeline_mode<synchronous>, transform_indices = @transform_8, window_bounds = array<i64: 1, 16>}, {pipeline_mode = #tpu.pipeline_mode<synchronous>, transform_indices = @transform_9, window_bounds = array<i64: 16, 8>}, {pipeline_mode = #tpu.pipeline_mode<synchronous>, transform_indices = @transform_10, window_bounds = array<i64: 1, 8>}, {pipeline_mode = #tpu.pipeline_mode<synchronous>, transform_indices = @transform_11, window_bounds = array<i64: 16, 8>}, {pipeline_mode = #tpu.pipeline_mode<synchronous>, transform_indices = @transform_12, window_bounds = array<i64: 1, 8>}, {pipeline_mode = #tpu.pipeline_mode<synchronous>, transform_indices = @transform_13, window_bounds = array<i64: 1, 8>}, {pipeline_mode = #tpu.pipeline_mode<synchronous>, transform_indices = @transform_14, window_bounds = array<i64: 1, 8>}, {pipeline_mode = #tpu.pipeline_mode<synchronous>, transform_indices = @transform_15, window_bounds = array<i64: 64, 64>}, {pipeline_mode = #tpu.pipeline_mode<synchronous>, transform_indices = @transform_16, window_bounds = array<i64: 64, 1>}, {pipeline_mode = #tpu.pipeline_mode<synchronous>, transform_indices = @transform_17, window_bounds = array<i64: 8, 16>}, {pipeline_mode = #tpu.pipeline_mode<synchronous>, transform_indices = @transform_18, window_bounds = array<i64: 1, 16>}, {pipeline_mode = #tpu.pipeline_mode<synchronous>, transform_indices = @transform_19, window_bounds = array<i64: 16, 32>}, {pipeline_mode = #tpu.pipeline_mode<synchronous>, transform_indices = @transform_20, window_bounds = array<i64: 1, 32>}, {pipeline_mode = #tpu.pipeline_mode<synchronous>, transform_indices = @transform_21, window_bounds = array<i64: 32, 128>}, {pipeline_mode = #tpu.pipeline_mode<synchronous>, transform_indices = @transform_22, window_bounds = array<i64: 1, 128>}, {pipeline_mode = #tpu.pipeline_mode<synchronous>, transform_indices = @transform_23, window_bounds = array<i64: 32, 128>}, {pipeline_mode = #tpu.pipeline_mode<synchronous>, transform_indices = @transform_24, window_bounds = array<i64: 1, 128>}, {transform_indices = @transform_25, window_bounds = array<i64: 1, 64, 128>}, {transform_indices = @transform_26, window_bounds = array<i64: 1, 64, 128>}]} {
    %c0 = arith.constant 0 : index
    %c0_0 = arith.constant 0 : index
    %0 = vector.load %arg8[%c0, %c0_0] : memref<1x16xf32, #tpu.memory_space<vmem>>, vector<1x16xf32>
    %c0_1 = arith.constant 0 : index
    %c0_2 = arith.constant 0 : index
    %1 = vector.load %arg9[%c0_1, %c0_2] : memref<1x16xf32, #tpu.memory_space<vmem>>, vector<1x16xf32>
    %c0_3 = arith.constant 0 : index
    %c0_4 = arith.constant 0 : index
    %2 = vector.load %arg10[%c0_3, %c0_4] : memref<16x8xbf16, #tpu.memory_space<vmem>>, vector<16x8xbf16>
    %c0_5 = arith.constant 0 : index
    %c0_6 = arith.constant 0 : index
    %3 = vector.load %arg11[%c0_5, %c0_6] : memref<1x8xf32, #tpu.memory_space<vmem>>, vector<1x8xf32>
    %c0_7 = arith.constant 0 : index
    %c0_8 = arith.constant 0 : index
    %4 = vector.load %arg12[%c0_7, %c0_8] : memref<16x8xbf16, #tpu.memory_space<vmem>>, vector<16x8xbf16>
    %c0_9 = arith.constant 0 : index
    %c0_10 = arith.constant 0 : index
    %5 = vector.load %arg13[%c0_9, %c0_10] : memref<1x8xf32, #tpu.memory_space<vmem>>, vector<1x8xf32>
    %c0_11 = arith.constant 0 : index
    %c0_12 = arith.constant 0 : index
    %6 = vector.load %arg14[%c0_11, %c0_12] : memref<1x8xf32, #tpu.memory_space<vmem>>, vector<1x8xf32>
    %c0_13 = arith.constant 0 : index
    %c0_14 = arith.constant 0 : index
    %7 = vector.load %arg15[%c0_13, %c0_14] : memref<1x8xf32, #tpu.memory_space<vmem>>, vector<1x8xf32>
    %c0_15 = arith.constant 0 : index
    %c0_16 = arith.constant 0 : index
    %8 = vector.load %arg16[%c0_15, %c0_16] : memref<64x64xbf16, #tpu.memory_space<vmem>>, vector<64x64xbf16>
    %c0_17 = arith.constant 0 : index
    %c0_18 = arith.constant 0 : index
    %9 = vector.load %arg17[%c0_17, %c0_18] : memref<64x1xf32, #tpu.memory_space<vmem>>, vector<64x1xf32>
    %c0_19 = arith.constant 0 : index
    %c0_20 = arith.constant 0 : index
    %10 = vector.load %arg18[%c0_19, %c0_20] : memref<8x16xbf16, #tpu.memory_space<vmem>>, vector<8x16xbf16>
    %c0_21 = arith.constant 0 : index
    %c0_22 = arith.constant 0 : index
    %11 = vector.load %arg19[%c0_21, %c0_22] : memref<1x16xf32, #tpu.memory_space<vmem>>, vector<1x16xf32>
    %c0_23 = arith.constant 0 : index
    %c0_24 = arith.constant 0 : index
    %c0_25 = arith.constant 0 : index
    %12 = vector.load %arg1[%c0_23, %c0_24, %c0_25] : memref<1x64x34xbf16, #tpu.memory_space<vmem>>, vector<1x64x34xbf16>
    %13 = vector.shape_cast %12 : vector<1x64x34xbf16> to vector<64x34xbf16>
    %c0_26 = arith.constant 0 : index
    %c0_27 = arith.constant 0 : index
    %14 = vector.load %arg2[%c0_26, %c0_27] : memref<34x32xbf16, #tpu.memory_space<vmem>>, vector<34x32xbf16>
    %c0_28 = arith.constant 0 : index
    %c0_29 = arith.constant 0 : index
    %15 = vector.load %arg3[%c0_28, %c0_29] : memref<1x32xf32, #tpu.memory_space<vmem>>, vector<1x32xf32>
    %cst = arith.constant dense<0.000000e+00> : vector<64x32xf32>
    %16 = tpu.matmul %13, %14, %cst {dimension_numbers = #tpu.dot_dimension_numbers<[1], [0], [0], [1], [0, 0, 1, 1], [], []>} : vector<64x34xbf16>, vector<34x32xbf16>, vector<64x32xf32> -> vector<64x32xf32>
    %17 = vector.broadcast %15 : vector<1x32xf32> to vector<64x32xf32>
    %18 = arith.addf %16, %17 : vector<64x32xf32>
    %cst_30 = arith.constant 0.000000e+00 : f32
    %19 = vector.broadcast %cst_30 : f32 to vector<64x32xf32>
    %20 = arith.maximumf %18, %19 : vector<64x32xf32>
    %c0_31 = arith.constant 0 : index
    %c0_32 = arith.constant 0 : index
    %21 = vector.load %arg4[%c0_31, %c0_32] : memref<32x32xbf16, #tpu.memory_space<vmem>>, vector<32x32xbf16>
    %c0_33 = arith.constant 0 : index
    %c0_34 = arith.constant 0 : index
    %22 = vector.load %arg5[%c0_33, %c0_34] : memref<1x32xf32, #tpu.memory_space<vmem>>, vector<1x32xf32>
    %23 = arith.truncf %20 : vector<64x32xf32> to vector<64x32xbf16>
    %cst_35 = arith.constant dense<0.000000e+00> : vector<64x32xf32>
    %24 = tpu.matmul %23, %21, %cst_35 {dimension_numbers = #tpu.dot_dimension_numbers<[1], [0], [0], [1], [0, 0, 1, 1], [], []>} : vector<64x32xbf16>, vector<32x32xbf16>, vector<64x32xf32> -> vector<64x32xf32>
    %25 = vector.broadcast %22 : vector<1x32xf32> to vector<64x32xf32>
    %26 = arith.addf %24, %25 : vector<64x32xf32>
    %cst_36 = arith.constant 0.000000e+00 : f32
    %27 = vector.broadcast %cst_36 : f32 to vector<64x32xf32>
    %28 = arith.maximumf %26, %27 : vector<64x32xf32>
    %c0_37 = arith.constant 0 : index
    %c0_38 = arith.constant 0 : index
    %29 = vector.load %arg6[%c0_37, %c0_38] : memref<32x16xbf16, #tpu.memory_space<vmem>>, vector<32x16xbf16>
    %c0_39 = arith.constant 0 : index
    %c0_40 = arith.constant 0 : index
    %30 = vector.load %arg7[%c0_39, %c0_40] : memref<1x16xf32, #tpu.memory_space<vmem>>, vector<1x16xf32>
    %31 = arith.truncf %28 : vector<64x32xf32> to vector<64x32xbf16>
    %cst_41 = arith.constant dense<0.000000e+00> : vector<64x16xf32>
    %32 = tpu.matmul %31, %29, %cst_41 {dimension_numbers = #tpu.dot_dimension_numbers<[1], [0], [0], [1], [0, 0, 1, 1], [], []>} : vector<64x32xbf16>, vector<32x16xbf16>, vector<64x16xf32> -> vector<64x16xf32>
    %33 = vector.broadcast %30 : vector<1x16xf32> to vector<64x16xf32>
    %34 = arith.addf %32, %33 : vector<64x16xf32>
    %cst_42 = arith.constant 0.000000e+00 : f32
    %35 = vector.broadcast %cst_42 : f32 to vector<64x16xf32>
    %36 = arith.maximumf %34, %35 : vector<64x16xf32>
    %cst_43 = arith.constant dense<0.000000e+00> : vector<64xf32>
    %37 = vector.multi_reduction <add>, %36, %cst_43 [1] : vector<64x16xf32> to vector<64xf32>
    %38 = vector.shape_cast %37 : vector<64xf32> to vector<64x1xf32>
    %cst_44 = arith.constant 1.600000e+01 : f32
    %39 = vector.broadcast %cst_44 : f32 to vector<64x1xf32>
    %40 = arith.divf %38, %39 : vector<64x1xf32>
    %41 = vector.broadcast %40 : vector<64x1xf32> to vector<64x16xf32>
    %42 = arith.subf %36, %41 : vector<64x16xf32>
    %43 = arith.mulf %42, %42 : vector<64x16xf32>
    %cst_45 = arith.constant dense<0.000000e+00> : vector<64xf32>
    %44 = vector.multi_reduction <add>, %43, %cst_45 [1] : vector<64x16xf32> to vector<64xf32>
    %45 = vector.shape_cast %44 : vector<64xf32> to vector<64x1xf32>
    %cst_46 = arith.constant 1.600000e+01 : f32
    %46 = vector.broadcast %cst_46 : f32 to vector<64x1xf32>
    %47 = arith.divf %45, %46 : vector<64x1xf32>
    %48 = vector.broadcast %40 : vector<64x1xf32> to vector<64x16xf32>
    %49 = arith.subf %36, %48 : vector<64x16xf32>
    %cst_47 = arith.constant 9.99999974E-6 : f32
    %50 = vector.broadcast %cst_47 : f32 to vector<64x1xf32>
    %51 = arith.addf %47, %50 : vector<64x1xf32>
    %52 = math.rsqrt %51 : vector<64x1xf32>
    %53 = vector.broadcast %52 : vector<64x1xf32> to vector<64x16xf32>
    %54 = arith.mulf %49, %53 : vector<64x16xf32>
    %55 = vector.broadcast %0 : vector<1x16xf32> to vector<64x16xf32>
    %56 = arith.mulf %54, %55 : vector<64x16xf32>
    %57 = vector.broadcast %1 : vector<1x16xf32> to vector<64x16xf32>
    %58 = arith.addf %56, %57 : vector<64x16xf32>
    %59 = arith.truncf %58 : vector<64x16xf32> to vector<64x16xbf16>
    %cst_48 = arith.constant dense<0.000000e+00> : vector<64x8xf32>
    %60 = tpu.matmul %59, %2, %cst_48 {dimension_numbers = #tpu.dot_dimension_numbers<[1], [0], [0], [1], [0, 0, 1, 1], [], []>} : vector<64x16xbf16>, vector<16x8xbf16>, vector<64x8xf32> -> vector<64x8xf32>
    %61 = vector.broadcast %3 : vector<1x8xf32> to vector<64x8xf32>
    %62 = arith.addf %60, %61 : vector<64x8xf32>
    %63 = arith.mulf %62, %62 : vector<64x8xf32>
    %64 = arith.mulf %62, %63 : vector<64x8xf32>
    %cst_49 = arith.constant 4.471500e-02 : f32
    %65 = vector.broadcast %cst_49 : f32 to vector<64x8xf32>
    %66 = arith.mulf %65, %64 : vector<64x8xf32>
    %67 = arith.addf %62, %66 : vector<64x8xf32>
    %cst_50 = arith.constant 0.797884583 : f32
    %68 = vector.broadcast %cst_50 : f32 to vector<64x8xf32>
    %69 = arith.mulf %68, %67 : vector<64x8xf32>
    %70 = math.tanh %69 : vector<64x8xf32>
    %cst_51 = arith.constant 1.000000e+00 : f32
    %71 = vector.broadcast %cst_51 : f32 to vector<64x8xf32>
    %72 = arith.addf %71, %70 : vector<64x8xf32>
    %cst_52 = arith.constant 5.000000e-01 : f32
    %73 = vector.broadcast %cst_52 : f32 to vector<64x8xf32>
    %74 = arith.mulf %73, %72 : vector<64x8xf32>
    %75 = arith.mulf %62, %74 : vector<64x8xf32>
    %cst_53 = arith.constant dense<0.000000e+00> : vector<64x8xf32>
    %76 = tpu.matmul %59, %4, %cst_53 {dimension_numbers = #tpu.dot_dimension_numbers<[1], [0], [0], [1], [0, 0, 1, 1], [], []>} : vector<64x16xbf16>, vector<16x8xbf16>, vector<64x8xf32> -> vector<64x8xf32>
    %77 = vector.broadcast %5 : vector<1x8xf32> to vector<64x8xf32>
    %78 = arith.addf %76, %77 : vector<64x8xf32>
    %79 = arith.mulf %78, %78 : vector<64x8xf32>
    %80 = arith.mulf %78, %79 : vector<64x8xf32>
    %cst_54 = arith.constant 4.471500e-02 : f32
    %81 = vector.broadcast %cst_54 : f32 to vector<64x8xf32>
    %82 = arith.mulf %81, %80 : vector<64x8xf32>
    %83 = arith.addf %78, %82 : vector<64x8xf32>
    %cst_55 = arith.constant 0.797884583 : f32
    %84 = vector.broadcast %cst_55 : f32 to vector<64x8xf32>
    %85 = arith.mulf %84, %83 : vector<64x8xf32>
    %86 = math.tanh %85 : vector<64x8xf32>
    %cst_56 = arith.constant 1.000000e+00 : f32
    %87 = vector.broadcast %cst_56 : f32 to vector<64x8xf32>
    %88 = arith.addf %87, %86 : vector<64x8xf32>
    %cst_57 = arith.constant 5.000000e-01 : f32
    %89 = vector.broadcast %cst_57 : f32 to vector<64x8xf32>
    %90 = arith.mulf %89, %88 : vector<64x8xf32>
    %91 = arith.mulf %78, %90 : vector<64x8xf32>
    %cst_58 = arith.constant dense<0.000000e+00> : vector<64xf32>
    %92 = vector.multi_reduction <add>, %91, %cst_58 [1] : vector<64x8xf32> to vector<64xf32>
    %93 = vector.shape_cast %92 : vector<64xf32> to vector<64x1xf32>
    %cst_59 = arith.constant 8.000000e+00 : f32
    %94 = vector.broadcast %cst_59 : f32 to vector<64x1xf32>
    %95 = arith.divf %93, %94 : vector<64x1xf32>
    %96 = vector.broadcast %95 : vector<64x1xf32> to vector<64x8xf32>
    %97 = arith.subf %91, %96 : vector<64x8xf32>
    %98 = arith.mulf %97, %97 : vector<64x8xf32>
    %cst_60 = arith.constant dense<0.000000e+00> : vector<64xf32>
    %99 = vector.multi_reduction <add>, %98, %cst_60 [1] : vector<64x8xf32> to vector<64xf32>
    %100 = vector.shape_cast %99 : vector<64xf32> to vector<64x1xf32>
    %cst_61 = arith.constant 8.000000e+00 : f32
    %101 = vector.broadcast %cst_61 : f32 to vector<64x1xf32>
    %102 = arith.divf %100, %101 : vector<64x1xf32>
    %103 = vector.broadcast %95 : vector<64x1xf32> to vector<64x8xf32>
    %104 = arith.subf %91, %103 : vector<64x8xf32>
    %cst_62 = arith.constant 9.99999974E-6 : f32
    %105 = vector.broadcast %cst_62 : f32 to vector<64x1xf32>
    %106 = arith.addf %102, %105 : vector<64x1xf32>
    %107 = math.rsqrt %106 : vector<64x1xf32>
    %108 = vector.broadcast %107 : vector<64x1xf32> to vector<64x8xf32>
    %109 = arith.mulf %104, %108 : vector<64x8xf32>
    %110 = vector.broadcast %6 : vector<1x8xf32> to vector<64x8xf32>
    %111 = arith.mulf %109, %110 : vector<64x8xf32>
    %112 = vector.broadcast %7 : vector<1x8xf32> to vector<64x8xf32>
    %113 = arith.addf %111, %112 : vector<64x8xf32>
    %114 = arith.truncf %113 : vector<64x8xf32> to vector<64x8xbf16>
    %cst_63 = arith.constant dense<0.000000e+00> : vector<64x8xf32>
    %115 = tpu.matmul %8, %114, %cst_63 {dimension_numbers = #tpu.dot_dimension_numbers<[1], [0], [0], [1], [0, 0, 1, 1], [], []>} : vector<64x64xbf16>, vector<64x8xbf16>, vector<64x8xf32> -> vector<64x8xf32>
    %116 = vector.broadcast %9 : vector<64x1xf32> to vector<64x8xf32>
    %117 = arith.addf %115, %116 : vector<64x8xf32>
    %118 = arith.mulf %75, %117 : vector<64x8xf32>
    %119 = arith.truncf %118 : vector<64x8xf32> to vector<64x8xbf16>
    %cst_64 = arith.constant dense<0.000000e+00> : vector<64x16xf32>
    %120 = tpu.matmul %119, %10, %cst_64 {dimension_numbers = #tpu.dot_dimension_numbers<[1], [0], [0], [1], [0, 0, 1, 1], [], []>} : vector<64x8xbf16>, vector<8x16xbf16>, vector<64x16xf32> -> vector<64x16xf32>
    %121 = vector.broadcast %11 : vector<1x16xf32> to vector<64x16xf32>
    %122 = arith.addf %120, %121 : vector<64x16xf32>
    %123 = arith.addf %122, %36 : vector<64x16xf32>
    %124 = arith.truncf %123 : vector<64x16xf32> to vector<64x16xbf16>
    %c0_65 = arith.constant 0 : index
    %c0_66 = arith.constant 0 : index
    %125 = vector.load %arg20[%c0_65, %c0_66] : memref<16x32xbf16, #tpu.memory_space<vmem>>, vector<16x32xbf16>
    %cst_67 = arith.constant dense<0.000000e+00> : vector<64x32xf32>
    %126 = tpu.matmul %124, %125, %cst_67 {dimension_numbers = #tpu.dot_dimension_numbers<[1], [0], [0], [1], [0, 0, 1, 1], [], []>} : vector<64x16xbf16>, vector<16x32xbf16>, vector<64x32xf32> -> vector<64x32xf32>
    %c0_68 = arith.constant 0 : index
    %c0_69 = arith.constant 0 : index
    %127 = vector.load %arg21[%c0_68, %c0_69] : memref<1x32xf32, #tpu.memory_space<vmem>>, vector<1x32xf32>
    %128 = vector.broadcast %127 : vector<1x32xf32> to vector<64x32xf32>
    %129 = arith.addf %126, %128 : vector<64x32xf32>
    %cst_70 = arith.constant 0.000000e+00 : f32
    %130 = vector.broadcast %cst_70 : f32 to vector<64x32xf32>
    %131 = arith.maximumf %129, %130 : vector<64x32xf32>
    %132 = arith.truncf %131 : vector<64x32xf32> to vector<64x32xbf16>
    %c0_71 = arith.constant 0 : index
    %c0_72 = arith.constant 0 : index
    %133 = vector.load %arg22[%c0_71, %c0_72] : memref<32x128xbf16, #tpu.memory_space<vmem>>, vector<32x128xbf16>
    %cst_73 = arith.constant dense<0.000000e+00> : vector<64x128xf32>
    %134 = tpu.matmul %132, %133, %cst_73 {dimension_numbers = #tpu.dot_dimension_numbers<[1], [0], [0], [1], [0, 0, 1, 1], [], []>} : vector<64x32xbf16>, vector<32x128xbf16>, vector<64x128xf32> -> vector<64x128xf32>
    %c0_74 = arith.constant 0 : index
    %c0_75 = arith.constant 0 : index
    %135 = vector.load %arg23[%c0_74, %c0_75] : memref<1x128xf32, #tpu.memory_space<vmem>>, vector<1x128xf32>
    %136 = vector.broadcast %135 : vector<1x128xf32> to vector<64x128xf32>
    %137 = arith.addf %134, %136 : vector<64x128xf32>
    %cst_76 = arith.constant dense<0xFF800000> : vector<64xf32>
    %138 = vector.multi_reduction <maximumf>, %137, %cst_76 [1] : vector<64x128xf32> to vector<64xf32>
    %139 = vector.shape_cast %138 : vector<64xf32> to vector<64x1xf32>
    %140 = vector.broadcast %139 : vector<64x1xf32> to vector<64x128xf32>
    %141 = arith.subf %137, %140 : vector<64x128xf32>
    %142 = math.exp %141 : vector<64x128xf32>
    %cst_77 = arith.constant dense<0.000000e+00> : vector<64xf32>
    %143 = vector.multi_reduction <add>, %142, %cst_77 [1] : vector<64x128xf32> to vector<64xf32>
    %144 = vector.shape_cast %143 : vector<64xf32> to vector<64x1xf32>
    %145 = math.log %144 : vector<64x1xf32>
    %146 = arith.addf %145, %139 : vector<64x1xf32>
    %147 = vector.broadcast %146 : vector<64x1xf32> to vector<64x128xf32>
    %148 = arith.subf %137, %147 : vector<64x128xf32>
    %c0_78 = arith.constant 0 : index
    %c0_79 = arith.constant 0 : index
    %c0_80 = arith.constant 0 : index
    %149 = vector.load %arg26[%c0_78, %c0_79, %c0_80] : memref<1x64x128xf32, #tpu.memory_space<vmem>>, vector<1x64x128xf32>
    %150 = vector.shape_cast %149 : vector<1x64x128xf32> to vector<64x128xf32>
    %151 = vector.shape_cast %148 : vector<64x128xf32> to vector<1x64x128xf32>
    tpu.vector_store %arg26[%c0_78, %c0_79, %c0_80], %151 {strides = array<i32>} : memref<1x64x128xf32, #tpu.memory_space<vmem>>, vector<1x64x128xf32>,
    %c0_81 = arith.constant 0 : index
    %c0_82 = arith.constant 0 : index
    %152 = vector.load %arg24[%c0_81, %c0_82] : memref<32x128xbf16, #tpu.memory_space<vmem>>, vector<32x128xbf16>
    %cst_83 = arith.constant dense<0.000000e+00> : vector<64x128xf32>
    %153 = tpu.matmul %132, %152, %cst_83 {dimension_numbers = #tpu.dot_dimension_numbers<[1], [0], [0], [1], [0, 0, 1, 1], [], []>} : vector<64x32xbf16>, vector<32x128xbf16>, vector<64x128xf32> -> vector<64x128xf32>
    %c0_84 = arith.constant 0 : index
    %c0_85 = arith.constant 0 : index
    %154 = vector.load %arg25[%c0_84, %c0_85] : memref<1x128xf32, #tpu.memory_space<vmem>>, vector<1x128xf32>
    %155 = vector.broadcast %154 : vector<1x128xf32> to vector<64x128xf32>
    %156 = arith.addf %153, %155 : vector<64x128xf32>
    %c0_86 = arith.constant 0 : index
    %c0_87 = arith.constant 0 : index
    %c0_88 = arith.constant 0 : index
    %157 = vector.load %arg27[%c0_86, %c0_87, %c0_88] : memref<1x64x128xf32, #tpu.memory_space<vmem>>, vector<1x64x128xf32>
    %158 = vector.shape_cast %157 : vector<1x64x128xf32> to vector<64x128xf32>
    %159 = vector.shape_cast %156 : vector<64x128xf32> to vector<1x64x128xf32>
    tpu.vector_store %arg27[%c0_86, %c0_87, %c0_88], %159 {strides = array<i32>} : memref<1x64x128xf32, #tpu.memory_space<vmem>>, vector<1x64x128xf32>,
    return
  }
  func.func @transform_0(%arg0: i32) -> (i32, i32, i32) {
    %c0_i32 = arith.constant 0 : i32
    %c0_i32_0 = arith.constant 0 : i32
    %c0_i32_1 = arith.constant 0 : i32
    return %arg0, %c0_i32, %c0_i32_0 : i32, i32, i32
  }
  func.func @transform_1(%arg0: i32) -> (i32, i32) {
    %c0_i32 = arith.constant 0 : i32
    %c0_i32_0 = arith.constant 0 : i32
    %c0_i32_1 = arith.constant 0 : i32
    return %c0_i32, %c0_i32_0 : i32, i32
  }
  func.func @transform_2(%arg0: i32) -> (i32, i32) {
    %c0_i32 = arith.constant 0 : i32
    %c0_i32_0 = arith.constant 0 : i32
    %c0_i32_1 = arith.constant 0 : i32
    return %c0_i32, %c0_i32_0 : i32, i32
  }
  func.func @transform_3(%arg0: i32) -> (i32, i32) {
    %c0_i32 = arith.constant 0 : i32
    %c0_i32_0 = arith.constant 0 : i32
    %c0_i32_1 = arith.constant 0 : i32
    return %c0_i32, %c0_i32_0 : i32, i32
  }
  func.func @transform_4(%arg0: i32) -> (i32, i32) {
    %c0_i32 = arith.constant 0 : i32
    %c0_i32_0 = arith.constant 0 : i32
    %c0_i32_1 = arith.constant 0 : i32
    return %c0_i32, %c0_i32_0 : i32, i32
  }
  func.func @transform_5(%arg0: i32) -> (i32, i32) {
    %c0_i32 = arith.constant 0 : i32
    %c0_i32_0 = arith.constant 0 : i32
    %c0_i32_1 = arith.constant 0 : i32
    return %c0_i32, %c0_i32_0 : i32, i32
  }
  func.func @transform_6(%arg0: i32) -> (i32, i32) {
    %c0_i32 = arith.constant 0 : i32
    %c0_i32_0 = arith.constant 0 : i32
    %c0_i32_1 = arith.constant 0 : i32
    return %c0_i32, %c0_i32_0 : i32, i32
  }
  func.func @transform_7(%arg0: i32) -> (i32, i32) {
    %c0_i32 = arith.constant 0 : i32
    %c0_i32_0 = arith.constant 0 : i32
    %c0_i32_1 = arith.constant 0 : i32
    return %c0_i32, %c0_i32_0 : i32, i32
  }
  func.func @transform_8(%arg0: i32) -> (i32, i32) {
    %c0_i32 = arith.constant 0 : i32
    %c0_i32_0 = arith.constant 0 : i32
    %c0_i32_1 = arith.constant 0 : i32
    return %c0_i32, %c0_i32_0 : i32, i32
  }
  func.func @transform_9(%arg0: i32) -> (i32, i32) {
    %c0_i32 = arith.constant 0 : i32
    %c0_i32_0 = arith.constant 0 : i32
    %c0_i32_1 = arith.constant 0 : i32
    return %c0_i32, %c0_i32_0 : i32, i32
  }
  func.func @transform_10(%arg0: i32) -> (i32, i32) {
    %c0_i32 = arith.constant 0 : i32
    %c0_i32_0 = arith.constant 0 : i32
    %c0_i32_1 = arith.constant 0 : i32
    return %c0_i32, %c0_i32_0 : i32, i32
  }
  func.func @transform_11(%arg0: i32) -> (i32, i32) {
    %c0_i32 = arith.constant 0 : i32
    %c0_i32_0 = arith.constant 0 : i32
    %c0_i32_1 = arith.constant 0 : i32
    return %c0_i32, %c0_i32_0 : i32, i32
  }
  func.func @transform_12(%arg0: i32) -> (i32, i32) {
    %c0_i32 = arith.constant 0 : i32
    %c0_i32_0 = arith.constant 0 : i32
    %c0_i32_1 = arith.constant 0 : i32
    return %c0_i32, %c0_i32_0 : i32, i32
  }
  func.func @transform_13(%arg0: i32) -> (i32, i32) {
    %c0_i32 = arith.constant 0 : i32
    %c0_i32_0 = arith.constant 0 : i32
    %c0_i32_1 = arith.constant 0 : i32
    return %c0_i32, %c0_i32_0 : i32, i32
  }
  func.func @transform_14(%arg0: i32) -> (i32, i32) {
    %c0_i32 = arith.constant 0 : i32
    %c0_i32_0 = arith.constant 0 : i32
    %c0_i32_1 = arith.constant 0 : i32
    return %c0_i32, %c0_i32_0 : i32, i32
  }
  func.func @transform_15(%arg0: i32) -> (i32, i32) {
    %c0_i32 = arith.constant 0 : i32
    %c0_i32_0 = arith.constant 0 : i32
    %c0_i32_1 = arith.constant 0 : i32
    return %c0_i32, %c0_i32_0 : i32, i32
  }
  func.func @transform_16(%arg0: i32) -> (i32, i32) {
    %c0_i32 = arith.constant 0 : i32
    %c0_i32_0 = arith.constant 0 : i32
    %c0_i32_1 = arith.constant 0 : i32
    return %c0_i32, %c0_i32_0 : i32, i32
  }
  func.func @transform_17(%arg0: i32) -> (i32, i32) {
    %c0_i32 = arith.constant 0 : i32
    %c0_i32_0 = arith.constant 0 : i32
    %c0_i32_1 = arith.constant 0 : i32
    return %c0_i32, %c0_i32_0 : i32, i32
  }
  func.func @transform_18(%arg0: i32) -> (i32, i32) {
    %c0_i32 = arith.constant 0 : i32
    %c0_i32_0 = arith.constant 0 : i32
    %c0_i32_1 = arith.constant 0 : i32
    return %c0_i32, %c0_i32_0 : i32, i32
  }
  func.func @transform_19(%arg0: i32) -> (i32, i32) {
    %c0_i32 = arith.constant 0 : i32
    %c0_i32_0 = arith.constant 0 : i32
    %c0_i32_1 = arith.constant 0 : i32
    return %c0_i32, %c0_i32_0 : i32, i32
  }
  func.func @transform_20(%arg0: i32) -> (i32, i32) {
    %c0_i32 = arith.constant 0 : i32
    %c0_i32_0 = arith.constant 0 : i32
    %c0_i32_1 = arith.constant 0 : i32
    return %c0_i32, %c0_i32_0 : i32, i32
  }
  func.func @transform_21(%arg0: i32) -> (i32, i32) {
    %c0_i32 = arith.constant 0 : i32
    %c0_i32_0 = arith.constant 0 : i32
    %c0_i32_1 = arith.constant 0 : i32
    return %c0_i32, %c0_i32_0 : i32, i32
  }
  func.func @transform_22(%arg0: i32) -> (i32, i32) {
    %c0_i32 = arith.constant 0 : i32
    %c0_i32_0 = arith.constant 0 : i32
    %c0_i32_1 = arith.constant 0 : i32
    return %c0_i32, %c0_i32_0 : i32, i32
  }
  func.func @transform_23(%arg0: i32) -> (i32, i32) {
    %c0_i32 = arith.constant 0 : i32
    %c0_i32_0 = arith.constant 0 : i32
    %c0_i32_1 = arith.constant 0 : i32
    return %c0_i32, %c0_i32_0 : i32, i32
  }
  func.func @transform_24(%arg0: i32) -> (i32, i32) {
    %c0_i32 = arith.constant 0 : i32
    %c0_i32_0 = arith.constant 0 : i32
    %c0_i32_1 = arith.constant 0 : i32
    return %c0_i32, %c0_i32_0 : i32, i32
  }
  func.func @transform_25(%arg0: i32) -> (i32, i32, i32) {
    %c0_i32 = arith.constant 0 : i32
    %c0_i32_0 = arith.constant 0 : i32
    %c0_i32_1 = arith.constant 0 : i32
    return %arg0, %c0_i32, %c0_i32_0 : i32, i32, i32
  }
  func.func @transform_26(%arg0: i32) -> (i32, i32, i32) {
    %c0_i32 = arith.constant 0 : i32
    %c0_i32_0 = arith.constant 0 : i32
    %c0_i32_1 = arith.constant 0 : i32
    return %arg0, %c0_i32, %c0_i32_0 : i32, i32, i32
  }
}

</mosaic_0001>

<bundles_post_ra>
// kernel: custom-call.20
= control target key start
LH: loop header
LB: loop body
LE: loop exit
PB: predicated region body
PF: predicated region fallthrough
CT: control target
= control target key end

     0   :  { %s6_s0 = inlined_call_operand.vmem [shape: f32[2,64], index: 0, kind: output, shape index: {}]  }

// kernel: custom-call.21
= control target key start
LH: loop header
LB: loop body
LE: loop exit
PB: predicated region body
PF: predicated region fallthrough
CT: control target
= control target key end

     0   :  { %s6_s0 = inlined_call_operand.vmem [shape: f32[2,32], index: 0, kind: output, shape index: {}]  }

// kernel: forward.4
= control target key start
LH: loop header
LB: loop body
LE: loop exit
PB: predicated region body
PF: predicated region fallthrough
CT: control target
= control target key end

     0   :  { %s5586_s0 = inlined_call_operand.vmem [shape: bf16[2,512,5], index: 0, kind: input, shape index: {}]   ;;  %s5587_s1 = inlined_call_operand.vmem [shape: bf16[5,16], index: 1, kind: input, shape index: {}]   ;;  %s5588_s2 = inlined_call_operand.vmem [shape: f32[1,16], index: 2, kind: input, shape index: {}]   ;;  %s5589_s3 = inlined_call_operand.vmem [shape: bf16[16,32], index: 3, kind: input, shape index: {}]   ;;  %s5590_s4 = inlined_call_operand.vmem [shape: f32[1,32], index: 4, kind: input, shape index: {}]   ;;  %s5591_s5 = inlined_call_operand.vmem [shape: bf16[32,64], index: 5, kind: input, shape index: {}]   ;;  %s5592_s6 = inlined_call_operand.vmem [shape: f32[1,64], index: 6, kind: input, shape index: {}]   ;;  %s5593_s7 = inlined_call_operand.vmem [shape: f32[1,64], index: 7, kind: input, shape index: {}]   ;;  %s5594_s8 = inlined_call_operand.vmem [shape: f32[1,64], index: 8, kind: input, shape index: {}]   ;;  %s5595_s9 = inlined_call_operand.vmem [shape: bf16[64,32], index: 9, kind: input, shape index: {}]   ;;  %s5596_s10 = inlined_call_operand.vmem [shape: f32[1,32], index: 10, kind: input, shape index: {}]   ;;  %s5597_s11 = inlined_call_operand.vmem [shape: bf16[64,32], index: 11, kind: input, shape index: {}]   ;;  %s5598_s12 = inlined_call_operand.vmem [shape: f32[1,32], index: 12, kind: input, shape index: {}]   ;;  %s5599_s13 = inlined_call_operand.vmem [shape: f32[1,32], index: 13, kind: input, shape index: {}]   ;;  %s5600_s14 = inlined_call_operand.vmem [shape: f32[1,32], index: 14, kind: input, shape index: {}]   ;;  %s5601_s15 = inlined_call_operand.vmem [shape: bf16[32,32], index: 15, kind: input, shape index: {}]   ;;  %s5602_s16 = inlined_call_operand.vmem [shape: f32[32,1], index: 16, kind: input, shape index: {}]   ;;  %s5603_s17 = inlined_call_operand.vmem [shape: bf16[32,64], index: 17, kind: input, shape index: {}]   ;;  %s5604_s18 = inlined_call_operand.vmem [shape: f32[1,64], index: 18, kind: input, shape index: {}]   ;;  %s5605_s19 = inlined_call_operand.vmem [shape: f32[2,32,64], index: 19, kind: output, shape index: {}]  }
   0x1   :  { %5606 = sst [smem:[#allocation2_spill]] %s5586_s0  ;;  %s4552_s0 = smov 0  }
   0x2   :  { %5607 = sst [smem:[#allocation3_spill]] %s5587_s1 }
   0x3   :  { %5608 = sst [smem:[#allocation4_spill]] %s5588_s2 }
   0x4   :  { %5609 = sst [smem:[#allocation5_spill]] %s5589_s3 }
   0x5 LB: > { %s3815_s30 = sadd.s32 4294967295, %s4448_s0   ;;  %p3819_p0 = scmp.ge.s32.totalorder %s4448_s0, 1  ;;  %s4448_s0 = sphi %s4552_s0, %s29_s0  }
   0x6   : > { %p537_p1 = scmp.lt.s32.totalorder %s4448_s0, 3 }
   0x8   : > { %p538_p2 = pnand %p3819_p0, %p537_p1 }
   0x9   : > { %s5610_s1 = sld [smem:[#allocation3_spill]] (!%p538_p2)  ;;  %vm968_vm0 = vcmask (!%p538_p2), 1041408   ;;  %vm969_vm1 = vcmask (!%p538_p2), 1042432   ;;  %p593_p3 = scmp.lt.s32.totalorder (!%p538_p2), %s3815_s30, 1  ;;  %v4450_v1 = vmov (!%p538_p2), 65535   ;;  %vm871_vm2 = vcmask (!%p538_p2), 39936  }
   0xa   : > { %541 = sbr.rel (%p538_p2) target bundleno = 2188 (0x88c), region = 96  ;;  %v970_v2 = vsel (!%p538_p2), %vm968_vm0, 4294967295, %v4450_v1  ;;  %s5611_s23 = sld [smem:[#allocation5_spill]] (!%p538_p2)  ;;  %v4396_v46 = vld [vmem:[%s5591_s5] sm:$0xff] (!%p538_p2)   ;;  %v4397_v47 = vld [vmem:[%s5591_s5 + $0x8] sm:$0xff] (!%p538_p2)   ;;  %vm1375_vm3 = vcmask (!%p538_p2), 130048  }
   0xb   : > { %v971_v3 = vsel (!%p538_p2), %vm969_vm1, %v970_v2, 0  ;;  %s5612_s26 = sld [smem:[#allocation2_spill]] (!%p538_p2)  ;;  %s5613_s20 = sld [smem:[#allocation4_spill]] (!%p538_p2)  ;;  %vm1880_vm4 = vcmask (!%p538_p2), 261120   ;;  %vm2330_vm5 = vcmask (!%p538_p2), 523264   ;;  %vm2651_vm6 = vcmask (!%p538_p2), 1041409  }
   0xc   : > { %vm2653_vm7 = vcmask (!%p538_p2), 1042434   ;;  %vm2655_vm8 = vcmask (!%p538_p2), 1043459   ;;  %vm2657_vm9 = vcmask (!%p538_p2), 1044484   ;;  %vm2659_vm10 = vcmask (!%p538_p2), 1045509  }
   0xd   : > { %vm2661_vm11 = vcmask (!%p538_p2), 1046534   ;;  %vm2663_vm12 = vcmask (!%p538_p2), 1047559  }
   0xf   : > { %v703_v0 = vld [vmem:[%s5610_s1] sm:$0x7] (!%p538_p2) }
  0x10   : > { %v4395_v4 = vld [vmem:[%s5611_s23] sm:$0xff] (!%p538_p2)   ;;  %v973_v5 = vand.u32 (!%p538_p2), %v971_v3, %v703_v0 }
  0x11   : > { %s5615_s30 = smov (!%p593_p3, %s3815_s30), 1  ;;  %v4641_v38 = vld [vmem:[%s5613_s20] ss:$0 sm:$0xff] }
  0x12   : > { %s3987_s24 = sshll.u32 %s5615_s30, 8  ;;  %4109 = vmatprep.subr.bf16.mxu0 %v973_v5  ;;  %4349 = vmatprep.subr.bf16.mxu1 %v973_v5  ;;  %s3988_s22 = sshll.u32 %s5615_s30, 5 }
  0x13   : > { %s4572_s27 = scalar_lea.vmem %s5612_s26, %s3987_s24  ;;  %4110 = vmatpush3.bf16.msra.mxu0 %v973_v5  ;;  %4350 = vmatpush3.bf16.msra.mxu1 %v973_v5  ;;  %s602_s24 = scalar_lea.vmem %s5605_s19, %s3988_s22 }
  0x14   : > { %v4363_v6 = vld [vmem:[%s4572_s27] sm:$0xff]   ;;  %v4364_v7 = vld [vmem:[%s4572_s27 + $0x8] sm:$0xff]   ;;  %4175 = vmatprep.subr.bf16.mxu1 %v4395_v4  ;;  %v4365_v8 = vld [vmem:[%s4572_s27 + $0x10] sm:$0xff]   ;;  %4241 = vmatprep.subr.bf16.mxu0 %v4396_v46 }
  0x15   : > { %4111 = vmatprep.mubr.msk.bf16.mxu0 %vm871_vm2, %v4363_v6  ;;  %v4366_v9 = vld [vmem:[%s4572_s27 + $0x18] sm:$0xff]   ;;  %v4367_v10 = vld [vmem:[%s4572_s27 + $0x20] sm:$0xff]   ;;  %v4368_v11 = vld [vmem:[%s4572_s27 + $0x28] sm:$0xff]  }
  0x16   : > { %4112 = vmatmul.mubr.msk.bf16.vlgmr.msra.gmra.mrb[0].mxu0 %vm871_vm2, %v4364_v7  ;;  %v4369_v12 = vld [vmem:[%s4572_s27 + $0x30] sm:$0xff]   ;;  %v4370_v13 = vld [vmem:[%s4572_s27 + $0x38] sm:$0xff]   ;;  %v4371_v14 = vld [vmem:[%s4572_s27 + $0x40] sm:$0xff]  }
  0x17   : > { %4115 = vmatprep.mubr.msk.bf16.mxu0 %vm871_vm2, %v4365_v8  ;;  %v4385_v15 = vld [vmem:[%s4572_s27 + $0xb0] sm:$0xff]   ;;  %v4386_v16 = vld [vmem:[%s4572_s27 + $0xb8] sm:$0xff]   ;;  %v4387_v17 = vld [vmem:[%s4572_s27 + $0xc0] sm:$0xff]   ;;  %4242 = vmatpush3.bf16.msra.mxu0 %v4396_v46 }
  0x18   : > { %4155 = vmatprep.mubr.msk.bf16.mxu1 %vm871_vm2, %v4385_v15  ;;  %v4372_v18 = vld [vmem:[%s4572_s27 + $0x48] sm:$0xff]   ;;  %v4389_v20 = vld [vmem:[%s4572_s27 + $0xd0] sm:$0xff]   ;;  %v4390_v22 = vld [vmem:[%s4572_s27 + $0xd8] sm:$0xff]   ;;  %4243 = vmatprep.subr.bf16.mxu0 %v4397_v47 }
  0x19   : > { %4156 = vmatmul.mubr.msk.bf16.vlgmr.msra.gmra.mrb[0].mxu1 %vm871_vm2, %v4386_v16  ;;  %v4388_v19 = vld [vmem:[%s4572_s27 + $0xc8] sm:$0xff]   ;;  %v4373_v21 = vld [vmem:[%s4572_s27 + $0x50] sm:$0xff]   ;;  %v4391_v23 = vld [vmem:[%s4572_s27 + $0xe0] sm:$0xff]  }
  0x1a   : > { %4159 = vmatprep.mubr.msk.bf16.mxu1 %vm871_vm2, %v4387_v17  ;;  %4176 = vmatpush3.bf16.msra.mxu1 %v4395_v4  ;;  %v4374_v24 = vld [vmem:[%s4572_s27 + $0x58] sm:$0xff]   ;;  %v4375_v25 = vld [vmem:[%s4572_s27 + $0x60] sm:$0xff]   ;;  %v4392_v26 = vld [vmem:[%s4572_s27 + $0xe8] sm:$0xff]  }
  0x1b   : > { %v4393_v27 = vld [vmem:[%s4572_s27 + $0xf0] sm:$0xff]   ;;  %v4376_v28 = vld [vmem:[%s4572_s27 + $0x68] sm:$0xff]   ;;  %v4394_v30 = vld [vmem:[%s4572_s27 + $0xf8] sm:$0xff]   ;;  %4244 = vmatpush3.bf16.msra.mxu0 %v4397_v47 }
  0x1c   : > { %v4377_v29 = vld [vmem:[%s4572_s27 + $0x70] sm:$0xff]   ;;  %v4378_v31 = vld [vmem:[%s4572_s27 + $0x78] sm:$0xff]   ;;  %v4379_v32 = vld [vmem:[%s4572_s27 + $0x80] sm:$0xff]  }
  0x1d   : > { %v4380_v33 = vld [vmem:[%s4572_s27 + $0x88] sm:$0xff]   ;;  %v4381_v34 = vld [vmem:[%s4572_s27 + $0x90] sm:$0xff]   ;;  %v4382_v35 = vld [vmem:[%s4572_s27 + $0x98] sm:$0xff]  }
  0x1e   : > { %4116 = vmatmul.mubr.msk.bf16.gmra.mrb[4].mxu0 %vm871_vm2, %v4366_v9  ;;  %v4383_v36 = vld [vmem:[%s4572_s27 + $0xa0] sm:$0xff]   ;;  %v4384_v37 = vld [vmem:[%s4572_s27 + $0xa8] sm:$0xff]  }
  0x1f   : > { %4119 = vmatprep.mubr.msk.bf16.mxu0 %vm871_vm2, %v4367_v10 }
  0x21   : > { %4160 = vmatmul.mubr.msk.bf16.gmra.mrb[4].mxu1 %vm871_vm2, %v4388_v19 }
  0x22   : > { %4163 = vmatprep.mubr.msk.bf16.mxu1 %vm871_vm2, %v4389_v20 }
  0x26   : > { %4120 = vmatmul.mubr.msk.bf16.gmra.mrb[8].mxu0 %vm871_vm2, %v4368_v11 }
  0x27   : > { %4123 = vmatprep.mubr.msk.bf16.mxu0 %vm871_vm2, %v4369_v12 }
  0x29   : > { %4164 = vmatmul.mubr.msk.bf16.gmra.mrb[8].mxu1 %vm871_vm2, %v4390_v22 }
  0x2a   : > { %4167 = vmatprep.mubr.msk.bf16.mxu1 %vm871_vm2, %v4391_v23 }
  0x2e   : > { %4124 = vmatmul.mubr.msk.bf16.gmra.mrb[12].mxu0 %vm871_vm2, %v4370_v13 }
  0x2f   : > { %4127 = vmatprep.mubr.msk.bf16.mxu0 %vm871_vm2, %v4371_v14 }
  0x31   : > { %4168 = vmatmul.mubr.msk.bf16.gmra.mrb[12].mxu1 %vm871_vm2, %v4392_v26 }
  0x32   : > { %4171 = vmatprep.mubr.msk.bf16.mxu1 %vm871_vm2, %v4393_v27 }
  0x36   : > { %4128 = vmatmul.mubr.msk.bf16.gmra.mrb[16].mxu0 %vm871_vm2, %v4372_v18 }
  0x37   : > { %4131 = vmatprep.mubr.msk.bf16.mxu0 %vm871_vm2, %v4373_v21 }
  0x39   : > { %4172 = vmatmul.mubr.msk.bf16.gmra.mrb[16].mxu1 %vm871_vm2, %v4394_v30 }
  0x3e   : > { %4132 = vmatmul.mubr.msk.bf16.gmra.mrb[20].mxu0 %vm871_vm2, %v4374_v24 }
  0x3f   : > { %4135 = vmatprep.mubr.msk.bf16.mxu0 %vm871_vm2, %v4375_v25 }
  0x46   : > { %4136 = vmatmul.mubr.msk.bf16.gmra.mrb[24].mxu0 %vm871_vm2, %v4376_v28 }
  0x47   : > { %4139 = vmatprep.mubr.msk.bf16.mxu0 %vm871_vm2, %v4377_v29 }
  0x4e   : > { %4140 = vmatmul.mubr.msk.bf16.gmra.mrb[28].mxu0 %vm871_vm2, %v4378_v31 }
  0x4f   : > { %4143 = vmatprep.mubr.msk.bf16.mxu0 %vm871_vm2, %v4379_v32 }
  0x56   : > { %4144 = vmatmul.mubr.msk.bf16.gmra.mrb[32].mxu0 %vm871_vm2, %v4380_v33 }
  0x57   : > { %4147 = vmatprep.mubr.msk.bf16.mxu0 %vm871_vm2, %v4381_v34 }
  0x5e   : > { %4148 = vmatmul.mubr.msk.bf16.gmra.mrb[36].mxu0 %vm871_vm2, %v4382_v35 }
  0x5f   : > { %4151 = vmatprep.mubr.msk.bf16.mxu0 %vm871_vm2, %v4383_v36 }
  0x66   : > { %4152 = vmatmul.mubr.msk.bf16.gmra.mrb[40].mxu0 %vm871_vm2, %v4384_v37 }
  0xe9   : > { %v4113_v39 = vpop.f32.mrb[0].mxu0 }
  0xea   : > { %v1018_v40 = vadd.f32 %v4113_v39, %v4641_v38  ;;  %v1009_v41 = vpop.f32.mrb[1].mxu0 }
  0xeb   : > { %v1010_v42 = vadd.f32 %v4641_v38, %v1009_v41  ;;  %v4114_v43 = vpop.f32.mrb[2].mxu0 }
  0xec   : > { %v1021_v44 = vadd.f32 %v4114_v43, %v4641_v38  ;;  %v1012_v45 = vpop.f32.mrb[3].mxu0  ;;  %v1266_v49 = vmax.f32 %v1018_v40, 0.0  ;;  %v4157_v17 = vpop.f32.mrb[0].mxu1 }
  0xed   : > { %v1013_v48 = vadd.f32 %v4641_v38, %v1012_v45  ;;  %v1264_v51 = vmax.f32 %v1010_v42, 0.0  ;;  %v1194_v19 = vadd.f32 %v4157_v17, %v4641_v38  ;;  %v1185_v20 = vpop.f32.mrb[1].mxu1 }
  0xee   : > { %v1267_v50 = vmax.f32 %v1021_v44, 0.0  ;;  %v1186_v23 = vadd.f32 %v4641_v38, %v1185_v20  ;;  %v4158_v24 = vpop.f32.mrb[2].mxu1 }
  0xef   : > { %v1265_v52 = vmax.f32 %v1013_v48, 0.0  ;;  %v1310_v27 = vmax.f32 %v1194_v19, 0.0  ;;  %v1197_v28 = vadd.f32 %v4158_v24, %v4641_v38  ;;  %v1188_v29 = vpop.f32.mrb[3].mxu1 }
  0xf0   : > { %v1332_v53 = vpack.c.bf16 %v1267_v50, %v1266_v49  ;;  %v1308_v32 = vmax.f32 %v1186_v23, 0.0  ;;  %v1189_v33 = vadd.f32 %v4641_v38, %v1188_v29 }
  0xf1   : > { %v1331_v54 = vpack.c.bf16 %v1265_v52, %v1264_v51  ;;  %v4117_v55 = vpop.f32.mrb[4].mxu0  ;;  %v1311_v36 = vmax.f32 %v1197_v28, 0.0 }
  0xf2   : > { %v1034_v56 = vadd.f32 %v4117_v55, %v4641_v38  ;;  %v1025_v57 = vpop.f32.mrb[5].mxu0  ;;  %v1309_v39 = vmax.f32 %v1189_v33, 0.0 }
  0xf3   : > { %v1026_v58 = vadd.f32 %v4641_v38, %v1025_v57  ;;  %v4118_v59 = vpop.f32.mrb[6].mxu0  ;;  %4177 = vmatprep.mubr.msk.bf16.mxu1 %vm1375_vm3, %v1331_v54  ;;  %v4675_v42 = vpack.c.bf16 %v1311_v36, %v1310_v27 }
  0xf4   : > { %v1037_v60 = vadd.f32 %v4118_v59, %v4641_v38  ;;  %v1028_v61 = vpop.f32.mrb[7].mxu0  ;;  %4178 = vmatmul.mubr.msk.bf16.vlgmr.msra.gmra.mrb[20].mxu1 %vm1375_vm3, %v1332_v53  ;;  %v1270_v63 = vmax.f32 %v1034_v56, 0.0  ;;  %v4677_v45 = vpack.c.bf16 %v1309_v39, %v1308_v32  ;;  %v4161_v46 = vpop.f32.mrb[4].mxu1 }
  0xf5   : > { %v1029_v62 = vadd.f32 %v4641_v38, %v1028_v61  ;;  %v1268_v1 = vmax.f32 %v1026_v58, 0.0  ;;  %v1210_v48 = vadd.f32 %v4161_v46, %v4641_v38  ;;  %v1201_v49 = vpop.f32.mrb[5].mxu1 }
  0xf6   : > { %v1271_v0 = vmax.f32 %v1037_v60, 0.0  ;;  %v1202_v52 = vadd.f32 %v4641_v38, %v1201_v49  ;;  %v4162_v53 = vpop.f32.mrb[6].mxu1 }
  0xf7   : > { %v1269_v2 = vmax.f32 %v1029_v62, 0.0  ;;  %v1314_v56 = vmax.f32 %v1210_v48, 0.0  ;;  %v1213_v57 = vadd.f32 %v4162_v53, %v4641_v38  ;;  %v1204_v58 = vpop.f32.mrb[7].mxu1 }
  0xf8   : > { %v1334_v3 = vpack.c.bf16 %v1271_v0, %v1270_v63  ;;  %v1312_v61 = vmax.f32 %v1202_v52, 0.0  ;;  %v1205_v62 = vadd.f32 %v4641_v38, %v1204_v58 }
  0xf9   : > { %v1333_v4 = vpack.c.bf16 %v1269_v2, %v1268_v1  ;;  %v4121_v5 = vpop.f32.mrb[8].mxu0  ;;  %v1315_v1 = vmax.f32 %v1213_v57, 0.0 }
  0xfa   : > { %v1050_v6 = vadd.f32 %v4121_v5, %v4641_v38  ;;  %v1041_v7 = vpop.f32.mrb[9].mxu0 }
  0xfb   : > { %v1042_v8 = vadd.f32 %v4641_v38, %v1041_v7  ;;  %v4122_v9 = vpop.f32.mrb[10].mxu0  ;;  %4181 = vmatprep.mubr.msk.bf16.mxu1 %vm1375_vm3, %v1333_v4 }
  0xfc   : > { %v1053_v10 = vadd.f32 %v4122_v9, %v4641_v38  ;;  %v1044_v11 = vpop.f32.mrb[11].mxu0  ;;  %4182 = vmatmul.mubr.msk.bf16.gmra.mrb[24].mxu1 %vm1375_vm3, %v1334_v3  ;;  %v1274_v13 = vmax.f32 %v1050_v6, 0.0  ;;  %v1313_v3 = vmax.f32 %v1205_v62, 0.0  ;;  %v4689_v6 = vpack.c.bf16 %v1315_v1, %v1314_v56 }
  0xfd   : > { %v1045_v12 = vadd.f32 %v4641_v38, %v1044_v11  ;;  %v1272_v15 = vmax.f32 %v1042_v8, 0.0 }
  0xfe   : > { %v1275_v14 = vmax.f32 %v1053_v10, 0.0  ;;  %v4691_v9 = vpack.c.bf16 %v1313_v3, %v1312_v61  ;;  %v4165_v10 = vpop.f32.mrb[8].mxu1 }
  0xff   : > { %v1273_v16 = vmax.f32 %v1045_v12, 0.0  ;;  %v1226_v12 = vadd.f32 %v4165_v10, %v4641_v38 }
 0x100   : > { %v1336_v18 = vpack.c.bf16 %v1275_v14, %v1274_v13  ;;  %v1217_v13 = vpop.f32.mrb[9].mxu1 }
 0x101   : > { %v1335_v21 = vpack.c.bf16 %v1273_v16, %v1272_v15  ;;  %v4125_v22 = vpop.f32.mrb[12].mxu0  ;;  %v1218_v16 = vadd.f32 %v4641_v38, %v1217_v13  ;;  %v4166_v17 = vpop.f32.mrb[10].mxu1  ;;  %v1318_v20 = vmax.f32 %v1226_v12, 0.0 }
 0x102   : > { %v1066_v25 = vadd.f32 %v4125_v22, %v4641_v38  ;;  %v1057_v26 = vpop.f32.mrb[13].mxu0  ;;  %v1220_v22 = vpop.f32.mrb[11].mxu1 }
 0x103   : > { %v1058_v30 = vadd.f32 %v4641_v38, %v1057_v26  ;;  %v4126_v31 = vpop.f32.mrb[14].mxu0  ;;  %4185 = vmatprep.mubr.msk.bf16.mxu1 %vm1375_vm3, %v1335_v21  ;;  %v1229_v21 = vadd.f32 %v4166_v17, %v4641_v38  ;;  %v1221_v26 = vadd.f32 %v4641_v38, %v1220_v22 }
 0x104   : > { %v1069_v34 = vadd.f32 %v4126_v31, %v4641_v38  ;;  %v1060_v35 = vpop.f32.mrb[15].mxu0  ;;  %4186 = vmatmul.mubr.msk.bf16.gmra.mrb[28].mxu1 %vm1375_vm3, %v1336_v18  ;;  %v1278_v40 = vmax.f32 %v1066_v25, 0.0  ;;  %v1316_v25 = vmax.f32 %v1218_v16, 0.0  ;;  %v4169_v39 = vpop.f32.mrb[12].mxu1 }
 0x105   : > { %v1061_v37 = vadd.f32 %v4641_v38, %v1060_v35  ;;  %v1276_v43 = vmax.f32 %v1058_v30, 0.0  ;;  %v1319_v29 = vmax.f32 %v1229_v21, 0.0  ;;  %v1317_v31 = vmax.f32 %v1221_v26, 0.0 }
 0x106   : > { %v1279_v41 = vmax.f32 %v1069_v34, 0.0 }
 0x107   : > { %v1277_v44 = vmax.f32 %v1061_v37, 0.0  ;;  %v4703_v34 = vpack.c.bf16 %v1319_v29, %v1318_v20  ;;  %v4705_v37 = vpack.c.bf16 %v1317_v31, %v1316_v25 }
 0x108   : > { %v1338_v47 = vpack.c.bf16 %v1279_v41, %v1278_v40  ;;  %v1242_v41 = vadd.f32 %v4169_v39, %v4641_v38 }
 0x109   : > { %v1337_v50 = vpack.c.bf16 %v1277_v44, %v1276_v43  ;;  %v4129_v51 = vpop.f32.mrb[16].mxu0  ;;  %v1233_v43 = vpop.f32.mrb[13].mxu1 }
 0x10a   : > { %v1082_v54 = vadd.f32 %v4129_v51, %v4641_v38  ;;  %v1073_v55 = vpop.f32.mrb[17].mxu0  ;;  %v4170_v48 = vpop.f32.mrb[14].mxu1  ;;  %v1322_v51 = vmax.f32 %v1242_v41, 0.0 }
 0x10b   : > { %v1074_v59 = vadd.f32 %v4641_v38, %v1073_v55  ;;  %v4130_v60 = vpop.f32.mrb[18].mxu0  ;;  %4189 = vmatprep.mubr.msk.bf16.mxu1 %vm1375_vm3, %v1337_v50  ;;  %v1245_v52 = vadd.f32 %v4170_v48, %v4641_v38  ;;  %v1236_v53 = vpop.f32.mrb[15].mxu1 }
 0x10c   : > { %v1085_v63 = vadd.f32 %v4130_v60, %v4641_v38  ;;  %v1076_v0 = vpop.f32.mrb[19].mxu0  ;;  %4190 = vmatmul.mubr.msk.bf16.gmra.mrb[32].mxu1 %vm1375_vm3, %v1338_v47  ;;  %v1282_v4 = vmax.f32 %v1082_v54, 0.0  ;;  %v1234_v47 = vadd.f32 %v4641_v38, %v1233_v43  ;;  %v1237_v57 = vadd.f32 %v4641_v38, %v1236_v53 }
 0x10d   : > { %v1077_v2 = vadd.f32 %v4641_v38, %v1076_v0  ;;  %v1280_v7 = vmax.f32 %v1074_v59, 0.0  ;;  %v1323_v60 = vmax.f32 %v1245_v52, 0.0 }
 0x10e   : > { %v1283_v5 = vmax.f32 %v1085_v63, 0.0  ;;  %v1320_v56 = vmax.f32 %v1234_v47, 0.0  ;;  %v1321_v62 = vmax.f32 %v1237_v57, 0.0 }
 0x10f   : > { %v1281_v8 = vmax.f32 %v1077_v2, 0.0  ;;  %v4717_v1 = vpack.c.bf16 %v1323_v60, %v1322_v51 }
 0x110   : > { %v1340_v11 = vpack.c.bf16 %v1283_v5, %v1282_v4  ;;  %v4719_v4 = vpack.c.bf16 %v1321_v62, %v1320_v56  ;;  %v4173_v5 = vpop.f32.mrb[16].mxu1 }
 0x111   : > { %v1339_v14 = vpack.c.bf16 %v1281_v8, %v1280_v7  ;;  %v4133_v15 = vpop.f32.mrb[20].mxu0  ;;  %v1258_v8 = vadd.f32 %v4173_v5, %v4641_v38  ;;  %v1249_v10 = vpop.f32.mrb[17].mxu1 }
 0x112   : > { %v1098_v18 = vadd.f32 %v4133_v15, %v4641_v38  ;;  %v1089_v19 = vpop.f32.mrb[21].mxu0  ;;  %v1250_v13 = vadd.f32 %v4641_v38, %v1249_v10 }
 0x113   : > { %v1090_v23 = vadd.f32 %v4641_v38, %v1089_v19  ;;  %v4134_v24 = vpop.f32.mrb[22].mxu0  ;;  %4193 = vmatprep.mubr.msk.bf16.mxu1 %vm1375_vm3, %v1339_v14  ;;  %v4174_v14 = vpop.f32.mrb[18].mxu1  ;;  %v1326_v17 = vmax.f32 %v1258_v8, 0.0 }
 0x114   : > { %v1101_v27 = vadd.f32 %v4134_v24, %v4641_v38  ;;  %v1092_v28 = vpop.f32.mrb[23].mxu0  ;;  %4194 = vmatmul.mubr.msk.bf16.gmra.mrb[36].mxu1 %vm1375_vm3, %v1340_v11  ;;  %v1286_v32 = vmax.f32 %v1098_v18, 0.0  ;;  %v1261_v18 = vadd.f32 %v4174_v14, %v4641_v38  ;;  %v1252_v19 = vpop.f32.mrb[19].mxu1  ;;  %v1324_v22 = vmax.f32 %v1250_v13, 0.0 }
 0x115   : > { %v1093_v30 = vadd.f32 %v4641_v38, %v1092_v28  ;;  %v1284_v35 = vmax.f32 %v1090_v23, 0.0  ;;  %v1253_v23 = vadd.f32 %v4641_v38, %v1252_v19 }
 0x116   : > { %v1287_v33 = vmax.f32 %v1101_v27, 0.0  ;;  %v1327_v26 = vmax.f32 %v1261_v18, 0.0 }
 0x117   : > { %v1285_v36 = vmax.f32 %v1093_v30, 0.0  ;;  %v1325_v28 = vmax.f32 %v1253_v23, 0.0 }
 0x118   : > { %v1342_v40 = vpack.c.bf16 %v1287_v33, %v1286_v32  ;;  %v4731_v31 = vpack.c.bf16 %v1327_v26, %v1326_v17 }
 0x119   : > { %v1341_v44 = vpack.c.bf16 %v1285_v36, %v1284_v35  ;;  %v4137_v46 = vpop.f32.mrb[24].mxu0  ;;  %v1361_v35 = vpack.c.bf16 %v1325_v28, %v1324_v22 }
 0x11a   : > { %v1114_v49 = vadd.f32 %v4137_v46, %v4641_v38  ;;  %v1105_v50 = vpop.f32.mrb[25].mxu0 }
 0x11b   : > { %v1106_v54 = vadd.f32 %v4641_v38, %v1105_v50  ;;  %v4138_v55 = vpop.f32.mrb[26].mxu0  ;;  %4197 = vmatprep.mubr.msk.bf16.mxu1 %vm1375_vm3, %v1341_v44 }
 0x11c   : > { %v1117_v58 = vadd.f32 %v4138_v55, %v4641_v38  ;;  %v1108_v59 = vpop.f32.mrb[27].mxu0  ;;  %4198 = vmatmul.mubr.msk.bf16.gmra.mrb[40].mxu1 %vm1375_vm3, %v1342_v40  ;;  %v1290_v63 = vmax.f32 %v1114_v49, 0.0 }
 0x11d   : > { %v1109_v61 = vadd.f32 %v4641_v38, %v1108_v59  ;;  %v1288_v2 = vmax.f32 %v1106_v54, 0.0 }
 0x11e   : > { %v1291_v0 = vmax.f32 %v1117_v58, 0.0 }
 0x11f   : > { %v1289_v3 = vmax.f32 %v1109_v61, 0.0 }
 0x120   : > { %v1344_v7 = vpack.c.bf16 %v1291_v0, %v1290_v63 }
 0x121   : > { %v1343_v11 = vpack.c.bf16 %v1289_v3, %v1288_v2  ;;  %v4141_v12 = vpop.f32.mrb[28].mxu0 }
 0x122   : > { %v1130_v15 = vadd.f32 %v4141_v12, %v4641_v38  ;;  %v1121_v16 = vpop.f32.mrb[29].mxu0 }
 0x123   : > { %v1122_v20 = vadd.f32 %v4641_v38, %v1121_v16  ;;  %v4142_v21 = vpop.f32.mrb[30].mxu0  ;;  %4201 = vmatprep.mubr.msk.bf16.mxu1 %vm1375_vm3, %v1343_v11 }
 0x124   : > { %v1133_v24 = vadd.f32 %v4142_v21, %v4641_v38  ;;  %v1124_v25 = vpop.f32.mrb[31].mxu0  ;;  %4202 = vmatmul.mubr.msk.bf16.gmra.mrb[44].mxu1 %vm1375_vm3, %v1344_v7  ;;  %v1294_v29 = vmax.f32 %v1130_v15, 0.0 }
 0x125   : > { %v1125_v27 = vadd.f32 %v4641_v38, %v1124_v25  ;;  %v1292_v32 = vmax.f32 %v1122_v20, 0.0 }
 0x126   : > { %v1295_v30 = vmax.f32 %v1133_v24, 0.0 }
 0x127   : > { %v1293_v33 = vmax.f32 %v1125_v27, 0.0 }
 0x128   : > { %v1346_v36 = vpack.c.bf16 %v1295_v30, %v1294_v29 }
 0x129   : > { %v1345_v39 = vpack.c.bf16 %v1293_v33, %v1292_v32  ;;  %v4145_v40 = vpop.f32.mrb[32].mxu0 }
 0x12a   : > { %v1146_v41 = vadd.f32 %v4145_v40, %v4641_v38  ;;  %v1137_v43 = vpop.f32.mrb[33].mxu0 }
 0x12b   : > { %v1138_v44 = vadd.f32 %v4641_v38, %v1137_v43  ;;  %v4146_v46 = vpop.f32.mrb[34].mxu0  ;;  %4205 = vmatprep.mubr.msk.bf16.mxu1 %vm1375_vm3, %v1345_v39 }
 0x12c   : > { %v1149_v47 = vadd.f32 %v4146_v46, %v4641_v38  ;;  %v1140_v48 = vpop.f32.mrb[35].mxu0  ;;  %4206 = vmatmul.mubr.msk.bf16.gmra.mrb[48].mxu1 %vm1375_vm3, %v1346_v36  ;;  %v1298_v50 = vmax.f32 %v1146_v41, 0.0 }
 0x12d   : > { %v1141_v49 = vadd.f32 %v4641_v38, %v1140_v48  ;;  %v1296_v52 = vmax.f32 %v1138_v44, 0.0 }
 0x12e   : > { %v1299_v51 = vmax.f32 %v1149_v47, 0.0 }
 0x12f   : > { %v1297_v53 = vmax.f32 %v1141_v49, 0.0 }
 0x130   : > { %v1348_v54 = vpack.c.bf16 %v1299_v51, %v1298_v50 }
 0x131   : > { %v1347_v55 = vpack.c.bf16 %v1297_v53, %v1296_v52  ;;  %v4149_v56 = vpop.f32.mrb[36].mxu0 }
 0x132   : > { %v1162_v57 = vadd.f32 %v4149_v56, %v4641_v38  ;;  %v1153_v58 = vpop.f32.mrb[37].mxu0 }
 0x133   : > { %v1154_v59 = vadd.f32 %v4641_v38, %v1153_v58  ;;  %v4150_v60 = vpop.f32.mrb[38].mxu0  ;;  %4209 = vmatprep.mubr.msk.bf16.mxu1 %vm1375_vm3, %v1347_v55 }
 0x134   : > { %v1165_v61 = vadd.f32 %v4150_v60, %v4641_v38  ;;  %v1156_v62 = vpop.f32.mrb[39].mxu0  ;;  %4210 = vmatmul.mubr.msk.bf16.gmra.mrb[52].mxu1 %vm1375_vm3, %v1348_v54  ;;  %v1302_v0 = vmax.f32 %v1162_v57, 0.0 }
 0x135   : > { %v1157_v63 = vadd.f32 %v4641_v38, %v1156_v62  ;;  %v1300_v3 = vmax.f32 %v1154_v59, 0.0 }
 0x136   : > { %v1303_v2 = vmax.f32 %v1165_v61, 0.0 }
 0x137   : > { %v1301_v5 = vmax.f32 %v1157_v63, 0.0 }
 0x138   : > { %v1350_v7 = vpack.c.bf16 %v1303_v2, %v1302_v0 }
 0x139   : > { %v1349_v8 = vpack.c.bf16 %v1301_v5, %v1300_v3  ;;  %v4153_v10 = vpop.f32.mrb[40].mxu0 }
 0x13a   : > { %v1178_v11 = vadd.f32 %v4153_v10, %v4641_v38  ;;  %v1169_v12 = vpop.f32.mrb[41].mxu0 }
 0x13b   : > { %v1170_v13 = vadd.f32 %v4641_v38, %v1169_v12  ;;  %v4154_v14 = vpop.f32.mrb[42].mxu0  ;;  %4213 = vmatprep.mubr.msk.bf16.mxu1 %vm1375_vm3, %v1349_v8 }
 0x13c   : > { %v1181_v15 = vadd.f32 %v4154_v14, %v4641_v38  ;;  %v1172_v16 = vpop.f32.mrb[43].mxu0  ;;  %4214 = vmatmul.mubr.msk.bf16.gmra.mrb[56].mxu1 %vm1375_vm3, %v1350_v7  ;;  %v1306_v18 = vmax.f32 %v1178_v11, 0.0 }
 0x13d   : > { %v1173_v17 = vadd.f32 %v4641_v38, %v1172_v16  ;;  %v1304_v20 = vmax.f32 %v1170_v13, 0.0  ;;  %v4775_v38 = vld [vmem:[%s5590_s4] ss:$0 sm:$0xff] }
 0x13e   : > { %v1307_v19 = vmax.f32 %v1181_v15, 0.0 }
 0x13f   : > { %v1305_v21 = vmax.f32 %v1173_v17, 0.0 }
 0x140   : > { %v1352_v22 = vpack.c.bf16 %v1307_v19, %v1306_v18 }
 0x141   : > { %v1351_v23 = vpack.c.bf16 %v1305_v21, %v1304_v20 }
 0x143   : > { %4217 = vmatprep.mubr.msk.bf16.mxu1 %vm1375_vm3, %v1351_v23 }
 0x144   : > { %4218 = vmatmul.mubr.msk.bf16.gmra.mrb[60].mxu1 %vm1375_vm3, %v1352_v22 }
 0x145   : > { %4221 = vmatprep.mubr.msk.bf16.mxu1 %vm1375_vm3, %v4677_v45 }
 0x14c   : > { %4222 = vmatmul.mubr.msk.bf16.gmra.mrb[64].mxu1 %vm1375_vm3, %v4675_v42 }
 0x14d   : > { %4225 = vmatprep.mubr.msk.bf16.mxu1 %vm1375_vm3, %v4691_v9 }
 0x154   : > { %4226 = vmatmul.mubr.msk.bf16.gmra.mrb[68].mxu1 %vm1375_vm3, %v4689_v6 }
 0x155   : > { %4229 = vmatprep.mubr.msk.bf16.mxu1 %vm1375_vm3, %v4705_v37 }
 0x15c   : > { %4230 = vmatmul.mubr.msk.bf16.gmra.mrb[72].mxu1 %vm1375_vm3, %v4703_v34 }
 0x15d   : > { %4233 = vmatprep.mubr.msk.bf16.mxu1 %vm1375_vm3, %v4719_v4 }
 0x164   : > { %4234 = vmatmul.mubr.msk.bf16.gmra.mrb[76].mxu1 %vm1375_vm3, %v4717_v1 }
 0x165   : > { %4237 = vmatprep.mubr.msk.bf16.mxu1 %vm1375_vm3, %v1361_v35 }
 0x16c   : > { %4238 = vmatmul.mubr.msk.bf16.gmra.mrb[80].mxu1 %vm1375_vm3, %v4731_v31 }
 0x1c7   : > { %v4179_v42 = vpop.f32.mrb[20].mxu1 }
 0x1c8   : > { %v1515_v45 = vadd.f32 %v4179_v42, %v4775_v38  ;;  %v1506_v6 = vpop.f32.mrb[21].mxu1 }
 0x1c9   : > { %v1507_v9 = vadd.f32 %v4775_v38, %v1506_v6  ;;  %v4180_v34 = vpop.f32.mrb[22].mxu1 }
 0x1ca   : > { %v1518_v37 = vadd.f32 %v4180_v34, %v4775_v38  ;;  %v1509_v1 = vpop.f32.mrb[23].mxu1  ;;  %v1763_v24 = vmax.f32 %v1515_v45, 0.0 }
 0x1cb   : > { %v1510_v4 = vadd.f32 %v4775_v38, %v1509_v1  ;;  %v1761_v26 = vmax.f32 %v1507_v9, 0.0 }
 0x1cc   : > { %v1764_v25 = vmax.f32 %v1518_v37, 0.0 }
 0x1cd   : > { %v1762_v27 = vmax.f32 %v1510_v4, 0.0 }
 0x1ce   : > { %v1831_v28 = vpack.c.bf16 %v1764_v25, %v1763_v24 }
 0x1cf   : > { %v1830_v29 = vpack.c.bf16 %v1762_v27, %v1761_v26  ;;  %v4183_v30 = vpop.f32.mrb[24].mxu1 }
 0x1d0   : > { %v1531_v31 = vadd.f32 %v4183_v30, %v4775_v38  ;;  %v1522_v32 = vpop.f32.mrb[25].mxu1 }
 0x1d1   : > { %v1523_v33 = vadd.f32 %v4775_v38, %v1522_v32  ;;  %v4184_v35 = vpop.f32.mrb[26].mxu1  ;;  %4245 = vmatprep.mubr.msk.bf16.mxu0 %vm1880_vm4, %v1830_v29 }
 0x1d2   : > { %v1534_v36 = vadd.f32 %v4184_v35, %v4775_v38  ;;  %v1525_v39 = vpop.f32.mrb[27].mxu1  ;;  %4246 = vmatmul.mubr.msk.bf16.vlgmr.msra.gmra.mrb[44].mxu0 %vm1880_vm4, %v1831_v28  ;;  %v1767_v41 = vmax.f32 %v1531_v31, 0.0 }
 0x1d3   : > { %v1526_v40 = vadd.f32 %v4775_v38, %v1525_v39  ;;  %v1765_v44 = vmax.f32 %v1523_v33, 0.0 }
 0x1d4   : > { %v1768_v43 = vmax.f32 %v1534_v36, 0.0 }
 0x1d5   : > { %v1766_v46 = vmax.f32 %v1526_v40, 0.0 }
 0x1d6   : > { %v1833_v47 = vpack.c.bf16 %v1768_v43, %v1767_v41 }
 0x1d7   : > { %v1832_v48 = vpack.c.bf16 %v1766_v46, %v1765_v44  ;;  %v4187_v49 = vpop.f32.mrb[28].mxu1 }
 0x1d8   : > { %v1547_v50 = vadd.f32 %v4187_v49, %v4775_v38  ;;  %v1538_v51 = vpop.f32.mrb[29].mxu1 }
 0x1d9   : > { %v1539_v52 = vadd.f32 %v4775_v38, %v1538_v51  ;;  %v4188_v53 = vpop.f32.mrb[30].mxu1  ;;  %4249 = vmatprep.mubr.msk.bf16.mxu0 %vm1880_vm4, %v1832_v48 }
 0x1da   : > { %v1550_v54 = vadd.f32 %v4188_v53, %v4775_v38  ;;  %v1541_v55 = vpop.f32.mrb[31].mxu1  ;;  %4250 = vmatmul.mubr.msk.bf16.gmra.mrb[48].mxu0 %vm1880_vm4, %v1833_v47  ;;  %v1771_v57 = vmax.f32 %v1547_v50, 0.0 }
 0x1db   : > { %v1542_v56 = vadd.f32 %v4775_v38, %v1541_v55  ;;  %v1769_v59 = vmax.f32 %v1539_v52, 0.0 }
 0x1dc   : > { %v1772_v58 = vmax.f32 %v1550_v54, 0.0 }
 0x1dd   : > { %v1770_v60 = vmax.f32 %v1542_v56, 0.0 }
 0x1de   : > { %v1835_v61 = vpack.c.bf16 %v1772_v58, %v1771_v57 }
 0x1df   : > { %v1834_v62 = vpack.c.bf16 %v1770_v60, %v1769_v59  ;;  %v4191_v63 = vpop.f32.mrb[32].mxu1 }
 0x1e0   : > { %v1563_v0 = vadd.f32 %v4191_v63, %v4775_v38  ;;  %v1554_v2 = vpop.f32.mrb[33].mxu1 }
 0x1e1   : > { %v1555_v3 = vadd.f32 %v4775_v38, %v1554_v2  ;;  %v4192_v5 = vpop.f32.mrb[34].mxu1  ;;  %4253 = vmatprep.mubr.msk.bf16.mxu0 %vm1880_vm4, %v1834_v62 }
 0x1e2   : > { %v1566_v7 = vadd.f32 %v4192_v5, %v4775_v38  ;;  %v1557_v8 = vpop.f32.mrb[35].mxu1  ;;  %4254 = vmatmul.mubr.msk.bf16.gmra.mrb[52].mxu0 %vm1880_vm4, %v1835_v61  ;;  %v1775_v11 = vmax.f32 %v1563_v0, 0.0 }
 0x1e3   : > { %v1558_v10 = vadd.f32 %v4775_v38, %v1557_v8  ;;  %v1773_v13 = vmax.f32 %v1555_v3, 0.0 }
 0x1e4   : > { %v1776_v12 = vmax.f32 %v1566_v7, 0.0 }
 0x1e5   : > { %v1774_v14 = vmax.f32 %v1558_v10, 0.0 }
 0x1e6   : > { %v1837_v15 = vpack.c.bf16 %v1776_v12, %v1775_v11 }
 0x1e7   : > { %v1836_v16 = vpack.c.bf16 %v1774_v14, %v1773_v13  ;;  %v4195_v17 = vpop.f32.mrb[36].mxu1 }
 0x1e8   : > { %v1579_v18 = vadd.f32 %v4195_v17, %v4775_v38  ;;  %v1570_v19 = vpop.f32.mrb[37].mxu1 }
 0x1e9   : > { %v1571_v20 = vadd.f32 %v4775_v38, %v1570_v19  ;;  %v4196_v21 = vpop.f32.mrb[38].mxu1  ;;  %4257 = vmatprep.mubr.msk.bf16.mxu0 %vm1880_vm4, %v1836_v16 }
 0x1ea   : > { %v1582_v22 = vadd.f32 %v4196_v21, %v4775_v38  ;;  %v1573_v23 = vpop.f32.mrb[39].mxu1  ;;  %4258 = vmatmul.mubr.msk.bf16.gmra.mrb[56].mxu0 %vm1880_vm4, %v1837_v15  ;;  %v1779_v45 = vmax.f32 %v1579_v18, 0.0 }
 0x1eb   : > { %v1574_v42 = vadd.f32 %v4775_v38, %v1573_v23  ;;  %v1777_v9 = vmax.f32 %v1571_v20, 0.0 }
 0x1ec   : > { %v1780_v6 = vmax.f32 %v1582_v22, 0.0 }
 0x1ed   : > { %v1778_v34 = vmax.f32 %v1574_v42, 0.0 }
 0x1ee   : > { %v1839_v37 = vpack.c.bf16 %v1780_v6, %v1779_v45 }
 0x1ef   : > { %v1838_v1 = vpack.c.bf16 %v1778_v34, %v1777_v9  ;;  %v4199_v4 = vpop.f32.mrb[40].mxu1 }
 0x1f0   : > { %v1595_v24 = vadd.f32 %v4199_v4, %v4775_v38  ;;  %v1586_v25 = vpop.f32.mrb[41].mxu1 }
 0x1f1   : > { %v1587_v26 = vadd.f32 %v4775_v38, %v1586_v25  ;;  %v4200_v27 = vpop.f32.mrb[42].mxu1  ;;  %4261 = vmatprep.mubr.msk.bf16.mxu0 %vm1880_vm4, %v1838_v1 }
 0x1f2   : > { %v1598_v28 = vadd.f32 %v4200_v27, %v4775_v38  ;;  %v1589_v29 = vpop.f32.mrb[43].mxu1  ;;  %4262 = vmatmul.mubr.msk.bf16.gmra.mrb[60].mxu0 %vm1880_vm4, %v1839_v37  ;;  %v1783_v31 = vmax.f32 %v1595_v24, 0.0 }
 0x1f3   : > { %v1590_v30 = vadd.f32 %v4775_v38, %v1589_v29  ;;  %v1781_v33 = vmax.f32 %v1587_v26, 0.0 }
 0x1f4   : > { %v1784_v32 = vmax.f32 %v1598_v28, 0.0 }
 0x1f5   : > { %v1782_v35 = vmax.f32 %v1590_v30, 0.0 }
 0x1f6   : > { %v1841_v36 = vpack.c.bf16 %v1784_v32, %v1783_v31 }
 0x1f7   : > { %v1840_v39 = vpack.c.bf16 %v1782_v35, %v1781_v33  ;;  %v4203_v40 = vpop.f32.mrb[44].mxu1 }
 0x1f8   : > { %v1611_v41 = vadd.f32 %v4203_v40, %v4775_v38  ;;  %v1602_v43 = vpop.f32.mrb[45].mxu1 }
 0x1f9   : > { %v1603_v44 = vadd.f32 %v4775_v38, %v1602_v43  ;;  %v4204_v46 = vpop.f32.mrb[46].mxu1  ;;  %4265 = vmatprep.mubr.msk.bf16.mxu0 %vm1880_vm4, %v1840_v39 }
 0x1fa   : > { %v1614_v47 = vadd.f32 %v4204_v46, %v4775_v38  ;;  %v1605_v48 = vpop.f32.mrb[47].mxu1  ;;  %4266 = vmatmul.mubr.msk.bf16.gmra.mrb[64].mxu0 %vm1880_vm4, %v1841_v36  ;;  %v1787_v50 = vmax.f32 %v1611_v41, 0.0 }
 0x1fb   : > { %v1606_v49 = vadd.f32 %v4775_v38, %v1605_v48  ;;  %v1785_v52 = vmax.f32 %v1603_v44, 0.0 }
 0x1fc   : > { %v1788_v51 = vmax.f32 %v1614_v47, 0.0 }
 0x1fd   : > { %v1786_v53 = vmax.f32 %v1606_v49, 0.0 }
 0x1fe   : > { %v1843_v54 = vpack.c.bf16 %v1788_v51, %v1787_v50 }
 0x1ff   : > { %v1842_v55 = vpack.c.bf16 %v1786_v53, %v1785_v52  ;;  %v4207_v56 = vpop.f32.mrb[48].mxu1 }
 0x200   : > { %v1627_v57 = vadd.f32 %v4207_v56, %v4775_v38  ;;  %v1618_v58 = vpop.f32.mrb[49].mxu1 }
 0x201   : > { %v1619_v59 = vadd.f32 %v4775_v38, %v1618_v58  ;;  %v4208_v60 = vpop.f32.mrb[50].mxu1  ;;  %4269 = vmatprep.mubr.msk.bf16.mxu0 %vm1880_vm4, %v1842_v55 }
 0x202   : > { %v1630_v61 = vadd.f32 %v4208_v60, %v4775_v38  ;;  %v1621_v62 = vpop.f32.mrb[51].mxu1  ;;  %4270 = vmatmul.mubr.msk.bf16.gmra.mrb[68].mxu0 %vm1880_vm4, %v1843_v54  ;;  %v1791_v0 = vmax.f32 %v1627_v57, 0.0 }
 0x203   : > { %v1622_v63 = vadd.f32 %v4775_v38, %v1621_v62  ;;  %v1789_v3 = vmax.f32 %v1619_v59, 0.0 }
 0x204   : > { %v1792_v2 = vmax.f32 %v1630_v61, 0.0 }
 0x205   : > { %v1790_v5 = vmax.f32 %v1622_v63, 0.0 }
 0x206   : > { %v1845_v7 = vpack.c.bf16 %v1792_v2, %v1791_v0 }
 0x207   : > { %v1844_v8 = vpack.c.bf16 %v1790_v5, %v1789_v3  ;;  %v4211_v10 = vpop.f32.mrb[52].mxu1 }
 0x208   : > { %v1643_v11 = vadd.f32 %v4211_v10, %v4775_v38  ;;  %v1634_v12 = vpop.f32.mrb[53].mxu1 }
 0x209   : > { %v1635_v13 = vadd.f32 %v4775_v38, %v1634_v12  ;;  %v4212_v14 = vpop.f32.mrb[54].mxu1  ;;  %4273 = vmatprep.mubr.msk.bf16.mxu0 %vm1880_vm4, %v1844_v8 }
 0x20a   : > { %v1646_v15 = vadd.f32 %v4212_v14, %v4775_v38  ;;  %v1637_v16 = vpop.f32.mrb[55].mxu1  ;;  %4274 = vmatmul.mubr.msk.bf16.gmra.mrb[72].mxu0 %vm1880_vm4, %v1845_v7  ;;  %v1795_v18 = vmax.f32 %v1643_v11, 0.0 }
 0x20b   : > { %v1638_v17 = vadd.f32 %v4775_v38, %v1637_v16  ;;  %v1793_v20 = vmax.f32 %v1635_v13, 0.0 }
 0x20c   : > { %v1796_v19 = vmax.f32 %v1646_v15, 0.0 }
 0x20d   : > { %v1794_v21 = vmax.f32 %v1638_v17, 0.0 }
 0x20e   : > { %v1847_v22 = vpack.c.bf16 %v1796_v19, %v1795_v18 }
 0x20f   : > { %v1846_v23 = vpack.c.bf16 %v1794_v21, %v1793_v20  ;;  %v4215_v42 = vpop.f32.mrb[56].mxu1 }
 0x210   : > { %v1659_v45 = vadd.f32 %v4215_v42, %v4775_v38  ;;  %v1650_v6 = vpop.f32.mrb[57].mxu1 }
 0x211   : > { %v1651_v9 = vadd.f32 %v4775_v38, %v1650_v6  ;;  %v4216_v34 = vpop.f32.mrb[58].mxu1  ;;  %4277 = vmatprep.mubr.msk.bf16.mxu0 %vm1880_vm4, %v1846_v23 }
 0x212   : > { %v1662_v37 = vadd.f32 %v4216_v34, %v4775_v38  ;;  %v1653_v1 = vpop.f32.mrb[59].mxu1  ;;  %4278 = vmatmul.mubr.msk.bf16.gmra.mrb[76].mxu0 %vm1880_vm4, %v1847_v22  ;;  %v1799_v24 = vmax.f32 %v1659_v45, 0.0 }
 0x213   : > { %v1654_v4 = vadd.f32 %v4775_v38, %v1653_v1  ;;  %v1797_v26 = vmax.f32 %v1651_v9, 0.0 }
 0x214   : > { %v1800_v25 = vmax.f32 %v1662_v37, 0.0 }
 0x215   : > { %v1798_v27 = vmax.f32 %v1654_v4, 0.0 }
 0x216   : > { %v1849_v28 = vpack.c.bf16 %v1800_v25, %v1799_v24 }
 0x217   : > { %v1848_v29 = vpack.c.bf16 %v1798_v27, %v1797_v26  ;;  %v4219_v30 = vpop.f32.mrb[60].mxu1 }
 0x218   : > { %v1675_v31 = vadd.f32 %v4219_v30, %v4775_v38  ;;  %v1666_v32 = vpop.f32.mrb[61].mxu1 }
 0x219   : > { %v1667_v33 = vadd.f32 %v4775_v38, %v1666_v32  ;;  %v4220_v35 = vpop.f32.mrb[62].mxu1  ;;  %4281 = vmatprep.mubr.msk.bf16.mxu0 %vm1880_vm4, %v1848_v29 }
 0x21a   : > { %v1678_v36 = vadd.f32 %v4220_v35, %v4775_v38  ;;  %v1669_v39 = vpop.f32.mrb[63].mxu1  ;;  %4282 = vmatmul.mubr.msk.bf16.gmra.mrb[80].mxu0 %vm1880_vm4, %v1849_v28  ;;  %v1803_v41 = vmax.f32 %v1675_v31, 0.0 }
 0x21b   : > { %v1670_v40 = vadd.f32 %v4775_v38, %v1669_v39  ;;  %v1801_v44 = vmax.f32 %v1667_v33, 0.0 }
 0x21c   : > { %v1804_v43 = vmax.f32 %v1678_v36, 0.0 }
 0x21d   : > { %v1802_v46 = vmax.f32 %v1670_v40, 0.0 }
 0x21e   : > { %v1851_v47 = vpack.c.bf16 %v1804_v43, %v1803_v41 }
 0x21f   : > { %v1850_v48 = vpack.c.bf16 %v1802_v46, %v1801_v44  ;;  %v4223_v49 = vpop.f32.mrb[64].mxu1 }
 0x220   : > { %v1691_v50 = vadd.f32 %v4223_v49, %v4775_v38  ;;  %v1682_v51 = vpop.f32.mrb[65].mxu1 }
 0x221   : > { %v1683_v52 = vadd.f32 %v4775_v38, %v1682_v51  ;;  %v4224_v53 = vpop.f32.mrb[66].mxu1  ;;  %4285 = vmatprep.mubr.msk.bf16.mxu0 %vm1880_vm4, %v1850_v48 }
 0x222   : > { %v1694_v54 = vadd.f32 %v4224_v53, %v4775_v38  ;;  %v1685_v55 = vpop.f32.mrb[67].mxu1  ;;  %4286 = vmatmul.mubr.msk.bf16.gmra.mrb[84].mxu0 %vm1880_vm4, %v1851_v47  ;;  %v1807_v57 = vmax.f32 %v1691_v50, 0.0 }
 0x223   : > { %v1686_v56 = vadd.f32 %v4775_v38, %v1685_v55  ;;  %v1805_v59 = vmax.f32 %v1683_v52, 0.0 }
 0x224   : > { %v1808_v58 = vmax.f32 %v1694_v54, 0.0 }
 0x225   : > { %v1806_v60 = vmax.f32 %v1686_v56, 0.0  ;;  %v4876_v56 = vld [vmem:[%s5592_s6] ss:$0 sm:$0xff] }
 0x226   : > { %v1853_v61 = vpack.c.bf16 %v1808_v58, %v1807_v57 }
 0x227   : > { %v1852_v62 = vpack.c.bf16 %v1806_v60, %v1805_v59  ;;  %v4227_v63 = vpop.f32.mrb[68].mxu1 }
 0x228   : > { %v1707_v0 = vadd.f32 %v4227_v63, %v4775_v38  ;;  %v1698_v2 = vpop.f32.mrb[69].mxu1 }
 0x229   : > { %v1699_v3 = vadd.f32 %v4775_v38, %v1698_v2  ;;  %v4228_v5 = vpop.f32.mrb[70].mxu1  ;;  %4289 = vmatprep.mubr.msk.bf16.mxu0 %vm1880_vm4, %v1852_v62 }
 0x22a   : > { %v1710_v7 = vadd.f32 %v4228_v5, %v4775_v38  ;;  %v1701_v8 = vpop.f32.mrb[71].mxu1  ;;  %4290 = vmatmul.mubr.msk.bf16.gmra.mrb[88].mxu0 %vm1880_vm4, %v1853_v61  ;;  %v1811_v11 = vmax.f32 %v1707_v0, 0.0 }
 0x22b   : > { %v1702_v10 = vadd.f32 %v4775_v38, %v1701_v8  ;;  %v1809_v13 = vmax.f32 %v1699_v3, 0.0 }
 0x22c   : > { %v1812_v12 = vmax.f32 %v1710_v7, 0.0 }
 0x22d   : > { %v1810_v14 = vmax.f32 %v1702_v10, 0.0 }
 0x22e   : > { %v1855_v15 = vpack.c.bf16 %v1812_v12, %v1811_v11 }
 0x22f   : > { %v1854_v16 = vpack.c.bf16 %v1810_v14, %v1809_v13  ;;  %v4231_v17 = vpop.f32.mrb[72].mxu1 }
 0x230   : > { %v1723_v18 = vadd.f32 %v4231_v17, %v4775_v38  ;;  %v1714_v19 = vpop.f32.mrb[73].mxu1 }
 0x231   : > { %v1715_v20 = vadd.f32 %v4775_v38, %v1714_v19  ;;  %v4232_v21 = vpop.f32.mrb[74].mxu1  ;;  %4293 = vmatprep.mubr.msk.bf16.mxu0 %vm1880_vm4, %v1854_v16 }
 0x232   : > { %v1726_v22 = vadd.f32 %v4232_v21, %v4775_v38  ;;  %v1717_v23 = vpop.f32.mrb[75].mxu1  ;;  %4294 = vmatmul.mubr.msk.bf16.gmra.mrb[92].mxu0 %vm1880_vm4, %v1855_v15  ;;  %v1815_v45 = vmax.f32 %v1723_v18, 0.0 }
 0x233   : > { %v1718_v42 = vadd.f32 %v4775_v38, %v1717_v23  ;;  %v1813_v9 = vmax.f32 %v1715_v20, 0.0 }
 0x234   : > { %v1816_v6 = vmax.f32 %v1726_v22, 0.0 }
 0x235   : > { %v1814_v34 = vmax.f32 %v1718_v42, 0.0 }
 0x236   : > { %v1857_v37 = vpack.c.bf16 %v1816_v6, %v1815_v45 }
 0x237   : > { %v1856_v1 = vpack.c.bf16 %v1814_v34, %v1813_v9  ;;  %v4235_v4 = vpop.f32.mrb[76].mxu1 }
 0x238   : > { %v1739_v24 = vadd.f32 %v4235_v4, %v4775_v38  ;;  %v1730_v25 = vpop.f32.mrb[77].mxu1 }
 0x239   : > { %v1731_v26 = vadd.f32 %v4775_v38, %v1730_v25  ;;  %v4236_v27 = vpop.f32.mrb[78].mxu1  ;;  %4297 = vmatprep.mubr.msk.bf16.mxu0 %vm1880_vm4, %v1856_v1 }
 0x23a   : > { %v1742_v28 = vadd.f32 %v4236_v27, %v4775_v38  ;;  %v1733_v29 = vpop.f32.mrb[79].mxu1  ;;  %4298 = vmatmul.mubr.msk.bf16.gmra.mrb[96].mxu0 %vm1880_vm4, %v1857_v37  ;;  %v1819_v31 = vmax.f32 %v1739_v24, 0.0 }
 0x23b   : > { %v1734_v30 = vadd.f32 %v4775_v38, %v1733_v29  ;;  %v1817_v33 = vmax.f32 %v1731_v26, 0.0 }
 0x23c   : > { %v1820_v32 = vmax.f32 %v1742_v28, 0.0 }
 0x23d   : > { %v1818_v35 = vmax.f32 %v1734_v30, 0.0 }
 0x23e   : > { %v1859_v36 = vpack.c.bf16 %v1820_v32, %v1819_v31 }
 0x23f   : > { %v1858_v39 = vpack.c.bf16 %v1818_v35, %v1817_v33  ;;  %v4239_v40 = vpop.f32.mrb[80].mxu1 }
 0x240   : > { %v1755_v41 = vadd.f32 %v4239_v40, %v4775_v38  ;;  %v1746_v43 = vpop.f32.mrb[81].mxu1 }
 0x241   : > { %v1747_v44 = vadd.f32 %v4775_v38, %v1746_v43  ;;  %v4240_v46 = vpop.f32.mrb[82].mxu1  ;;  %4301 = vmatprep.mubr.msk.bf16.mxu0 %vm1880_vm4, %v1858_v39 }
 0x242   : > { %v1758_v47 = vadd.f32 %v4240_v46, %v4775_v38  ;;  %v1749_v48 = vpop.f32.mrb[83].mxu1  ;;  %4302 = vmatmul.mubr.msk.bf16.gmra.mrb[100].mxu0 %vm1880_vm4, %v1859_v36  ;;  %v1823_v50 = vmax.f32 %v1755_v41, 0.0 }
 0x243   : > { %v1750_v49 = vadd.f32 %v4775_v38, %v1749_v48  ;;  %v1821_v52 = vmax.f32 %v1747_v44, 0.0 }
 0x244   : > { %v1824_v51 = vmax.f32 %v1758_v47, 0.0 }
 0x245   : > { %v1822_v53 = vmax.f32 %v1750_v49, 0.0 }
 0x246   : > { %v1861_v54 = vpack.c.bf16 %v1824_v51, %v1823_v50 }
 0x247   : > { %v1860_v55 = vpack.c.bf16 %v1822_v53, %v1821_v52 }
 0x249   : > { %4305 = vmatprep.mubr.msk.bf16.mxu0 %vm1880_vm4, %v1860_v55 }
 0x24a   : > { %4306 = vmatmul.mubr.msk.bf16.gmra.mrb[104].mxu0 %vm1880_vm4, %v1861_v54 }
 0x2a5   : > { %v4247_v57 = vpop.f32.mrb[44].mxu0 }
 0x2a6   : > { %v2020_v58 = vadd.f32 %v4247_v57, %v4876_v56  ;;  %v2011_v59 = vpop.f32.mrb[45].mxu0 }
 0x2a7   : > { %v2012_v38 = vadd.f32 %v4876_v56, %v2011_v59  ;;  %v4248_v60 = vpop.f32.mrb[46].mxu0 }
 0x2a8   : > { %v2268_v61 = vmax.f32 %v2020_v58, 0.0  ;;  %v2023_v62 = vadd.f32 %v4248_v60, %v4876_v56  ;;  %v2014_v63 = vpop.f32.mrb[47].mxu0 }
 0x2a9   : > { %v2266_v0 = vmax.f32 %v2012_v38, 0.0  ;;  %v2015_v2 = vadd.f32 %v4876_v56, %v2014_v63 }
 0x2aa   : > { %v2269_v3 = vmax.f32 %v2023_v62, 0.0  ;;  %v2340_v7 = vsel %vm2330_vm5, %v2268_v61, -inf }
 0x2ab   : > { %v2267_v5 = vmax.f32 %v2015_v2, 0.0  ;;  %v2331_v10 = vsel %vm2330_vm5, %v2266_v0, -inf }
 0x2ac   : > { %v2341_v8 = vsel %vm2330_vm5, %v2269_v3, -inf }
 0x2ad   : > { %v2342_v11 = vmax.f32 %v2340_v7, %v2341_v8  ;;  %v2332_v12 = vsel %vm2330_vm5, %v2267_v5, -inf  ;;  %v4251_v13 = vpop.f32.mrb[48].mxu0 }
 0x2ae   : > { %v2333_v14 = vmax.f32 %v2331_v10, %v2332_v12  ;;  %v2036_v15 = vadd.f32 %v4251_v13, %v4876_v56  ;;  %v2027_v16 = vpop.f32.mrb[49].mxu0 }
 0x2af   : > { %v2028_v17 = vadd.f32 %v4876_v56, %v2027_v16  ;;  %v4252_v18 = vpop.f32.mrb[50].mxu0  ;;  %v2343_v19 = vrot.slane %v2342_v11, 4 }
 0x2b0   : > { %v2272_v20 = vmax.f32 %v2036_v15, 0.0  ;;  %v2039_v21 = vadd.f32 %v4252_v18, %v4876_v56  ;;  %v2030_v22 = vpop.f32.mrb[51].mxu0  ;;  %v2334_v23 = vrot.slane %v2333_v14, 4 }
 0x2b1   : > { %v2270_v42 = vmax.f32 %v2028_v17, 0.0  ;;  %v2031_v45 = vadd.f32 %v4876_v56, %v2030_v22  ;;  %v2344_v34 = vmax.f32 %v2342_v11, %v2343_v19 }
 0x2b2   : > { %v2273_v6 = vmax.f32 %v2039_v21, 0.0  ;;  %v2358_v37 = vsel %vm2330_vm5, %v2272_v20, -inf  ;;  %v2335_v4 = vmax.f32 %v2333_v14, %v2334_v23 }
 0x2b3   : > { %v2271_v9 = vmax.f32 %v2031_v45, 0.0  ;;  %v2349_v24 = vsel %vm2330_vm5, %v2270_v42, -inf  ;;  %v2345_v35 = vrot.slane %v2344_v34, 2 }
 0x2b4   : > { %v2359_v1 = vsel %vm2330_vm5, %v2273_v6, -inf  ;;  %v2336_v43 = vrot.slane %v2335_v4, 2 }
 0x2b5   : > { %v2360_v25 = vmax.f32 %v2358_v37, %v2359_v1  ;;  %v2350_v26 = vsel %vm2330_vm5, %v2271_v9, -inf  ;;  %v4255_v27 = vpop.f32.mrb[52].mxu0  ;;  %v2346_v51 = vmax.f32 %v2344_v34, %v2345_v35 }
 0x2b6   : > { %v2351_v28 = vmax.f32 %v2349_v24, %v2350_v26  ;;  %v2052_v29 = vadd.f32 %v4255_v27, %v4876_v56  ;;  %v2043_v30 = vpop.f32.mrb[53].mxu0  ;;  %v2337_v55 = vmax.f32 %v2335_v4, %v2336_v43 }
 0x2b7   : > { %v2361_v31 = vrot.slane %v2360_v25, 4  ;;  %v2044_v32 = vadd.f32 %v4876_v56, %v2043_v30  ;;  %v4256_v33 = vpop.f32.mrb[54].mxu0  ;;  %v2347_v7 = vrot.slane %v2346_v51, 1 }
 0x2b8   : > { %v2352_v36 = vrot.slane %v2351_v28, 4  ;;  %v2276_v39 = vmax.f32 %v2052_v29, 0.0  ;;  %v2055_v40 = vadd.f32 %v4256_v33, %v4876_v56  ;;  %v2046_v41 = vpop.f32.mrb[55].mxu0  ;;  %v2338_v13 = vrot.slane %v2337_v55, 1 }
 0x2b9   : > { %v2274_v44 = vmax.f32 %v2044_v32, 0.0  ;;  %v2047_v46 = vadd.f32 %v4876_v56, %v2046_v41  ;;  %v2362_v47 = vmax.f32 %v2360_v25, %v2361_v31  ;;  %v4906_v23 = vmax.f32 %v2346_v51, %v2347_v7 }
 0x2ba   : > { %v2353_v48 = vmax.f32 %v2351_v28, %v2352_v36  ;;  %v2277_v49 = vmax.f32 %v2055_v40, 0.0  ;;  %v2376_v53 = vsel %vm2330_vm5, %v2276_v39, -inf  ;;  %v4910_v9 = vmax.f32 %v2337_v55, %v2338_v13 }
 0x2bb   : > { %v2275_v50 = vmax.f32 %v2047_v46, 0.0  ;;  %v2367_v57 = vsel %vm2330_vm5, %v2274_v44, -inf  ;;  %v2363_v60 = vrot.slane %v2362_v47, 2 }
 0x2bc   : > { %v2354_v52 = vrot.slane %v2353_v48, 2  ;;  %v2377_v54 = vsel %vm2330_vm5, %v2277_v49, -inf }
 0x2bd   : > { %v2378_v58 = vmax.f32 %v2376_v53, %v2377_v54  ;;  %v2368_v59 = vsel %vm2330_vm5, %v2275_v50, -inf  ;;  %v4259_v38 = vpop.f32.mrb[56].mxu0  ;;  %v2364_v17 = vmax.f32 %v2362_v47, %v2363_v60  ;;  %v2652_v50 = vsel %vm2651_vm6, %v4906_v23, %v4910_v9 }
 0x2be   : > { %v2369_v61 = vmax.f32 %v2367_v57, %v2368_v59  ;;  %v2068_v62 = vadd.f32 %v4259_v38, %v4876_v56  ;;  %v2059_v63 = vpop.f32.mrb[57].mxu0  ;;  %v2355_v0 = vmax.f32 %v2353_v48, %v2354_v52 }
 0x2bf   : > { %v2379_v2 = vrot.slane %v2378_v58, 4  ;;  %v2060_v3 = vadd.f32 %v4876_v56, %v2059_v63  ;;  %v4260_v5 = vpop.f32.mrb[58].mxu0  ;;  %v2365_v24 = vrot.slane %v2364_v17, 1 }
 0x2c0   : > { %v2370_v8 = vrot.slane %v2369_v61, 4  ;;  %v2280_v10 = vmax.f32 %v2068_v62, 0.0  ;;  %v2071_v11 = vadd.f32 %v4260_v5, %v4876_v56  ;;  %v2062_v12 = vpop.f32.mrb[59].mxu0  ;;  %v2356_v20 = vrot.slane %v2355_v0, 1 }
 0x2c1   : > { %v2380_v14 = vmax.f32 %v2378_v58, %v2379_v2  ;;  %v2278_v15 = vmax.f32 %v2060_v3, 0.0  ;;  %v2063_v16 = vadd.f32 %v4876_v56, %v2062_v12  ;;  %v4920_v47 = vmax.f32 %v2364_v17, %v2365_v24 }
 0x2c2   : > { %v2371_v18 = vmax.f32 %v2369_v61, %v2370_v8  ;;  %v2281_v19 = vmax.f32 %v2071_v11, 0.0  ;;  %v2394_v45 = vsel %vm2330_vm5, %v2280_v10, -inf  ;;  %v4915_v29 = vmax.f32 %v2355_v0, %v2356_v20 }
 0x2c3   : > { %v2381_v21 = vrot.slane %v2380_v14, 2  ;;  %v2279_v22 = vmax.f32 %v2063_v16, 0.0  ;;  %v2385_v34 = vsel %vm2330_vm5, %v2278_v15, -inf }
 0x2c4   : > { %v2372_v42 = vrot.slane %v2371_v18, 2  ;;  %v2395_v6 = vsel %vm2330_vm5, %v2281_v19, -inf  ;;  %v2654_v54 = vsel %vm2653_vm7, %v4915_v29, %v2652_v50 }
 0x2c5   : > { %v2396_v37 = vmax.f32 %v2394_v45, %v2395_v6  ;;  %v2386_v1 = vsel %vm2330_vm5, %v2279_v22, -inf  ;;  %v4263_v4 = vpop.f32.mrb[60].mxu0  ;;  %v2382_v30 = vmax.f32 %v2380_v14, %v2381_v21  ;;  %v2656_v7 = vsel %vm2655_vm8, %v4920_v47, %v2654_v54 }
 0x2c6   : > { %v2373_v25 = vmax.f32 %v2371_v18, %v2372_v42  ;;  %v2387_v26 = vmax.f32 %v2385_v34, %v2386_v1  ;;  %v2084_v27 = vadd.f32 %v4263_v4, %v4876_v56  ;;  %v2075_v28 = vpop.f32.mrb[61].mxu0 }
 0x2c7   : > { %v2397_v31 = vrot.slane %v2396_v37, 4  ;;  %v2076_v32 = vadd.f32 %v4876_v56, %v2075_v28  ;;  %v4264_v33 = vpop.f32.mrb[62].mxu0  ;;  %v2383_v55 = vrot.slane %v2382_v30, 1 }
 0x2c8   : > { %v2374_v35 = vrot.slane %v2373_v25, 1  ;;  %v2388_v36 = vrot.slane %v2387_v26, 4  ;;  %v2284_v39 = vmax.f32 %v2084_v27, 0.0  ;;  %v2087_v40 = vadd.f32 %v4264_v33, %v4876_v56  ;;  %v2078_v41 = vpop.f32.mrb[63].mxu0 }
 0x2c9   : > { %v2398_v43 = vmax.f32 %v2396_v37, %v2397_v31  ;;  %v2282_v44 = vmax.f32 %v2076_v32, 0.0  ;;  %v2079_v46 = vadd.f32 %v4876_v56, %v2078_v41  ;;  %v4941_v21 = vmax.f32 %v2382_v30, %v2383_v55 }
 0x2ca   : > { %v2389_v48 = vmax.f32 %v2387_v26, %v2388_v36  ;;  %v2285_v49 = vmax.f32 %v2087_v40, 0.0  ;;  %v4925_v51 = vmax.f32 %v2373_v25, %v2374_v35  ;;  %v2412_v58 = vsel %vm2330_vm5, %v2284_v39, -inf }
 0x2cb   : > { %v2399_v52 = vrot.slane %v2398_v43, 2  ;;  %v2283_v53 = vmax.f32 %v2079_v46, 0.0  ;;  %v2403_v38 = vsel %vm2330_vm5, %v2282_v44, -inf }
 0x2cc   : > { %v2390_v57 = vrot.slane %v2389_v48, 2  ;;  %v2413_v59 = vsel %vm2330_vm5, %v2285_v49, -inf  ;;  %v2658_v13 = vsel %vm2657_vm9, %v4925_v51, %v2656_v7 }
 0x2cd   : > { %v2414_v60 = vmax.f32 %v2412_v58, %v2413_v59  ;;  %v2404_v61 = vsel %vm2330_vm5, %v2283_v53, -inf  ;;  %v4267_v62 = vpop.f32.mrb[64].mxu0  ;;  %v2400_v63 = vmax.f32 %v2398_v43, %v2399_v52  ;;  %v2660_v37 = vsel %vm2659_vm10, %v4941_v21, %v2658_v13 }
 0x2ce   : > { %v2391_v0 = vmax.f32 %v2389_v48, %v2390_v57  ;;  %v2405_v2 = vmax.f32 %v2403_v38, %v2404_v61  ;;  %v2100_v3 = vadd.f32 %v4267_v62, %v4876_v56  ;;  %v2091_v5 = vpop.f32.mrb[65].mxu0 }
 0x2cf   : > { %v2415_v8 = vrot.slane %v2414_v60, 4  ;;  %v2092_v10 = vadd.f32 %v4876_v56, %v2091_v5  ;;  %v4268_v11 = vpop.f32.mrb[66].mxu0  ;;  %v2401_v12 = vrot.slane %v2400_v63, 1 }
 0x2d0   : > { %v2406_v14 = vrot.slane %v2405_v2, 4  ;;  %v2288_v15 = vmax.f32 %v2100_v3, 0.0  ;;  %v2103_v16 = vadd.f32 %v4268_v11, %v4876_v56  ;;  %v2094_v17 = vpop.f32.mrb[67].mxu0  ;;  %v2392_v18 = vrot.slane %v2391_v0, 1 }
 0x2d1   : > { %v2286_v19 = vmax.f32 %v2092_v10, 0.0  ;;  %v2095_v20 = vadd.f32 %v4876_v56, %v2094_v17  ;;  %v2416_v45 = vmax.f32 %v2414_v60, %v2415_v8  ;;  %v4945_v34 = vmax.f32 %v2400_v63, %v2401_v12 }
 0x2d2   : > { %v2289_v22 = vmax.f32 %v2103_v16, 0.0  ;;  %v4943_v42 = vmax.f32 %v2391_v0, %v2392_v18  ;;  %v2407_v1 = vmax.f32 %v2405_v2, %v2406_v14  ;;  %v2430_v4 = vsel %vm2330_vm5, %v2288_v15, -inf }
 0x2d3   : > { %v2287_v6 = vmax.f32 %v2095_v20, 0.0  ;;  %v2421_v26 = vsel %vm2330_vm5, %v2286_v19, -inf  ;;  %v2417_v43 = vrot.slane %v2416_v45, 2 }
 0x2d4   : > { %v2431_v24 = vsel %vm2330_vm5, %v2289_v22, -inf  ;;  %v2662_v25 = vsel %vm2661_vm11, %v4943_v42, %v2660_v37  ;;  %v2408_v50 = vrot.slane %v2407_v1, 2 }
 0x2d5   : > { %v2432_v27 = vmax.f32 %v2430_v4, %v2431_v24  ;;  %v2422_v28 = vsel %vm2330_vm5, %v2287_v6, -inf  ;;  %v4271_v30 = vpop.f32.mrb[68].mxu0  ;;  %v4957_v31 = vsel %vm2663_vm12, %v4945_v34, %v2662_v25  ;;  %v2418_v59 = vmax.f32 %v2416_v45, %v2417_v43 }
 0x2d6   : > { %v2423_v32 = vmax.f32 %v2421_v26, %v2422_v28  ;;  %v2116_v33 = vadd.f32 %v4271_v30, %v4876_v56  ;;  %v2107_v35 = vpop.f32.mrb[69].mxu0  ;;  %v2690_v36 = vsel %vm2330_vm5, %v4957_v31, 0.0  ;;  %v2409_v62 = vmax.f32 %v2407_v1, %v2408_v50 }
 0x2d7   : > { %v2433_v39 = vrot.slane %v2432_v27, 4  ;;  %v2108_v40 = vadd.f32 %v4876_v56, %v2107_v35  ;;  %v4272_v41 = vpop.f32.mrb[70].mxu0  ;;  %2691 = vadd.xlane.f32.xlu0 %v2690_v36  ;;  %v2419_v15 = vrot.slane %v2418_v59, 1 }
 0x2d8   : > { %v2424_v44 = vrot.slane %v2423_v32, 4  ;;  %v2292_v46 = vmax.f32 %v2116_v33, 0.0  ;;  %v2119_v48 = vadd.f32 %v4272_v41, %v4876_v56  ;;  %v2110_v49 = vpop.f32.mrb[71].mxu0  ;;  %v2410_v20 = vrot.slane %v2409_v62, 1 }
 0x2d9   : > { %v2290_v52 = vmax.f32 %v2108_v40, 0.0  ;;  %v2111_v53 = vadd.f32 %v4876_v56, %v2110_v49  ;;  %v2434_v54 = vmax.f32 %v2432_v27, %v2433_v39  ;;  %v4973_v27 = vmax.f32 %v2418_v59, %v2419_v15 }
 0x2da   : > { %v2425_v55 = vmax.f32 %v2423_v32, %v2424_v44  ;;  %v2293_v57 = vmax.f32 %v2119_v48, 0.0  ;;  %v2448_v60 = vsel %vm2330_vm5, %v2292_v46, -inf  ;;  %v4977_v33 = vmax.f32 %v2409_v62, %v2410_v20 }
 0x2db   : > { %v2291_v58 = vmax.f32 %v2111_v53, 0.0  ;;  %v2439_v63 = vsel %vm2330_vm5, %v2290_v52, -inf  ;;  %v2435_v5 = vrot.slane %v2434_v54, 2 }
 0x2dc   : > { %v2426_v38 = vrot.slane %v2425_v55, 2  ;;  %v2449_v61 = vsel %vm2330_vm5, %v2293_v57, -inf }
 0x2dd   : > { %v2450_v0 = vmax.f32 %v2448_v60, %v2449_v61  ;;  %v2440_v2 = vsel %vm2330_vm5, %v2291_v58, -inf  ;;  %v4275_v3 = vpop.f32.mrb[72].mxu0  ;;  %v2436_v37 = vmax.f32 %v2434_v54, %v2435_v5 }
 0x2de   : > { %v2441_v7 = vmax.f32 %v2439_v63, %v2440_v2  ;;  %v2132_v8 = vadd.f32 %v4275_v3, %v4876_v56  ;;  %v2123_v10 = vpop.f32.mrb[73].mxu0  ;;  %v2427_v11 = vmax.f32 %v2425_v55, %v2426_v38  ;;  %v2665_v63 = vsel %vm2651_vm6, %v4973_v27, %v4977_v33 }
 0x2df   : > { %v2451_v12 = vrot.slane %v2450_v0, 4  ;;  %v2124_v13 = vadd.f32 %v4876_v56, %v2123_v10  ;;  %v4276_v14 = vpop.f32.mrb[74].mxu0  ;;  %v2437_v41 = vrot.slane %v2436_v37, 1 }
 0x2e0   : > { %v2442_v16 = vrot.slane %v2441_v7, 4  ;;  %v2296_v17 = vmax.f32 %v2132_v8, 0.0  ;;  %v2135_v18 = vadd.f32 %v4276_v14, %v4876_v56  ;;  %v2126_v19 = vpop.f32.mrb[75].mxu0  ;;  %v2428_v24 = vrot.slane %v2427_v11, 1 }
 0x2e1   : > { %v2452_v22 = vmax.f32 %v2450_v0, %v2451_v12  ;;  %v2294_v45 = vmax.f32 %v2124_v13, 0.0  ;;  %v2127_v6 = vadd.f32 %v4876_v56, %v2126_v19  ;;  %v4990_v0 = vmax.f32 %v2436_v37, %v2437_v41 }
 0x2e2   : > { %v2443_v1 = vmax.f32 %v2441_v7, %v2442_v16  ;;  %v2297_v4 = vmax.f32 %v2135_v18, 0.0  ;;  %v2466_v30 = vsel %vm2330_vm5, %v2296_v17, -inf  ;;  %v4982_v49 = vmax.f32 %v2427_v11, %v2428_v24 }
 0x2e3   : > { %v2453_v25 = vrot.slane %v2452_v22, 2  ;;  %v2295_v26 = vmax.f32 %v2127_v6, 0.0  ;;  %v2457_v35 = vsel %vm2330_vm5, %v2294_v45, -inf }
 0x2e4   : > { %v2444_v28 = vrot.slane %v2443_v1, 2  ;;  %v2467_v32 = vsel %vm2330_vm5, %v2297_v4, -inf  ;;  %v2666_v10 = vsel %vm2653_vm7, %v4982_v49, %v2665_v63 }
 0x2e5   : > { %v2468_v36 = vmax.f32 %v2466_v30, %v2467_v32  ;;  %v2458_v39 = vsel %vm2330_vm5, %v2295_v26, -inf  ;;  %v4279_v40 = vpop.f32.mrb[76].mxu0  ;;  %v2454_v50 = vmax.f32 %v2452_v22, %v2453_v25  ;;  %v2667_v37 = vsel %vm2655_vm8, %v4990_v0, %v2666_v10 }
 0x2e6   : > { %v2445_v43 = vmax.f32 %v2443_v1, %v2444_v28  ;;  %v2459_v44 = vmax.f32 %v2457_v35, %v2458_v39  ;;  %v2148_v46 = vadd.f32 %v4279_v40, %v4876_v56  ;;  %v2139_v48 = vpop.f32.mrb[77].mxu0 }
 0x2e7   : > { %v2469_v52 = vrot.slane %v2468_v36, 4  ;;  %v2140_v53 = vadd.f32 %v4876_v56, %v2139_v48  ;;  %v4280_v54 = vpop.f32.mrb[78].mxu0  ;;  %v2455_v11 = vrot.slane %v2454_v50, 1 }
 0x2e8   : > { %v2446_v55 = vrot.slane %v2445_v43, 1  ;;  %v2460_v57 = vrot.slane %v2459_v44, 4  ;;  %v2300_v58 = vmax.f32 %v2148_v46, 0.0  ;;  %v2151_v59 = vadd.f32 %v4280_v54, %v4876_v56  ;;  %v2142_v38 = vpop.f32.mrb[79].mxu0 }
 0x2e9   : > { %v2470_v60 = vmax.f32 %v2468_v36, %v2469_v52  ;;  %v2298_v61 = vmax.f32 %v2140_v53, 0.0  ;;  %v2143_v62 = vadd.f32 %v4876_v56, %v2142_v38  ;;  %v5007_v39 = vmax.f32 %v2454_v50, %v2455_v11 }
 0x2ea   : > { %v2461_v2 = vmax.f32 %v2459_v44, %v2460_v57  ;;  %v2301_v3 = vmax.f32 %v2151_v59, 0.0  ;;  %v4992_v5 = vmax.f32 %v2445_v43, %v2446_v55  ;;  %v2484_v13 = vsel %vm2330_vm5, %v2300_v58, -inf }
 0x2eb   : > { %v2471_v7 = vrot.slane %v2470_v60, 2  ;;  %v2299_v8 = vmax.f32 %v2143_v62, 0.0  ;;  %v2475_v15 = vsel %vm2330_vm5, %v2298_v61, -inf }
 0x2ec   : > { %v2462_v12 = vrot.slane %v2461_v2, 2  ;;  %v2485_v14 = vsel %vm2330_vm5, %v2301_v3, -inf  ;;  %v2668_v26 = vsel %vm2657_vm9, %v4992_v5, %v2667_v37 }
 0x2ed   : > { %v2486_v16 = vmax.f32 %v2484_v13, %v2485_v14  ;;  %v2476_v17 = vsel %vm2330_vm5, %v2299_v8, -inf  ;;  %v4283_v18 = vpop.f32.mrb[80].mxu0  ;;  %v2472_v19 = vmax.f32 %v2470_v60, %v2471_v7  ;;  %v2669_v53 = vsel %vm2659_vm10, %v5007_v39, %v2668_v26 }
 0x2ee   : > { %v2463_v20 = vmax.f32 %v2461_v2, %v2462_v12  ;;  %v2477_v22 = vmax.f32 %v2475_v15, %v2476_v17  ;;  %v2164_v45 = vadd.f32 %v4283_v18, %v4876_v56  ;;  %v2155_v6 = vpop.f32.mrb[81].mxu0 }
 0x2ef   : > { %v2487_v1 = vrot.slane %v2486_v16, 4  ;;  %v2156_v4 = vadd.f32 %v4876_v56, %v2155_v6  ;;  %v4284_v24 = vpop.f32.mrb[82].mxu0  ;;  %v2473_v25 = vrot.slane %v2472_v19, 1 }
 0x2f0   : > { %v2464_v28 = vrot.slane %v2463_v20, 1  ;;  %v2478_v30 = vrot.slane %v2477_v22, 4  ;;  %v2304_v32 = vmax.f32 %v2164_v45, 0.0  ;;  %v2167_v35 = vadd.f32 %v4284_v24, %v4876_v56  ;;  %v2158_v36 = vpop.f32.mrb[83].mxu0 }
 0x2f1   : > { %v2302_v40 = vmax.f32 %v2156_v4, 0.0  ;;  %v2159_v41 = vadd.f32 %v4876_v56, %v2158_v36  ;;  %v2488_v46 = vmax.f32 %v2486_v16, %v2487_v1  ;;  %v5012_v52 = vmax.f32 %v2472_v19, %v2473_v25 }
 0x2f2   : > { %v2305_v43 = vmax.f32 %v2167_v35, 0.0  ;;  %v5010_v44 = vmax.f32 %v2463_v20, %v2464_v28  ;;  %v2479_v54 = vmax.f32 %v2477_v22, %v2478_v30  ;;  %v2502_v55 = vsel %vm2330_vm5, %v2304_v32, -inf }
 0x2f3   : > { %v2303_v48 = vmax.f32 %v2159_v41, 0.0  ;;  %v2493_v58 = vsel %vm2330_vm5, %v2302_v40, -inf  ;;  %v2489_v11 = vrot.slane %v2488_v46, 2 }
 0x2f4   : > { %v2503_v57 = vsel %vm2330_vm5, %v2305_v43, -inf  ;;  %v2670_v50 = vsel %vm2661_vm11, %v5010_v44, %v2669_v53  ;;  %v2480_v16 = vrot.slane %v2479_v54, 2 }
 0x2f5   : > { %v2504_v59 = vmax.f32 %v2502_v55, %v2503_v57  ;;  %v2494_v38 = vsel %vm2330_vm5, %v2303_v48, -inf  ;;  %v4287_v60 = vpop.f32.mrb[84].mxu0  ;;  %v5024_v61 = vsel %vm2663_vm12, %v5012_v52, %v2670_v50  ;;  %v2490_v6 = vmax.f32 %v2488_v46, %v2489_v11 }
 0x2f6   : > { %v2495_v62 = vmax.f32 %v2493_v58, %v2494_v38  ;;  %v2180_v63 = vadd.f32 %v4287_v60, %v4876_v56  ;;  %v2171_v2 = vpop.f32.mrb[85].mxu0  ;;  %v2693_v3 = vsel %vm2330_vm5, %v5024_v61, 0.0  ;;  %v2481_v24 = vmax.f32 %v2479_v54, %v2480_v16 }
 0x2f7   : > { %v2505_v7 = vrot.slane %v2504_v59, 4  ;;  %v2172_v8 = vadd.f32 %v4876_v56, %v2171_v2  ;;  %v4288_v10 = vpop.f32.mrb[86].mxu0  ;;  %2694 = vadd.xlane.f32.xlu0 %v2693_v3  ;;  %v2491_v53 = vrot.slane %v2490_v6, 1 }
 0x2f8   : > { %v2496_v12 = vrot.slane %v2495_v62, 4  ;;  %v2308_v13 = vmax.f32 %v2180_v63, 0.0  ;;  %v2183_v14 = vadd.f32 %v4288_v10, %v4876_v56  ;;  %v2174_v15 = vpop.f32.mrb[87].mxu0  ;;  %v2482_v58 = vrot.slane %v2481_v24, 1 }
 0x2f9   : > { %v2306_v17 = vmax.f32 %v2172_v8, 0.0  ;;  %v2175_v18 = vadd.f32 %v4876_v56, %v2174_v15  ;;  %v2506_v19 = vmax.f32 %v2504_v59, %v2505_v7  ;;  %v5040_v10 = vmax.f32 %v2490_v6, %v2491_v53 }
 0x2fa   : > { %v2497_v20 = vmax.f32 %v2495_v62, %v2496_v12  ;;  %v2309_v22 = vmax.f32 %v2183_v14, 0.0  ;;  %v2520_v1 = vsel %vm2330_vm5, %v2308_v13, -inf  ;;  %v5044_v14 = vmax.f32 %v2481_v24, %v2482_v58 }
 0x2fb   : > { %v2307_v45 = vmax.f32 %v2175_v18, 0.0  ;;  %v2511_v25 = vsel %vm2330_vm5, %v2306_v17, -inf  ;;  %v2507_v32 = vrot.slane %v2506_v19, 2 }
 0x2fc   : > { %v2498_v37 = vrot.slane %v2497_v20, 2  ;;  %v2521_v4 = vsel %vm2330_vm5, %v2309_v22, -inf  ;;  %v2672_v53 = vsel %vm2651_vm6, %v5040_v10, %v5044_v14 }
 0x2fd   : > { %v2522_v26 = vmax.f32 %v2520_v1, %v2521_v4  ;;  %v2512_v28 = vsel %vm2330_vm5, %v2307_v45, -inf  ;;  %v4291_v30 = vpop.f32.mrb[88].mxu0  ;;  %v2508_v62 = vmax.f32 %v2506_v19, %v2507_v32 }
 0x2fe   : > { %v2513_v35 = vmax.f32 %v2511_v25, %v2512_v28  ;;  %v2196_v36 = vadd.f32 %v4291_v30, %v4876_v56  ;;  %v2187_v40 = vpop.f32.mrb[89].mxu0  ;;  %v2499_v41 = vmax.f32 %v2497_v20, %v2498_v37 }
 0x2ff   : > { %v2523_v43 = vrot.slane %v2522_v26, 4  ;;  %v2188_v46 = vadd.f32 %v4876_v56, %v2187_v40  ;;  %v4292_v48 = vpop.f32.mrb[90].mxu0  ;;  %v2509_v19 = vrot.slane %v2508_v62, 1 }
 0x300   : > { %v2514_v55 = vrot.slane %v2513_v35, 4  ;;  %v2312_v57 = vmax.f32 %v2196_v36, 0.0  ;;  %v2199_v54 = vadd.f32 %v4292_v48, %v4876_v56  ;;  %v2190_v50 = vpop.f32.mrb[91].mxu0  ;;  %v2500_v3 = vrot.slane %v2499_v41, 1 }
 0x301   : > { %v2524_v59 = vmax.f32 %v2522_v26, %v2523_v43  ;;  %v2310_v38 = vmax.f32 %v2188_v46, 0.0  ;;  %v2191_v60 = vadd.f32 %v4876_v56, %v2190_v50  ;;  %v5054_v46 = vmax.f32 %v2508_v62, %v2509_v19 }
 0x302   : > { %v2515_v63 = vmax.f32 %v2513_v35, %v2514_v55  ;;  %v2313_v2 = vmax.f32 %v2199_v54, 0.0  ;;  %v2538_v12 = vsel %vm2330_vm5, %v2312_v57, -inf  ;;  %v5049_v37 = vmax.f32 %v2499_v41, %v2500_v3 }
 0x303   : > { %v2525_v7 = vrot.slane %v2524_v59, 2  ;;  %v2311_v8 = vmax.f32 %v2191_v60, 0.0  ;;  %v2529_v15 = vsel %vm2330_vm5, %v2310_v38, -inf }
 0x304   : > { %v2516_v11 = vrot.slane %v2515_v63, 2  ;;  %v2539_v13 = vsel %vm2330_vm5, %v2313_v2, -inf  ;;  %v2673_v50 = vsel %vm2653_vm7, %v5049_v37, %v2672_v53 }
 0x305   : > { %v2540_v16 = vmax.f32 %v2538_v12, %v2539_v13  ;;  %v2530_v17 = vsel %vm2330_vm5, %v2311_v8, -inf  ;;  %v4295_v18 = vpop.f32.mrb[92].mxu0  ;;  %v2526_v1 = vmax.f32 %v2524_v59, %v2525_v7 }
 0x306   : > { %v2517_v20 = vmax.f32 %v2515_v63, %v2516_v11  ;;  %v2531_v22 = vmax.f32 %v2529_v15, %v2530_v17  ;;  %v2212_v45 = vadd.f32 %v4295_v18, %v4876_v56  ;;  %v2203_v6 = vpop.f32.mrb[93].mxu0  ;;  %v2674_v18 = vsel %vm2655_vm8, %v5054_v46, %v2673_v50 }
 0x307   : > { %v2541_v4 = vrot.slane %v2540_v16, 4  ;;  %v2204_v25 = vadd.f32 %v4876_v56, %v2203_v6  ;;  %v4296_v24 = vpop.f32.mrb[94].mxu0  ;;  %v2527_v55 = vrot.slane %v2526_v1, 1 }
 0x308   : > { %v2518_v26 = vrot.slane %v2517_v20, 1  ;;  %v2532_v28 = vrot.slane %v2531_v22, 4  ;;  %v2316_v30 = vmax.f32 %v2212_v45, 0.0  ;;  %v2215_v32 = vadd.f32 %v4296_v24, %v4876_v56  ;;  %v2206_v35 = vpop.f32.mrb[95].mxu0 }
 0x309   : > { %v2542_v36 = vmax.f32 %v2540_v16, %v2541_v4  ;;  %v2314_v40 = vmax.f32 %v2204_v25, 0.0  ;;  %v2207_v43 = vadd.f32 %v4876_v56, %v2206_v35  ;;  %v5075_v24 = vmax.f32 %v2526_v1, %v2527_v55 }
 0x30a   : > { %v2533_v48 = vmax.f32 %v2531_v22, %v2532_v28  ;;  %v2317_v41 = vmax.f32 %v2215_v32, 0.0  ;;  %v5061_v58 = vmax.f32 %v2517_v20, %v2518_v26  ;;  %v2556_v38 = vsel %vm2330_vm5, %v2316_v30, -inf }
 0x30b   : > { %v2543_v57 = vrot.slane %v2542_v36, 2  ;;  %v2315_v54 = vmax.f32 %v2207_v43, 0.0  ;;  %v2547_v62 = vsel %vm2330_vm5, %v2314_v40, -inf }
 0x30c   : > { %v2534_v59 = vrot.slane %v2533_v48, 2  ;;  %v2557_v60 = vsel %vm2330_vm5, %v2317_v41, -inf  ;;  %v2675_v6 = vsel %vm2657_vm9, %v5061_v58, %v2674_v18 }
 0x30d   : > { %v2558_v63 = vmax.f32 %v2556_v38, %v2557_v60  ;;  %v2548_v2 = vsel %vm2330_vm5, %v2315_v54, -inf  ;;  %v4299_v3 = vpop.f32.mrb[96].mxu0  ;;  %v2544_v7 = vmax.f32 %v2542_v36, %v2543_v57  ;;  %v2676_v40 = vsel %vm2659_vm10, %v5075_v24, %v2675_v6 }
 0x30e   : > { %v2535_v8 = vmax.f32 %v2533_v48, %v2534_v59  ;;  %v2549_v11 = vmax.f32 %v2547_v62, %v2548_v2  ;;  %v2228_v12 = vadd.f32 %v4299_v3, %v4876_v56  ;;  %v2219_v13 = vpop.f32.mrb[97].mxu0 }
 0x30f   : > { %v2220_v15 = vadd.f32 %v4876_v56, %v2219_v13  ;;  %v4300_v16 = vpop.f32.mrb[98].mxu0  ;;  %v2545_v17 = vrot.slane %v2544_v7, 1  ;;  %v2559_v26 = vrot.slane %v2558_v63, 4 }
 0x310   : > { %v2320_v19 = vmax.f32 %v2228_v12, 0.0  ;;  %v2231_v20 = vadd.f32 %v4300_v16, %v4876_v56  ;;  %v2222_v22 = vpop.f32.mrb[99].mxu0  ;;  %v2536_v45 = vrot.slane %v2535_v8, 1  ;;  %v2550_v32 = vrot.slane %v2549_v11, 4 }
 0x311   : > { %v2318_v4 = vmax.f32 %v2220_v15, 0.0  ;;  %v2223_v25 = vadd.f32 %v4876_v56, %v2222_v22  ;;  %v5079_v36 = vmax.f32 %v2544_v7, %v2545_v17  ;;  %v2560_v50 = vmax.f32 %v2558_v63, %v2559_v26 }
 0x312   : > { %v2321_v28 = vmax.f32 %v2231_v20, 0.0  ;;  %v5077_v30 = vmax.f32 %v2535_v8, %v2536_v45  ;;  %v2574_v43 = vsel %vm2330_vm5, %v2320_v19, -inf  ;;  %v2551_v2 = vmax.f32 %v2549_v11, %v2550_v32 }
 0x313   : > { %v2319_v35 = vmax.f32 %v2223_v25, 0.0  ;;  %v2565_v1 = vsel %vm2330_vm5, %v2318_v4, -inf  ;;  %v2561_v18 = vrot.slane %v2560_v50, 2 }
 0x314   : > { %v2575_v48 = vsel %vm2330_vm5, %v2321_v28, -inf  ;;  %v2677_v41 = vsel %vm2661_vm11, %v5077_v30, %v2676_v40  ;;  %v2552_v22 = vrot.slane %v2551_v2, 2 }
 0x315   : > { %v2576_v53 = vmax.f32 %v2574_v43, %v2575_v48  ;;  %v2566_v55 = vsel %vm2330_vm5, %v2319_v35, -inf  ;;  %v4303_v57 = vpop.f32.mrb[100].mxu0  ;;  %v5091_v54 = vsel %vm2663_vm12, %v5079_v36, %v2677_v41  ;;  %v2562_v40 = vmax.f32 %v2560_v50, %v2561_v18 }
 0x316   : > { %v2567_v59 = vmax.f32 %v2565_v1, %v2566_v55  ;;  %v2244_v38 = vadd.f32 %v4303_v57, %v4876_v56  ;;  %v2235_v60 = vpop.f32.mrb[101].mxu0  ;;  %v2696_v62 = vsel %vm2330_vm5, %v5091_v54, 0.0  ;;  %v2553_v1 = vmax.f32 %v2551_v2, %v2552_v22 }
 0x317   : > { %v2577_v3 = vrot.slane %v2576_v53, 4  ;;  %v2236_v7 = vadd.f32 %v4876_v56, %v2235_v60  ;;  %v4304_v8 = vpop.f32.mrb[102].mxu0  ;;  %2697 = vadd.xlane.f32.xlu1 %v2696_v62 }
 0x318   : > { %v2568_v12 = vrot.slane %v2567_v59, 4  ;;  %v2324_v13 = vmax.f32 %v2244_v38, 0.0  ;;  %v2247_v15 = vadd.f32 %v4304_v8, %v4876_v56  ;;  %v2238_v16 = vpop.f32.mrb[103].mxu0 }
 0x319   : > { %v2322_v17 = vmax.f32 %v2236_v7, 0.0  ;;  %v2239_v63 = vadd.f32 %v4876_v56, %v2238_v16  ;;  %v2578_v45 = vmax.f32 %v2576_v53, %v2577_v3  ;;  %v2563_v16 = vrot.slane %v2562_v40, 1 }
 0x31a   : > { %v2569_v19 = vmax.f32 %v2567_v59, %v2568_v12  ;;  %v2325_v20 = vmax.f32 %v2247_v15, 0.0  ;;  %v2592_v4 = vsel %vm2330_vm5, %v2324_v13, -inf }
 0x31b   : > { %v2323_v6 = vmax.f32 %v2239_v63, 0.0  ;;  %v2583_v26 = vsel %vm2330_vm5, %v2322_v17, -inf  ;;  %v2579_v55 = vrot.slane %v2578_v45, 2  ;;  %v2554_v17 = vrot.slane %v2553_v1, 1 }
 0x31c   : > { %v2570_v11 = vrot.slane %v2569_v19, 2  ;;  %v2593_v25 = vsel %vm2330_vm5, %v2325_v20, -inf }
 0x31d   : > { %v2594_v28 = vmax.f32 %v2592_v4, %v2593_v25  ;;  %v2584_v32 = vsel %vm2330_vm5, %v2323_v6, -inf  ;;  %v4307_v35 = vpop.f32.mrb[104].mxu0  ;;  %v2580_v2 = vmax.f32 %v2578_v45, %v2579_v55 }
 0x31e   : > { %v2585_v43 = vmax.f32 %v2583_v26, %v2584_v32  ;;  %v2260_v48 = vadd.f32 %v4307_v35, %v4876_v56  ;;  %v2251_v41 = vpop.f32.mrb[105].mxu0  ;;  %v2571_v38 = vmax.f32 %v2569_v19, %v2570_v11  ;;  %v5113_v32 = vmax.f32 %v2553_v1, %v2554_v17 }
 0x31f   : > { %v2595_v53 = vrot.slane %v2594_v28, 4  ;;  %v2252_v57 = vadd.f32 %v4876_v56, %v2251_v41  ;;  %v4308_v59 = vpop.f32.mrb[106].mxu0  ;;  %v2581_v41 = vrot.slane %v2580_v2, 1 }
 0x320   : > { %v2586_v60 = vrot.slane %v2585_v43, 4  ;;  %v2328_v62 = vmax.f32 %v2260_v48, 0.0  ;;  %v2263_v3 = vadd.f32 %v4308_v59, %v4876_v56  ;;  %v2254_v7 = vpop.f32.mrb[107].mxu0  ;;  %v2572_v18 = vrot.slane %v2571_v38, 1 }
 0x321   : > { %v2596_v8 = vmax.f32 %v2594_v28, %v2595_v53  ;;  %v2326_v12 = vmax.f32 %v2252_v57, 0.0  ;;  %v2255_v50 = vadd.f32 %v4876_v56, %v2254_v7  ;;  %v5111_v28 = vmax.f32 %v2562_v40, %v2563_v16 }
 0x322   : > { %v2587_v13 = vmax.f32 %v2585_v43, %v2586_v60  ;;  %v2329_v15 = vmax.f32 %v2263_v3, 0.0  ;;  %v2610_v22 = vsel %vm2330_vm5, %v2328_v62, -inf  ;;  %v5115_v35 = vmax.f32 %v2571_v38, %v2572_v18 }
 0x323   : > { %v2327_v63 = vmax.f32 %v2255_v50, 0.0  ;;  %v2597_v6 = vrot.slane %v2596_v8, 2  ;;  %v2601_v11 = vsel %vm2330_vm5, %v2326_v12, -inf  ;;  %v2679_v59 = vsel %vm2651_vm6, %v5111_v28, %v5113_v32 }
 0x324   : > { %v2588_v20 = vrot.slane %v2587_v13, 2  ;;  %v2611_v19 = vsel %vm2330_vm5, %v2329_v15, -inf  ;;  %v2680_v1 = vsel %vm2653_vm7, %v5115_v35, %v2679_v59  ;;  %v5124_v3 = vmax.f32 %v2580_v2, %v2581_v41 }
 0x325   : > { %v2612_v4 = vmax.f32 %v2610_v22, %v2611_v19  ;;  %v2602_v25 = vsel %vm2330_vm5, %v2327_v63, -inf  ;;  %v2598_v55 = vmax.f32 %v2596_v8, %v2597_v6 }
 0x326   : > { %v2589_v26 = vmax.f32 %v2587_v13, %v2588_v20  ;;  %v2603_v56 = vmax.f32 %v2601_v11, %v2602_v25  ;;  %v2681_v8 = vsel %vm2655_vm8, %v5124_v3, %v2680_v1 }
 0x327   : > { %v2613_v45 = vrot.slane %v2612_v4, 4  ;;  %v2599_v38 = vrot.slane %v2598_v55, 1 }
 0x328   : > { %v2590_v43 = vrot.slane %v2589_v26, 1  ;;  %v2604_v48 = vrot.slane %v2603_v56, 4 }
 0x329   : > { %v2614_v53 = vmax.f32 %v2612_v4, %v2613_v45  ;;  %v5130_v16 = vmax.f32 %v2598_v55, %v2599_v38 }
 0x32a   : > { %v2605_v57 = vmax.f32 %v2603_v56, %v2604_v48  ;;  %v5120_v62 = vmax.f32 %v2589_v26, %v2590_v43 }
 0x32b   : > { %v2615_v60 = vrot.slane %v2614_v53, 2 }
 0x32c   : > { %v2606_v40 = vrot.slane %v2605_v57, 2  ;;  %v2682_v15 = vsel %vm2657_vm9, %v5120_v62, %v2681_v8 }
 0x32d   : > { %v2616_v7 = vmax.f32 %v2614_v53, %v2615_v60  ;;  %v2683_v2 = vsel %vm2659_vm10, %v5130_v16, %v2682_v15 }
 0x32e   : > { %v2607_v12 = vmax.f32 %v2605_v57, %v2606_v40 }
 0x32f   : > { %v2617_v50 = vrot.slane %v2616_v7, 1 }
 0x330   : > { %v2608_v13 = vrot.slane %v2607_v12, 1 }
 0x331   : > { %v5134_v63 = vmax.f32 %v2616_v7, %v2617_v50 }
 0x332   : > { %v5132_v17 = vmax.f32 %v2607_v12, %v2608_v13 }
 0x334   : > { %v2684_v18 = vsel %vm2661_vm11, %v5132_v17, %v2683_v2 }
 0x335   : > { %v5142_v20 = vsel %vm2663_vm12, %v5134_v63, %v2684_v18 }
 0x336   : > { %v2699_v22 = vsel %vm2330_vm5, %v5142_v20, 0.0 }
 0x337   : > { %2700 = vadd.xlane.f32.xlu1 %v2699_v22 }
 0x364   : > { %v2692_v19 = vpop.xlane.xlu0 %2691 }
 0x365   : > { %v2703_v6 = vmul.f32 0.015625, %v2692_v19 }
 0x367   : > { %v2711_v11 = vrot.slane %v2703_v6, 1  ;;  %v2712_v4 = vrot.slane %v2703_v6, 2  ;;  %v2713_v25 = vrot.slane %v2703_v6, 3  ;;  %v2714_v26 = vrot.slane %v2703_v6, 4 }
 0x368   : > { %v2715_v56 = vrot.slane %v2703_v6, 5  ;;  %v2716_v45 = vrot.slane %v2703_v6, 6  ;;  %v2717_v43 = vrot.slane %v2703_v6, 7  ;;  %v5147_v48 = vsub.f32 %v4910_v9, %v2703_v6 }
 0x369   : > { %v5150_v41 = vsub.f32 %v4906_v23, %v2711_v11  ;;  %v5153_v55 = vsub.f32 %v4915_v29, %v2712_v4  ;;  %v5156_v53 = vsub.f32 %v4920_v47, %v2713_v25  ;;  %v5159_v57 = vsub.f32 %v4925_v51, %v2714_v26 }
 0x36a   : > { %v5162_v59 = vsub.f32 %v4941_v21, %v2715_v56  ;;  %v5165_v60 = vsub.f32 %v4943_v42, %v2716_v45  ;;  %v5168_v9 = vsub.f32 %v4945_v34, %v2717_v43  ;;  %v2803_v21 = vmul.f32 %v5147_v48, %v5147_v48 }
 0x36b   : > { %v2804_v23 = vmul.f32 %v5150_v41, %v5150_v41  ;;  %v2805_v29 = vmul.f32 %v5153_v55, %v5153_v55  ;;  %v2806_v47 = vmul.f32 %v5156_v53, %v5156_v53  ;;  %v2807_v51 = vmul.f32 %v5159_v57, %v5159_v57 }
 0x36c   : > { %v2808_v42 = vmul.f32 %v5162_v59, %v5162_v59  ;;  %v2809_v1 = vmul.f32 %v5165_v60, %v5165_v60  ;;  %v2810_v38 = vmul.f32 %v5168_v9, %v5168_v9 }
 0x36d   : > { %v2867_v34 = vrot.slane %v2804_v23, 7  ;;  %v2869_v40 = vrot.slane %v2805_v29, 6  ;;  %v2871_v12 = vrot.slane %v2806_v47, 5  ;;  %v2873_v8 = vrot.slane %v2807_v51, 4 }
 0x36e   : > { %v2875_v15 = vrot.slane %v2808_v42, 3  ;;  %v2877_v18 = vrot.slane %v2809_v1, 2  ;;  %v2879_v19 = vrot.slane %v2810_v38, 1  ;;  %v4398_v38 = vld [vmem:[%s5595_s9] sm:$0xff]  }
 0x36f   : > { %v2868_v7 = vsel %vm2651_vm6, %v2867_v34, %v2803_v21  ;;  %4309 = vmatprep.subr.bf16.mxu1 %v4398_v38 }
 0x370   : > { %v2870_v50 = vsel %vm2653_vm7, %v2869_v40, %v2868_v7  ;;  %4310 = vmatpush3.bf16.msra.mxu1 %v4398_v38 }
 0x371   : > { %v2872_v13 = vsel %vm2655_vm8, %v2871_v12, %v2870_v50 }
 0x372   : > { %v2874_v2 = vsel %vm2657_vm9, %v2873_v8, %v2872_v13 }
 0x373   : > { %v2876_v22 = vsel %vm2659_vm10, %v2875_v15, %v2874_v2 }
 0x374   : > { %v2878_v6 = vsel %vm2661_vm11, %v2877_v18, %v2876_v22 }
 0x375   : > { %v2880_v11 = vsel %vm2663_vm12, %v2879_v19, %v2878_v6 }
 0x376   : > { %v2927_v4 = vsel %vm2330_vm5, %v2880_v11, 0.0 }
 0x377   : > { %2928 = vadd.xlane.f32.xlu0 %v2927_v4 }
 0x384   : > { %v2695_v25 = vpop.xlane.xlu0 %2694 }
 0x385   : > { %v2704_v26 = vmul.f32 0.015625, %v2695_v25 }
 0x387   : > { %v2718_v56 = vrot.slane %v2704_v26, 1  ;;  %v2719_v45 = vrot.slane %v2704_v26, 2  ;;  %v2720_v43 = vrot.slane %v2704_v26, 3  ;;  %v2721_v23 = vrot.slane %v2704_v26, 4 }
 0x388   : > { %v2722_v29 = vrot.slane %v2704_v26, 5  ;;  %v2723_v47 = vrot.slane %v2704_v26, 6  ;;  %v2724_v51 = vrot.slane %v2704_v26, 7  ;;  %v5195_v21 = vsub.f32 %v4977_v33, %v2704_v26 }
 0x389   : > { %v5198_v42 = vsub.f32 %v4973_v27, %v2718_v56  ;;  %v5201_v34 = vsub.f32 %v4982_v49, %v2719_v45  ;;  %v5204_v40 = vsub.f32 %v4990_v0, %v2720_v43  ;;  %v5207_v1 = vsub.f32 %v4992_v5, %v2721_v23 }
 0x38a   : > { %v5213_v7 = vsub.f32 %v5007_v39, %v2722_v29  ;;  %v5216_v33 = vsub.f32 %v5010_v44, %v2723_v47  ;;  %v5219_v27 = vsub.f32 %v5012_v52, %v2724_v51  ;;  %v2811_v44 = vmul.f32 %v5195_v21, %v5195_v21 }
 0x38b   : > { %v2812_v49 = vmul.f32 %v5198_v42, %v5198_v42  ;;  %v2813_v0 = vmul.f32 %v5201_v34, %v5201_v34  ;;  %v2814_v5 = vmul.f32 %v5204_v40, %v5204_v40  ;;  %v2815_v39 = vmul.f32 %v5207_v1, %v5207_v1 }
 0x38c   : > { %v2816_v52 = vmul.f32 %v5213_v7, %v5213_v7  ;;  %v2817_v8 = vmul.f32 %v5216_v33, %v5216_v33  ;;  %v2818_v13 = vmul.f32 %v5219_v27, %v5219_v27 }
 0x38d   : > { %v2881_v12 = vrot.slane %v2812_v49, 7  ;;  %v2883_v50 = vrot.slane %v2813_v0, 6  ;;  %v2885_v2 = vrot.slane %v2814_v5, 5  ;;  %v2887_v22 = vrot.slane %v2815_v39, 4 }
 0x38e   : > { %v2889_v6 = vrot.slane %v2816_v52, 3  ;;  %v2891_v4 = vrot.slane %v2817_v8, 2  ;;  %v2893_v26 = vrot.slane %v2818_v13, 1  ;;  %v4399_v13 = vld [vmem:[%s5595_s9 + $0x8] sm:$0xff]  }
 0x38f   : > { %v2882_v15 = vsel %vm2651_vm6, %v2881_v12, %v2811_v44  ;;  %4311 = vmatprep.subr.bf16.mxu1 %v4399_v13 }
 0x390   : > { %v2884_v18 = vsel %vm2653_vm7, %v2883_v50, %v2882_v15  ;;  %4312 = vmatpush3.bf16.msra.mxu1 %v4399_v13 }
 0x391   : > { %v2886_v19 = vsel %vm2655_vm8, %v2885_v2, %v2884_v18 }
 0x392   : > { %v2888_v11 = vsel %vm2657_vm9, %v2887_v22, %v2886_v19 }
 0x393   : > { %v2890_v25 = vsel %vm2659_vm10, %v2889_v6, %v2888_v11 }
 0x394   : > { %v2892_v56 = vsel %vm2661_vm11, %v2891_v4, %v2890_v25 }
 0x395   : > { %v2894_v45 = vsel %vm2663_vm12, %v2893_v26, %v2892_v56 }
 0x396   : > { %v2930_v43 = vsel %vm2330_vm5, %v2894_v45, 0.0 }
 0x397   : > { %2931 = vadd.xlane.f32.xlu1 %v2930_v43 }
 0x3a4   : > { %v2698_v23 = vpop.xlane.xlu1 %2697 }
 0x3a5   : > { %v2705_v29 = vmul.f32 0.015625, %v2698_v23 }
 0x3a7   : > { %v2725_v47 = vrot.slane %v2705_v29, 1  ;;  %v2726_v51 = vrot.slane %v2705_v29, 2  ;;  %v2727_v38 = vrot.slane %v2705_v29, 3  ;;  %v2728_v49 = vrot.slane %v2705_v29, 4 }
 0x3a8   : > { %v2729_v0 = vrot.slane %v2705_v29, 5  ;;  %v2730_v5 = vrot.slane %v2705_v29, 6  ;;  %v2731_v39 = vrot.slane %v2705_v29, 7  ;;  %v5246_v44 = vsub.f32 %v5044_v14, %v2705_v29 }
 0x3a9   : > { %v5249_v52 = vsub.f32 %v5040_v10, %v2725_v47  ;;  %v5252_v12 = vsub.f32 %v5049_v37, %v2726_v51  ;;  %v5255_v50 = vsub.f32 %v5054_v46, %v2727_v38  ;;  %v5258_v8 = vsub.f32 %v5061_v58, %v2728_v49 }
 0x3aa   : > { %v5264_v15 = vsub.f32 %v5075_v24, %v2729_v0  ;;  %v5267_v14 = vsub.f32 %v5077_v30, %v2730_v5  ;;  %v5270_v10 = vsub.f32 %v5079_v36, %v2731_v39  ;;  %v2819_v30 = vmul.f32 %v5246_v44, %v5246_v44 }
 0x3ab   : > { %v2820_v37 = vmul.f32 %v5249_v52, %v5249_v52  ;;  %v2821_v46 = vmul.f32 %v5252_v12, %v5252_v12  ;;  %v2822_v58 = vmul.f32 %v5255_v50, %v5255_v50  ;;  %v2823_v24 = vmul.f32 %v5258_v8, %v5258_v8 }
 0x3ac   : > { %v2824_v36 = vmul.f32 %v5264_v15, %v5264_v15  ;;  %v2825_v22 = vmul.f32 %v5267_v14, %v5267_v14  ;;  %v2826_v19 = vmul.f32 %v5270_v10, %v5270_v10 }
 0x3ad   : > { %v2895_v2 = vrot.slane %v2820_v37, 7  ;;  %v2897_v18 = vrot.slane %v2821_v46, 6  ;;  %v2899_v11 = vrot.slane %v2822_v58, 5  ;;  %v2901_v25 = vrot.slane %v2823_v24, 4 }
 0x3ae   : > { %v2903_v56 = vrot.slane %v2824_v36, 3  ;;  %v2905_v43 = vrot.slane %v2825_v22, 2  ;;  %v2907_v29 = vrot.slane %v2826_v19, 1  ;;  %v4400_v19 = vld [vmem:[%s5595_s9 + $0x10] sm:$0xff]  }
 0x3af   : > { %v2896_v6 = vsel %vm2651_vm6, %v2895_v2, %v2819_v30  ;;  %4313 = vmatprep.subr.bf16.mxu1 %v4400_v19 }
 0x3b0   : > { %v2898_v4 = vsel %vm2653_vm7, %v2897_v18, %v2896_v6  ;;  %4314 = vmatpush3.bf16.msra.mxu1 %v4400_v19 }
 0x3b1   : > { %v2900_v26 = vsel %vm2655_vm8, %v2899_v11, %v2898_v4 }
 0x3b2   : > { %v2902_v45 = vsel %vm2657_vm9, %v2901_v25, %v2900_v26 }
 0x3b3   : > { %v2904_v23 = vsel %vm2659_vm10, %v2903_v56, %v2902_v45 }
 0x3b4   : > { %v2906_v47 = vsel %vm2661_vm11, %v2905_v43, %v2904_v23 }
 0x3b5   : > { %v2908_v51 = vsel %vm2663_vm12, %v2907_v29, %v2906_v47 }
 0x3b6   : > { %v2933_v38 = vsel %vm2330_vm5, %v2908_v51, 0.0 }
 0x3b7   : > { %2934 = vadd.xlane.f32.xlu0 %v2933_v38 }
 0x3c4   : > { %v2701_v49 = vpop.xlane.xlu1 %2700 }
 0x3c5   : > { %v2706_v0 = vmul.f32 0.015625, %v2701_v49 }
 0x3c7   : > { %v2732_v5 = vrot.slane %v2706_v0, 1  ;;  %v2733_v39 = vrot.slane %v2706_v0, 2  ;;  %v2734_v13 = vrot.slane %v2706_v0, 3  ;;  %v2735_v37 = vrot.slane %v2706_v0, 4 }
 0x3c8   : > { %v2736_v46 = vrot.slane %v2706_v0, 5  ;;  %v2737_v58 = vrot.slane %v2706_v0, 6  ;;  %v2738_v24 = vrot.slane %v2706_v0, 7  ;;  %v5297_v30 = vsub.f32 %v5113_v32, %v2706_v0 }
 0x3c9   : > { %v5300_v36 = vsub.f32 %v5111_v28, %v2732_v5  ;;  %v5303_v2 = vsub.f32 %v5115_v35, %v2733_v39  ;;  %v5306_v18 = vsub.f32 %v5124_v3, %v2734_v13  ;;  %v5309_v22 = vsub.f32 %v5120_v62, %v2735_v37  ;;  %v4401_v37 = vld [vmem:[%s5595_s9 + $0x18] sm:$0xff]  }
 0x3ca   : > { %v5315_v6 = vsub.f32 %v5130_v16, %v2736_v46  ;;  %v5318_v32 = vsub.f32 %v5132_v17, %v2737_v58  ;;  %v5321_v28 = vsub.f32 %v5134_v63, %v2738_v24  ;;  %v2827_v17 = vmul.f32 %v5297_v30, %v5297_v30  ;;  %v5353_v46 = vld [vmem:[%s5597_s11] sm:$0xff]   ;;  %4315 = vmatprep.subr.bf16.mxu1 %v4401_v37 }
 0x3cb   : > { %v2828_v35 = vmul.f32 %v5300_v36, %v5300_v36  ;;  %v2829_v62 = vmul.f32 %v5303_v2, %v5303_v2  ;;  %v2830_v3 = vmul.f32 %v5306_v18, %v5306_v18  ;;  %v2831_v16 = vmul.f32 %v5309_v22, %v5309_v22  ;;  %4316 = vmatpush3.bf16.msra.mxu1 %v4401_v37 }
 0x3cc   : > { %v2832_v63 = vmul.f32 %v5315_v6, %v5315_v6  ;;  %v2833_v25 = vmul.f32 %v5318_v32, %v5318_v32  ;;  %v2834_v26 = vmul.f32 %v5321_v28, %v5321_v28  ;;  %4321 = vmatprep.subr.bf16.mxu1 %v5353_v46 }
 0x3cd   : > { %v2909_v11 = vrot.slane %v2828_v35, 7  ;;  %v2911_v4 = vrot.slane %v2829_v62, 6  ;;  %v2913_v45 = vrot.slane %v2830_v3, 5  ;;  %v2915_v23 = vrot.slane %v2831_v16, 4 }
 0x3ce   : > { %v2917_v47 = vrot.slane %v2832_v63, 3  ;;  %v2919_v38 = vrot.slane %v2833_v25, 2  ;;  %v2921_v0 = vrot.slane %v2834_v26, 1  ;;  %v5368_v26 = vld [vmem:[%s5594_s8] ss:$0 sm:$0xff] }
 0x3cf   : > { %v2910_v56 = vsel %vm2651_vm6, %v2909_v11, %v2827_v17  ;;  %v5360_v17 = vld [vmem:[%s5593_s7] ss:$0 sm:$0xff] }
 0x3d0   : > { %v2912_v43 = vsel %vm2653_vm7, %v2911_v4, %v2910_v56 }
 0x3d1   : > { %v2914_v29 = vsel %vm2655_vm8, %v2913_v45, %v2912_v43 }
 0x3d2   : > { %v2916_v51 = vsel %vm2657_vm9, %v2915_v23, %v2914_v29 }
 0x3d3   : > { %v2918_v49 = vsel %vm2659_vm10, %v2917_v47, %v2916_v51 }
 0x3d4   : > { %v2920_v5 = vsel %vm2661_vm11, %v2919_v38, %v2918_v49 }
 0x3d5   : > { %v2922_v39 = vsel %vm2663_vm12, %v2921_v0, %v2920_v5 }
 0x3d6   : > { %v2936_v13 = vsel %vm2330_vm5, %v2922_v39, 0.0 }
 0x3d7   : > { %2937 = vadd.xlane.f32.xlu1 %v2936_v13 }
 0x404   : > { %v2929_v58 = vpop.xlane.xlu0 %2928 }
 0x405   : > { %v2939_v24 = vmul.f32 0.015625, %v2929_v58 }
 0x407   : > { %v2943_v19 = vadd.f32 1e-05, %v2939_v24 }
 0x409   : > { %4410 = vrsqrt.f32 %v2943_v19 }
 0x413   : > { %v4411_v35 = vpop.eup %4410 }
 0x414   : > { %v2955_v62 = vrot.slane %v4411_v35, 1  ;;  %v2956_v3 = vrot.slane %v4411_v35, 2  ;;  %v2957_v11 = vrot.slane %v4411_v35, 3  ;;  %v3015_v25 = vmul.f32 %v4411_v35, %v5147_v48 }
 0x415   : > { %v2958_v43 = vrot.slane %v4411_v35, 4  ;;  %v2959_v23 = vrot.slane %v4411_v35, 5  ;;  %v2960_v51 = vrot.slane %v4411_v35, 6  ;;  %v2961_v58 = vrot.slane %v4411_v35, 7 }
 0x416   : > { %v3016_v16 = vmul.f32 %v2955_v62, %v5150_v41  ;;  %v3017_v63 = vmul.f32 %v2956_v3, %v5153_v55  ;;  %v3018_v41 = vmul.f32 %v2957_v11, %v5156_v53  ;;  %v3053_v55 = vmul.f32 %v5360_v17, %v3015_v25 }
 0x417   : > { %v3019_v38 = vmul.f32 %v2958_v43, %v5159_v57  ;;  %v3020_v49 = vmul.f32 %v2959_v23, %v5162_v59  ;;  %v3021_v24 = vmul.f32 %v2960_v51, %v5165_v60  ;;  %v3022_v11 = vmul.f32 %v2961_v58, %v5168_v9 }
 0x418   : > { %v3054_v4 = vmul.f32 %v5360_v17, %v3016_v16  ;;  %v3055_v56 = vmul.f32 %v5360_v17, %v3017_v63  ;;  %v3056_v47 = vmul.f32 %v5360_v17, %v3018_v41  ;;  %v3091_v0 = vadd.f32 %v5368_v26, %v3053_v55 }
 0x419   : > { %v3057_v62 = vmul.f32 %v5360_v17, %v3019_v38  ;;  %v3058_v3 = vmul.f32 %v5360_v17, %v3020_v49  ;;  %v3060_v43 = vmul.f32 %v5360_v17, %v3022_v11 }
 0x41a   : > { %v3092_v45 = vadd.f32 %v5368_v26, %v3054_v4  ;;  %v3093_v29 = vadd.f32 %v5368_v26, %v3055_v56  ;;  %v3094_v13 = vadd.f32 %v5368_v26, %v3056_v47  ;;  %v3123_v16 = vpack.c.bf16 %v3091_v0, %v3091_v0 }
 0x41b   : > { %v3059_v4 = vmul.f32 %v5360_v17, %v3021_v24  ;;  %v3095_v25 = vadd.f32 %v5368_v26, %v3057_v62  ;;  %v3096_v35 = vadd.f32 %v5368_v26, %v3058_v3 }
 0x41c   : > { %v3124_v48 = vpack.c.bf16 %v3092_v45, %v3092_v45  ;;  %v3125_v53 = vpack.c.bf16 %v3093_v29, %v3093_v29  ;;  %v3126_v59 = vpack.c.bf16 %v3094_v13, %v3094_v13  ;;  %v3193_v56 = vunpack.c.l.b16 %v3123_v16 }
 0x41d   : > { %v3097_v23 = vadd.f32 %v5368_v26, %v3059_v4  ;;  %v3127_v55 = vpack.c.bf16 %v3095_v25, %v3095_v25  ;;  %v3128_v29 = vpack.c.bf16 %v3096_v35, %v3096_v35 }
 0x41e   : > { %v3194_v37 = vunpack.c.l.b16 %v3124_v48  ;;  %v3195_v57 = vunpack.c.l.b16 %v3125_v53  ;;  %v3196_v41 = vunpack.c.l.b16 %v3126_v59  ;;  %v3098_v48 = vadd.f32 %v5368_v26, %v3060_v43 }
 0x41f   : > { %v3129_v38 = vpack.c.bf16 %v3097_v23, %v3097_v23  ;;  %v3197_v49 = vunpack.c.l.b16 %v3127_v55  ;;  %v3198_v0 = vunpack.c.l.b16 %v3128_v29 }
 0x420   : > { %v3225_v63 = vrot.slane %v3194_v37, 7  ;;  %v3227_v60 = vrot.slane %v3195_v57, 6  ;;  %v3229_v9 = vrot.slane %v3196_v41, 5 }
 0x422   : > { %v3226_v45 = vsel %vm2651_vm6, %v3225_v63, %v3193_v56 }
 0x423   : > { %v3228_v47 = vsel %vm2653_vm7, %v3227_v60, %v3226_v45 }
 0x424   : > { %v2932_v5 = vpop.xlane.xlu1 %2931 }
 0x425   : > { %v2940_v39 = vmul.f32 0.015625, %v2932_v5  ;;  %v3230_v5 = vsel %vm2655_vm8, %v3229_v9, %v3228_v47 }
 0x427   : > { %v2944_v19 = vadd.f32 1e-05, %v2940_v39 }
 0x429   : > { %4412 = vrsqrt.f32 %v2944_v19 }
 0x433   : > { %v4413_v51 = vpop.eup %4412 }
 0x434   : > { %v2962_v53 = vrot.slane %v4413_v51, 1  ;;  %v2963_v39 = vrot.slane %v4413_v51, 2  ;;  %v2964_v13 = vrot.slane %v4413_v51, 3  ;;  %v2965_v37 = vrot.slane %v4413_v51, 4 }
 0x435   : > { %v2966_v58 = vrot.slane %v4413_v51, 5  ;;  %v2967_v24 = vrot.slane %v4413_v51, 6  ;;  %v2968_v19 = vrot.slane %v4413_v51, 7  ;;  %v3023_v62 = vmul.f32 %v4413_v51, %v5195_v21 }
 0x436   : > { %v3024_v3 = vmul.f32 %v2962_v53, %v5198_v42  ;;  %v3025_v16 = vmul.f32 %v2963_v39, %v5201_v34  ;;  %v3026_v57 = vmul.f32 %v2964_v13, %v5204_v40  ;;  %v3027_v59 = vmul.f32 %v2965_v37, %v5207_v1 }
 0x437   : > { %v3028_v63 = vmul.f32 %v2966_v58, %v5213_v7  ;;  %v3029_v11 = vmul.f32 %v2967_v24, %v5216_v33  ;;  %v3030_v4 = vmul.f32 %v2968_v19, %v5219_v27  ;;  %v3061_v25 = vmul.f32 %v5360_v17, %v3023_v62 }
 0x438   : > { %v3062_v35 = vmul.f32 %v5360_v17, %v3024_v3  ;;  %v3063_v21 = vmul.f32 %v5360_v17, %v3025_v16  ;;  %v3064_v42 = vmul.f32 %v5360_v17, %v3026_v57  ;;  %v3065_v34 = vmul.f32 %v5360_v17, %v3027_v59 }
 0x439   : > { %v3066_v40 = vmul.f32 %v5360_v17, %v3028_v63  ;;  %v3067_v1 = vmul.f32 %v5360_v17, %v3029_v11  ;;  %v3068_v7 = vmul.f32 %v5360_v17, %v3030_v4  ;;  %v3099_v33 = vadd.f32 %v5368_v26, %v3061_v25 }
 0x43a   : > { %v3100_v27 = vadd.f32 %v5368_v26, %v3062_v35  ;;  %v3101_v56 = vadd.f32 %v5368_v26, %v3063_v21  ;;  %v3102_v60 = vadd.f32 %v5368_v26, %v3064_v42  ;;  %v3103_v41 = vadd.f32 %v5368_v26, %v3065_v34 }
 0x43b   : > { %v3104_v45 = vadd.f32 %v5368_v26, %v3066_v40  ;;  %v3105_v43 = vadd.f32 %v5368_v26, %v3067_v1  ;;  %v3106_v23 = vadd.f32 %v5368_v26, %v3068_v7  ;;  %v3131_v55 = vpack.c.bf16 %v3099_v33, %v3099_v33 }
 0x43c   : > { %v3132_v29 = vpack.c.bf16 %v3100_v27, %v3100_v27  ;;  %v3133_v47 = vpack.c.bf16 %v3101_v56, %v3101_v56  ;;  %v3134_v9 = vpack.c.bf16 %v3102_v60, %v3102_v60  ;;  %v3135_v51 = vpack.c.bf16 %v3103_v41, %v3103_v41 }
 0x43d   : > { %v3130_v53 = vpack.c.bf16 %v3098_v48, %v3098_v48  ;;  %v3136_v39 = vpack.c.bf16 %v3104_v45, %v3104_v45  ;;  %v3137_v13 = vpack.c.bf16 %v3105_v43, %v3105_v43  ;;  %v3231_v37 = vrot.slane %v3197_v49, 4 }
 0x43e   : > { %v3138_v58 = vpack.c.bf16 %v3106_v23, %v3106_v23  ;;  %v3202_v24 = vunpack.c.l.b16 %v3132_v29  ;;  %v3203_v19 = vunpack.c.l.b16 %v3133_v47  ;;  %v3204_v62 = vunpack.c.l.b16 %v3134_v9 }
 0x43f   : > { %v3199_v3 = vunpack.c.l.b16 %v3129_v38  ;;  %v3205_v16 = vunpack.c.l.b16 %v3135_v51  ;;  %v3232_v57 = vsel %vm2657_vm9, %v3231_v37, %v3230_v5  ;;  %v3233_v59 = vrot.slane %v3198_v0, 3 }
 0x440   : > { %v3201_v63 = vunpack.c.l.b16 %v3131_v55  ;;  %v3206_v11 = vunpack.c.l.b16 %v3136_v39  ;;  %v3239_v4 = vrot.slane %v3202_v24, 7  ;;  %v3241_v25 = vrot.slane %v3203_v19, 6 }
 0x441   : > { %v3200_v35 = vunpack.c.l.b16 %v3130_v53  ;;  %v3207_v21 = vunpack.c.l.b16 %v3137_v13  ;;  %v3208_v42 = vunpack.c.l.b16 %v3138_v58  ;;  %v3234_v48 = vsel %vm2659_vm10, %v3233_v59, %v3232_v57 }
 0x442   : > { %v3240_v49 = vsel %vm2651_vm6, %v3239_v4, %v3201_v63  ;;  %v3243_v34 = vrot.slane %v3204_v62, 5  ;;  %v3235_v40 = vrot.slane %v3199_v3, 2  ;;  %v3245_v38 = vrot.slane %v3205_v16, 4 }
 0x443   : > { %v3242_v1 = vsel %vm2653_vm7, %v3241_v25, %v3240_v49  ;;  %v3247_v0 = vrot.slane %v3206_v11, 3  ;;  %v3249_v60 = vrot.slane %v3207_v21, 2  ;;  %v3237_v41 = vrot.slane %v3200_v35, 1 }
 0x444   : > { %v2935_v7 = vpop.xlane.xlu0 %2934  ;;  %v3244_v5 = vsel %vm2655_vm8, %v3243_v34, %v3242_v1  ;;  %v3236_v27 = vsel %vm2661_vm11, %v3235_v40, %v3234_v48  ;;  %v3251_v43 = vrot.slane %v3208_v42, 1 }
 0x445   : > { %v2941_v33 = vmul.f32 0.015625, %v2935_v7  ;;  %v3246_v56 = vsel %vm2657_vm9, %v3245_v38, %v3244_v5  ;;  %v3238_v29 = vsel %vm2663_vm12, %v3237_v41, %v3236_v27 }
 0x446   : > { %v3248_v45 = vsel %vm2659_vm10, %v3247_v0, %v3246_v56 }
 0x447   : > { %v2945_v23 = vadd.f32 1e-05, %v2941_v33  ;;  %v3250_v55 = vsel %vm2661_vm11, %v3249_v60, %v3248_v45 }
 0x448   : > { %v3252_v47 = vsel %vm2663_vm12, %v3251_v43, %v3250_v55 }
 0x449   : > { %4414 = vrsqrt.f32 %v2945_v23  ;;  %v5428_v9 = vpack.c.b16 %v3252_v47, %v3238_v29 }
 0x44b   : > { %4317 = vmatprep.mubr.msk.bf16.mxu1 %vm2330_vm5, %v5428_v9 }
 0x453   : > { %v4415_v51 = vpop.eup %4414 }
 0x454   : > { %v2969_v53 = vrot.slane %v4415_v51, 1  ;;  %v2970_v39 = vrot.slane %v4415_v51, 2  ;;  %v2971_v58 = vrot.slane %v4415_v51, 3  ;;  %v3031_v19 = vmul.f32 %v4415_v51, %v5246_v44 }
 0x455   : > { %v2972_v57 = vrot.slane %v4415_v51, 4  ;;  %v2973_v59 = vrot.slane %v4415_v51, 5  ;;  %v2974_v4 = vrot.slane %v4415_v51, 6  ;;  %v2975_v34 = vrot.slane %v4415_v51, 7 }
 0x456   : > { %v3032_v13 = vmul.f32 %v2969_v53, %v5249_v52  ;;  %v3033_v37 = vmul.f32 %v2970_v39, %v5252_v12  ;;  %v3034_v3 = vmul.f32 %v2971_v58, %v5255_v50  ;;  %v3069_v63 = vmul.f32 %v5360_v17, %v3031_v19 }
 0x457   : > { %v3035_v25 = vmul.f32 %v2972_v57, %v5258_v8  ;;  %v3036_v44 = vmul.f32 %v2973_v59, %v5264_v15  ;;  %v3037_v40 = vmul.f32 %v2974_v4, %v5267_v14  ;;  %v3038_v33 = vmul.f32 %v2975_v34, %v5270_v10 }
 0x458   : > { %v3070_v24 = vmul.f32 %v5360_v17, %v3032_v13  ;;  %v3071_v62 = vmul.f32 %v5360_v17, %v3033_v37  ;;  %v3072_v52 = vmul.f32 %v5360_v17, %v3034_v3  ;;  %v3107_v35 = vadd.f32 %v5368_v26, %v3069_v63 }
 0x459   : > { %v3073_v38 = vmul.f32 %v5360_v17, %v3035_v25  ;;  %v3074_v7 = vmul.f32 %v5360_v17, %v3036_v44  ;;  %v3075_v27 = vmul.f32 %v5360_v17, %v3037_v40  ;;  %v3076_v23 = vmul.f32 %v5360_v17, %v3038_v33 }
 0x45a   : > { %v3108_v16 = vadd.f32 %v5368_v26, %v3070_v24  ;;  %v3109_v11 = vadd.f32 %v5368_v26, %v3071_v62  ;;  %v3110_v48 = vadd.f32 %v5368_v26, %v3072_v52  ;;  %v3139_v5 = vpack.c.bf16 %v3107_v35, %v3107_v35 }
 0x45b   : > { %v3111_v56 = vadd.f32 %v5368_v26, %v3073_v38  ;;  %v3112_v60 = vadd.f32 %v5368_v26, %v3074_v7  ;;  %v3113_v55 = vadd.f32 %v5368_v26, %v3075_v27  ;;  %v3114_v53 = vadd.f32 %v5368_v26, %v3076_v23 }
 0x45c   : > { %v3140_v12 = vpack.c.bf16 %v3108_v16, %v3108_v16  ;;  %v3141_v50 = vpack.c.bf16 %v3109_v11, %v3109_v11  ;;  %v3142_v15 = vpack.c.bf16 %v3110_v48, %v3110_v48  ;;  %v3209_v41 = vunpack.c.l.b16 %v3139_v5 }
 0x45d   : > { %v3143_v29 = vpack.c.bf16 %v3111_v56, %v3111_v56  ;;  %v3144_v47 = vpack.c.bf16 %v3112_v60, %v3112_v60  ;;  %v3145_v13 = vpack.c.bf16 %v3113_v55, %v3113_v55 }
 0x45e   : > { %v3210_v49 = vunpack.c.l.b16 %v3140_v12  ;;  %v3211_v8 = vunpack.c.l.b16 %v3141_v50  ;;  %v3212_v45 = vunpack.c.l.b16 %v3142_v15 }
 0x45f   : > { %v3213_v37 = vunpack.c.l.b16 %v3143_v29  ;;  %v3214_v58 = vunpack.c.l.b16 %v3144_v47 }
 0x460   : > { %v3253_v0 = vrot.slane %v3210_v49, 7  ;;  %v3255_v14 = vrot.slane %v3211_v8, 6  ;;  %v3257_v10 = vrot.slane %v3212_v45, 5 }
 0x461   : > { %v3259_v56 = vrot.slane %v3213_v37, 4  ;;  %v3261_v29 = vrot.slane %v3214_v58, 3 }
 0x462   : > { %v3254_v43 = vsel %vm2651_vm6, %v3253_v0, %v3209_v41  ;;  %v3146_v0 = vpack.c.bf16 %v3114_v53, %v3114_v53 }
 0x463   : > { %v3256_v51 = vsel %vm2653_vm7, %v3255_v14, %v3254_v43  ;;  %v3215_v43 = vunpack.c.l.b16 %v3145_v13 }
 0x464   : > { %v2938_v21 = vpop.xlane.xlu1 %2937  ;;  %v3258_v24 = vsel %vm2655_vm8, %v3257_v10, %v3256_v51 }
 0x465   : > { %v2942_v42 = vmul.f32 0.015625, %v2938_v21  ;;  %v3260_v55 = vsel %vm2657_vm9, %v3259_v56, %v3258_v24 }
 0x466   : > { %v3262_v53 = vsel %vm2659_vm10, %v3261_v29, %v3260_v55 }
 0x467   : > { %v2946_v1 = vadd.f32 1e-05, %v2942_v42 }
 0x469   : > { %4416 = vrsqrt.f32 %v2946_v1 }
 0x473   : > { %v4417_v39 = vpop.eup %4416 }
 0x474   : > { %v2976_v19 = vrot.slane %v4417_v39, 1  ;;  %v2977_v62 = vrot.slane %v4417_v39, 2  ;;  %v2978_v3 = vrot.slane %v4417_v39, 3  ;;  %v2979_v16 = vrot.slane %v4417_v39, 4 }
 0x475   : > { %v2980_v57 = vrot.slane %v4417_v39, 5  ;;  %v2981_v59 = vrot.slane %v4417_v39, 6  ;;  %v2982_v63 = vrot.slane %v4417_v39, 7  ;;  %v3039_v11 = vmul.f32 %v4417_v39, %v5297_v30 }
 0x476   : > { %v3040_v52 = vmul.f32 %v2976_v19, %v5300_v36  ;;  %v3041_v12 = vmul.f32 %v2977_v62, %v5303_v2  ;;  %v3042_v4 = vmul.f32 %v2978_v3, %v5306_v18  ;;  %v3043_v25 = vmul.f32 %v2979_v16, %v5309_v22 }
 0x477   : > { %v3044_v44 = vmul.f32 %v2980_v57, %v5315_v6  ;;  %v3045_v35 = vmul.f32 %v2981_v59, %v5318_v32  ;;  %v3046_v21 = vmul.f32 %v2982_v63, %v5321_v28  ;;  %v3077_v50 = vmul.f32 %v5360_v17, %v3039_v11 }
 0x478   : > { %v3078_v42 = vmul.f32 %v5360_v17, %v3040_v52  ;;  %v3079_v30 = vmul.f32 %v5360_v17, %v3041_v12  ;;  %v3080_v36 = vmul.f32 %v5360_v17, %v3042_v4  ;;  %v3081_v2 = vmul.f32 %v5360_v17, %v3043_v25 }
 0x479   : > { %v3082_v18 = vmul.f32 %v5360_v17, %v3044_v44  ;;  %v3083_v22 = vmul.f32 %v5360_v17, %v3045_v35  ;;  %v3084_v6 = vmul.f32 %v5360_v17, %v3046_v21  ;;  %v3115_v32 = vadd.f32 %v5368_v26, %v3077_v50  ;;  %v4403_v50 = vld [vmem:[%s5597_s11 + $0x8] sm:$0xff]  }
 0x47a   : > { %v3116_v28 = vadd.f32 %v5368_v26, %v3078_v42  ;;  %v3117_v48 = vadd.f32 %v5368_v26, %v3079_v30  ;;  %v3118_v49 = vadd.f32 %v5368_v26, %v3080_v36  ;;  %v3119_v34 = vadd.f32 %v5368_v26, %v3081_v2  ;;  %v4404_v42 = vld [vmem:[%s5597_s11 + $0x10] sm:$0xff]   ;;  %v4405_v30 = vld [vmem:[%s5597_s11 + $0x18] sm:$0xff]  }
 0x47b   : > { %v3120_v40 = vadd.f32 %v5368_v26, %v3082_v18  ;;  %v3121_v1 = vadd.f32 %v5368_v26, %v3083_v22  ;;  %v3122_v38 = vadd.f32 %v5368_v26, %v3084_v6  ;;  %v3147_v7 = vpack.c.bf16 %v3115_v32, %v3115_v32  ;;  %v3967_v18 = vld [vmem:[%s5598_s12] ss:$0 sm:$0xff] }
 0x47c   : > { %v3148_v5 = vpack.c.bf16 %v3116_v28, %v3116_v28  ;;  %v3149_v8 = vpack.c.bf16 %v3117_v48, %v3117_v48  ;;  %v3150_v17 = vpack.c.bf16 %v3118_v49, %v3118_v49  ;;  %v3151_v15 = vpack.c.bf16 %v3119_v34, %v3119_v34 }
 0x47d   : > { %v3152_v33 = vpack.c.bf16 %v3120_v40, %v3120_v40  ;;  %v3153_v27 = vpack.c.bf16 %v3121_v1, %v3121_v1  ;;  %v3154_v60 = vpack.c.bf16 %v3122_v38, %v3122_v38  ;;  %v3217_v47 = vunpack.c.l.b16 %v3147_v7 }
 0x47e   : > { %v3218_v41 = vunpack.c.l.b16 %v3148_v5  ;;  %v3219_v14 = vunpack.c.l.b16 %v3149_v8  ;;  %v3220_v45 = vunpack.c.l.b16 %v3150_v17  ;;  %v3221_v23 = vunpack.c.l.b16 %v3151_v15 }
 0x47f   : > { %v3222_v26 = vunpack.c.l.b16 %v3152_v33  ;;  %v3216_v39 = vunpack.c.l.b16 %v3146_v0  ;;  %v3223_v19 = vunpack.c.l.b16 %v3153_v27  ;;  %v3224_v62 = vunpack.c.l.b16 %v3154_v60 }
 0x480   : > { %v3267_v51 = vrot.slane %v3218_v41, 7  ;;  %v3269_v10 = vrot.slane %v3219_v14, 6  ;;  %v3271_v3 = vrot.slane %v3220_v45, 5  ;;  %v3263_v16 = vrot.slane %v3215_v43, 2 }
 0x481   : > { %v3273_v13 = vrot.slane %v3221_v23, 4  ;;  %v3275_v24 = vrot.slane %v3222_v26, 3  ;;  %v3277_v11 = vrot.slane %v3223_v19, 2  ;;  %v3265_v52 = vrot.slane %v3216_v39, 1 }
 0x482   : > { %v3268_v37 = vsel %vm2651_vm6, %v3267_v51, %v3217_v47  ;;  %v3264_v58 = vsel %vm2661_vm11, %v3263_v16, %v3262_v53  ;;  %v3279_v4 = vrot.slane %v3224_v62, 1 }
 0x483   : > { %v3270_v57 = vsel %vm2653_vm7, %v3269_v10, %v3268_v37  ;;  %v3266_v44 = vsel %vm2663_vm12, %v3265_v52, %v3264_v58 }
 0x484   : > { %v3272_v59 = vsel %vm2655_vm8, %v3271_v3, %v3270_v57 }
 0x485   : > { %v3274_v63 = vsel %vm2657_vm9, %v3273_v13, %v3272_v59 }
 0x486   : > { %v3276_v12 = vsel %vm2659_vm10, %v3275_v24, %v3274_v63 }
 0x487   : > { %v3278_v25 = vsel %vm2661_vm11, %v3277_v11, %v3276_v12 }
 0x488   : > { %v3280_v35 = vsel %vm2663_vm12, %v3279_v4, %v3278_v25 }
 0x489   : > { %v3282_v21 = vpack.c.b16 %v3280_v35, %v3266_v44 }
 0x48b   : > { %4318 = vmatmul.mubr.msk.bf16.vlgmr.msra.gmra.mrb[84].mxu1 %vm2330_vm5, %v3282_v21 }
 0x48c   : > { %4322 = vmatpush3.bf16.msra.mxu1 %v5353_v46  ;;  %4329 = vmatprep.mubr.msk.bf16.mxu1 %vm2330_vm5, %v5428_v9 }
 0x48d   : > { %4323 = vmatprep.subr.bf16.mxu1 %v4403_v50 }
 0x490   : > { %4324 = vmatpush3.bf16.msra.mxu1 %v4403_v50 }
 0x491   : > { %4325 = vmatprep.subr.bf16.mxu1 %v4404_v42 }
 0x494   : > { %4326 = vmatpush3.bf16.msra.mxu1 %v4404_v42 }
 0x495   : > { %4327 = vmatprep.subr.bf16.mxu1 %v4405_v30 }
 0x498   : > { %4328 = vmatpush3.bf16.msra.mxu1 %v4405_v30 }
 0x49b   : > { %4330 = vmatmul.mubr.msk.bf16.vlgmr.msra.gmra.mrb[88].mxu1 %vm2330_vm5, %v3282_v21 }
 0x55e   : > { %v5508_v46 = vpop.f32.mrb[84].mxu1 }
 0x55f   : > { %v5510_v36 = vpop.f32.mrb[85].mxu1 }
 0x560   : > { %v5512_v9 = vpop.f32.mrb[86].mxu1 }
 0x561   : > { %v5514_v2 = vpop.f32.mrb[87].mxu1 }
 0x56e   : > { %v4331_v22 = vpop.f32.mrb[88].mxu1 }
 0x56f   : > { %v3471_v6 = vadd.f32 %v4331_v22, %v3967_v18  ;;  %v3462_v32 = vpop.f32.mrb[89].mxu1 }
 0x570   : > { %v3463_v28 = vadd.f32 %v3967_v18, %v3462_v32  ;;  %v4332_v48 = vpop.f32.mrb[90].mxu1 }
 0x571   : > { %v3479_v49 = vmul.f32 %v3471_v6, %v3471_v6  ;;  %v3474_v34 = vadd.f32 %v4332_v48, %v3967_v18  ;;  %v3465_v40 = vpop.f32.mrb[91].mxu1 }
 0x572   : > { %v3477_v1 = vmul.f32 %v3463_v28, %v3463_v28  ;;  %v3466_v38 = vadd.f32 %v3967_v18, %v3465_v40 }
 0x573   : > { %v3483_v7 = vmul.f32 %v3479_v49, %v3471_v6  ;;  %v3480_v5 = vmul.f32 %v3474_v34, %v3474_v34 }
 0x574   : > { %v3481_v8 = vmul.f32 %v3477_v1, %v3463_v28  ;;  %v3478_v17 = vmul.f32 %v3466_v38, %v3466_v38 }
 0x575   : > { %v3487_v15 = vmul.f32 0.044715, %v3483_v7  ;;  %v3484_v0 = vmul.f32 %v3480_v5, %v3474_v34 }
 0x576   : > { %v3485_v33 = vmul.f32 0.044715, %v3481_v8  ;;  %v3482_v27 = vmul.f32 %v3478_v17, %v3466_v38  ;;  %v4406_v8 = vld [vmem:[%s5601_s15] sm:$0xff]   ;;  %v631_v17 = vld [vmem:[%s5602_s16 + $0x8] sm:$0xff] }
 0x577   : > { %v3491_v56 = vadd.f32 %v3487_v15, %v3471_v6  ;;  %v3488_v60 = vmul.f32 0.044715, %v3484_v0  ;;  %4337 = vmatprep.mubr.msk.bf16.mxu1 %vm1880_vm4, %v4406_v8  ;;  %v4451_v15 = vmov 0   ;;  %v630_v0 = vld [vmem:[%s5602_s16] sm:$0xff] }
 0x578   : > { %v3489_v41 = vadd.f32 %v3485_v33, %v3463_v28  ;;  %v3486_v14 = vmul.f32 0.044715, %v3482_v27  ;;  %4362 = vset.pattern.permute.xlu1 %v4451_v15  ;;  %4361 = vset.pattern.permute.xlu0 %v4451_v15  ;;  %v632_v33 = vld [vmem:[%s5602_s16 + $0x10] sm:$0xff]  ;;  %v633_v27 = vld [vmem:[%s5602_s16 + $0x18] sm:$0xff] }
 0x579   : > { %v3492_v45 = vadd.f32 %v3488_v60, %v3474_v34  ;;  %v3495_v43 = vmul.f32 0.7978846, %v3491_v56 }
 0x57a   : > { %v3490_v23 = vadd.f32 %v3486_v14, %v3466_v38  ;;  %v3493_v55 = vmul.f32 0.7978846, %v3489_v41 }
 0x57b   : > { %4418 = vtanh.f32 %v3495_v43  ;;  %v3496_v29 = vmul.f32 0.7978846, %v3492_v45 }
 0x57c   : > { %4420 = vtanh.f32 %v3493_v55  ;;  %v3494_v47 = vmul.f32 0.7978846, %v3490_v23 }
 0x57d   : > { %4422 = vtanh.f32 %v3496_v29 }
 0x57e   : > { %4424 = vtanh.f32 %v3494_v47 }
 0x585   : > { %v4419_v26 = vpop.eup %4418 }
 0x586   : > { %v4421_v51 = vpop.eup %4420  ;;  %v3503_v10 = vadd.f32 1.0, %v4419_v26 }
 0x587   : > { %v4423_v39 = vpop.eup %4422  ;;  %v3501_v19 = vadd.f32 1.0, %v4421_v51 }
 0x588   : > { %v4425_v62 = vpop.eup %4424  ;;  %v3504_v53 = vadd.f32 1.0, %v4423_v39  ;;  %v3507_v16 = vmul.f32 0.5, %v3503_v10  ;;  %v3974_v39 = vld [vmem:[%s5599_s13] ss:$0 sm:$0xff] }
 0x589   : > { %v3505_v37 = vmul.f32 0.5, %v3501_v19  ;;  %v3502_v3 = vadd.f32 1.0, %v4425_v62 }
 0x58a   : > { %v3508_v59 = vmul.f32 0.5, %v3504_v53  ;;  %v3511_v63 = vmul.f32 %v3507_v16, %v3471_v6  ;;  %v3975_v16 = vld [vmem:[%s5600_s14] ss:$0 sm:$0xff] }
 0x58b   : > { %v3509_v57 = vmul.f32 %v3505_v37, %v3463_v28  ;;  %v3506_v13 = vmul.f32 0.5, %v3502_v3 }
 0x58c   : > { %v3512_v52 = vmul.f32 %v3508_v59, %v3474_v34  ;;  %v3519_v12 = vsel %vm1880_vm4, %v3511_v63, 0.0 }
 0x58d   : > { %v3513_v24 = vsel %vm1880_vm4, %v3509_v57, 0.0  ;;  %v3510_v58 = vmul.f32 %v3506_v13, %v3466_v38 }
 0x58e   : > { %3514 = vadd.xlane.f32.xlu0 %v3513_v24  ;;  %v3522_v4 = vsel %vm1880_vm4, %v3512_v52, 0.0 }
 0x58f   : > { %v3516_v11 = vsel %vm1880_vm4, %v3510_v58, 0.0 }
 0x590   : > { %3517 = vadd.xlane.f32.xlu1 %v3516_v11 }
 0x592   : > { %3520 = vadd.xlane.f32.xlu0 %v3519_v12 }
 0x594   : > { %3523 = vadd.xlane.f32.xlu1 %v3522_v4 }
 0x61b   : > { %v3515_v25 = vpop.xlane.xlu0 %3514 }
 0x61c   : > { %v3526_v44 = vmul.f32 0.03125, %v3515_v25 }
 0x61d   : > { %v3518_v35 = vpop.xlane.xlu1 %3517 }
 0x61e   : > { %v3530_v21 = vsub.f32 %v3509_v57, %v3526_v44  ;;  %v3527_v50 = vmul.f32 0.03125, %v3518_v35  ;;  %v4407_v35 = vld [vmem:[%s5601_s15 + $0x8] sm:$0xff]  }
 0x61f   : > { %v3521_v42 = vpop.xlane.xlu0 %3520 }
 0x620   : > { %v3531_v30 = vsub.f32 %v3510_v58, %v3527_v50  ;;  %v3528_v18 = vmul.f32 0.03125, %v3521_v42  ;;  %v3534_v22 = vmul.f32 %v3530_v21, %v3530_v21  ;;  %v4409_v50 = vld [vmem:[%s5603_s17 + $0x8] sm:$0xff]   ;;  %v3960_v42 = vld [vmem:[%s5596_s10] ss:$0 sm:$0xff] }
 0x621   : > { %v3524_v6 = vpop.xlane.xlu1 %3523 }
 0x622   : > { %v3532_v32 = vsub.f32 %v3511_v63, %v3528_v18  ;;  %v3529_v28 = vmul.f32 0.03125, %v3524_v6  ;;  %v3538_v48 = vsel %vm1880_vm4, %v3534_v22, 0.0  ;;  %v3535_v49 = vmul.f32 %v3531_v30, %v3531_v30 }
 0x623   : > { %3539 = vadd.xlane.f32.xlu0 %v3538_v48  ;;  %v3348_v18 = vadd.f32 %v3960_v42, %v5510_v36  ;;  %v3359_v22 = vadd.f32 %v5512_v9, %v3960_v42  ;;  %v3351_v6 = vadd.f32 %v3960_v42, %v5514_v2 }
 0x624   : > { %v3533_v34 = vsub.f32 %v3512_v52, %v3529_v28  ;;  %v3541_v40 = vsel %vm1880_vm4, %v3535_v49, 0.0  ;;  %v3536_v1 = vmul.f32 %v3532_v32, %v3532_v32 }
 0x625   : > { %3542 = vadd.xlane.f32.xlu1 %v3541_v40  ;;  %v3362_v28 = vmul.f32 %v3348_v18, %v3348_v18  ;;  %v3365_v48 = vmul.f32 %v3359_v22, %v3359_v22  ;;  %v3363_v49 = vmul.f32 %v3351_v6, %v3351_v6 }
 0x626   : > { %v3544_v38 = vsel %vm1880_vm4, %v3536_v1, 0.0  ;;  %v3537_v7 = vmul.f32 %v3533_v34, %v3533_v34 }
 0x627   : > { %3545 = vadd.xlane.f32.xlu0 %v3544_v38  ;;  %v3366_v40 = vmul.f32 %v3362_v28, %v3348_v18  ;;  %v3369_v1 = vmul.f32 %v3365_v48, %v3359_v22  ;;  %v3367_v38 = vmul.f32 %v3363_v49, %v3351_v6 }
 0x628   : > { %v3547_v5 = vsel %vm1880_vm4, %v3537_v7, 0.0 }
 0x629   : > { %3548 = vadd.xlane.f32.xlu1 %v3547_v5  ;;  %v3370_v5 = vmul.f32 0.044715, %v3366_v40  ;;  %v3373_v8 = vmul.f32 0.044715, %v3369_v1 }
 0x63a   : > { %3595 = vperm.xlu1 %4362, %v631_v17   ;;  %v3371_v17 = vmul.f32 0.044715, %v3367_v38 }
 0x63c   : > { %v3375_v36 = vadd.f32 %v3371_v17, %v3351_v6 }
 0x63d   : > { %3590 = vperm.xlu0 %4361, %v630_v0   ;;  %v3377_v0 = vadd.f32 %v3373_v8, %v3359_v22 }
 0x63e   : > { %3600 = vperm.xlu1 %4362, %v632_v33   ;;  %v3379_v2 = vmul.f32 0.7978846, %v3375_v36 }
 0x642   : > { %3605 = vperm.xlu1 %4362, %v633_v27   ;;  %v3381_v27 = vmul.f32 0.7978846, %v3377_v0 }
 0x6b0   : > { %v3540_v56 = vpop.xlane.xlu0 %3539 }
 0x6b1   : > { %v3550_v60 = vmul.f32 0.03125, %v3540_v56 }
 0x6b2   : > { %v3543_v41 = vpop.xlane.xlu1 %3542 }
 0x6b3   : > { %v3554_v14 = vadd.f32 1e-05, %v3550_v60  ;;  %v3551_v45 = vmul.f32 0.03125, %v3543_v41 }
 0x6b4   : > { %v3546_v43 = vpop.xlane.xlu0 %3545 }
 0x6b5   : > { %4426 = vrsqrt.f32 %v3554_v14  ;;  %v3555_v23 = vadd.f32 1e-05, %v3551_v45  ;;  %v3552_v55 = vmul.f32 0.03125, %v3546_v43 }
 0x6b6   : > { %v3549_v29 = vpop.xlane.xlu1 %3548 }
 0x6b7   : > { %4428 = vrsqrt.f32 %v3555_v23  ;;  %v3556_v47 = vadd.f32 1e-05, %v3552_v55  ;;  %v3553_v26 = vmul.f32 0.03125, %v3549_v29 }
 0x6b9   : > { %4430 = vrsqrt.f32 %v3556_v47  ;;  %v3557_v51 = vadd.f32 1e-05, %v3553_v26 }
 0x6ba   : > { %v3596_v60 = vpop.permute.xlu1 %3595 }
 0x6bb   : > { %4432 = vrsqrt.f32 %v3557_v51 }
 0x6be   : > { %v3601_v29 = vpop.permute.xlu1 %3600 }
 0x6bf   : > { %v4427_v10 = vpop.eup %4426 }
 0x6c0   : > { %v3562_v19 = vmul.f32 %v4427_v10, %v3530_v21  ;;  %v4408_v21 = vld [vmem:[%s5603_s17] sm:$0xff]   ;;  %v3591_v10 = vpop.permute.xlu0 %3590 }
 0x6c1   : > { %v4429_v62 = vpop.eup %4428 }
 0x6c2   : > { %v3563_v53 = vmul.f32 %v4429_v62, %v3531_v30  ;;  %v3572_v37 = vmul.f32 %v3974_v39, %v3562_v19  ;;  %v3356_v30 = vadd.f32 %v5508_v46, %v3960_v42  ;;  %v3374_v46 = vadd.f32 %v3370_v5, %v3348_v18 }
 0x6c3   : > { %v4431_v3 = vpop.eup %4430 }
 0x6c4   : > { %v3573_v57 = vmul.f32 %v3974_v39, %v3563_v53  ;;  %v3564_v13 = vmul.f32 %v4431_v3, %v3532_v32  ;;  %v3582_v24 = vadd.f32 %v3975_v16, %v3572_v37  ;;  %v3364_v32 = vmul.f32 %v3356_v30, %v3356_v30 }
 0x6c5   : > { %v4433_v59 = vpop.eup %4432  ;;  %v3378_v9 = vmul.f32 0.7978846, %v3374_v46 }
 0x6c6   : > { %v3583_v58 = vadd.f32 %v3975_v16, %v3573_v57  ;;  %v3565_v63 = vmul.f32 %v4433_v59, %v3533_v34  ;;  %v3574_v11 = vmul.f32 %v3974_v39, %v3564_v13  ;;  %v3368_v34 = vmul.f32 %v3364_v32, %v3356_v30 }
 0x6c8   : > { %v3586_v52 = vpack.c.bf16 %v3583_v58, %v3582_v24  ;;  %v3575_v12 = vmul.f32 %v3974_v39, %v3565_v63  ;;  %v3584_v4 = vadd.f32 %v3975_v16, %v3574_v11  ;;  %v3372_v7 = vmul.f32 0.044715, %v3368_v34 }
 0x6ca   : > { %4333 = vmatprep.subr.bf16.mxu1 %v3586_v52  ;;  %v3585_v25 = vadd.f32 %v3975_v16, %v3575_v12  ;;  %v3376_v15 = vadd.f32 %v3372_v7, %v3356_v30  ;;  %v3606_v16 = vpop.permute.xlu1 %3605 }
 0x6cb   : > { %4334 = vmatpush3.bf16.msra.mxu1 %v3586_v52 }
 0x6cc   : > { %v3587_v44 = vpack.c.bf16 %v3585_v25, %v3584_v4  ;;  %v3380_v33 = vmul.f32 0.7978846, %v3376_v15 }
 0x6ce   : > { %4335 = vmatprep.subr.bf16.mxu1 %v3587_v44  ;;  %4434 = vtanh.f32 %v3380_v33 }
 0x6cf   : > { %4336 = vmatpush3.bf16.msra.mxu1 %v3587_v44  ;;  %4436 = vtanh.f32 %v3378_v9 }
 0x6d0   : > { %4341 = vmatprep.subr.bf16.mxu1 %v4408_v21  ;;  %4438 = vtanh.f32 %v3381_v27 }
 0x6d1   : > { %4440 = vtanh.f32 %v3379_v2 }
 0x6d2   : > { %4338 = vmatmul.mubr.msk.bf16.vlgmr.msra.gmra.mrb[92].mxu1 %vm1880_vm4, %v4407_v35 }
 0x6d3   : > { %4342 = vmatpush3.bf16.msra.mxu1 %v4408_v21 }
 0x6d4   : > { %4343 = vmatprep.subr.bf16.mxu1 %v4409_v50 }
 0x6d7   : > { %4344 = vmatpush3.bf16.msra.mxu1 %v4409_v50  ;;  %v3980_v50 = vld [vmem:[%s5604_s18] ss:$0 sm:$0xff] }
 0x6d8   : > { %v4435_v56 = vpop.eup %4434 }
 0x6d9   : > { %v4437_v41 = vpop.eup %4436  ;;  %v3388_v43 = vadd.f32 1.0, %v4435_v56 }
 0x6da   : > { %v4439_v14 = vpop.eup %4438  ;;  %v3386_v23 = vadd.f32 1.0, %v4437_v41 }
 0x6db   : > { %v4441_v45 = vpop.eup %4440  ;;  %v3389_v55 = vadd.f32 1.0, %v4439_v14  ;;  %v3392_v26 = vmul.f32 0.5, %v3388_v43 }
 0x6dc   : > { %v3387_v47 = vadd.f32 1.0, %v4441_v45  ;;  %v3390_v51 = vmul.f32 0.5, %v3386_v23 }
 0x6dd   : > { %v3393_v39 = vmul.f32 0.5, %v3389_v55  ;;  %v3396_v53 = vmul.f32 %v3392_v26, %v3356_v30 }
 0x6de   : > { %v3391_v62 = vmul.f32 0.5, %v3387_v47  ;;  %v3394_v57 = vmul.f32 %v3390_v51, %v3348_v18 }
 0x6df   : > { %v3397_v58 = vmul.f32 %v3393_v39, %v3359_v22 }
 0x6e0   : > { %v3395_v12 = vmul.f32 %v3391_v62, %v3351_v6 }
 0x7a5   : > { %v4339_v19 = vpop.f32.mrb[92].mxu1 }
 0x7a6   : > { %v3667_v37 = vadd.f32 %v4339_v19, %v3601_v29  ;;  %v3658_v3 = vpop.f32.mrb[93].mxu1 }
 0x7a7   : > { %v3659_v13 = vadd.f32 %v3658_v3, %v3591_v10  ;;  %v4340_v59 = vpop.f32.mrb[94].mxu1 }
 0x7a8   : > { %v3675_v24 = vmul.f32 %v3667_v37, %v3396_v53  ;;  %v3670_v63 = vadd.f32 %v4340_v59, %v3606_v16  ;;  %v3661_v11 = vpop.f32.mrb[95].mxu1 }
 0x7a9   : > { %v3673_v52 = vmul.f32 %v3659_v13, %v3394_v57  ;;  %v3662_v4 = vadd.f32 %v3661_v11, %v3596_v60 }
 0x7aa   : > { %v3676_v25 = vmul.f32 %v3670_v63, %v3397_v58 }
 0x7ab   : > { %v3674_v44 = vmul.f32 %v3662_v4, %v3395_v12 }
 0x7ac   : > { %v3678_v35 = vpack.c.bf16 %v3676_v25, %v3675_v24 }
 0x7ad   : > { %v3677_v21 = vpack.c.bf16 %v3674_v44, %v3673_v52 }
 0x7af   : > { %4345 = vmatprep.mubr.msk.bf16.mxu1 %vm1880_vm4, %v3677_v21 }
 0x7b0   : > { %4346 = vmatmul.mubr.msk.bf16.vlgmr.msra.gmra.mrb[96].mxu1 %vm1880_vm4, %v3678_v35 }
 0x883   : > { %v4347_v42 = vpop.f32.mrb[96].mxu1 }
 0x884   : > { %v3746_v30 = vadd.f32 %v4347_v42, %v3980_v50  ;;  %v3737_v18 = vpop.f32.mrb[97].mxu1 }
 0x885   : > { %v3738_v22 = vadd.f32 %v3980_v50, %v3737_v18  ;;  %v4348_v6 = vpop.f32.mrb[98].mxu1 }
 0x886   : > { %v3754_v32 = vadd.f32 %v3746_v30, %v5091_v54  ;;  %v3749_v28 = vadd.f32 %v4348_v6, %v3980_v50  ;;  %v3740_v48 = vpop.f32.mrb[99].mxu1 }
 0x887   : > { %v3752_v49 = vadd.f32 %v3738_v22, %v4957_v31  ;;  %v3741_v34 = vadd.f32 %v3980_v50, %v3740_v48 }
 0x888   : > { %3758 = vst.msk [vmem:[%s602_s24 + $0x10] sm:$0xff] %vm2330_vm5, %v3754_v32  ;;  %v3755_v40 = vadd.f32 %v3749_v28, %v5142_v20 }
 0x889   : > { %3756 = vst.msk [vmem:[%s602_s24] sm:$0xff] %vm2330_vm5, %v3752_v49  ;;  %v3753_v1 = vadd.f32 %v3741_v34, %v5024_v61 }
 0x88a   : > { %3759 = vst.msk [vmem:[%s602_s24 + $0x18] sm:$0xff] %vm2330_vm5, %v3755_v40 }
 0x88b   : > { %3757 = vst.msk [vmem:[%s602_s24 + $0x8] sm:$0xff] %vm2330_vm5, %v3753_v1 }
 0x88c PF: > { %s29_s0 = sadd.s32 1, %s4448_s0  }
 0x88d   : > { %p26_p4 = scmp.ge.s32.totalorder %s29_s0, 4  }
 0x88f   :  { %28 = sbr.rel (!%p26_p4) target bundleno = 5 (0x5), region = 126 }

// kernel: forward.5
= control target key start
LH: loop header
LB: loop body
LE: loop exit
PB: predicated region body
PF: predicated region fallthrough
CT: control target
= control target key end

     0   :  { %s4185_s0 = inlined_call_operand.vmem [shape: bf16[2,128,67], index: 0, kind: input, shape index: {}]   ;;  %s4186_s1 = inlined_call_operand.vmem [shape: bf16[67,64], index: 1, kind: input, shape index: {}]   ;;  %s4187_s2 = inlined_call_operand.vmem [shape: f32[1,64], index: 2, kind: input, shape index: {}]   ;;  %s4188_s3 = inlined_call_operand.vmem [shape: bf16[64,128], index: 3, kind: input, shape index: {}]   ;;  %s4189_s4 = inlined_call_operand.vmem [shape: f32[1,128], index: 4, kind: input, shape index: {}]   ;;  %s4190_s5 = inlined_call_operand.vmem [shape: bf16[128,256], index: 5, kind: input, shape index: {}]   ;;  %s4191_s6 = inlined_call_operand.vmem [shape: f32[1,256], index: 6, kind: input, shape index: {}]   ;;  %s4192_s7 = inlined_call_operand.vmem [shape: f32[1,256], index: 7, kind: input, shape index: {}]   ;;  %s4193_s8 = inlined_call_operand.vmem [shape: f32[1,256], index: 8, kind: input, shape index: {}]   ;;  %s4194_s9 = inlined_call_operand.vmem [shape: bf16[256,128], index: 9, kind: input, shape index: {}]   ;;  %s4195_s10 = inlined_call_operand.vmem [shape: f32[1,128], index: 10, kind: input, shape index: {}]   ;;  %s4196_s11 = inlined_call_operand.vmem [shape: bf16[256,128], index: 11, kind: input, shape index: {}]   ;;  %s4197_s12 = inlined_call_operand.vmem [shape: f32[1,128], index: 12, kind: input, shape index: {}]   ;;  %s4198_s13 = inlined_call_operand.vmem [shape: f32[1,128], index: 13, kind: input, shape index: {}]   ;;  %s4199_s14 = inlined_call_operand.vmem [shape: f32[1,128], index: 14, kind: input, shape index: {}]   ;;  %s4200_s15 = inlined_call_operand.vmem [shape: bf16[16,16], index: 15, kind: input, shape index: {}]   ;;  %s4201_s16 = inlined_call_operand.vmem [shape: f32[16,1], index: 16, kind: input, shape index: {}]   ;;  %s4202_s17 = inlined_call_operand.vmem [shape: bf16[128,256], index: 17, kind: input, shape index: {}]   ;;  %s4203_s18 = inlined_call_operand.vmem [shape: f32[1,256], index: 18, kind: input, shape index: {}]   ;;  %s4204_s19 = inlined_call_operand.vmem [shape: f32[2,16,256], index: 19, kind: output, shape index: {}]  }
   0x1   :  { %4210 = sst [smem:[#allocation5_spill]] %s4185_s0  ;;  %s3270_s0 = smov 0  }
   0x2   :  { %4211 = sst [smem:[#allocation6_spill]] %s4186_s1 }
   0x3   :  { %4212 = sst [smem:[#allocation7_spill]] %s4187_s2 }
   0x4   :  { %4213 = sst [smem:[#allocation8_spill]] %s4188_s3 }
   0x5 LB: > { %s2785_s30 = sadd.s32 4294967295, %s3164_s0   ;;  %p2789_p0 = scmp.ge.s32.totalorder %s3164_s0, 1  ;;  %s3164_s0 = sphi %s3270_s0, %s29_s0  }
   0x6   : > { %p537_p1 = scmp.lt.s32.totalorder %s3164_s0, 3 }
   0x8   : > { %p538_p2 = pnand %p2789_p0, %p537_p1 }
   0xa   : > { %541 = sbr.rel (%p538_p2) target bundleno = 2179 (0x883), region = 96 }
  0x11   : > { %s4214_s1 = sld [smem:[#allocation6_spill]]  ;;  %vm819_vm0 = vcmask 1040384   ;;  %vm820_vm1 = vcmask 1041408   ;;  %p593_p3 = scmp.lt.s32.totalorder %s2785_s30, 1  ;;  %v3166_v5 = vmov 65535   ;;  %vm794_vm2 = vcmask 547840  }
  0x12   : > { %v821_v6 = vsel %vm819_vm0, 4294967295, %v3166_v5  ;;  %s4215_s20 = sld [smem:[#allocation8_spill]]  ;;  %s4216_s25 = sld [smem:[#allocation5_spill]]  ;;  %v3063_v21 = vld [vmem:[%s4190_s5 + $0x4] ss:$8 sps:$4 sm:$0xff]   ;;  %vm986_vm3 = vcmask 523264  }
  0x13   : > { %s4225_s30 = smov (!%p593_p3, %s2785_s30), 1  ;;  %v822_v9 = vsel %vm820_vm1, %v821_v6, 0  ;;  %s4217_s24 = sld [smem:[#allocation7_spill]]  ;;  %v3061_v38 = vld [vmem:[%s4190_s5] ss:$8 sps:$4 sm:$0xff]   ;;  %vm1609_vm4 = vcmask 1041409  }
  0x14   : > { %s2901_s2 = sshll.u32 %s4225_s30, 6  ;;  %v3066_v41 = vld [vmem:[%s4190_s5 + $0x14] ss:$8 sps:$4 sm:$0xff]   ;;  %v3064_v49 = vld [vmem:[%s4190_s5 + $0x10] ss:$8 sps:$4 sm:$0xff]   ;;  %vm1611_vm5 = vcmask 1042434  }
  0x15   : > { %v3069_v51 = vld [vmem:[%s4190_s5 + $0x24] ss:$8 sps:$4 sm:$0xff]   ;;  %v3067_v56 = vld [vmem:[%s4190_s5 + $0x20] ss:$8 sps:$4 sm:$0xff]   ;;  %v3072_v59 = vld [vmem:[%s4190_s5 + $0x34] ss:$8 sps:$4 sm:$0xff]  }
  0x16   : > { %v3075_v5 = vld [vmem:[%s4190_s5 + $0x44] ss:$8 sps:$4 sm:$0xff]   ;;  %vm1613_vm6 = vcmask 1043459   ;;  %vm1615_vm7 = vcmask 1044484   ;;  %vm1617_vm8 = vcmask 1045509   ;;  %vm1619_vm9 = vcmask 1046534  }
  0x17   : > { %v3044_v0 = vld [vmem:[%s4214_s1] sm:$0xff]   ;;  %v3045_v1 = vld [vmem:[%s4214_s1 + $0x8] sm:$0xff]   ;;  %v3046_v2 = vld [vmem:[%s4214_s1 + $0x10] sm:$0xff]   ;;  %vm1621_vm10 = vcmask 1047559   ;;  %vm3169_vm11 = vmmov 0   ;;  %vm2540_vm12 = vcmask 130048  }
  0x18   : > { %2974 = vmatprep.subr.bf16.mxu0 %v3044_v0  ;;  %v3047_v3 = vld [vmem:[%s4214_s1 + $0x18] sm:$0xff]   ;;  %v3048_v4 = vld [vmem:[%s4214_s1 + $0x20] ss:$0 sps:$4 sm:$0x33]   ;;  %v3058_v8 = vld [vmem:[%s4215_s20 + $0x8] sm:$0xff]   ;;  %s597_s3 = scalar_lea.vmem %s4216_s25, %s2901_s2  ;;  %s2902_s22 = sshll.u32 %s4225_s30, 5 }
  0x19   : > { %2975 = vmatpush3.bf16.msra.mxu0 %v3044_v0  ;;  %v3057_v7 = vld [vmem:[%s4215_s20] sm:$0xff]   ;;  %v824_v11 = vand.u32 %v3048_v4, %v822_v9  ;;  %v3050_v12 = vld [vmem:[%s597_s3 + $0x8] sm:$0xff]   ;;  %v3051_v13 = vld [vmem:[%s597_s3 + $0x10] sm:$0xff]  }
  0x1a   : > { %2976 = vmatprep.subr.bf16.mxu0 %v3045_v1  ;;  %3000 = vmatprep.subr.bf16.mxu1 %v3057_v7  ;;  %v3049_v10 = vld [vmem:[%s597_s3] sm:$0xff]   ;;  %v3052_v14 = vld [vmem:[%s597_s3 + $0x18] sm:$0xff]   ;;  %v3054_v16 = vld [vmem:[%s597_s3 + $0x28] sm:$0xff]  }
  0x1b   : > { %3001 = vmatpush3.bf16.msra.mxu1 %v3057_v7  ;;  %2984 = vmatprep.mubr.msk.bf16.mxu0 %vm794_vm2, %v3049_v10  ;;  %v3053_v15 = vld [vmem:[%s597_s3 + $0x20] sm:$0xff]   ;;  %v3055_v17 = vld [vmem:[%s597_s3 + $0x30] sm:$0xff]   ;;  %v3056_v18 = vld [vmem:[%s597_s3 + $0x38] sm:$0xff]  }
  0x1c   : > { %3002 = vmatprep.subr.bf16.mxu1 %v3058_v8  ;;  %v3059_v19 = vld [vmem:[%s4215_s20 + $0x10] sm:$0xff]   ;;  %v3060_v20 = vld [vmem:[%s4215_s20 + $0x18] sm:$0xff]   ;;  %v3325_v22 = vld [vmem:[%s4217_s24] ss:$0 sm:$0xff]  ;;  %s602_s24 = scalar_lea.vmem %s4204_s19, %s2902_s22 }
  0x1d   : > { %2977 = vmatpush3.bf16.msra.mxu0 %v3045_v1  ;;  %v3073_v10 = vld [vmem:[%s4190_s5 + $0x40] ss:$8 sps:$4 sm:$0xff]  }
  0x1e   : > { %2978 = vmatprep.subr.bf16.mxu0 %v3046_v2 }
  0x1f   : > { %3003 = vmatpush3.bf16.msra.mxu1 %v3058_v8 }
  0x20   : > { %3004 = vmatprep.subr.bf16.mxu1 %v3059_v19 }
  0x21   : > { %2979 = vmatpush3.bf16.msra.mxu0 %v3046_v2 }
  0x22   : > { %2980 = vmatprep.subr.bf16.mxu0 %v3047_v3 }
  0x23   : > { %3005 = vmatpush3.bf16.msra.mxu1 %v3059_v19 }
  0x24   : > { %3006 = vmatprep.subr.bf16.mxu1 %v3060_v20 }
  0x25   : > { %2981 = vmatpush3.bf16.msra.mxu0 %v3047_v3  ;;  %v3070_v3 = vld [vmem:[%s4190_s5 + $0x30] ss:$8 sps:$4 sm:$0xff]  }
  0x26   : > { %2982 = vmatprep.subr.bf16.mxu0 %v824_v11 }
  0x27   : > { %3007 = vmatpush3.bf16.msra.mxu1 %v3060_v20 }
  0x28   : > { %1240 = vmatprep.subr.bf16.mxu1 %v3063_v21  ;;  %v3076_v21 = vld [vmem:[%s4190_s5 + $0x50] ss:$8 sps:$4 sm:$0xff]  }
  0x29   : > { %2983 = vmatpush3.bf16.msra.mxu0 %v824_v11 }
  0x2c   : > { %2985 = vmatmul.mubr.msk.bf16.vlgmr.msra.gmra.mrb[0].mxu0 %vm794_vm2, %v3050_v12 }
  0x2d   : > { %2988 = vmatprep.mubr.msk.bf16.mxu0 %vm794_vm2, %v3051_v13  ;;  %v3078_v13 = vld [vmem:[%s4190_s5 + $0x54] ss:$8 sps:$4 sm:$0xff]  }
  0x34   : > { %2989 = vmatmul.mubr.msk.bf16.gmra.mrb[4].mxu0 %vm794_vm2, %v3052_v14 }
  0x35   : > { %2992 = vmatprep.mubr.msk.bf16.mxu0 %vm794_vm2, %v3053_v15 }
  0x3c   : > { %2993 = vmatmul.mubr.msk.bf16.gmra.mrb[8].mxu0 %vm794_vm2, %v3054_v16 }
  0x3d   : > { %2996 = vmatprep.mubr.msk.bf16.mxu0 %vm794_vm2, %v3055_v17 }
  0x44   : > { %2997 = vmatmul.mubr.msk.bf16.gmra.mrb[12].mxu0 %vm794_vm2, %v3056_v18 }
  0xff   : > { %v2986_v23 = vpop.f32.mrb[0].mxu0 }
 0x100   : > { %v869_v24 = vadd.f32 %v2986_v23, %v3325_v22  ;;  %v860_v25 = vpop.f32.mrb[1].mxu0 }
 0x101   : > { %v861_v26 = vadd.f32 %v3325_v22, %v860_v25  ;;  %v2987_v27 = vpop.f32.mrb[2].mxu0 }
 0x102   : > { %v872_v28 = vadd.f32 %v2987_v27, %v3325_v22  ;;  %v863_v29 = vpop.f32.mrb[3].mxu0  ;;  %v925_v31 = vmax.f32 %v869_v24, 0.0  ;;  %v3081_v27 = vld [vmem:[%s4190_s5 + $0x64] ss:$8 sps:$4 sm:$0xff]  }
 0x103   : > { %v864_v30 = vadd.f32 %v3325_v22, %v863_v29  ;;  %v923_v33 = vmax.f32 %v861_v26, 0.0  ;;  %v3082_v29 = vld [vmem:[%s4190_s5 + $0x70] ss:$8 sps:$4 sm:$0xff]  }
 0x104   : > { %v926_v32 = vmax.f32 %v872_v28, 0.0  ;;  %v3084_v28 = vld [vmem:[%s4190_s5 + $0x74] ss:$8 sps:$4 sm:$0xff]  }
 0x105   : > { %v924_v34 = vmax.f32 %v864_v30, 0.0  ;;  %v3167_v30 = vmov 0  }
 0x106   : > { %v949_v35 = vpack.c.bf16 %v926_v32, %v925_v31  ;;  %3042 = vset.pattern.permute.xlu0 %v3167_v30  ;;  %3043 = vset.pattern.permute.xlu1 %v3167_v30  ;;  %v2816_v31 = vld [vmem:[%s4189_s4] ss:$0 sm:$0xff] }
 0x107   : > { %v2990_v36 = vpop.f32.mrb[4].mxu0  ;;  %v948_v37 = vpack.c.bf16 %v924_v34, %v923_v33 }
 0x108   : > { %v885_v39 = vadd.f32 %v2990_v36, %v3325_v22  ;;  %v876_v40 = vpop.f32.mrb[5].mxu0 }
 0x109   : > { %v877_v42 = vadd.f32 %v3325_v22, %v876_v40  ;;  %3008 = vmatprep.mubr.msk.bf16.mxu1 %vm986_vm3, %v948_v37  ;;  %v2991_v43 = vpop.f32.mrb[6].mxu0 }
 0x10a   : > { %v929_v44 = vmax.f32 %v885_v39, 0.0  ;;  %v888_v45 = vadd.f32 %v2991_v43, %v3325_v22  ;;  %3009 = vmatmul.mubr.msk.bf16.vlgmr.msra.gmra.mrb[0].mxu1 %vm986_vm3, %v949_v35  ;;  %v879_v46 = vpop.f32.mrb[7].mxu0 }
 0x10b   : > { %v927_v47 = vmax.f32 %v877_v42, 0.0  ;;  %v880_v48 = vadd.f32 %v3325_v22, %v879_v46  ;;  %1241 = vmatpush1.bf16.msra.mxu1 %v3061_v38 }
 0x10c   : > { %v930_v50 = vmax.f32 %v888_v45, 0.0  ;;  %1242 = vmatprep.subr.bf16.mxu1 %v3066_v41 }
 0x10d   : > { %v928_v52 = vmax.f32 %v880_v48, 0.0 }
 0x10e   : > { %v951_v53 = vpack.c.bf16 %v930_v50, %v929_v44 }
 0x10f   : > { %v950_v54 = vpack.c.bf16 %v928_v52, %v927_v47  ;;  %v2994_v55 = vpop.f32.mrb[8].mxu0  ;;  %1243 = vmatpush1.bf16.msra.mxu1 %v3064_v49 }
 0x110   : > { %v901_v57 = vadd.f32 %v2994_v55, %v3325_v22  ;;  %v892_v58 = vpop.f32.mrb[9].mxu0  ;;  %1244 = vmatprep.subr.bf16.mxu1 %v3069_v51 }
 0x111   : > { %3012 = vmatprep.mubr.msk.bf16.mxu1 %vm986_vm3, %v950_v54  ;;  %v893_v60 = vadd.f32 %v3325_v22, %v892_v58  ;;  %v2995_v61 = vpop.f32.mrb[10].mxu0 }
 0x112   : > { %3013 = vmatmul.mubr.msk.bf16.gmra.mrb[4].mxu1 %vm986_vm3, %v951_v53  ;;  %v933_v62 = vmax.f32 %v901_v57, 0.0  ;;  %v904_v63 = vadd.f32 %v2995_v61, %v3325_v22  ;;  %v895_v0 = vpop.f32.mrb[11].mxu0 }
 0x113   : > { %v931_v1 = vmax.f32 %v893_v60, 0.0  ;;  %v896_v2 = vadd.f32 %v3325_v22, %v895_v0  ;;  %1245 = vmatpush1.bf16.msra.mxu1 %v3067_v56 }
 0x114   : > { %v934_v4 = vmax.f32 %v904_v63, 0.0  ;;  %1246 = vmatprep.subr.bf16.mxu1 %v3072_v59 }
 0x115   : > { %v932_v6 = vmax.f32 %v896_v2, 0.0 }
 0x116   : > { %v953_v7 = vpack.c.bf16 %v934_v4, %v933_v62 }
 0x117   : > { %v952_v8 = vpack.c.bf16 %v932_v6, %v931_v1  ;;  %v2998_v9 = vpop.f32.mrb[12].mxu0  ;;  %1247 = vmatpush1.bf16.msra.mxu1 %v3070_v3 }
 0x118   : > { %v917_v11 = vadd.f32 %v2998_v9, %v3325_v22  ;;  %v908_v12 = vpop.f32.mrb[13].mxu0  ;;  %1248 = vmatprep.subr.bf16.mxu1 %v3075_v5 }
 0x119   : > { %3016 = vmatprep.mubr.msk.bf16.mxu1 %vm986_vm3, %v952_v8  ;;  %v909_v14 = vadd.f32 %v3325_v22, %v908_v12  ;;  %v2999_v15 = vpop.f32.mrb[14].mxu0 }
 0x11a   : > { %3017 = vmatmul.mubr.msk.bf16.gmra.mrb[8].mxu1 %vm986_vm3, %v953_v7  ;;  %v937_v16 = vmax.f32 %v917_v11, 0.0  ;;  %v920_v17 = vadd.f32 %v2999_v15, %v3325_v22  ;;  %v911_v18 = vpop.f32.mrb[15].mxu0 }
 0x11b   : > { %v935_v19 = vmax.f32 %v909_v14, 0.0  ;;  %v912_v20 = vadd.f32 %v3325_v22, %v911_v18  ;;  %1249 = vmatpush1.bf16.msra.mxu1 %v3073_v10  ;;  %v3079_v22 = vld [vmem:[%s4190_s5 + $0x60] ss:$8 sps:$4 sm:$0xff]  }
 0x11c   : > { %v938_v23 = vmax.f32 %v920_v17, 0.0  ;;  %1250 = vmatprep.subr.bf16.mxu1 %v3078_v13 }
 0x11d   : > { %v936_v24 = vmax.f32 %v912_v20, 0.0 }
 0x11e   : > { %v955_v25 = vpack.c.bf16 %v938_v23, %v937_v16 }
 0x11f   : > { %v954_v26 = vpack.c.bf16 %v936_v24, %v935_v19  ;;  %1251 = vmatpush1.bf16.msra.mxu1 %v3076_v21 }
 0x120   : > { %1252 = vmatprep.subr.bf16.mxu1 %v3081_v27 }
 0x121   : > { %3020 = vmatprep.mubr.msk.bf16.mxu1 %vm986_vm3, %v954_v26 }
 0x122   : > { %3021 = vmatmul.mubr.msk.bf16.gmra.mrb[12].mxu1 %vm986_vm3, %v955_v25  ;;  %v1150_v25 = vlaneseq }
 0x123   : > { %1253 = vmatpush1.bf16.msra.mxu1 %v3079_v22  ;;  %1272 = vmatprep.mubr.bf16.mxu1 %v3167_v30  ;;  %v1140_v22 = vld [vmem:[%s4191_s6] sm:$0x3] }
 0x124   : > { %1254 = vmatprep.subr.bf16.mxu1 %v3084_v28  ;;  %v1151_v26 = vshrl.u32 %v1150_v25, 7 }
 0x126   : > { %v3410_v27 = vsub.s32 0, %v1151_v26  ;;  %v3415_v28 = vsub.s32 1, %v1151_v26 }
 0x127   : > { %1255 = vmatpush1.bf16.msra.mxu1 %v3082_v29 }
 0x128   : > { %v3418_v29 = vrot.slane %v1140_v22, %v3410_v27 }
 0x1dd   : > { %v3010_v32 = vpop.f32.mrb[0].mxu1 }
 0x1de   : > { %v1054_v33 = vadd.f32 %v3010_v32, %v2816_v31  ;;  %v1045_v34 = vpop.f32.mrb[1].mxu1 }
 0x1df   : > { %v1046_v35 = vadd.f32 %v2816_v31, %v1045_v34  ;;  %v3011_v36 = vpop.f32.mrb[2].mxu1 }
 0x1e0   : > { %v1057_v37 = vadd.f32 %v3011_v36, %v2816_v31  ;;  %v1048_v38 = vpop.f32.mrb[3].mxu1  ;;  %v1110_v40 = vmax.f32 %v1054_v33, 0.0 }
 0x1e1   : > { %v1049_v39 = vadd.f32 %v2816_v31, %v1048_v38  ;;  %v1108_v42 = vmax.f32 %v1046_v35, 0.0 }
 0x1e2   : > { %v1111_v41 = vmax.f32 %v1057_v37, 0.0 }
 0x1e3   : > { %v1109_v43 = vmax.f32 %v1049_v39, 0.0 }
 0x1e4   : > { %v1142_v44 = vpack.c.bf16 %v1111_v41, %v1110_v40 }
 0x1e5   : > { %v1141_v45 = vpack.c.bf16 %v1109_v43, %v1108_v42  ;;  %v3014_v46 = vpop.f32.mrb[4].mxu1 }
 0x1e6   : > { %v1070_v47 = vadd.f32 %v3014_v46, %v2816_v31  ;;  %v1061_v48 = vpop.f32.mrb[5].mxu1 }
 0x1e7   : > { %v1062_v49 = vadd.f32 %v2816_v31, %v1061_v48  ;;  %1273 = vmatmul.mubr.bf16.vlgmr.msra.gmra.mrb[16].mxu1 %v1141_v45  ;;  %v3015_v50 = vpop.f32.mrb[6].mxu1 }
 0x1e8   : > { %v1114_v51 = vmax.f32 %v1070_v47, 0.0  ;;  %v1073_v52 = vadd.f32 %v3015_v50, %v2816_v31  ;;  %v1064_v53 = vpop.f32.mrb[7].mxu1  ;;  %1282 = vmatprep.mubr.bf16.mxu1 %v3167_v30 }
 0x1e9   : > { %v1112_v54 = vmax.f32 %v1062_v49, 0.0  ;;  %v1065_v55 = vadd.f32 %v2816_v31, %v1064_v53 }
 0x1ea   : > { %v1115_v56 = vmax.f32 %v1073_v52, 0.0 }
 0x1eb   : > { %v1113_v57 = vmax.f32 %v1065_v55, 0.0 }
 0x1ec   : > { %v1144_v58 = vpack.c.bf16 %v1115_v56, %v1114_v51 }
 0x1ed   : > { %v1143_v59 = vpack.c.bf16 %v1113_v57, %v1112_v54  ;;  %v3018_v60 = vpop.f32.mrb[8].mxu1 }
 0x1ee   : > { %v1086_v61 = vadd.f32 %v3018_v60, %v2816_v31  ;;  %v1077_v62 = vpop.f32.mrb[9].mxu1 }
 0x1ef   : > { %1283 = vmatmul.mubr.bf16.gmra.mrb[20].mxu1 %v1142_v44  ;;  %v1078_v63 = vadd.f32 %v2816_v31, %v1077_v62  ;;  %v3019_v0 = vpop.f32.mrb[10].mxu1 }
 0x1f0   : > { %v1118_v1 = vmax.f32 %v1086_v61, 0.0  ;;  %1292 = vmatprep.mubr.bf16.mxu1 %v3167_v30  ;;  %v1089_v2 = vadd.f32 %v3019_v0, %v2816_v31  ;;  %v1080_v3 = vpop.f32.mrb[11].mxu1 }
 0x1f1   : > { %v1116_v4 = vmax.f32 %v1078_v63, 0.0  ;;  %v1081_v5 = vadd.f32 %v2816_v31, %v1080_v3 }
 0x1f2   : > { %v1119_v6 = vmax.f32 %v1089_v2, 0.0 }
 0x1f3   : > { %v1117_v7 = vmax.f32 %v1081_v5, 0.0 }
 0x1f4   : > { %v1146_v8 = vpack.c.bf16 %v1119_v6, %v1118_v1 }
 0x1f5   : > { %v1145_v9 = vpack.c.bf16 %v1117_v7, %v1116_v4  ;;  %v3022_v10 = vpop.f32.mrb[12].mxu1 }
 0x1f6   : > { %v1102_v11 = vadd.f32 %v3022_v10, %v2816_v31  ;;  %v1093_v12 = vpop.f32.mrb[13].mxu1 }
 0x1f7   : > { %1293 = vmatmul.mubr.bf16.gmra.mrb[24].mxu1 %v1143_v59  ;;  %v1094_v13 = vadd.f32 %v2816_v31, %v1093_v12  ;;  %v3023_v14 = vpop.f32.mrb[14].mxu1 }
 0x1f8   : > { %1302 = vmatprep.mubr.bf16.mxu1 %v3167_v30  ;;  %v1122_v15 = vmax.f32 %v1102_v11, 0.0  ;;  %v1105_v16 = vadd.f32 %v3023_v14, %v2816_v31  ;;  %v1096_v17 = vpop.f32.mrb[15].mxu1 }
 0x1f9   : > { %v1120_v18 = vmax.f32 %v1094_v13, 0.0  ;;  %v1097_v19 = vadd.f32 %v2816_v31, %v1096_v17  ;;  %v3421_v31 = vrot.slane %v1140_v22, %v3415_v28 }
 0x1fa   : > { %v1123_v20 = vmax.f32 %v1105_v16, 0.0 }
 0x1fb   : > { %v1121_v21 = vmax.f32 %v1097_v19, 0.0 }
 0x1fc   : > { %v1148_v23 = vpack.c.bf16 %v1123_v20, %v1122_v15 }
 0x1fd   : > { %v1147_v24 = vpack.c.bf16 %v1121_v21, %v1120_v18 }
 0x1ff   : > { %1303 = vmatmul.mubr.bf16.gmra.mrb[28].mxu1 %v1144_v58 }
 0x200   : > { %1312 = vmatprep.mubr.bf16.mxu1 %v3167_v30 }
 0x207   : > { %1313 = vmatmul.mubr.bf16.gmra.mrb[32].mxu1 %v1145_v9 }
 0x208   : > { %1322 = vmatprep.mubr.bf16.mxu1 %v3167_v30 }
 0x20f   : > { %1323 = vmatmul.mubr.bf16.gmra.mrb[36].mxu1 %v1146_v8 }
 0x210   : > { %1332 = vmatprep.mubr.bf16.mxu1 %v3167_v30 }
 0x217   : > { %1333 = vmatmul.mubr.bf16.gmra.mrb[40].mxu1 %v1147_v24 }
 0x218   : > { %1342 = vmatprep.mubr.bf16.mxu1 %v3167_v30 }
 0x21f   : > { %1343 = vmatmul.mubr.bf16.gmra.mrb[44].mxu1 %v1148_v23 }
 0x220   : > { %2711 = vmatprep.mubr.bf16.mxu1 %v3167_v30 }
 0x2ba   : > { %v1274_v32 = vpop.f32.mrb[16].mxu1 }
 0x2bb   : > { %v1275_v33 = vadd.f32 %v1274_v32, %v3418_v29  ;;  %v1276_v30 = vpop.f32.mrb[17].mxu1 }
 0x2bc   : > { %v1277_v34 = vadd.f32 %v1276_v30, %v3421_v31  ;;  %v1278_v35 = vpop.f32.mrb[18].mxu1 }
 0x2bd   : > { %v1353_v36 = vmax.f32 %v1275_v33, 0.0  ;;  %v1279_v37 = vadd.f32 %v1278_v35, %v3418_v29  ;;  %v1280_v38 = vpop.f32.mrb[19].mxu1 }
 0x2be   : > { %v1354_v39 = vmax.f32 %v1277_v34, 0.0  ;;  %v1281_v40 = vadd.f32 %v1280_v38, %v3421_v31 }
 0x2bf   : > { %v1385_v41 = vrot.slane %v1353_v36, 4  ;;  %v1355_v42 = vmax.f32 %v1279_v37, 0.0 }
 0x2c0   : > { %v1391_v43 = vrot.slane %v1354_v39, 4  ;;  %v1356_v44 = vmax.f32 %v1281_v40, 0.0 }
 0x2c1   : > { %v1386_v45 = vmax.f32 %v1353_v36, %v1385_v41  ;;  %v1397_v46 = vrot.slane %v1355_v42, 4 }
 0x2c2   : > { %v1392_v47 = vmax.f32 %v1354_v39, %v1391_v43  ;;  %v1403_v48 = vrot.slane %v1356_v44, 4  ;;  %v1284_v49 = vpop.f32.mrb[20].mxu1 }
 0x2c3   : > { %v1387_v50 = vrot.slane %v1386_v45, 2  ;;  %v1398_v51 = vmax.f32 %v1355_v42, %v1397_v46  ;;  %v1285_v52 = vadd.f32 %v1284_v49, %v3418_v29  ;;  %v1286_v53 = vpop.f32.mrb[21].mxu1 }
 0x2c4   : > { %v1393_v54 = vrot.slane %v1392_v47, 2  ;;  %v1404_v55 = vmax.f32 %v1356_v44, %v1403_v48  ;;  %v1287_v56 = vadd.f32 %v1286_v53, %v3421_v31  ;;  %v1288_v57 = vpop.f32.mrb[22].mxu1 }
 0x2c5   : > { %v1388_v58 = vmax.f32 %v1386_v45, %v1387_v50  ;;  %v1399_v59 = vrot.slane %v1398_v51, 2  ;;  %v1357_v60 = vmax.f32 %v1285_v52, 0.0  ;;  %v1289_v61 = vadd.f32 %v1288_v57, %v3418_v29  ;;  %v1290_v62 = vpop.f32.mrb[23].mxu1 }
 0x2c6   : > { %v1394_v63 = vmax.f32 %v1392_v47, %v1393_v54  ;;  %v1405_v0 = vrot.slane %v1404_v55, 2  ;;  %v1358_v1 = vmax.f32 %v1287_v56, 0.0  ;;  %v1291_v2 = vadd.f32 %v1290_v62, %v3421_v31 }
 0x2c7   : > { %v1389_v3 = vrot.slane %v1388_v58, 1  ;;  %v1400_v4 = vmax.f32 %v1398_v51, %v1399_v59  ;;  %v1409_v5 = vrot.slane %v1357_v60, 4  ;;  %v1359_v6 = vmax.f32 %v1289_v61, 0.0 }
 0x2c8   : > { %v1395_v7 = vrot.slane %v1394_v63, 1  ;;  %v1406_v8 = vmax.f32 %v1404_v55, %v1405_v0  ;;  %v1415_v9 = vrot.slane %v1358_v1, 4  ;;  %v1360_v10 = vmax.f32 %v1291_v2, 0.0 }
 0x2c9   : > { %v3431_v11 = vmax.f32 %v1388_v58, %v1389_v3  ;;  %v1401_v12 = vrot.slane %v1400_v4, 1  ;;  %v1410_v13 = vmax.f32 %v1357_v60, %v1409_v5  ;;  %v1421_v14 = vrot.slane %v1359_v6, 4 }
 0x2ca   : > { %v3433_v15 = vmax.f32 %v1394_v63, %v1395_v7  ;;  %v1407_v16 = vrot.slane %v1406_v8, 1  ;;  %v1416_v17 = vmax.f32 %v1358_v1, %v1415_v9  ;;  %v1427_v18 = vrot.slane %v1360_v10, 4  ;;  %v1294_v19 = vpop.f32.mrb[24].mxu1 }
 0x2cb   : > { %v3435_v20 = vmax.f32 %v1400_v4, %v1401_v12  ;;  %v1411_v21 = vrot.slane %v1410_v13, 2  ;;  %v1422_v23 = vmax.f32 %v1359_v6, %v1421_v14  ;;  %v1295_v24 = vadd.f32 %v1294_v19, %v3418_v29  ;;  %v1296_v25 = vpop.f32.mrb[25].mxu1 }
 0x2cc   : > { %v3438_v26 = vmax.f32 %v1406_v8, %v1407_v16  ;;  %v1417_v22 = vrot.slane %v1416_v17, 2  ;;  %v1428_v32 = vmax.f32 %v1360_v10, %v1427_v18  ;;  %v1297_v33 = vadd.f32 %v1296_v25, %v3421_v31  ;;  %v1298_v30 = vpop.f32.mrb[26].mxu1 }
 0x2cd   : > { %v1610_v34 = vsel %vm1609_vm4, %v3435_v20, %v3431_v11  ;;  %v1412_v35 = vmax.f32 %v1410_v13, %v1411_v21  ;;  %v1423_v36 = vrot.slane %v1422_v23, 2  ;;  %v1361_v37 = vmax.f32 %v1295_v24, 0.0  ;;  %v1300_v38 = vpop.f32.mrb[27].mxu1 }
 0x2ce   : > { %v1623_v39 = vsel %vm1609_vm4, %v3438_v26, %v3433_v15  ;;  %v1418_v40 = vmax.f32 %v1416_v17, %v1417_v22  ;;  %v1429_v41 = vrot.slane %v1428_v32, 2  ;;  %v1362_v42 = vmax.f32 %v1297_v33, 0.0 }
 0x2cf   : > { %v1413_v43 = vrot.slane %v1412_v35, 1  ;;  %v1424_v44 = vmax.f32 %v1422_v23, %v1423_v36  ;;  %v1433_v45 = vrot.slane %v1361_v37, 4  ;;  %v1299_v46 = vadd.f32 %v1298_v30, %v3418_v29 }
 0x2d0   : > { %v1419_v47 = vrot.slane %v1418_v40, 1  ;;  %v1430_v48 = vmax.f32 %v1428_v32, %v1429_v41  ;;  %v1439_v49 = vrot.slane %v1362_v42, 4  ;;  %v1301_v50 = vadd.f32 %v1300_v38, %v3421_v31 }
 0x2d1   : > { %v3449_v51 = vmax.f32 %v1412_v35, %v1413_v43  ;;  %v1425_v52 = vrot.slane %v1424_v44, 1  ;;  %v1434_v53 = vmax.f32 %v1361_v37, %v1433_v45  ;;  %v1363_v54 = vmax.f32 %v1299_v46, 0.0 }
 0x2d2   : > { %v3451_v55 = vmax.f32 %v1418_v40, %v1419_v47  ;;  %v1431_v56 = vrot.slane %v1430_v48, 1  ;;  %v1440_v57 = vmax.f32 %v1362_v42, %v1439_v49  ;;  %v1364_v58 = vmax.f32 %v1301_v50, 0.0  ;;  %v1304_v59 = vpop.f32.mrb[28].mxu1 }
 0x2d3   : > { %v3455_v60 = vsel %vm1611_vm5, %v3449_v51, %v1610_v34  ;;  %v3457_v61 = vmax.f32 %v1424_v44, %v1425_v52  ;;  %v1435_v62 = vrot.slane %v1434_v53, 2  ;;  %v1445_v63 = vrot.slane %v1363_v54, 4  ;;  %v1306_v0 = vpop.f32.mrb[29].mxu1 }
 0x2d4   : > { %v3461_v1 = vsel %vm1611_vm5, %v3451_v55, %v1623_v39  ;;  %v3463_v2 = vmax.f32 %v1430_v48, %v1431_v56  ;;  %v1441_v3 = vrot.slane %v1440_v57, 2  ;;  %v1451_v4 = vrot.slane %v1364_v58, 4  ;;  %v1308_v5 = vpop.f32.mrb[30].mxu1 }
 0x2d5   : > { %v1436_v6 = vmax.f32 %v1434_v53, %v1435_v62  ;;  %v1446_v7 = vmax.f32 %v1363_v54, %v1445_v63  ;;  %v1305_v8 = vadd.f32 %v1304_v59, %v3418_v29  ;;  %v1307_v9 = vadd.f32 %v1306_v0, %v3421_v31  ;;  %v1310_v10 = vpop.f32.mrb[31].mxu1 }
 0x2d6   : > { %v1442_v12 = vmax.f32 %v1440_v57, %v1441_v3  ;;  %v1452_v13 = vmax.f32 %v1364_v58, %v1451_v4  ;;  %v1309_v14 = vadd.f32 %v1308_v5, %v3418_v29  ;;  %v1311_v16 = vadd.f32 %v1310_v10, %v3421_v31 }
 0x2d7   : > { %v1437_v17 = vrot.slane %v1436_v6, 1  ;;  %v1447_v18 = vrot.slane %v1446_v7, 2  ;;  %v1365_v19 = vmax.f32 %v1305_v8, 0.0  ;;  %v1366_v21 = vmax.f32 %v1307_v9, 0.0 }
 0x2d8   : > { %v1443_v23 = vrot.slane %v1442_v12, 1  ;;  %v1453_v24 = vrot.slane %v1452_v13, 2  ;;  %v1367_v25 = vmax.f32 %v1309_v14, 0.0  ;;  %v1368_v22 = vmax.f32 %v1311_v16, 0.0 }
 0x2d9   : > { %v3469_v32 = vmax.f32 %v1436_v6, %v1437_v17  ;;  %v1448_v33 = vmax.f32 %v1446_v7, %v1447_v18  ;;  %v1457_v30 = vrot.slane %v1365_v19, 4  ;;  %v1463_v34 = vrot.slane %v1366_v21, 4 }
 0x2da   : > { %v3471_v35 = vmax.f32 %v1442_v12, %v1443_v23  ;;  %v1454_v36 = vmax.f32 %v1452_v13, %v1453_v24  ;;  %v1469_v37 = vrot.slane %v1367_v25, 4  ;;  %v1475_v38 = vrot.slane %v1368_v22, 4  ;;  %v1314_v39 = vpop.f32.mrb[32].mxu1 }
 0x2db   : > { %v1449_v40 = vrot.slane %v1448_v33, 1  ;;  %v1458_v41 = vmax.f32 %v1365_v19, %v1457_v30  ;;  %v1464_v42 = vmax.f32 %v1366_v21, %v1463_v34  ;;  %v1315_v43 = vadd.f32 %v1314_v39, %v3418_v29  ;;  %v1316_v44 = vpop.f32.mrb[33].mxu1 }
 0x2dc   : > { %v1455_v45 = vrot.slane %v1454_v36, 1  ;;  %v1470_v46 = vmax.f32 %v1367_v25, %v1469_v37  ;;  %v1476_v47 = vmax.f32 %v1368_v22, %v1475_v38  ;;  %v1317_v48 = vadd.f32 %v1316_v44, %v3421_v31  ;;  %v1318_v49 = vpop.f32.mrb[34].mxu1 }
 0x2dd   : > { %v3475_v50 = vmax.f32 %v1448_v33, %v1449_v40  ;;  %v1459_v52 = vrot.slane %v1458_v41, 2  ;;  %v1465_v53 = vrot.slane %v1464_v42, 2  ;;  %v1369_v54 = vmax.f32 %v1315_v43, 0.0  ;;  %v1320_v56 = vpop.f32.mrb[35].mxu1 }
 0x2de   : > { %v3477_v57 = vmax.f32 %v1454_v36, %v1455_v45  ;;  %v1471_v58 = vrot.slane %v1470_v46, 2  ;;  %v1477_v59 = vrot.slane %v1476_v47, 2  ;;  %v1370_v62 = vmax.f32 %v1317_v48, 0.0 }
 0x2df   : > { %v1460_v63 = vmax.f32 %v1458_v41, %v1459_v52  ;;  %v1466_v0 = vmax.f32 %v1464_v42, %v1465_v53  ;;  %v1481_v3 = vrot.slane %v1369_v54, 4  ;;  %v1319_v4 = vadd.f32 %v1318_v49, %v3418_v29 }
 0x2e0   : > { %v1472_v5 = vmax.f32 %v1470_v46, %v1471_v58  ;;  %v1478_v6 = vmax.f32 %v1476_v47, %v1477_v59  ;;  %v1487_v7 = vrot.slane %v1370_v62, 4  ;;  %v1321_v8 = vadd.f32 %v1320_v56, %v3421_v31 }
 0x2e1   : > { %v1461_v9 = vrot.slane %v1460_v63, 1  ;;  %v1467_v10 = vrot.slane %v1466_v0, 1  ;;  %v1482_v12 = vmax.f32 %v1369_v54, %v1481_v3  ;;  %v1371_v13 = vmax.f32 %v1319_v4, 0.0 }
 0x2e2   : > { %v1473_v14 = vrot.slane %v1472_v5, 1  ;;  %v1479_v16 = vrot.slane %v1478_v6, 1  ;;  %v1488_v17 = vmax.f32 %v1370_v62, %v1487_v7  ;;  %v1372_v18 = vmax.f32 %v1321_v8, 0.0  ;;  %v1324_v19 = vpop.f32.mrb[36].mxu1 }
 0x2e3   : > { %v3481_v21 = vmax.f32 %v1460_v63, %v1461_v9  ;;  %v3483_v23 = vmax.f32 %v1466_v0, %v1467_v10  ;;  %v1483_v24 = vrot.slane %v1482_v12, 2  ;;  %v1493_v25 = vrot.slane %v1371_v13, 4  ;;  %v1326_v22 = vpop.f32.mrb[37].mxu1 }
 0x2e4   : > { %v1489_v33 = vrot.slane %v1488_v17, 2  ;;  %v1499_v30 = vrot.slane %v1372_v18, 4  ;;  %v1325_v34 = vadd.f32 %v1324_v19, %v3418_v29  ;;  %v1327_v36 = vadd.f32 %v1326_v22, %v3421_v31  ;;  %v1328_v37 = vpop.f32.mrb[38].mxu1 }
 0x2e5   : > { %v1484_v38 = vmax.f32 %v1482_v12, %v1483_v24  ;;  %v1494_v39 = vmax.f32 %v1371_v13, %v1493_v25  ;;  %v1329_v40 = vadd.f32 %v1328_v37, %v3418_v29  ;;  %v1330_v41 = vpop.f32.mrb[39].mxu1  ;;  %v3488_v42 = vmax.f32 %v1472_v5, %v1473_v14 }
 0x2e6   : > { %v1490_v43 = vmax.f32 %v1488_v17, %v1489_v33  ;;  %v1500_v44 = vmax.f32 %v1372_v18, %v1499_v30  ;;  %v1373_v45 = vmax.f32 %v1325_v34, 0.0  ;;  %v1374_v46 = vmax.f32 %v1327_v36, 0.0 }
 0x2e7   : > { %v1485_v47 = vrot.slane %v1484_v38, 1  ;;  %v1495_v48 = vrot.slane %v1494_v39, 2  ;;  %v1375_v49 = vmax.f32 %v1329_v40, 0.0  ;;  %v1331_v52 = vadd.f32 %v1330_v41, %v3421_v31 }
 0x2e8   : > { %v1491_v53 = vrot.slane %v1490_v43, 1  ;;  %v1501_v54 = vrot.slane %v1500_v44, 2  ;;  %v1505_v56 = vrot.slane %v1373_v45, 4  ;;  %v1511_v58 = vrot.slane %v1374_v46, 4 }
 0x2e9   : > { %v3491_v59 = vmax.f32 %v1484_v38, %v1485_v47  ;;  %v1496_v62 = vmax.f32 %v1494_v39, %v1495_v48  ;;  %v1517_v63 = vrot.slane %v1375_v49, 4  ;;  %v1376_v0 = vmax.f32 %v1331_v52, 0.0 }
 0x2ea   : > { %v3493_v3 = vmax.f32 %v1490_v43, %v1491_v53  ;;  %v1502_v4 = vmax.f32 %v1500_v44, %v1501_v54  ;;  %v1506_v5 = vmax.f32 %v1373_v45, %v1505_v56  ;;  %v1512_v7 = vmax.f32 %v1374_v46, %v1511_v58  ;;  %v1334_v8 = vpop.f32.mrb[40].mxu1 }
 0x2eb   : > { %v1497_v9 = vrot.slane %v1496_v62, 1  ;;  %v1518_v10 = vmax.f32 %v1375_v49, %v1517_v63  ;;  %v1523_v12 = vrot.slane %v1376_v0, 4  ;;  %v3495_v13 = vmax.f32 %v1478_v6, %v1479_v16  ;;  %v1336_v14 = vpop.f32.mrb[41].mxu1 }
 0x2ec   : > { %v1503_v17 = vrot.slane %v1502_v4, 1  ;;  %v1507_v18 = vrot.slane %v1506_v5, 2  ;;  %v1513_v19 = vrot.slane %v1512_v7, 2  ;;  %v1614_v24 = vsel %vm1613_vm6, %v3457_v61, %v3455_v60  ;;  %v1338_v25 = vpop.f32.mrb[42].mxu1 }
 0x2ed   : > { %v3500_v22 = vmax.f32 %v1496_v62, %v1497_v9  ;;  %v1519_v33 = vrot.slane %v1518_v10, 2  ;;  %v1524_v30 = vmax.f32 %v1376_v0, %v1523_v12  ;;  %v1616_v34 = vsel %vm1615_vm7, %v3469_v32, %v1614_v24  ;;  %v1340_v36 = vpop.f32.mrb[43].mxu1 }
 0x2ee   : > { %v3504_v37 = vmax.f32 %v1502_v4, %v1503_v17  ;;  %v1508_v6 = vmax.f32 %v1506_v5, %v1507_v18  ;;  %v1514_v16 = vmax.f32 %v1512_v7, %v1513_v19  ;;  %v1618_v38 = vsel %vm1617_vm8, %v3475_v50, %v1616_v34 }
 0x2ef   : > { %v1630_v60 = vsel %vm1609_vm4, %v3500_v22, %v3491_v59  ;;  %v1520_v39 = vmax.f32 %v1518_v10, %v1519_v33  ;;  %v1525_v40 = vrot.slane %v1524_v30, 2  ;;  %v1620_v41 = vsel %vm1619_vm9, %v3481_v21, %v1618_v38 }
 0x2f0   : > { %v1637_v43 = vsel %vm1609_vm4, %v3504_v37, %v3493_v3  ;;  %v1509_v44 = vrot.slane %v1508_v6, 1  ;;  %v1515_v45 = vrot.slane %v1514_v16, 1  ;;  %v3518_v46 = vsel %vm1621_vm10, %v3488_v42, %v1620_v41 }
 0x2f1   : > { %v1521_v47 = vrot.slane %v1520_v39, 1  ;;  %v1526_v48 = vmax.f32 %v1524_v30, %v1525_v40  ;;  %v1625_v49 = vsel %vm1613_vm6, %v3463_v2, %v3461_v1  ;;  %v1335_v52 = vadd.f32 %v1334_v8, %v3418_v29 }
 0x2f2   : > { %v3524_v53 = vmax.f32 %v1508_v6, %v1509_v44  ;;  %v3526_v54 = vmax.f32 %v1514_v16, %v1515_v45  ;;  %v1626_v56 = vsel %vm1615_vm7, %v3471_v35, %v1625_v49  ;;  %v1337_v58 = vadd.f32 %v1336_v14, %v3421_v31  ;;  %v1344_v62 = vpop.f32.mrb[44].mxu1 }
 0x2f3   : > { %v3531_v63 = vmax.f32 %v1520_v39, %v1521_v47  ;;  %v1527_v0 = vrot.slane %v1526_v48, 1  ;;  %v1627_v4 = vsel %vm1617_vm8, %v3477_v57, %v1626_v56  ;;  %v1377_v5 = vmax.f32 %v1335_v52, 0.0  ;;  %v1346_v1 = vpop.f32.mrb[45].mxu1 }
 0x2f4   : > { %v1631_v7 = vsel %vm1611_vm5, %v3524_v53, %v1630_v60  ;;  %v3539_v8 = vsel %vm1611_vm5, %v3526_v54, %v1637_v43  ;;  %v1628_v9 = vsel %vm1619_vm9, %v3483_v23, %v1627_v4  ;;  %v1378_v10 = vmax.f32 %v1337_v58, 0.0  ;;  %v1348_v12 = vpop.f32.mrb[46].mxu1 }
 0x2f5   : > { %v3543_v14 = vmax.f32 %v1526_v48, %v1527_v0  ;;  %v3547_v17 = vsel %vm1621_vm10, %v3495_v13, %v1628_v9  ;;  %v1529_v18 = vrot.slane %v1377_v5, 4  ;;  %v1339_v19 = vadd.f32 %v1338_v25, %v3418_v29  ;;  %v1350_v24 = vpop.f32.mrb[47].mxu1 }
 0x2f6   : > { %4218 = vst [vmem:[#allocation2_spill] sm:$0xff] %v3547_v17  ;;  %v1648_v33 = vadd.f32 %v3547_v17, %v3518_v46  ;;  %v1535_v30 = vrot.slane %v1378_v10, 4  ;;  %v1341_v34 = vadd.f32 %v1340_v36, %v3421_v31  ;;  %v1345_v6 = vadd.f32 %v1344_v62, %v3418_v29 }
 0x2f7   : > { %v1530_v16 = vmax.f32 %v1377_v5, %v1529_v18  ;;  %v1379_v38 = vmax.f32 %v1339_v19, 0.0  ;;  %v1347_v60 = vadd.f32 %v1346_v1, %v3421_v31  ;;  %v1349_v39 = vadd.f32 %v1348_v12, %v3418_v29 }
 0x2f8   : > { %1649 = vadd.xlane.f32.xlu0 %v1648_v33  ;;  %v1536_v40 = vmax.f32 %v1378_v10, %v1535_v30  ;;  %v1380_v41 = vmax.f32 %v1341_v34, 0.0  ;;  %v1381_v43 = vmax.f32 %v1345_v6, 0.0  ;;  %v1351_v25 = vadd.f32 %v1350_v24, %v3421_v31 }
 0x2f9   : > { %v1531_v44 = vrot.slane %v1530_v16, 2  ;;  %v1541_v45 = vrot.slane %v1379_v38, 4  ;;  %v1382_v47 = vmax.f32 %v1347_v60, 0.0  ;;  %v1383_v48 = vmax.f32 %v1349_v39, 0.0 }
 0x2fa   : > { %v1537_v49 = vrot.slane %v1536_v40, 2  ;;  %v1547_v36 = vrot.slane %v1380_v41, 4  ;;  %v1553_v52 = vrot.slane %v1381_v43, 4  ;;  %v1384_v56 = vmax.f32 %v1351_v25, 0.0 }
 0x2fb   : > { %v1532_v58 = vmax.f32 %v1530_v16, %v1531_v44  ;;  %v1542_v62 = vmax.f32 %v1379_v38, %v1541_v45  ;;  %v1559_v0 = vrot.slane %v1382_v47, 4  ;;  %v1565_v4 = vrot.slane %v1383_v48, 4 }
 0x2fc   : > { %v1538_v5 = vmax.f32 %v1536_v40, %v1537_v49  ;;  %v1548_v29 = vmax.f32 %v1380_v41, %v1547_v36  ;;  %v1554_v1 = vmax.f32 %v1381_v43, %v1553_v52  ;;  %v1571_v9 = vrot.slane %v1384_v56, 4 }
 0x2fd   : > { %v1533_v10 = vrot.slane %v1532_v58, 1  ;;  %v1543_v12 = vrot.slane %v1542_v62, 2  ;;  %v1560_v18 = vmax.f32 %v1382_v47, %v1559_v0  ;;  %v1566_v31 = vmax.f32 %v1383_v48, %v1565_v4 }
 0x2fe   : > { %v1539_v19 = vrot.slane %v1538_v5, 1  ;;  %v1549_v24 = vrot.slane %v1548_v29, 2  ;;  %v1555_v33 = vrot.slane %v1554_v1, 2  ;;  %v1572_v30 = vmax.f32 %v1384_v56, %v1571_v9 }
 0x2ff   : > { %v3557_v34 = vmax.f32 %v1532_v58, %v1533_v10  ;;  %v1544_v6 = vmax.f32 %v1542_v62, %v1543_v12  ;;  %v1561_v60 = vrot.slane %v1560_v18, 2  ;;  %v1567_v16 = vrot.slane %v1566_v31, 2 }
 0x300   : > { %v3559_v38 = vmax.f32 %v1538_v5, %v1539_v19  ;;  %v1550_v39 = vmax.f32 %v1548_v29, %v1549_v24  ;;  %v1556_v40 = vmax.f32 %v1554_v1, %v1555_v33  ;;  %v1573_v41 = vrot.slane %v1572_v30, 2 }
 0x301   : > { %v1545_v43 = vrot.slane %v1544_v6, 1  ;;  %v1562_v25 = vmax.f32 %v1560_v18, %v1561_v60  ;;  %v1568_v44 = vmax.f32 %v1566_v31, %v1567_v16  ;;  %v1632_v45 = vsel %vm1613_vm6, %v3531_v63, %v1631_v7 }
 0x302   : > { %v1551_v47 = vrot.slane %v1550_v39, 1  ;;  %v1557_v48 = vrot.slane %v1556_v40, 1  ;;  %v1574_v49 = vmax.f32 %v1572_v30, %v1573_v41  ;;  %v1633_v36 = vsel %vm1615_vm7, %v3557_v34, %v1632_v45 }
 0x303   : > { %v3565_v52 = vmax.f32 %v1544_v6, %v1545_v43  ;;  %v1563_v56 = vrot.slane %v1562_v25, 1  ;;  %v1569_v58 = vrot.slane %v1568_v44, 1  ;;  %v1639_v62 = vsel %vm1613_vm6, %v3543_v14, %v3539_v8 }
 0x304   : > { %v3570_v0 = vmax.f32 %v1550_v39, %v1551_v47  ;;  %v3572_v4 = vmax.f32 %v1556_v40, %v1557_v48  ;;  %v1575_v5 = vrot.slane %v1574_v49, 1  ;;  %v1640_v7 = vsel %vm1615_vm7, %v3559_v38, %v1639_v62 }
 0x305   : > { %v3576_v29 = vmax.f32 %v1562_v25, %v1563_v56  ;;  %v3578_v1 = vmax.f32 %v1568_v44, %v1569_v58  ;;  %v1634_v9 = vsel %vm1617_vm8, %v3565_v52, %v1633_v36 }
 0x306   : > { %v3582_v10 = vmax.f32 %v1574_v49, %v1575_v5  ;;  %v1635_v8 = vsel %vm1619_vm9, %v3572_v4, %v1634_v9  ;;  %v1641_v12 = vsel %vm1617_vm8, %v3570_v0, %v1640_v7 }
 0x307   : > { %v3590_v18 = vsel %vm1621_vm10, %v3578_v1, %v1635_v8  ;;  %v1642_v31 = vsel %vm1619_vm9, %v3576_v29, %v1641_v12 }
 0x308   : > { %4219 = vst [vmem:[#allocation3_spill] sm:$0xff] %v3590_v18  ;;  %v3596_v19 = vsel %vm1621_vm10, %v3582_v10, %v1642_v31 }
 0x309   : > { %4220 = vst [vmem:[#allocation4_spill] sm:$0xff] %v3596_v19  ;;  %v1651_v24 = vadd.f32 %v3596_v19, %v3590_v18 }
 0x30b   : > { %1652 = vadd.xlane.f32.xlu0 %v1651_v24 }
 0x385   : > { %v1650_v33 = vpop.xlane.xlu0 %1649 }
 0x386   : > { %v1655_v30 = vmul.f32 0.00390625, %v1650_v33 }
 0x388   : > { %v1659_v6 = vrot.slane %v1655_v30, 1  ;;  %v1660_v60 = vrot.slane %v1655_v30, 2  ;;  %v1661_v16 = vrot.slane %v1655_v30, 3  ;;  %v1662_v39 = vrot.slane %v1655_v30, 4 }
 0x389   : > { %v1663_v40 = vrot.slane %v1655_v30, 5  ;;  %v1664_v41 = vrot.slane %v1655_v30, 6  ;;  %v1665_v44 = vrot.slane %v1655_v30, 7  ;;  %v3613_v48 = vsub.f32 %v3431_v11, %v1655_v30 }
 0x38a   : > { %v3601_v43 = vsub.f32 %v3435_v20, %v1659_v6  ;;  %v3604_v25 = vsub.f32 %v3449_v51, %v1660_v60  ;;  %v3607_v45 = vsub.f32 %v3438_v26, %v1659_v6  ;;  %v3610_v47 = vsub.f32 %v3457_v61, %v1661_v16 }
 0x38b   : > { %v3616_v49 = vsub.f32 %v3433_v15, %v1655_v30  ;;  %v3619_v36 = vsub.f32 %v3451_v55, %v1660_v60  ;;  %v3622_v20 = vsub.f32 %v3469_v32, %v1662_v39  ;;  %v3625_v51 = vsub.f32 %v3463_v2, %v1661_v16 }
 0x38c   : > { %v3628_v26 = vsub.f32 %v3471_v35, %v1662_v39  ;;  %v3631_v61 = vsub.f32 %v3475_v50, %v1663_v40  ;;  %v3634_v11 = vsub.f32 %v3477_v57, %v1663_v40  ;;  %v3637_v15 = vsub.f32 %v3481_v21, %v1664_v41 }
 0x38d   : > { %v3640_v55 = vsub.f32 %v3483_v23, %v1664_v41  ;;  %v1723_v32 = vmul.f32 %v3601_v43, %v3601_v43  ;;  %v1725_v2 = vmul.f32 %v3604_v25, %v3604_v25  ;;  %v3647_v35 = vsub.f32 %v3488_v42, %v1665_v44 }
 0x38e   : > { %v3650_v50 = vsub.f32 %v3495_v13, %v1665_v44  ;;  %v1724_v57 = vmul.f32 %v3607_v45, %v3607_v45  ;;  %v1727_v21 = vmul.f32 %v3610_v47, %v3610_v47  ;;  %v1721_v23 = vmul.f32 %v3613_v48, %v3613_v48 }
 0x38f   : > { %v1722_v56 = vmul.f32 %v3616_v49, %v3616_v49  ;;  %v1726_v58 = vmul.f32 %v3619_v36, %v3619_v36  ;;  %v1729_v42 = vmul.f32 %v3622_v20, %v3622_v20  ;;  %v1728_v13 = vmul.f32 %v3625_v51, %v3625_v51 }
 0x390   : > { %v1730_v62 = vmul.f32 %v3628_v26, %v3628_v26  ;;  %v1731_v5 = vmul.f32 %v3631_v61, %v3631_v61  ;;  %v1785_v7 = vrot.slane %v1723_v32, 7  ;;  %v1732_v9 = vmul.f32 %v3634_v11, %v3634_v11 }
 0x391   : > { %v1733_v8 = vmul.f32 %v3637_v15, %v3637_v15  ;;  %v1734_v12 = vmul.f32 %v3640_v55, %v3640_v55  ;;  %v1787_v31 = vrot.slane %v1725_v2, 6  ;;  %v1735_v24 = vmul.f32 %v3647_v35, %v3647_v35 }
 0x392   : > { %v1786_v33 = vsel %vm1609_vm4, %v1785_v7, %v1721_v23  ;;  %v1789_v30 = vrot.slane %v1727_v21, 5  ;;  %v1799_v6 = vrot.slane %v1724_v57, 7  ;;  %v1736_v60 = vmul.f32 %v3650_v50, %v3650_v50 }
 0x393   : > { %v1788_v16 = vsel %vm1611_vm5, %v1787_v31, %v1786_v33  ;;  %v1791_v39 = vrot.slane %v1729_v42, 4  ;;  %v1801_v40 = vrot.slane %v1726_v58, 6  ;;  %v1793_v44 = vrot.slane %v1731_v5, 3 }
 0x394   : > { %v1790_v41 = vsel %vm1613_vm6, %v1789_v30, %v1788_v16  ;;  %v1800_v32 = vsel %vm1609_vm4, %v1799_v6, %v1722_v56  ;;  %v1803_v2 = vrot.slane %v1728_v13, 5  ;;  %v1795_v18 = vrot.slane %v1733_v8, 2 }
 0x395   : > { %v1792_v19 = vsel %vm1615_vm7, %v1791_v39, %v1790_v41  ;;  %v1802_v23 = vsel %vm1611_vm5, %v1801_v40, %v1800_v32  ;;  %v1805_v21 = vrot.slane %v1730_v62, 4  ;;  %v1797_v7 = vrot.slane %v1735_v24, 1 }
 0x396   : > { %v1794_v57 = vsel %vm1617_vm8, %v1793_v44, %v1792_v19  ;;  %v1804_v17 = vsel %vm1613_vm6, %v1803_v2, %v1802_v23  ;;  %v1807_v31 = vrot.slane %v1732_v9, 3  ;;  %v1809_v5 = vrot.slane %v1734_v12, 2 }
 0x397   : > { %v1796_v58 = vsel %vm1619_vm9, %v1795_v18, %v1794_v57  ;;  %v1806_v42 = vsel %vm1615_vm7, %v1805_v21, %v1804_v17  ;;  %v1811_v8 = vrot.slane %v1736_v60, 1 }
 0x398   : > { %v1653_v33 = vpop.xlane.xlu0 %1652  ;;  %v1798_v56 = vsel %vm1621_vm10, %v1797_v7, %v1796_v58  ;;  %v1808_v13 = vsel %vm1617_vm8, %v1807_v31, %v1806_v42 }
 0x399   : > { %v1656_v30 = vmul.f32 0.00390625, %v1653_v33  ;;  %v1810_v62 = vsel %vm1619_vm9, %v1809_v5, %v1808_v13 }
 0x39a   : > { %v1812_v19 = vsel %vm1621_vm10, %v1811_v8, %v1810_v62 }
 0x39b   : > { %v1666_v24 = vrot.slane %v1656_v30, 1  ;;  %v1667_v6 = vrot.slane %v1656_v30, 2  ;;  %v1668_v16 = vrot.slane %v1656_v30, 3  ;;  %v1845_v9 = vadd.f32 %v1812_v19, %v1798_v56 }
 0x39c   : > { %v1669_v39 = vrot.slane %v1656_v30, 4  ;;  %v1670_v18 = vrot.slane %v1656_v30, 5  ;;  %v1671_v12 = vrot.slane %v1656_v30, 6  ;;  %v1672_v40 = vrot.slane %v1656_v30, 7 }
 0x39d   : > { %v3695_v17 = vsub.f32 %v3500_v22, %v1666_v24  ;;  %1846 = vadd.xlane.f32.xlu1 %v1845_v9  ;;  %v3698_v41 = vsub.f32 %v3524_v53, %v1667_v6  ;;  %v3701_v60 = vsub.f32 %v3504_v37, %v1666_v24  ;;  %v3704_v44 = vsub.f32 %v3526_v54, %v1667_v6 }
 0x39e   : > { %v3707_v32 = vsub.f32 %v3531_v63, %v1668_v16  ;;  %v3710_v2 = vsub.f32 %v3491_v59, %v1656_v30  ;;  %v3713_v22 = vsub.f32 %v3493_v3, %v1656_v30  ;;  %v3716_v23 = vsub.f32 %v3557_v34, %v1669_v39 }
 0x39f   : > { %v3719_v53 = vsub.f32 %v3543_v14, %v1668_v16  ;;  %v3722_v37 = vsub.f32 %v3559_v38, %v1669_v39  ;;  %v3725_v54 = vsub.f32 %v3565_v52, %v1670_v18  ;;  %v1739_v63 = vmul.f32 %v3695_v17, %v3695_v17 }
 0x3a0   : > { %v3730_v59 = vsub.f32 %v3570_v0, %v1670_v18  ;;  %v3733_v3 = vsub.f32 %v3572_v4, %v1671_v12  ;;  %v3736_v34 = vsub.f32 %v3578_v1, %v1672_v40  ;;  %v1741_v14 = vmul.f32 %v3698_v41, %v3698_v41 }
 0x3a1   : > { %v3741_v38 = vsub.f32 %v3576_v29, %v1671_v12  ;;  %v1740_v52 = vmul.f32 %v3701_v60, %v3701_v60  ;;  %v1742_v21 = vmul.f32 %v3704_v44, %v3704_v44  ;;  %v1743_v0 = vmul.f32 %v3707_v32, %v3707_v32 }
 0x3a2   : > { %v3750_v4 = vsub.f32 %v3582_v10, %v1672_v40  ;;  %v1737_v1 = vmul.f32 %v3710_v2, %v3710_v2  ;;  %v1738_v57 = vmul.f32 %v3713_v22, %v3713_v22  ;;  %v1745_v29 = vmul.f32 %v3716_v23, %v3716_v23 }
 0x3a3   : > { %v1744_v7 = vmul.f32 %v3719_v53, %v3719_v53  ;;  %v1747_v31 = vmul.f32 %v3725_v54, %v3725_v54  ;;  %v1813_v58 = vrot.slane %v1739_v63, 7  ;;  %v1815_v42 = vrot.slane %v1741_v14, 6 }
 0x3a4   : > { %v1746_v10 = vmul.f32 %v3722_v37, %v3722_v37  ;;  %v1748_v5 = vmul.f32 %v3730_v59, %v3730_v59  ;;  %v1749_v33 = vmul.f32 %v3733_v3, %v3733_v3  ;;  %v1751_v56 = vmul.f32 %v3736_v34, %v3736_v34 }
 0x3a5   : > { %v1814_v13 = vsel %vm1609_vm4, %v1813_v58, %v1737_v1  ;;  %v1817_v8 = vrot.slane %v1743_v0, 5  ;;  %v1827_v30 = vrot.slane %v1740_v52, 7  ;;  %v1829_v62 = vrot.slane %v1742_v21, 6 }
 0x3a6   : > { %v1750_v19 = vmul.f32 %v3741_v38, %v3741_v38  ;;  %v1752_v24 = vmul.f32 %v3750_v4, %v3750_v4  ;;  %v1816_v6 = vsel %vm1611_vm5, %v1815_v42, %v1814_v13  ;;  %v1819_v16 = vrot.slane %v1745_v29, 4 }
 0x3a7   : > { %v1818_v9 = vsel %vm1613_vm6, %v1817_v8, %v1816_v6  ;;  %v1821_v39 = vrot.slane %v1747_v31, 3  ;;  %v1828_v18 = vsel %vm1609_vm4, %v1827_v30, %v1738_v57  ;;  %v1831_v12 = vrot.slane %v1744_v7, 5  ;;  %v3087_v30 = vld [vmem:[%s4194_s9 + $0x48] sm:$0xff]   ;;  %v3091_v6 = vld [vmem:[%s4194_s9 + $0x58] sm:$0xff]  }
 0x3a8   : > { %v1820_v40 = vsel %vm1615_vm7, %v1819_v16, %v1818_v9  ;;  %v1823_v63 = vrot.slane %v1749_v33, 2  ;;  %v1830_v14 = vsel %vm1611_vm5, %v1829_v62, %v1828_v18  ;;  %v1833_v52 = vrot.slane %v1746_v10, 4  ;;  %v3088_v62 = vld [vmem:[%s4194_s9 + $0x8] sm:$0xff]   ;;  %v3092_v16 = vld [vmem:[%s4194_s9 + $0x18] sm:$0xff]   ;;  %v3093_v9 = vld [vmem:[%s4194_s9 + $0x60] sm:$0xff]  }
 0x3a9   : > { %v1822_v21 = vsel %vm1617_vm8, %v1821_v39, %v1820_v40  ;;  %v1825_v0 = vrot.slane %v1751_v56, 1  ;;  %v1832_v1 = vsel %vm1613_vm6, %v1831_v12, %v1830_v14  ;;  %v1835_v58 = vrot.slane %v1748_v5, 3  ;;  %v3085_v5 = vld [vmem:[%s4194_s9 + $0x40] sm:$0xff]   ;;  %v3095_v18 = vld [vmem:[%s4194_s9 + $0x68] sm:$0xff]   ;;  %v3097_v40 = vld [vmem:[%s4194_s9 + $0x70] sm:$0xff]  }
 0x3aa   : > { %v1824_v29 = vsel %vm1619_vm9, %v1823_v63, %v1822_v21  ;;  %v1834_v42 = vsel %vm1615_vm7, %v1833_v52, %v1832_v1  ;;  %v1837_v31 = vrot.slane %v1750_v19, 2  ;;  %v1839_v13 = vrot.slane %v1752_v24, 1  ;;  %v3086_v56 = vld [vmem:[%s4194_s9] sm:$0xff]   ;;  %2928 = vmatprep.subr.bf16.mxu0 %v3085_v5  ;;  %v3089_v19 = vld [vmem:[%s4194_s9 + $0x50] sm:$0xff]   ;;  %v3096_v12 = vld [vmem:[%s4194_s9 + $0x28] sm:$0xff]  }
 0x3ab   : > { %v1826_v57 = vsel %vm1621_vm10, %v1825_v0, %v1824_v29  ;;  %v1836_v7 = vsel %vm1617_vm8, %v1835_v58, %v1834_v42  ;;  %2929 = vmatpush3.bf16.msra.mxu0 %v3086_v56  ;;  %v3090_v24 = vld [vmem:[%s4194_s9 + $0x10] sm:$0xff]   ;;  %v3094_v39 = vld [vmem:[%s4194_s9 + $0x20] sm:$0xff]   ;;  %v3099_v14 = vld [vmem:[%s4194_s9 + $0x78] sm:$0xff]  }
 0x3ac   : > { %v1838_v33 = vsel %vm1619_vm9, %v1837_v31, %v1836_v7  ;;  %2930 = vmatprep.subr.bf16.mxu0 %v3087_v30  ;;  %v3098_v63 = vld [vmem:[%s4194_s9 + $0x30] sm:$0xff]   ;;  %v3100_v52 = vld [vmem:[%s4194_s9 + $0x38] sm:$0xff]   ;;  %v3101_v21 = vld [vmem:[%s4196_s11 + $0x40] sm:$0xff]  }
 0x3ad   : > { %v1840_v10 = vsel %vm1621_vm10, %v1839_v13, %v1838_v33  ;;  %v604_v29 = vld [vmem:[%s4192_s7] sm:$0x3] }
 0x3ae   : > { %v1848_v8 = vadd.f32 %v1840_v10, %v1826_v57  ;;  %v3845_v31 = vrot.slane %v604_v29, %v3415_v28  ;;  %v605_v10 = vld [vmem:[%s4193_s8] sm:$0x3] }
 0x3af   : > { %2931 = vmatpush3.bf16.msra.mxu0 %v3088_v62 }
 0x3b0   : > { %1849 = vadd.xlane.f32.xlu1 %v1848_v8  ;;  %2932 = vmatprep.subr.bf16.mxu0 %v3089_v19 }
 0x3b3   : > { %2933 = vmatpush3.bf16.msra.mxu0 %v3090_v24 }
 0x3b4   : > { %2934 = vmatprep.subr.bf16.mxu0 %v3091_v6 }
 0x3b7   : > { %2935 = vmatpush3.bf16.msra.mxu0 %v3092_v16  ;;  %v3864_v16 = vrot.slane %v604_v29, %v3410_v27 }
 0x3b8   : > { %2936 = vmatprep.subr.bf16.mxu0 %v3093_v9 }
 0x3bb   : > { %2937 = vmatpush3.bf16.msra.mxu0 %v3094_v39 }
 0x3bc   : > { %2938 = vmatprep.subr.bf16.mxu0 %v3095_v18 }
 0x3bf   : > { %2939 = vmatpush3.bf16.msra.mxu0 %v3096_v12 }
 0x3c0   : > { %2940 = vmatprep.subr.bf16.mxu0 %v3097_v40 }
 0x3c3   : > { %2941 = vmatpush3.bf16.msra.mxu0 %v3098_v63 }
 0x3c4   : > { %2942 = vmatprep.subr.bf16.mxu0 %v3099_v14 }
 0x3c7   : > { %2943 = vmatpush3.bf16.msra.mxu0 %v3100_v52 }
 0x3c8   : > { %2950 = vmatprep.subr.bf16.mxu0 %v3101_v21 }
 0x42a   : > { %v1847_v0 = vpop.xlane.xlu1 %1846 }
 0x42b   : > { %v1851_v1 = vmul.f32 0.00390625, %v1847_v0 }
 0x42d   : > { %v1853_v58 = vadd.f32 1e-05, %v1851_v1 }
 0x42f   : > { %3142 = vrsqrt.f32 %v1853_v58 }
 0x439   : > { %v3842_v42 = vpop.eup %3142 }
 0x43a   : > { %v1859_v57 = vrot.slane %v3842_v42, 1  ;;  %v1860_v7 = vrot.slane %v3842_v42, 2  ;;  %v1861_v13 = vrot.slane %v3842_v42, 3  ;;  %v1862_v33 = vrot.slane %v3842_v42, 4 }
 0x43b   : > { %v1863_v8 = vrot.slane %v3842_v42, 5  ;;  %v1864_v5 = vrot.slane %v3842_v42, 6  ;;  %v1865_v56 = vrot.slane %v3842_v42, 7  ;;  %v1890_v30 = vmul.f32 %v3842_v42, %v3616_v49 }
 0x43c   : > { %v1892_v62 = vmul.f32 %v1859_v57, %v3607_v45  ;;  %v1894_v19 = vmul.f32 %v1860_v7, %v3619_v36  ;;  %v1896_v24 = vmul.f32 %v1861_v13, %v3625_v51  ;;  %v1898_v6 = vmul.f32 %v1862_v33, %v3628_v26 }
 0x43d   : > { %v1850_v9 = vpop.xlane.xlu1 %1849  ;;  %v1891_v39 = vmul.f32 %v1859_v57, %v3601_v43  ;;  %v1900_v18 = vmul.f32 %v1863_v8, %v3634_v11  ;;  %v1902_v12 = vmul.f32 %v1864_v5, %v3640_v55  ;;  %v3870_v49 = vrot.slane %v605_v10, %v3415_v28 }
 0x43e   : > { %v1852_v45 = vmul.f32 0.00390625, %v1850_v9  ;;  %v1893_v36 = vmul.f32 %v1860_v7, %v3604_v25  ;;  %v1904_v51 = vmul.f32 %v1865_v56, %v3650_v50  ;;  %v1933_v26 = vmul.f32 %v3845_v31, %v1890_v30 }
 0x43f   : > { %v1935_v40 = vmul.f32 %v3845_v31, %v1892_v62  ;;  %v1937_v63 = vmul.f32 %v3845_v31, %v1894_v19  ;;  %v1939_v43 = vmul.f32 %v3845_v31, %v1896_v24  ;;  %v1941_v11 = vmul.f32 %v3845_v31, %v1898_v6 }
 0x440   : > { %v1854_v14 = vadd.f32 1e-05, %v1852_v45  ;;  %v1943_v55 = vmul.f32 %v3845_v31, %v1900_v18  ;;  %v1945_v52 = vmul.f32 %v3845_v31, %v1902_v12  ;;  %v1947_v21 = vmul.f32 %v3845_v31, %v1904_v51 }
 0x441   : > { %v1976_v25 = vadd.f32 %v3870_v49, %v1933_v26  ;;  %v1978_v50 = vadd.f32 %v3870_v49, %v1935_v40  ;;  %v1980_v0 = vadd.f32 %v3870_v49, %v1937_v63  ;;  %v1982_v1 = vadd.f32 %v3870_v49, %v1939_v43 }
 0x442   : > { %3144 = vrsqrt.f32 %v1854_v14  ;;  %v1984_v58 = vadd.f32 %v3870_v49, %v1941_v11  ;;  %v1986_v29 = vadd.f32 %v3870_v49, %v1943_v55  ;;  %v1988_v57 = vadd.f32 %v3870_v49, %v1945_v52 }
 0x443   : > { %v1990_v7 = vadd.f32 %v3870_v49, %v1947_v21  ;;  %v2008_v30 = vpack.c.bf16 %v1976_v25, %v1976_v25  ;;  %v2010_v62 = vpack.c.bf16 %v1978_v50, %v1978_v50  ;;  %v2012_v19 = vpack.c.bf16 %v1980_v0, %v1980_v0 }
 0x444   : > { %v2014_v24 = vpack.c.bf16 %v1982_v1, %v1982_v1  ;;  %v2016_v6 = vpack.c.bf16 %v1984_v58, %v1984_v58  ;;  %v2018_v9 = vpack.c.bf16 %v1986_v29, %v1986_v29  ;;  %v2020_v18 = vpack.c.bf16 %v1988_v57, %v1988_v57 }
 0x445   : > { %v2022_v12 = vpack.c.bf16 %v1990_v7, %v1990_v7  ;;  %v2078_v45 = vunpack.c.l.b16 %v2008_v30  ;;  %v2080_v51 = vunpack.c.l.b16 %v2010_v62  ;;  %v2082_v26 = vunpack.c.l.b16 %v2012_v19 }
 0x446   : > { %v2084_v40 = vunpack.c.l.b16 %v2014_v24  ;;  %v2086_v63 = vunpack.c.l.b16 %v2016_v6  ;;  %v3890_v43 = vunpack.c.l.b16 %v2018_v9  ;;  %v3892_v11 = vunpack.c.l.b16 %v2020_v18 }
 0x447   : > { %v3894_v14 = vunpack.c.l.b16 %v2022_v12  ;;  %v2123_v55 = vrot.slane %v2080_v51, 7  ;;  %v2125_v52 = vrot.slane %v2082_v26, 6  ;;  %v1889_v21 = vmul.f32 %v3842_v42, %v3613_v48 }
 0x448   : > { %v1895_v25 = vmul.f32 %v1861_v13, %v3610_v47  ;;  %v1897_v50 = vmul.f32 %v1862_v33, %v3622_v20  ;;  %v1899_v0 = vmul.f32 %v1863_v8, %v3631_v61  ;;  %v3902_v1 = vrot.slane %v605_v10, %v3410_v27 }
 0x449   : > { %v1901_v58 = vmul.f32 %v1864_v5, %v3637_v15  ;;  %v1903_v29 = vmul.f32 %v1865_v56, %v3647_v35  ;;  %v2124_v57 = vsel %vm1609_vm4, %v2123_v55, %v2078_v45  ;;  %v2127_v7 = vrot.slane %v2084_v40, 5 }
 0x44a   : > { %v2126_v30 = vsel %vm1611_vm5, %v2125_v52, %v2124_v57  ;;  %v2129_v62 = vrot.slane %v2086_v63, 4  ;;  %v2131_v48 = vrot.slane %v3890_v43, 3  ;;  %v2133_v47 = vrot.slane %v3892_v11, 2 }
 0x44b   : > { %v2135_v20 = vrot.slane %v3894_v14, 1  ;;  %v1932_v61 = vmul.f32 %v3864_v16, %v1889_v21  ;;  %v1934_v42 = vmul.f32 %v3864_v16, %v1891_v39  ;;  %v1936_v15 = vmul.f32 %v3864_v16, %v1893_v36 }
 0x44c   : > { %v3914_v13 = vpop.eup %3144  ;;  %v2128_v35 = vsel %vm1613_vm6, %v2127_v7, %v2126_v30  ;;  %v3918_v33 = vmul.f32 %v3864_v16, %v1895_v25  ;;  %v3921_v10 = vmul.f32 %v3864_v16, %v1897_v50  ;;  %v3924_v8 = vmul.f32 %v3864_v16, %v1899_v0 }
 0x44d   : > { %v1866_v5 = vrot.slane %v3914_v13, 1  ;;  %v1867_v56 = vrot.slane %v3914_v13, 2  ;;  %v1868_v39 = vrot.slane %v3914_v13, 3  ;;  %v1869_v36 = vrot.slane %v3914_v13, 4 }
 0x44e   : > { %v1870_v19 = vrot.slane %v3914_v13, 5  ;;  %v1871_v24 = vrot.slane %v3914_v13, 6  ;;  %v1872_v6 = vrot.slane %v3914_v13, 7  ;;  %v1906_v9 = vmul.f32 %v3914_v13, %v3713_v22 }
 0x44f   : > { %v1908_v18 = vmul.f32 %v1866_v5, %v3701_v60  ;;  %v1910_v12 = vmul.f32 %v1867_v56, %v3704_v44  ;;  %v3938_v45 = vmul.f32 %v3864_v16, %v1901_v58  ;;  %v3941_v51 = vmul.f32 %v3864_v16, %v1903_v29 }
 0x450   : > { %v1912_v26 = vmul.f32 %v1868_v39, %v3719_v53  ;;  %v1914_v40 = vmul.f32 %v1869_v36, %v3722_v37  ;;  %v2130_v63 = vsel %vm1615_vm7, %v2129_v62, %v2128_v35  ;;  %v3947_v55 = vadd.f32 %v3902_v1, %v1932_v61 }
 0x451   : > { %v1916_v22 = vmul.f32 %v1870_v19, %v3730_v59  ;;  %v1918_v60 = vmul.f32 %v1871_v24, %v3741_v38  ;;  %v3952_v44 = vadd.f32 %v3902_v1, %v1934_v42  ;;  %v3955_v52 = vadd.f32 %v3902_v1, %v1936_v15 }
 0x452   : > { %v1907_v21 = vmul.f32 %v1866_v5, %v3695_v17  ;;  %v1920_v53 = vmul.f32 %v1872_v6, %v3750_v4  ;;  %v1949_v37 = vmul.f32 %v3845_v31, %v1906_v9  ;;  %v1951_v25 = vmul.f32 %v3845_v31, %v1908_v18 }
 0x453   : > { %v1953_v50 = vmul.f32 %v3845_v31, %v1910_v12  ;;  %v1955_v59 = vmul.f32 %v3845_v31, %v1912_v26  ;;  %v1957_v38 = vmul.f32 %v3845_v31, %v1914_v40  ;;  %v1959_v0 = vmul.f32 %v3845_v31, %v1916_v22 }
 0x454   : > { %v1961_v58 = vmul.f32 %v3845_v31, %v1918_v60  ;;  %v1963_v29 = vmul.f32 %v3845_v31, %v1920_v53  ;;  %v1992_v17 = vadd.f32 %v3870_v49, %v1949_v37  ;;  %v1994_v4 = vadd.f32 %v3870_v49, %v1951_v25 }
 0x455   : > { %v1996_v57 = vadd.f32 %v3870_v49, %v1953_v50  ;;  %v1998_v7 = vadd.f32 %v3870_v49, %v1955_v59  ;;  %v2000_v30 = vadd.f32 %v3870_v49, %v1957_v38  ;;  %v2002_v62 = vadd.f32 %v3870_v49, %v1959_v0 }
 0x456   : > { %v2004_v61 = vadd.f32 %v3870_v49, %v1961_v58  ;;  %v2006_v42 = vadd.f32 %v3870_v49, %v1963_v29  ;;  %v2024_v15 = vpack.c.bf16 %v1992_v17, %v1992_v17  ;;  %v2026_v35 = vpack.c.bf16 %v1994_v4, %v1994_v4 }
 0x457   : > { %v2028_v5 = vpack.c.bf16 %v1996_v57, %v1996_v57  ;;  %v2030_v31 = vpack.c.bf16 %v1998_v7, %v1998_v7  ;;  %v2032_v9 = vpack.c.bf16 %v2000_v30, %v2000_v30  ;;  %v2034_v18 = vpack.c.bf16 %v2002_v62, %v2002_v62 }
 0x458   : > { %v1909_v12 = vmul.f32 %v1867_v56, %v3698_v41  ;;  %v2036_v26 = vpack.c.bf16 %v2004_v61, %v2004_v61  ;;  %v2038_v40 = vpack.c.bf16 %v2006_v42, %v2006_v42  ;;  %v2096_v22 = vunpack.c.l.b16 %v2026_v35 }
 0x459   : > { %v1911_v60 = vmul.f32 %v1868_v39, %v3707_v32  ;;  %v2098_v53 = vunpack.c.l.b16 %v2028_v5  ;;  %v2100_v37 = vunpack.c.l.b16 %v2030_v31  ;;  %v2102_v25 = vunpack.c.l.b16 %v2032_v9 }
 0x45a   : > { %v2094_v50 = vunpack.c.l.b16 %v2024_v15  ;;  %v2104_v59 = vunpack.c.l.b16 %v2034_v18  ;;  %v2132_v49 = vsel %vm1617_vm8, %v2131_v48, %v2130_v63  ;;  %v2151_v38 = vrot.slane %v2096_v22, 7 }
 0x45b   : > { %v1913_v0 = vmul.f32 %v1869_v36, %v3716_v23  ;;  %v1915_v58 = vmul.f32 %v1870_v19, %v3725_v54  ;;  %v2106_v41 = vunpack.c.l.b16 %v2036_v26  ;;  %v2153_v56 = vrot.slane %v2098_v53, 6 }
 0x45c   : > { %v2108_v29 = vunpack.c.l.b16 %v2038_v40  ;;  %v2134_v32 = vsel %vm1619_vm9, %v2133_v47, %v2132_v49  ;;  %v2152_v39 = vsel %vm1609_vm4, %v2151_v38, %v2094_v50  ;;  %v2155_v17 = vrot.slane %v2100_v37, 5 }
 0x45d   : > { %v1917_v4 = vmul.f32 %v1871_v24, %v3733_v3  ;;  %v2154_v43 = vsel %vm1611_vm5, %v2153_v56, %v2152_v39  ;;  %v2157_v48 = vrot.slane %v2102_v25, 4  ;;  %v1905_v23 = vmul.f32 %v3914_v13, %v3710_v2 }
 0x45e   : > { %v1919_v54 = vmul.f32 %v1872_v6, %v3736_v34  ;;  %v2156_v36 = vsel %vm1613_vm6, %v2155_v17, %v2154_v43  ;;  %v2159_v19 = vrot.slane %v2104_v59, 3  ;;  %v1950_v11 = vmul.f32 %v3864_v16, %v1907_v21 }
 0x45f   : > { %v2136_v47 = vsel %vm1621_vm10, %v2135_v20, %v2134_v32  ;;  %v2158_v63 = vsel %vm1615_vm7, %v2157_v48, %v2156_v36  ;;  %v2161_v3 = vrot.slane %v2106_v41, 2  ;;  %v1952_v24 = vmul.f32 %v3864_v16, %v1909_v12 }
 0x460   : > { %v2160_v57 = vsel %vm1617_vm8, %v2159_v19, %v2158_v63  ;;  %v2163_v7 = vrot.slane %v2108_v29, 1  ;;  %v1954_v2 = vmul.f32 %v3864_v16, %v1911_v60  ;;  %v1956_v34 = vmul.f32 %v3864_v16, %v1913_v0 }
 0x461   : > { %v2162_v13 = vsel %vm1619_vm9, %v2161_v3, %v2160_v57  ;;  %v1948_v6 = vmul.f32 %v3864_v16, %v1905_v23  ;;  %v1958_v14 = vmul.f32 %v3864_v16, %v1915_v58  ;;  %v1960_v20 = vmul.f32 %v3864_v16, %v1917_v4 }
 0x462   : > { %v2164_v21 = vsel %vm1621_vm10, %v2163_v7, %v2162_v13  ;;  %v1962_v30 = vmul.f32 %v3864_v16, %v1919_v54  ;;  %v1981_v62 = vadd.f32 %v3902_v1, %v3918_v33  ;;  %v1993_v61 = vadd.f32 %v3902_v1, %v1950_v11 }
 0x463   : > { %v4010_v42 = vpack.c.b16 %v2164_v21, %v2136_v47  ;;  %v1983_v15 = vadd.f32 %v3902_v1, %v3921_v10  ;;  %v1985_v35 = vadd.f32 %v3902_v1, %v3924_v8  ;;  %v1995_v5 = vadd.f32 %v3902_v1, %v1952_v24 }
 0x464   : > { %v1987_v31 = vadd.f32 %v3902_v1, %v3938_v45  ;;  %v1989_v16 = vadd.f32 %v3902_v1, %v3941_v51  ;;  %v1997_v33 = vadd.f32 %v3902_v1, %v1954_v2  ;;  %v2009_v9 = vpack.c.bf16 %v3952_v44, %v3952_v44 }
 0x465   : > { %2297 = vmatprep.mubr.bf16.mxu0 %v4010_v42  ;;  %v1991_v10 = vadd.f32 %v3902_v1, %v1948_v6  ;;  %v1999_v18 = vadd.f32 %v3902_v1, %v1956_v34  ;;  %v2001_v8 = vadd.f32 %v3902_v1, %v1958_v14  ;;  %v2011_v12 = vpack.c.bf16 %v3955_v52, %v3955_v52 }
 0x466   : > { %v2003_v45 = vadd.f32 %v3902_v1, %v1960_v20  ;;  %v2005_v51 = vadd.f32 %v3902_v1, %v1962_v30  ;;  %v2013_v26 = vpack.c.bf16 %v1981_v62, %v1981_v62  ;;  %v2025_v40 = vpack.c.bf16 %v1993_v61, %v1993_v61 }
 0x467   : > { %v2007_v44 = vpack.c.bf16 %v3947_v55, %v3947_v55  ;;  %v2015_v22 = vpack.c.bf16 %v1983_v15, %v1983_v15  ;;  %v2017_v60 = vpack.c.bf16 %v1985_v35, %v1985_v35  ;;  %v2027_v53 = vpack.c.bf16 %v1995_v5, %v1995_v5 }
 0x468   : > { %v2019_v37 = vpack.c.bf16 %v1987_v31, %v1987_v31  ;;  %v2021_v25 = vpack.c.bf16 %v1989_v16, %v1989_v16  ;;  %v2029_v50 = vpack.c.bf16 %v1997_v33, %v1997_v33  ;;  %v2079_v59 = vunpack.c.l.b16 %v2009_v9 }
 0x469   : > { %v2023_v49 = vpack.c.bf16 %v1991_v10, %v1991_v10  ;;  %v2031_v38 = vpack.c.bf16 %v1999_v18, %v1999_v18  ;;  %v2033_v0 = vpack.c.bf16 %v2001_v8, %v2001_v8  ;;  %v2081_v52 = vunpack.c.l.b16 %v2011_v12 }
 0x46a   : > { %v2035_v58 = vpack.c.bf16 %v2003_v45, %v2003_v45  ;;  %v2037_v41 = vpack.c.bf16 %v2005_v51, %v2005_v51  ;;  %v2083_v56 = vunpack.c.l.b16 %v2013_v26  ;;  %v2095_v1 = vunpack.c.l.b16 %v2025_v40  ;;  %v3102_v45 = vld [vmem:[%s4196_s11] sm:$0xff]   ;;  %v3103_v26 = vld [vmem:[%s4196_s11 + $0x48] sm:$0xff]  }
 0x46b   : > { %v2077_v29 = vunpack.c.l.b16 %v2007_v44  ;;  %v2085_v32 = vunpack.c.l.b16 %v2015_v22  ;;  %v2087_v39 = vunpack.c.l.b16 %v2017_v60  ;;  %v2097_v17 = vunpack.c.l.b16 %v2027_v53  ;;  %v3104_v40 = vld [vmem:[%s4196_s11 + $0x8] sm:$0xff]   ;;  %v3105_v44 = vld [vmem:[%s4196_s11 + $0x50] sm:$0xff]   ;;  %v3107_v60 = vld [vmem:[%s4196_s11 + $0x58] sm:$0xff]  }
 0x46c   : > { %v2089_v55 = vunpack.c.l.b16 %v2019_v37  ;;  %v2099_v4 = vunpack.c.l.b16 %v2029_v50  ;;  %v2109_v43 = vrot.slane %v2079_v59, 7  ;;  %v2111_v48 = vrot.slane %v2081_v52, 6  ;;  %v3106_v22 = vld [vmem:[%s4196_s11 + $0x10] sm:$0xff]   ;;  %v3109_v53 = vld [vmem:[%s4196_s11 + $0x60] sm:$0xff]   ;;  %v3112_v50 = vld [vmem:[%s4196_s11 + $0x28] sm:$0xff]  }
 0x46d   : > { %v2091_v23 = vunpack.c.l.b16 %v2021_v25  ;;  %v2093_v54 = vunpack.c.l.b16 %v2023_v49  ;;  %v2101_v36 = vunpack.c.l.b16 %v2031_v38  ;;  %v2103_v19 = vunpack.c.l.b16 %v2033_v0  ;;  %v3110_v37 = vld [vmem:[%s4196_s11 + $0x20] sm:$0xff]   ;;  %v3111_v25 = vld [vmem:[%s4196_s11 + $0x68] sm:$0xff]   ;;  %v3113_v59 = vld [vmem:[%s4196_s11 + $0x70] sm:$0xff]  }
 0x46e   : > { %v2110_v11 = vsel %vm1609_vm4, %v2109_v43, %v2077_v29  ;;  %v2113_v47 = vrot.slane %v2083_v56, 5  ;;  %v2137_v63 = vrot.slane %v2095_v1, 7  ;;  %v2139_v3 = vrot.slane %v2097_v17, 6  ;;  %v3114_v49 = vld [vmem:[%s4196_s11 + $0x30] sm:$0xff]   ;;  %v3115_v38 = vld [vmem:[%s4196_s11 + $0x78] sm:$0xff]  }
 0x46f   : > { %v2105_v24 = vunpack.c.l.b16 %v2035_v58  ;;  %v2107_v57 = vunpack.c.l.b16 %v2037_v41  ;;  %v2112_v7 = vsel %vm1611_vm5, %v2111_v48, %v2110_v11  ;;  %v2115_v2 = vrot.slane %v2085_v32, 4  ;;  %v3116_v0 = vld [vmem:[%s4196_s11 + $0x38] sm:$0xff]  }
 0x470   : > { %v2114_v34 = vsel %vm1613_vm6, %v2113_v47, %v2112_v7  ;;  %v2117_v13 = vrot.slane %v2087_v39, 3  ;;  %v2138_v6 = vsel %vm1609_vm4, %v2137_v63, %v2093_v54  ;;  %v2141_v14 = vrot.slane %v2099_v4, 5  ;;  %v2862_v39 = vld [vmem:[%s4197_s12] ss:$0 sm:$0xff] }
 0x471   : > { %v2116_v20 = vsel %vm1615_vm7, %v2115_v2, %v2114_v34  ;;  %v2119_v21 = vrot.slane %v2089_v55, 2  ;;  %v2140_v30 = vsel %vm1611_vm5, %v2139_v3, %v2138_v6  ;;  %v2143_v62 = vrot.slane %v2101_v36, 4 }
 0x472   : > { %v2118_v61 = vsel %vm1617_vm8, %v2117_v13, %v2116_v20  ;;  %v2142_v15 = vsel %vm1613_vm6, %v2141_v14, %v2140_v30  ;;  %v2145_v35 = vrot.slane %v2103_v19, 3  ;;  %v2147_v16 = vrot.slane %v2105_v24, 2 }
 0x473   : > { %v2120_v5 = vsel %vm1619_vm9, %v2119_v21, %v2118_v61  ;;  %v2144_v31 = vsel %vm1615_vm7, %v2143_v62, %v2142_v15  ;;  %v2121_v33 = vrot.slane %v2091_v23, 1  ;;  %v2149_v10 = vrot.slane %v2107_v57, 1 }
 0x474   : > { %v2146_v9 = vsel %vm1617_vm8, %v2145_v35, %v2144_v31 }
 0x475   : > { %v2148_v18 = vsel %vm1619_vm9, %v2147_v16, %v2146_v9  ;;  %v2122_v8 = vsel %vm1621_vm10, %v2121_v33, %v2120_v5 }
 0x476   : > { %v2150_v12 = vsel %vm1621_vm10, %v2149_v10, %v2148_v18  ;;  %v3168_v10 = vmov 0.0   ;;  %v676_v18 = vld [vmem:[%s4201_s16] sm:$0xff] }
 0x477   : > { %v2165_v51 = vpack.c.b16 %v2150_v12, %v2122_v8  ;;  %v677_v8 = vld [vmem:[%s4201_s16 + $0x8] sm:$0xff] }
 0x478   : > { %v3118_v12 = vld [vmem:[%s4202_s17] ss:$8 sps:$4 sm:$0xff]  }
 0x479   : > { %2298 = vmatmul.mubr.bf16.vlgmr.msra.gmra.mrb[16].mxu0 %v2165_v51 }
 0x47a   : > { %2951 = vmatpush3.bf16.msra.mxu0 %v3102_v45  ;;  %2458 = vmatprep.mubr.bf16.mxu0 %v4010_v42  ;;  %v3108_v42 = vld [vmem:[%s4196_s11 + $0x18] sm:$0xff]   ;;  %v3120_v45 = vld [vmem:[%s4202_s17 + $0x4] ss:$8 sps:$4 sm:$0xff]  }
 0x47b   : > { %2952 = vmatprep.subr.bf16.mxu0 %v3103_v26  ;;  %2679 = vmatprep.subr.bf16.mxu1 %v3120_v45  ;;  %v3121_v26 = vld [vmem:[%s4202_s17 + $0x10] ss:$8 sps:$4 sm:$0xff]  }
 0x47c   : > { %2680 = vmatpush1.bf16.msra.mxu1 %v3118_v12 }
 0x47e   : > { %2953 = vmatpush3.bf16.msra.mxu0 %v3104_v40  ;;  %v3126_v40 = vld [vmem:[%s4202_s17 + $0x24] ss:$8 sps:$4 sm:$0xff]  }
 0x47f   : > { %2954 = vmatprep.subr.bf16.mxu0 %v3105_v44  ;;  %v3124_v44 = vld [vmem:[%s4202_s17 + $0x20] ss:$8 sps:$4 sm:$0xff]  }
 0x482   : > { %2955 = vmatpush3.bf16.msra.mxu0 %v3106_v22  ;;  %v3129_v22 = vld [vmem:[%s4202_s17 + $0x34] ss:$8 sps:$4 sm:$0xff]  }
 0x483   : > { %2956 = vmatprep.subr.bf16.mxu0 %v3107_v60  ;;  %v3127_v60 = vld [vmem:[%s4202_s17 + $0x30] ss:$8 sps:$4 sm:$0xff]  }
 0x486   : > { %2957 = vmatpush3.bf16.msra.mxu0 %v3108_v42  ;;  %v3132_v42 = vld [vmem:[%s4202_s17 + $0x44] ss:$8 sps:$4 sm:$0xff]  }
 0x487   : > { %2958 = vmatprep.subr.bf16.mxu0 %v3109_v53  ;;  %v3130_v53 = vld [vmem:[%s4202_s17 + $0x40] ss:$8 sps:$4 sm:$0xff]  }
 0x48a   : > { %2959 = vmatpush3.bf16.msra.mxu0 %v3110_v37  ;;  %v3135_v37 = vld [vmem:[%s4202_s17 + $0x54] ss:$8 sps:$4 sm:$0xff]  }
 0x48b   : > { %2960 = vmatprep.subr.bf16.mxu0 %v3111_v25  ;;  %v3133_v25 = vld [vmem:[%s4202_s17 + $0x50] ss:$8 sps:$4 sm:$0xff]  }
 0x48e   : > { %2961 = vmatpush3.bf16.msra.mxu0 %v3112_v50  ;;  %v3138_v50 = vld [vmem:[%s4202_s17 + $0x64] ss:$8 sps:$4 sm:$0xff]  }
 0x48f   : > { %2962 = vmatprep.subr.bf16.mxu0 %v3113_v59  ;;  %v3136_v59 = vld [vmem:[%s4202_s17 + $0x60] ss:$8 sps:$4 sm:$0xff]  }
 0x492   : > { %2963 = vmatpush3.bf16.msra.mxu0 %v3114_v49 }
 0x493   : > { %2964 = vmatprep.subr.bf16.mxu0 %v3115_v38 }
 0x496   : > { %2965 = vmatpush3.bf16.msra.mxu0 %v3116_v0 }
 0x497   : > { %3024 = vmatprep.subr.bf16.mxu0 %v3168_v10 }
 0x499   : > { %2459 = vmatmul.mubr.bf16.vlgmr.msra.gmra.mrb[20].mxu0 %v2165_v51  ;;  %v3123_v51 = vld [vmem:[%s4202_s17 + $0x14] ss:$8 sps:$4 sm:$0xff]  }
 0x49a   : > { %3026 = vmatprep.mubr.msk.bf16.mxu0 %vm3169_vm11, %v3168_v10  ;;  %2681 = vmatprep.subr.bf16.mxu1 %v3123_v51 }
 0x49b   : > { %2682 = vmatpush1.bf16.msra.mxu1 %v3121_v26 }
 0x49c   : > { %2683 = vmatprep.subr.bf16.mxu1 %v3126_v40 }
 0x49f   : > { %2684 = vmatpush1.bf16.msra.mxu1 %v3124_v44  ;;  %v694_v44 = vld [vmem:[%s4203_s18] sm:$0x3] }
 0x4a0   : > { %2685 = vmatprep.subr.bf16.mxu1 %v3129_v22  ;;  %v2592_v22 = vrot.slane %v694_v44, %v3410_v27  ;;  %v4222_v27 = vld [vmem:[#allocation3_spill] sm:$0xff] }
 0x4a3   : > { %2686 = vmatpush1.bf16.msra.mxu1 %v3127_v60  ;;  %v2596_v60 = vrot.slane %v694_v44, %v3415_v28 }
 0x4a4   : > { %2687 = vmatprep.subr.bf16.mxu1 %v3132_v42 }
 0x4a7   : > { %2688 = vmatpush1.bf16.msra.mxu1 %v3130_v53 }
 0x4a8   : > { %2689 = vmatprep.subr.bf16.mxu1 %v3135_v37 }
 0x4ab   : > { %2690 = vmatpush1.bf16.msra.mxu1 %v3133_v25 }
 0x4ac   : > { %2691 = vmatprep.subr.bf16.mxu1 %v3138_v50 }
 0x4af   : > { %2692 = vmatpush1.bf16.msra.mxu1 %v3136_v59 }
 0x54c   : > { %v2944_v52 = vpop.f32.mrb[16].mxu0 }
 0x54d   : > { %v2945_v58 = vpop.f32.mrb[17].mxu0 }
 0x54e   : > { %v4094_v41 = vadd.f32 %v2945_v58, %v2944_v52  ;;  %v2947_v56 = vpop.f32.mrb[18].mxu0 }
 0x54f   : > { %v2948_v1 = vpop.f32.mrb[19].mxu0 }
 0x550   : > { %v4096_v29 = vadd.f32 %v2948_v1, %v2947_v56 }
 0x56c   : > { %v2966_v32 = vpop.f32.mrb[20].mxu0 }
 0x56d   : > { %v2967_v17 = vpop.f32.mrb[21].mxu0 }
 0x56e   : > { %v2968_v55 = vadd.f32 %v2967_v17, %v2966_v32  ;;  %v2969_v4 = vpop.f32.mrb[22].mxu0  ;;  %v2879_v32 = vld [vmem:[%s4198_s13] ss:$0 sm:$0xff] }
 0x56f   : > { %v2970_v43 = vpop.f32.mrb[23].mxu0 }
 0x570   : > { %v2461_v48 = vadd.f32 %v2968_v55, %v2862_v39  ;;  %v2971_v23 = vadd.f32 %v2970_v43, %v2969_v4  ;;  %v2880_v43 = vld [vmem:[%s4199_s14] ss:$0 sm:$0xff] }
 0x572   : > { %v2467_v54 = vmul.f32 %v2461_v48, %v2461_v48  ;;  %v2464_v36 = vadd.f32 %v2971_v23, %v2862_v39 }
 0x574   : > { %v2468_v19 = vmul.f32 %v2464_v36, %v2464_v36  ;;  %v2469_v11 = vmul.f32 %v2467_v54, %v2461_v48 }
 0x576   : > { %v2471_v47 = vmul.f32 0.044715, %v2469_v11  ;;  %v2470_v63 = vmul.f32 %v2468_v19, %v2464_v36  ;;  %v3117_v19 = vld [vmem:[%s4200_s15] sm:$0xff]   ;;  %v3139_v11 = vld [vmem:[%s4202_s17 + $0x70] ss:$8 sps:$4 sm:$0xff]  }
 0x578   : > { %v2473_v3 = vadd.f32 %v2471_v47, %v2461_v48  ;;  %v2472_v24 = vmul.f32 0.044715, %v2470_v63  ;;  %v3141_v47 = vld [vmem:[%s4202_s17 + $0x74] ss:$8 sps:$4 sm:$0xff]   ;;  %v2845_v63 = vld [vmem:[%s4195_s10] ss:$0 sm:$0xff] }
 0x579   : > { %2693 = vmatprep.subr.bf16.mxu1 %v3141_v47 }
 0x57a   : > { %v2475_v57 = vmul.f32 0.7978846, %v2473_v3  ;;  %v2474_v7 = vadd.f32 %v2472_v24, %v2464_v36  ;;  %2694 = vmatpush1.bf16.msra.mxu1 %v3139_v11  ;;  %v2300_v3 = vadd.f32 %v4094_v41, %v2845_v63  ;;  %v2303_v24 = vadd.f32 %v4096_v29, %v2845_v63 }
 0x57c   : > { %3146 = vtanh.f32 %v2475_v57  ;;  %v2476_v2 = vmul.f32 0.7978846, %v2474_v7  ;;  %v2306_v57 = vmul.f32 %v2300_v3, %v2300_v3  ;;  %v2307_v7 = vmul.f32 %v2303_v24, %v2303_v24 }
 0x57e   : > { %3148 = vtanh.f32 %v2476_v2  ;;  %v2308_v2 = vmul.f32 %v2306_v57, %v2300_v3 }
 0x586   : > { %v3147_v34 = vpop.eup %3146 }
 0x587   : > { %v2479_v13 = vadd.f32 1.0, %v3147_v34  ;;  %v2309_v34 = vmul.f32 %v2307_v7, %v2303_v24 }
 0x588   : > { %v3149_v6 = vpop.eup %3148 }
 0x589   : > { %v2481_v14 = vmul.f32 0.5, %v2479_v13  ;;  %v2480_v20 = vadd.f32 1.0, %v3149_v6  ;;  %v2310_v13 = vmul.f32 0.044715, %v2308_v2  ;;  %v2311_v6 = vmul.f32 0.044715, %v2309_v34 }
 0x58b   : > { %v2483_v21 = vmul.f32 %v2481_v14, %v2461_v48  ;;  %v2482_v30 = vmul.f32 0.5, %v2480_v20  ;;  %v2312_v14 = vadd.f32 %v2310_v13, %v2300_v3  ;;  %v2313_v20 = vadd.f32 %v2311_v6, %v2303_v24 }
 0x58d   : > { %2485 = vadd.xlane.f32.xlu0 %v2483_v21  ;;  %v2484_v62 = vmul.f32 %v2482_v30, %v2464_v36  ;;  %v2315_v30 = vmul.f32 0.7978846, %v2313_v20 }
 0x58f   : > { %2487 = vadd.xlane.f32.xlu1 %v2484_v62 }
 0x61a   : > { %v2486_v61 = vpop.xlane.xlu0 %2485 }
 0x61b   : > { %v2490_v15 = vmul.f32 0.0078125, %v2486_v61 }
 0x61c   : > { %v2488_v35 = vpop.xlane.xlu1 %2487 }
 0x61d   : > { %v2492_v5 = vsub.f32 %v2483_v21, %v2490_v15  ;;  %v2491_v31 = vmul.f32 0.0078125, %v2488_v35  ;;  %v2314_v21 = vmul.f32 0.7978846, %v2312_v14 }
 0x61f   : > { %v2493_v16 = vsub.f32 %v2484_v62, %v2491_v31  ;;  %v2494_v33 = vmul.f32 %v2492_v5, %v2492_v5 }
 0x621   : > { %2496 = vadd.xlane.f32.xlu0 %v2494_v33  ;;  %v2495_v9 = vmul.f32 %v2493_v16, %v2493_v16 }
 0x623   : > { %2498 = vadd.xlane.f32.xlu1 %v2495_v9 }
 0x634   : > { %2532 = vperm.xlu1 %3043, %v677_v8  }
 0x637   : > { %2527 = vperm.xlu0 %3042, %v676_v18  }
 0x6ae   : > { %v2497_v49 = vpop.xlane.xlu0 %2496 }
 0x6af   : > { %v2500_v38 = vmul.f32 0.0078125, %v2497_v49 }
 0x6b0   : > { %v2499_v0 = vpop.xlane.xlu1 %2498 }
 0x6b1   : > { %v2502_v52 = vadd.f32 1e-05, %v2500_v38  ;;  %v2501_v58 = vmul.f32 0.0078125, %v2499_v0  ;;  %v4221_v0 = vld [vmem:[#allocation2_spill] sm:$0xff] }
 0x6b3   : > { %3150 = vrsqrt.f32 %v2502_v52  ;;  %v2503_v56 = vadd.f32 1e-05, %v2501_v58 }
 0x6b5   : > { %3152 = vrsqrt.f32 %v2503_v56  ;;  %v4223_v56 = vld [vmem:[#allocation4_spill] sm:$0xff] }
 0x6b6   : > { %3154 = vtanh.f32 %v2314_v21  ;;  %v2528_v41 = vpop.permute.xlu0 %2527 }
 0x6b7   : > { %3156 = vtanh.f32 %v2315_v30 }
 0x6bd   : > { %v3151_v1 = vpop.eup %3150 }
 0x6be   : > { %v2506_v39 = vmul.f32 %v3151_v1, %v2492_v5 }
 0x6bf   : > { %v3153_v17 = vpop.eup %3152 }
 0x6c0   : > { %v2507_v55 = vmul.f32 %v3153_v17, %v2493_v16  ;;  %v2514_v4 = vmul.f32 %v2879_v32, %v2506_v39  ;;  %v3155_v62 = vpop.eup %3154  ;;  %v2533_v16 = vpop.permute.xlu1 %2532 }
 0x6c1   : > { %v3157_v61 = vpop.eup %3156  ;;  %v2318_v15 = vadd.f32 1.0, %v3155_v62 }
 0x6c2   : > { %v2515_v48 = vmul.f32 %v2879_v32, %v2507_v55  ;;  %v2522_v23 = vadd.f32 %v2880_v43, %v2514_v4  ;;  %v2319_v35 = vadd.f32 1.0, %v3157_v61 }
 0x6c3   : > { %v2320_v5 = vmul.f32 0.5, %v2318_v15 }
 0x6c4   : > { %v2523_v54 = vadd.f32 %v2880_v43, %v2515_v48  ;;  %v2321_v31 = vmul.f32 0.5, %v2319_v35 }
 0x6c5   : > { %v2322_v33 = vmul.f32 %v2320_v5, %v2300_v3 }
 0x6c6   : > { %v2524_v36 = vpack.c.bf16 %v2523_v54, %v2522_v23  ;;  %v2323_v12 = vmul.f32 %v2321_v31, %v2303_v24 }
 0x6c8   : > { %3025 = vmatpush3.bf16.msra.mxu0 %v2524_v36 }
 0x6cb   : > { %3027 = vmatmul.mubr.msk.bf16.vlgmr.msra.gmra.mrb[24].mxu0 %vm2540_vm12, %v3117_v19 }
 0x79e   : > { %v2578_v29 = vpop.f32.mrb[24].mxu0 }
 0x79f   : > { %v2579_v9 = vadd.f32 %v2578_v29, %v2528_v41  ;;  %v3028_v10 = vpop.f32.mrb[25].mxu0 }
 0x7a0   : > { %v2581_v18 = vpop.f32.mrb[26].mxu0 }
 0x7a1   : > { %v2585_v8 = vmul.f32 %v2579_v9, %v2322_v33  ;;  %v2582_v45 = vadd.f32 %v2581_v18, %v2533_v16  ;;  %v3029_v51 = vpop.f32.mrb[27].mxu0 }
 0x7a3   : > { %v2586_v26 = vmul.f32 %v2582_v45, %v2323_v12 }
 0x7a5   : > { %v2587_v40 = vpack.c.bf16 %v2586_v26, %v2585_v8 }
 0x7a7   : > { %2712 = vmatmul.mubr.bf16.vlgmr.msra.gmra.mrb[48].mxu1 %v2587_v40 }
 0x87a   : > { %v2713_v42 = vpop.f32.mrb[48].mxu1 }
 0x87b   : > { %v2714_v53 = vadd.f32 %v2713_v42, %v2592_v22  ;;  %v2715_v37 = vpop.f32.mrb[49].mxu1 }
 0x87c   : > { %v2716_v25 = vadd.f32 %v2715_v37, %v2596_v60  ;;  %v2717_v50 = vpop.f32.mrb[50].mxu1 }
 0x87d   : > { %v2722_v59 = vadd.f32 %v2714_v53, %v3518_v46  ;;  %v2718_v49 = vadd.f32 %v2717_v50, %v2592_v22  ;;  %v2719_v38 = vpop.f32.mrb[51].mxu1 }
 0x87e   : > { %v2723_v52 = vadd.f32 %v2716_v25, %v4221_v0  ;;  %v2720_v58 = vadd.f32 %v2719_v38, %v2596_v60 }
 0x87f   : > { %2726 = vst [vmem:[%s602_s24] sm:$0xff] %v2722_v59  ;;  %v2724_v28 = vadd.f32 %v2718_v49, %v4222_v27 }
 0x880   : > { %2727 = vst [vmem:[%s602_s24 + $0x8] sm:$0xff] %v2723_v52  ;;  %v2725_v1 = vadd.f32 %v2720_v58, %v4223_v56 }
 0x881   : > { %2728 = vst [vmem:[%s602_s24 + $0x10] sm:$0xff] %v2724_v28 }
 0x882   : > { %2729 = vst [vmem:[%s602_s24 + $0x18] sm:$0xff] %v2725_v1 }
 0x883 PF: > { %s29_s0 = sadd.s32 1, %s3164_s0  }
 0x884   : > { %p26_p4 = scmp.ge.s32.totalorder %s29_s0, 4  }
 0x886   :  { %28 = sbr.rel (!%p26_p4) target bundleno = 5 (0x5), region = 126 }

// kernel: forward.6
= control target key start
LH: loop header
LB: loop body
LE: loop exit
PB: predicated region body
PF: predicated region fallthrough
CT: control target
= control target key end

     0   :  { %s1934_s24 = smov 0   ;;  %s2151_s0 = inlined_call_operand.vmem [shape: bf16[2,32,320], index: 0, kind: input, shape index: {}]   ;;  %s2152_s1 = inlined_call_operand.vmem [shape: bf16[320,64], index: 1, kind: input, shape index: {}]   ;;  %s2153_s2 = inlined_call_operand.vmem [shape: f32[1,64], index: 2, kind: input, shape index: {}]   ;;  %s2154_s3 = inlined_call_operand.vmem [shape: bf16[64,32], index: 3, kind: input, shape index: {}]   ;;  %s2155_s4 = inlined_call_operand.vmem [shape: f32[1,32], index: 4, kind: input, shape index: {}]   ;;  %s2156_s5 = inlined_call_operand.vmem [shape: f32[1,32], index: 5, kind: input, shape index: {}]   ;;  %s2157_s6 = inlined_call_operand.vmem [shape: f32[1,32], index: 6, kind: input, shape index: {}]   ;;  %s2158_s7 = inlined_call_operand.vmem [shape: bf16[32,16], index: 7, kind: input, shape index: {}]   ;;  %s2159_s8 = inlined_call_operand.vmem [shape: f32[1,16], index: 8, kind: input, shape index: {}]   ;;  %s2160_s9 = inlined_call_operand.vmem [shape: bf16[32,16], index: 9, kind: input, shape index: {}]   ;;  %s2161_s10 = inlined_call_operand.vmem [shape: f32[1,16], index: 10, kind: input, shape index: {}]   ;;  %s2162_s11 = inlined_call_operand.vmem [shape: f32[1,16], index: 11, kind: input, shape index: {}]   ;;  %s2163_s12 = inlined_call_operand.vmem [shape: f32[1,16], index: 12, kind: input, shape index: {}]   ;;  %s2164_s13 = inlined_call_operand.vmem [shape: bf16[32,32], index: 13, kind: input, shape index: {}]   ;;  %s2165_s14 = inlined_call_operand.vmem [shape: f32[32,1], index: 14, kind: input, shape index: {}]   ;;  %s2166_s15 = inlined_call_operand.vmem [shape: bf16[16,32], index: 15, kind: input, shape index: {}]   ;;  %s2167_s16 = inlined_call_operand.vmem [shape: f32[1,32], index: 16, kind: input, shape index: {}]   ;;  %s2168_s17 = inlined_call_operand.vmem [shape: f32[2,32,32], index: 17, kind: output, shape index: {}]  }
   0x1   :  { %2171 = sst [smem:[#allocation3_spill]] %s2151_s0 }
   0x2   :  { %2172 = sst [smem:[#allocation4_spill]] %s2152_s1 }
   0x3 LB: > { %2173 = sst [smem:[#allocation2_spill]] %s1841_s24  ;;  %s1574_s25 = sadd.s32 4294967295, %s1841_s24   ;;  %s1841_s24 = sphi %s1934_s24, %s27_s24  }
   0x4   : > { %p1578_p0 = scmp.ge.s32.totalorder %s1841_s24, 1  ;;  %p487_p1 = scmp.lt.s32.totalorder %s1841_s24, 3 }
   0x6   : > { %p488_p2 = pnand %p1578_p0, %p487_p1 }
   0x7   : > { %s2174_s28 = sld [smem:[#allocation4_spill]] (!%p488_p2)  ;;  %p539_p3 = scmp.lt.s32.totalorder (!%p488_p2), %s1574_s25, 1  ;;  %vm780_vm0 = vcmask (!%p488_p2), 523264   ;;  %v1792_v26 = vld [vmem:[%s2154_s3] sm:$0xff] (!%p488_p2)   ;;  %v1793_v27 = vld [vmem:[%s2154_s3 + $0x8] sm:$0xff] (!%p488_p2)   ;;  %v1794_v28 = vld [vmem:[%s2154_s3 + $0x10] sm:$0xff] (!%p488_p2)  }
   0x8   : > { %491 = sbr.rel (%p488_p2) target bundleno = 1828 (0x724), region = 88  ;;  %s2175_s1 = sld [smem:[#allocation3_spill]] (!%p488_p2)  ;;  %v1795_v29 = vld [vmem:[%s2154_s3 + $0x18] sm:$0xff] (!%p488_p2)   ;;  %v1582_v36 = vld [vmem:[%s2153_s2] ss:$0 sm:$0xff] (!%p488_p2)  ;;  %vm989_vm1 = vcmask (!%p488_p2), 261120  }
   0x9   : > { %v1611_v61 = vld [vmem:[%s2155_s4] ss:$0 sm:$0xff] (!%p488_p2)  ;;  %vm1277_vm2 = vcmask (!%p488_p2), 130048  }
   0xd   : > { %v1764_v0 = vld [vmem:[%s2174_s28 + $0x40] sm:$0xff] (!%p488_p2)   ;;  %v1766_v2 = vld [vmem:[%s2174_s28 + $0x48] sm:$0xff] (!%p488_p2)   ;;  %v1768_v4 = vld [vmem:[%s2174_s28 + $0x50] sm:$0xff] (!%p488_p2)  }
   0xe   : > { %v1765_v1 = vld [vmem:[%s2174_s28] sm:$0xff] (!%p488_p2)   ;;  %1643 = vmatprep.subr.bf16.mxu0 (!%p488_p2), %v1764_v0  ;;  %v1767_v3 = vld [vmem:[%s2174_s28 + $0x8] sm:$0xff] (!%p488_p2)   ;;  %v1769_v5 = vld [vmem:[%s2174_s28 + $0x10] sm:$0xff] (!%p488_p2)  }
   0xf   : > { %1644 = vmatpush3.bf16.msra.mxu0 %v1765_v1  ;;  %v1770_v6 = vld [vmem:[%s2174_s28 + $0x58] sm:$0xff]   ;;  %s2178_s25 = smov (!%p539_p3, %s1574_s25), 1  ;;  %v1775_v8 = vld [vmem:[%s2174_s28 + $0x80] sm:$0xff]   ;;  %v1778_v10 = vld [vmem:[%s2174_s28 + $0x88] sm:$0xff]  }
  0x10   : > { %1645 = vmatprep.subr.bf16.mxu0 %v1766_v2  ;;  %v1771_v7 = vld [vmem:[%s2174_s28 + $0x18] sm:$0xff]   ;;  %v1772_v9 = vld [vmem:[%s2174_s28 + $0x60] sm:$0xff]   ;;  %1698 = vmatprep.subr.bf16.mxu1 %v1775_v8  ;;  %s1752_s20 = smul.u32 48, %s2178_s25  ;;  %v1774_v12 = vld [vmem:[%s2174_s28 + $0x68] sm:$0xff]   ;;  %s1642_s0 = sshll.u32 %s2178_s25, 5 }
  0x11   : > { %1699 = vmatpush3.bf16.msra.mxu1 %v1775_v8  ;;  %v1773_v11 = vld [vmem:[%s2174_s28 + $0x20] sm:$0xff]   ;;  %v1781_v13 = vld [vmem:[%s2174_s28 + $0x90] sm:$0xff]   ;;  %v1776_v14 = vld [vmem:[%s2174_s28 + $0x28] sm:$0xff]   ;;  %s548_s19 = scalar_lea.vmem %s2168_s17, %s1642_s0 }
  0x12   : > { %1700 = vmatprep.subr.bf16.mxu1 %v1778_v10  ;;  %s543_s21 = scalar_lea.vmem %s2175_s1, %s1752_s20  ;;  %v1777_v15 = vld [vmem:[%s2174_s28 + $0x70] sm:$0xff]   ;;  %v1786_v17 = vld [vmem:[%s2174_s28 + $0x98] sm:$0xff]  }
  0x13   : > { %1646 = vmatpush3.bf16.msra.mxu0 %v1767_v3  ;;  %v1785_v16 = vld [vmem:[%s543_s21 + $0x4] ss:$12 sps:$4 sm:$0xff]   ;;  %v1787_v18 = vld [vmem:[%s543_s21 + $0x8] ss:$12 sps:$4 sm:$0xff]   ;;  %v1780_v20 = vld [vmem:[%s2174_s28 + $0x78] sm:$0xff]  }
  0x14   : > { %1647 = vmatprep.subr.bf16.mxu0 %v1768_v4  ;;  %819 = vmatprep.mubr.bf16.mxu0 %v1785_v16  ;;  %v1779_v19 = vld [vmem:[%s2174_s28 + $0x30] sm:$0xff]   ;;  %v1788_v21 = vld [vmem:[%s543_s21 + $0x20] ss:$12 sps:$4 sm:$0xff]   ;;  %v1782_v22 = vld [vmem:[%s2174_s28 + $0x38] sm:$0xff]  }
  0x15   : > { %1701 = vmatpush3.bf16.msra.mxu1 %v1778_v10  ;;  %1706 = vmatprep.mubr.msk.bf16.mxu1 %vm780_vm0, %v1787_v18  ;;  %v1783_v23 = vld [vmem:[%s543_s21] ss:$12 sps:$4 sm:$0xff]   ;;  %v1789_v24 = vld [vmem:[%s543_s21 + $0x1c] ss:$12 sps:$4 sm:$0xff]   ;;  %v1791_v25 = vld [vmem:[%s543_s21 + $0x18] ss:$12 sps:$4 sm:$0xff]  }
  0x16   : > { %1702 = vmatprep.subr.bf16.mxu1 %v1781_v13 }
  0x17   : > { %1648 = vmatpush3.bf16.msra.mxu0 %v1769_v5 }
  0x18   : > { %1649 = vmatprep.subr.bf16.mxu0 %v1770_v6 }
  0x19   : > { %1703 = vmatpush3.bf16.msra.mxu1 %v1781_v13 }
  0x1a   : > { %1704 = vmatprep.subr.bf16.mxu1 %v1786_v17 }
  0x1b   : > { %1650 = vmatpush3.bf16.msra.mxu0 %v1771_v7 }
  0x1c   : > { %1651 = vmatprep.subr.bf16.mxu0 %v1772_v9 }
  0x1d   : > { %1705 = vmatpush3.bf16.msra.mxu1 %v1786_v17 }
  0x1e   : > { %1710 = vmatprep.subr.bf16.mxu1 %v1792_v26 }
  0x1f   : > { %1652 = vmatpush3.bf16.msra.mxu0 %v1773_v11 }
  0x20   : > { %1653 = vmatprep.subr.bf16.mxu0 %v1774_v12  ;;  %1707 = vmatmul.mubr.msk.bf16.vlgmr.msra.gmra.mrb[0].mxu1 %vm780_vm0, %v1788_v21 }
  0x21   : > { %1711 = vmatpush3.bf16.msra.mxu1 %v1792_v26 }
  0x22   : > { %1712 = vmatprep.subr.bf16.mxu1 %v1793_v27 }
  0x23   : > { %1654 = vmatpush3.bf16.msra.mxu0 %v1776_v14 }
  0x24   : > { %1655 = vmatprep.subr.bf16.mxu0 %v1777_v15 }
  0x25   : > { %1713 = vmatpush3.bf16.msra.mxu1 %v1793_v27 }
  0x26   : > { %1714 = vmatprep.subr.bf16.mxu1 %v1794_v28 }
  0x27   : > { %1656 = vmatpush3.bf16.msra.mxu0 %v1779_v19 }
  0x28   : > { %1657 = vmatprep.subr.bf16.mxu0 %v1780_v20 }
  0x29   : > { %1715 = vmatpush3.bf16.msra.mxu1 %v1794_v28 }
  0x2a   : > { %1716 = vmatprep.subr.bf16.mxu1 %v1795_v29 }
  0x2b   : > { %1658 = vmatpush3.bf16.msra.mxu0 %v1782_v22 }
  0x2d   : > { %1717 = vmatpush3.bf16.msra.mxu1 %v1795_v29 }
  0x2e   : > { %820 = vmatmul.mubr.bf16.vlgmr.msra.gmra.mrb[0].mxu0 %v1783_v23 }
  0x2f   : > { %827 = vmatprep.mubr.bf16.mxu0 %v1789_v24 }
  0x36   : > { %828 = vmatmul.mubr.bf16.gmra.mrb[4].mxu0 %v1791_v25 }
  0xf3   : > { %v1708_v30 = vpop.f32.mrb[0].mxu1 }
  0xf4   : > { %v870_v31 = vpop.f32.mrb[1].mxu1 }
  0xf5   : > { %v1709_v32 = vpop.f32.mrb[2].mxu1 }
  0xf6   : > { %v873_v33 = vpop.f32.mrb[3].mxu1 }
 0x101   : > { %v1659_v34 = vpop.f32.mrb[0].mxu0 }
 0x102   : > { %v1660_v35 = vpop.f32.mrb[1].mxu0 }
 0x103   : > { %v1661_v37 = vadd.f32 %v1660_v35, %v1659_v34  ;;  %v1662_v38 = vpop.f32.mrb[2].mxu0  ;;  %v1796_v34 = vld [vmem:[%s2160_s9] sm:$0xff]  }
 0x104   : > { %v1663_v39 = vpop.f32.mrb[3].mxu0  ;;  %v1797_v35 = vld [vmem:[%s2158_s7] sm:$0xff]   ;;  %1730 = vmatprep.subr.bf16.mxu0 %v1796_v34 }
 0x105   : > { %v1664_v40 = vadd.f32 %v1663_v39, %v1662_v38  ;;  %v822_v41 = vadd.f32 %v1661_v37, %v1582_v36  ;;  %1722 = vmatprep.subr.bf16.mxu1 %v1797_v35  ;;  %1731 = vmatpush3.bf16.msra.mxu0 %v1796_v34  ;;  %v1799_v37 = vld [vmem:[%s2158_s7 + $0x8] sm:$0xff]  }
 0x107   : > { %v871_v42 = vadd.f32 %v870_v31, %v822_v41  ;;  %v825_v43 = vadd.f32 %v1664_v40, %v1582_v36 }
 0x109   : > { %v874_v44 = vadd.f32 %v873_v33, %v825_v43  ;;  %v1665_v45 = vpop.f32.mrb[4].mxu0  ;;  %v885_v47 = vmax.f32 %v871_v42, 0.0 }
 0x10a   : > { %v1666_v46 = vpop.f32.mrb[5].mxu0 }
 0x10b   : > { %v886_v48 = vmax.f32 %v874_v44, 0.0  ;;  %v1667_v49 = vadd.f32 %v1666_v46, %v1665_v45  ;;  %v1668_v50 = vpop.f32.mrb[6].mxu0 }
 0x10c   : > { %v1669_v51 = vpop.f32.mrb[7].mxu0 }
 0x10d   : > { %v898_v52 = vpack.c.bf16 %v886_v48, %v885_v47  ;;  %v830_v53 = vadd.f32 %v1667_v49, %v1582_v36  ;;  %v1670_v54 = vadd.f32 %v1669_v51, %v1668_v50 }
 0x10f   : > { %v879_v55 = vadd.f32 %v1708_v30, %v830_v53  ;;  %v833_v56 = vadd.f32 %v1670_v54, %v1582_v36  ;;  %1718 = vmatprep.mubr.msk.bf16.mxu1 %vm780_vm0, %v898_v52  ;;  %v1798_v36 = vld [vmem:[%s2160_s9 + $0x8] sm:$0xff]   ;;  %v1618_v52 = vld [vmem:[%s2156_s5] ss:$0 sm:$0xff] }
 0x110   : > { %1732 = vmatprep.subr.bf16.mxu0 %v1798_v36 }
 0x111   : > { %v882_v57 = vadd.f32 %v1709_v32, %v833_v56  ;;  %v887_v58 = vmax.f32 %v879_v55, 0.0  ;;  %1733 = vmatpush3.bf16.msra.mxu0 %v1798_v36 }
 0x113   : > { %v888_v59 = vmax.f32 %v882_v57, 0.0 }
 0x115   : > { %v899_v60 = vpack.c.bf16 %v888_v59, %v887_v58  ;;  %v1619_v58 = vld [vmem:[%s2157_s6] ss:$0 sm:$0xff] }
 0x117   : > { %1719 = vmatmul.mubr.msk.bf16.vlgmr.msra.gmra.mrb[4].mxu1 %vm780_vm0, %v899_v60 }
 0x118   : > { %1723 = vmatpush3.bf16.msra.mxu1 %v1797_v35 }
 0x119   : > { %1724 = vmatprep.subr.bf16.mxu1 %v1799_v37 }
 0x11c   : > { %1725 = vmatpush3.bf16.msra.mxu1 %v1799_v37 }
 0x1ea   : > { %v1720_v62 = vpop.f32.mrb[4].mxu1 }
 0x1eb   : > { %v979_v63 = vadd.f32 %v1720_v62, %v1611_v61  ;;  %v970_v0 = vpop.f32.mrb[5].mxu1 }
 0x1ec   : > { %v971_v1 = vadd.f32 %v1611_v61, %v970_v0  ;;  %v1721_v2 = vpop.f32.mrb[6].mxu1 }
 0x1ed   : > { %v2030_v3 = vmax.f32 %v979_v63, 0.0  ;;  %v982_v4 = vadd.f32 %v1721_v2, %v1611_v61  ;;  %v973_v5 = vpop.f32.mrb[7].mxu1 }
 0x1ee   : > { %v2032_v6 = vmax.f32 %v971_v1, 0.0  ;;  %v974_v7 = vadd.f32 %v1611_v61, %v973_v5 }
 0x1ef   : > { %v2034_v8 = vmax.f32 %v982_v4, 0.0  ;;  %v996_v9 = vsel %vm989_vm1, %v2030_v3, 0.0 }
 0x1f0   : > { %v2038_v10 = vmax.f32 %v974_v7, 0.0  ;;  %997 = vadd.xlane.f32.xlu1 %v996_v9  ;;  %v990_v11 = vsel %vm989_vm1, %v2032_v6, 0.0  ;;  %v1625_v9 = vld [vmem:[%s2161_s10] ss:$0 sm:$0xff] }
 0x1f1   : > { %991 = vadd.xlane.f32.xlu0 %v990_v11  ;;  %v999_v12 = vsel %vm989_vm1, %v2034_v8, 0.0 }
 0x1f2   : > { %v993_v13 = vsel %vm989_vm1, %v2038_v10, 0.0 }
 0x1f4   : > { %1000 = vadd.xlane.f32.xlu1 %v999_v12 }
 0x1f5   : > { %994 = vadd.xlane.f32.xlu0 %v993_v13 }
 0x27d   : > { %v998_v14 = vpop.xlane.xlu1 %997 }
 0x27e   : > { %v1005_v15 = vmul.f32 0.03125, %v998_v14  ;;  %v992_v16 = vpop.xlane.xlu0 %991 }
 0x27f   : > { %v1003_v17 = vmul.f32 0.03125, %v992_v16 }
 0x280   : > { %v1009_v18 = vsub.f32 %v2030_v3, %v1005_v15 }
 0x281   : > { %v1007_v19 = vsub.f32 %v2032_v6, %v1003_v17  ;;  %v1001_v20 = vpop.xlane.xlu1 %1000 }
 0x282   : > { %v1006_v21 = vmul.f32 0.03125, %v1001_v20  ;;  %v995_v22 = vpop.xlane.xlu0 %994  ;;  %v1013_v28 = vmul.f32 %v1009_v18, %v1009_v18 }
 0x283   : > { %v1004_v23 = vmul.f32 0.03125, %v995_v22  ;;  %v1011_v24 = vmul.f32 %v1007_v19, %v1007_v19 }
 0x284   : > { %v1010_v25 = vsub.f32 %v2034_v8, %v1006_v21  ;;  %v1021_v30 = vsel %vm989_vm1, %v1013_v28, 0.0 }
 0x285   : > { %v1008_v26 = vsub.f32 %v2038_v10, %v1004_v23  ;;  %v1015_v27 = vsel %vm989_vm1, %v1011_v24, 0.0 }
 0x286   : > { %1016 = vadd.xlane.f32.xlu0 %v1015_v27  ;;  %v1014_v32 = vmul.f32 %v1010_v25, %v1010_v25 }
 0x287   : > { %v1012_v29 = vmul.f32 %v1008_v26, %v1008_v26 }
 0x288   : > { %v1024_v33 = vsel %vm989_vm1, %v1014_v32, 0.0 }
 0x289   : > { %v1018_v31 = vsel %vm989_vm1, %v1012_v29, 0.0 }
 0x28a   : > { %1022 = vadd.xlane.f32.xlu0 %v1021_v30  ;;  %1019 = vadd.xlane.f32.xlu1 %v1018_v31 }
 0x28e   : > { %1025 = vadd.xlane.f32.xlu1 %v1024_v33 }
 0x313   : > { %v1017_v38 = vpop.xlane.xlu0 %1016 }
 0x314   : > { %v1027_v39 = vmul.f32 0.03125, %v1017_v38 }
 0x316   : > { %v1031_v40 = vadd.f32 1e-05, %v1027_v39 }
 0x317   : > { %v1020_v41 = vpop.xlane.xlu1 %1019  ;;  %v1023_v42 = vpop.xlane.xlu0 %1022 }
 0x318   : > { %1803 = vrsqrt.f32 %v1031_v40  ;;  %v1028_v43 = vmul.f32 0.03125, %v1020_v41  ;;  %v1029_v44 = vmul.f32 0.03125, %v1023_v42 }
 0x31a   : > { %v1032_v45 = vadd.f32 1e-05, %v1028_v43  ;;  %v1033_v46 = vadd.f32 1e-05, %v1029_v44 }
 0x31b   : > { %v1026_v47 = vpop.xlane.xlu1 %1025 }
 0x31c   : > { %1805 = vrsqrt.f32 %v1032_v45  ;;  %v1030_v48 = vmul.f32 0.03125, %v1026_v47 }
 0x31d   : > { %1807 = vrsqrt.f32 %v1033_v46 }
 0x31e   : > { %v1034_v49 = vadd.f32 1e-05, %v1030_v48 }
 0x320   : > { %1809 = vrsqrt.f32 %v1034_v49 }
 0x322   : > { %v1804_v50 = vpop.eup %1803 }
 0x323   : > { %v1039_v51 = vmul.f32 %v1804_v50, %v1007_v19 }
 0x325   : > { %v1049_v56 = vmul.f32 %v1618_v52, %v1039_v51 }
 0x326   : > { %v1806_v53 = vpop.eup %1805 }
 0x327   : > { %v1808_v54 = vpop.eup %1807  ;;  %v1040_v55 = vmul.f32 %v1806_v53, %v1008_v26  ;;  %v1059_v63 = vadd.f32 %v1619_v58, %v1049_v56 }
 0x328   : > { %v1041_v57 = vmul.f32 %v1808_v54, %v1009_v18 }
 0x329   : > { %v1050_v59 = vmul.f32 %v1618_v52, %v1040_v55 }
 0x32a   : > { %v1810_v60 = vpop.eup %1809  ;;  %v1051_v61 = vmul.f32 %v1618_v52, %v1041_v57 }
 0x32b   : > { %v1042_v62 = vmul.f32 %v1810_v60, %v1010_v25  ;;  %v1060_v0 = vadd.f32 %v1619_v58, %v1050_v59 }
 0x32c   : > { %v1061_v4 = vadd.f32 %v1619_v58, %v1051_v61 }
 0x32d   : > { %v1052_v1 = vmul.f32 %v1618_v52, %v1042_v62  ;;  %v1063_v2 = vpack.c.bf16 %v1060_v0, %v1059_v63 }
 0x32f   : > { %1726 = vmatprep.mubr.msk.bf16.mxu1 %vm989_vm1, %v1063_v2  ;;  %1734 = vmatprep.mubr.msk.bf16.mxu0 %vm989_vm1, %v1063_v2  ;;  %v1062_v5 = vadd.f32 %v1619_v58, %v1052_v1 }
 0x331   : > { %v1064_v7 = vpack.c.bf16 %v1062_v5, %v1061_v4 }
 0x333   : > { %1727 = vmatmul.mubr.msk.bf16.vlgmr.msra.gmra.mrb[8].mxu1 %vm989_vm1, %v1064_v7  ;;  %1735 = vmatmul.mubr.msk.bf16.vlgmr.msra.gmra.mrb[8].mxu0 %vm989_vm1, %v1064_v7 }
 0x406   : > { %v2079_v11 = vpop.f32.mrb[8].mxu1  ;;  %v1736_v12 = vpop.f32.mrb[8].mxu0 }
 0x407   : > { %v1235_v13 = vadd.f32 %v1736_v12, %v1625_v9  ;;  %v2081_v14 = vpop.f32.mrb[9].mxu1  ;;  %v1226_v15 = vpop.f32.mrb[9].mxu0 }
 0x408   : > { %v1227_v16 = vadd.f32 %v1625_v9, %v1226_v15  ;;  %v2083_v17 = vpop.f32.mrb[10].mxu1  ;;  %v1737_v18 = vpop.f32.mrb[10].mxu0 }
 0x409   : > { %v1243_v19 = vmul.f32 %v1235_v13, %v1235_v13  ;;  %v1238_v20 = vadd.f32 %v1737_v18, %v1625_v9  ;;  %v2085_v21 = vpop.f32.mrb[11].mxu1  ;;  %v1229_v22 = vpop.f32.mrb[11].mxu0 }
 0x40a   : > { %v1241_v23 = vmul.f32 %v1227_v16, %v1227_v16  ;;  %v1230_v24 = vadd.f32 %v1625_v9, %v1229_v22 }
 0x40b   : > { %v1247_v25 = vmul.f32 %v1243_v19, %v1235_v13  ;;  %v1244_v26 = vmul.f32 %v1238_v20, %v1238_v20 }
 0x40c   : > { %v1245_v27 = vmul.f32 %v1241_v23, %v1227_v16  ;;  %v1242_v28 = vmul.f32 %v1230_v24, %v1230_v24 }
 0x40d   : > { %v1251_v29 = vmul.f32 0.044715, %v1247_v25  ;;  %v1248_v30 = vmul.f32 %v1244_v26, %v1238_v20 }
 0x40e   : > { %v1249_v31 = vmul.f32 0.044715, %v1245_v27  ;;  %v1246_v32 = vmul.f32 %v1242_v28, %v1230_v24  ;;  %v1800_v27 = vld [vmem:[%s2164_s13] sm:$0xff]   ;;  %v569_v28 = vld [vmem:[%s2165_s14 + $0x8] sm:$0xff] }
 0x40f   : > { %v1252_v33 = vmul.f32 0.044715, %v1248_v30  ;;  %v1255_v36 = vadd.f32 %v1251_v29, %v1235_v13  ;;  %1742 = vmatprep.mubr.msk.bf16.mxu1 %vm989_vm1, %v1800_v27  ;;  %v1843_v29 = vmov 0   ;;  %v568_v30 = vld [vmem:[%s2165_s14] sm:$0xff] }
 0x410   : > { %v1253_v34 = vadd.f32 %v1249_v31, %v1227_v16  ;;  %v1250_v35 = vmul.f32 0.044715, %v1246_v32  ;;  %1763 = vset.pattern.permute.xlu1 %v1843_v29  ;;  %1762 = vset.pattern.permute.xlu0 %v1843_v29  ;;  %v570_v31 = vld [vmem:[%s2165_s14 + $0x10] sm:$0xff]  ;;  %v571_v32 = vld [vmem:[%s2165_s14 + $0x18] sm:$0xff] }
 0x411   : > { %v1256_v37 = vadd.f32 %v1252_v33, %v1238_v20  ;;  %v1259_v41 = vmul.f32 0.7978846, %v1255_v36 }
 0x412   : > { %v1254_v38 = vadd.f32 %v1250_v35, %v1230_v24  ;;  %v1257_v39 = vmul.f32 0.7978846, %v1253_v34 }
 0x413   : > { %v1260_v42 = vmul.f32 0.7978846, %v1256_v37 }
 0x414   : > { %v1258_v40 = vmul.f32 0.7978846, %v1254_v38  ;;  %1811 = vtanh.f32 %v1257_v39 }
 0x416   : > { %1813 = vtanh.f32 %v1258_v40 }
 0x417   : > { %1815 = vtanh.f32 %v1259_v41 }
 0x418   : > { %1817 = vtanh.f32 %v1260_v42 }
 0x41e   : > { %v1812_v43 = vpop.eup %1811 }
 0x41f   : > { %v1265_v45 = vadd.f32 1.0, %v1812_v43 }
 0x420   : > { %v1814_v44 = vpop.eup %1813 }
 0x421   : > { %v1816_v46 = vpop.eup %1815  ;;  %v1266_v47 = vadd.f32 1.0, %v1814_v44  ;;  %v1269_v49 = vmul.f32 0.5, %v1265_v45 }
 0x422   : > { %v1818_v48 = vpop.eup %1817  ;;  %v1267_v50 = vadd.f32 1.0, %v1816_v46  ;;  %v1630_v46 = vld [vmem:[%s2162_s11] ss:$0 sm:$0xff] }
 0x423   : > { %v1270_v51 = vmul.f32 0.5, %v1266_v47  ;;  %v1268_v52 = vadd.f32 1.0, %v1818_v48  ;;  %v1273_v53 = vmul.f32 %v1269_v49, %v1227_v16 }
 0x424   : > { %v1271_v54 = vmul.f32 0.5, %v1267_v50  ;;  %v1631_v50 = vld [vmem:[%s2163_s12] ss:$0 sm:$0xff] }
 0x425   : > { %v1274_v55 = vmul.f32 %v1270_v51, %v1230_v24  ;;  %v1272_v56 = vmul.f32 0.5, %v1268_v52  ;;  %v1278_v57 = vsel %vm1277_vm2, %v1273_v53, 0.0 }
 0x426   : > { %v1275_v58 = vmul.f32 %v1271_v54, %v1235_v13  ;;  %1279 = vadd.xlane.f32.xlu0 %v1278_v57 }
 0x427   : > { %v1281_v59 = vsel %vm1277_vm2, %v1274_v55, 0.0  ;;  %v1276_v60 = vmul.f32 %v1272_v56, %v1238_v20 }
 0x428   : > { %1282 = vadd.xlane.f32.xlu1 %v1281_v59  ;;  %v1284_v61 = vsel %vm1277_vm2, %v1275_v58, 0.0 }
 0x429   : > { %v1287_v62 = vsel %vm1277_vm2, %v1276_v60, 0.0 }
 0x42a   : > { %1285 = vadd.xlane.f32.xlu0 %v1284_v61 }
 0x42c   : > { %1288 = vadd.xlane.f32.xlu1 %v1287_v62 }
 0x4b3   : > { %v1280_v63 = vpop.xlane.xlu0 %1279 }
 0x4b4   : > { %v1291_v0 = vmul.f32 0.0625, %v1280_v63 }
 0x4b5   : > { %v1283_v1 = vpop.xlane.xlu1 %1282 }
 0x4b6   : > { %v1292_v2 = vmul.f32 0.0625, %v1283_v1  ;;  %v1295_v4 = vsub.f32 %v1273_v53, %v1291_v0  ;;  %v1801_v1 = vld [vmem:[%s2164_s13 + $0x8] sm:$0xff]  }
 0x4b7   : > { %v1286_v7 = vpop.xlane.xlu0 %1285 }
 0x4b8   : > { %v1296_v5 = vsub.f32 %v1274_v55, %v1292_v2  ;;  %v1293_v9 = vmul.f32 0.0625, %v1286_v7  ;;  %v1299_v13 = vmul.f32 %v1295_v4, %v1295_v4  ;;  %v1802_v2 = vld [vmem:[%s2166_s15] sm:$0xff]  }
 0x4b9   : > { %v1289_v12 = vpop.xlane.xlu1 %1288  ;;  %1746 = vmatprep.subr.bf16.mxu0 %v1802_v2 }
 0x4ba   : > { %v1294_v15 = vmul.f32 0.0625, %v1289_v12  ;;  %v1300_v16 = vmul.f32 %v1296_v5, %v1296_v5  ;;  %v1297_v18 = vsub.f32 %v1275_v58, %v1293_v9  ;;  %v1303_v19 = vsel %vm1277_vm2, %v1299_v13, 0.0  ;;  %1747 = vmatpush3.bf16.msra.mxu0 %v1802_v2  ;;  %v1636_v2 = vld [vmem:[%s2167_s16] ss:$0 sm:$0xff] }
 0x4bb   : > { %1304 = vadd.xlane.f32.xlu0 %v1303_v19 }
 0x4bc   : > { %v1298_v20 = vsub.f32 %v1276_v60, %v1294_v15  ;;  %v1306_v22 = vsel %vm1277_vm2, %v1300_v16, 0.0  ;;  %v1301_v23 = vmul.f32 %v1297_v18, %v1297_v18 }
 0x4bd   : > { %1307 = vadd.xlane.f32.xlu1 %v1306_v22 }
 0x4be   : > { %v1302_v24 = vmul.f32 %v1298_v20, %v1298_v20  ;;  %v1309_v25 = vsel %vm1277_vm2, %v1301_v23, 0.0 }
 0x4bf   : > { %1310 = vadd.xlane.f32.xlu0 %v1309_v25 }
 0x4c0   : > { %v1312_v26 = vsel %vm1277_vm2, %v1302_v24, 0.0 }
 0x4c1   : > { %1313 = vadd.xlane.f32.xlu1 %v1312_v26 }
 0x4d2   : > { %1360 = vperm.xlu1 %1763, %v569_v28  }
 0x4d5   : > { %1355 = vperm.xlu0 %1762, %v568_v30  }
 0x4d6   : > { %1365 = vperm.xlu1 %1763, %v570_v31  }
 0x4da   : > { %1370 = vperm.xlu1 %1763, %v571_v32  }
 0x548   : > { %v1305_v33 = vpop.xlane.xlu0 %1304 }
 0x549   : > { %v1315_v34 = vmul.f32 0.0625, %v1305_v33 }
 0x54a   : > { %v1308_v35 = vpop.xlane.xlu1 %1307 }
 0x54b   : > { %v1316_v36 = vmul.f32 0.0625, %v1308_v35  ;;  %v1319_v37 = vadd.f32 1e-05, %v1315_v34 }
 0x54c   : > { %v1311_v39 = vpop.xlane.xlu0 %1310 }
 0x54d   : > { %v1320_v38 = vadd.f32 1e-05, %v1316_v36  ;;  %1819 = vrsqrt.f32 %v1319_v37  ;;  %v1317_v40 = vmul.f32 0.0625, %v1311_v39 }
 0x54e   : > { %v1314_v41 = vpop.xlane.xlu1 %1313 }
 0x54f   : > { %1821 = vrsqrt.f32 %v1320_v38  ;;  %v1318_v42 = vmul.f32 0.0625, %v1314_v41  ;;  %v1321_v43 = vadd.f32 1e-05, %v1317_v40 }
 0x551   : > { %v1322_v44 = vadd.f32 1e-05, %v1318_v42  ;;  %1823 = vrsqrt.f32 %v1321_v43 }
 0x552   : > { %v1361_v33 = vpop.permute.xlu1 %1360 }
 0x553   : > { %1825 = vrsqrt.f32 %v1322_v44 }
 0x554   : > { %v1356_v44 = vpop.permute.xlu0 %1355 }
 0x556   : > { %v1366_v40 = vpop.permute.xlu1 %1365 }
 0x557   : > { %v1820_v45 = vpop.eup %1819 }
 0x558   : > { %v1327_v48 = vmul.f32 %v1820_v45, %v1295_v4  ;;  %v1620_v4 = vld [vmem:[%s2159_s8] ss:$0 sm:$0xff] }
 0x559   : > { %v1822_v47 = vpop.eup %1821  ;;  %v1124_v7 = vadd.f32 %v1620_v4, %v2081_v14  ;;  %v1135_v9 = vadd.f32 %v2083_v17, %v1620_v4  ;;  %v1127_v12 = vadd.f32 %v1620_v4, %v2085_v21 }
 0x55a   : > { %v1328_v49 = vmul.f32 %v1822_v47, %v1296_v5  ;;  %v1337_v51 = vmul.f32 %v1630_v46, %v1327_v48  ;;  %v1132_v5 = vadd.f32 %v2079_v11, %v1620_v4 }
 0x55b   : > { %v1824_v52 = vpop.eup %1823  ;;  %v1138_v15 = vmul.f32 %v1124_v7, %v1124_v7  ;;  %v1141_v16 = vmul.f32 %v1135_v9, %v1135_v9 }
 0x55c   : > { %v1338_v53 = vmul.f32 %v1630_v46, %v1328_v49  ;;  %v1329_v55 = vmul.f32 %v1824_v52, %v1297_v18  ;;  %v1347_v56 = vadd.f32 %v1631_v50, %v1337_v51  ;;  %v1140_v13 = vmul.f32 %v1132_v5, %v1132_v5  ;;  %v1371_v51 = vpop.permute.xlu1 %1370 }
 0x55d   : > { %v1826_v54 = vpop.eup %1825  ;;  %v1139_v18 = vmul.f32 %v1127_v12, %v1127_v12  ;;  %v1145_v22 = vmul.f32 %v1141_v16, %v1135_v9 }
 0x55e   : > { %v1348_v57 = vadd.f32 %v1631_v50, %v1338_v53  ;;  %v1330_v58 = vmul.f32 %v1826_v54, %v1298_v20  ;;  %v1339_v59 = vmul.f32 %v1630_v46, %v1329_v55  ;;  %v1144_v19 = vmul.f32 %v1140_v13, %v1132_v5 }
 0x55f   : > { %v1142_v20 = vmul.f32 %v1138_v15, %v1124_v7  ;;  %v1143_v23 = vmul.f32 %v1139_v18, %v1127_v12  ;;  %v1149_v26 = vmul.f32 0.044715, %v1145_v22 }
 0x560   : > { %v1351_v60 = vpack.c.bf16 %v1348_v57, %v1347_v56  ;;  %v1340_v61 = vmul.f32 %v1630_v46, %v1330_v58  ;;  %v1349_v62 = vadd.f32 %v1631_v50, %v1339_v59  ;;  %v1148_v24 = vmul.f32 0.044715, %v1144_v19 }
 0x561   : > { %v1146_v25 = vmul.f32 0.044715, %v1142_v20  ;;  %v1147_v27 = vmul.f32 0.044715, %v1143_v23  ;;  %v1153_v29 = vadd.f32 %v1149_v26, %v1135_v9 }
 0x562   : > { %1738 = vmatprep.subr.bf16.mxu1 %v1351_v60  ;;  %v1350_v63 = vadd.f32 %v1631_v50, %v1340_v61  ;;  %v1152_v28 = vadd.f32 %v1148_v24, %v1132_v5 }
 0x563   : > { %1739 = vmatpush3.bf16.msra.mxu1 %v1351_v60  ;;  %v1150_v11 = vadd.f32 %v1146_v25, %v1124_v7  ;;  %v1151_v14 = vadd.f32 %v1147_v27, %v1127_v12  ;;  %v1157_v31 = vmul.f32 0.7978846, %v1153_v29 }
 0x564   : > { %v1352_v0 = vpack.c.bf16 %v1350_v63, %v1349_v62  ;;  %v1156_v30 = vmul.f32 0.7978846, %v1152_v28 }
 0x565   : > { %v1154_v17 = vmul.f32 0.7978846, %v1150_v11  ;;  %v1155_v21 = vmul.f32 0.7978846, %v1151_v14 }
 0x566   : > { %1740 = vmatprep.subr.bf16.mxu1 %v1352_v0  ;;  %1827 = vtanh.f32 %v1156_v30 }
 0x567   : > { %1741 = vmatpush3.bf16.msra.mxu1 %v1352_v0  ;;  %1829 = vtanh.f32 %v1154_v17 }
 0x568   : > { %1831 = vtanh.f32 %v1157_v31 }
 0x569   : > { %1833 = vtanh.f32 %v1155_v21 }
 0x56a   : > { %1743 = vmatmul.mubr.msk.bf16.vlgmr.msra.gmra.mrb[12].mxu1 %vm989_vm1, %v1801_v1 }
 0x570   : > { %v1828_v32 = vpop.eup %1827 }
 0x571   : > { %v1830_v34 = vpop.eup %1829  ;;  %v1164_v37 = vadd.f32 1.0, %v1828_v32 }
 0x572   : > { %v1832_v35 = vpop.eup %1831  ;;  %v1162_v38 = vadd.f32 1.0, %v1830_v34 }
 0x573   : > { %v1834_v36 = vpop.eup %1833  ;;  %v1165_v39 = vadd.f32 1.0, %v1832_v35  ;;  %v1168_v42 = vmul.f32 0.5, %v1164_v37 }
 0x574   : > { %v1163_v41 = vadd.f32 1.0, %v1834_v36  ;;  %v1166_v43 = vmul.f32 0.5, %v1162_v38 }
 0x575   : > { %v1169_v45 = vmul.f32 0.5, %v1165_v39  ;;  %v1172_v48 = vmul.f32 %v1168_v42, %v1132_v5 }
 0x576   : > { %v1167_v47 = vmul.f32 0.5, %v1163_v41  ;;  %v1170_v52 = vmul.f32 %v1166_v43, %v1124_v7 }
 0x577   : > { %v1173_v56 = vmul.f32 %v1169_v45, %v1135_v9 }
 0x578   : > { %v1171_v60 = vmul.f32 %v1167_v47, %v1127_v12 }
 0x63d   : > { %v1744_v46 = vpop.f32.mrb[12].mxu1 }
 0x63e   : > { %v1432_v49 = vadd.f32 %v1744_v46, %v1366_v40  ;;  %v1423_v50 = vpop.f32.mrb[13].mxu1 }
 0x63f   : > { %v1424_v53 = vadd.f32 %v1423_v50, %v1356_v44  ;;  %v1745_v54 = vpop.f32.mrb[14].mxu1 }
 0x640   : > { %v1440_v55 = vmul.f32 %v1432_v49, %v1172_v48  ;;  %v1435_v57 = vadd.f32 %v1745_v54, %v1371_v51  ;;  %v1426_v58 = vpop.f32.mrb[15].mxu1 }
 0x641   : > { %v1438_v59 = vmul.f32 %v1424_v53, %v1170_v52  ;;  %v1427_v61 = vadd.f32 %v1426_v58, %v1361_v33 }
 0x642   : > { %v1441_v62 = vmul.f32 %v1435_v57, %v1173_v56 }
 0x643   : > { %v1439_v63 = vmul.f32 %v1427_v61, %v1171_v60 }
 0x644   : > { %v1443_v0 = vpack.c.bf16 %v1441_v62, %v1440_v55 }
 0x645   : > { %v1442_v1 = vpack.c.bf16 %v1439_v63, %v1438_v59 }
 0x647   : > { %1748 = vmatprep.mubr.msk.bf16.mxu0 %vm1277_vm2, %v1442_v1 }
 0x648   : > { %1749 = vmatmul.mubr.msk.bf16.vlgmr.msra.gmra.mrb[12].mxu0 %vm1277_vm2, %v1443_v0 }
 0x71b   : > { %v1750_v4 = vpop.f32.mrb[12].mxu0 }
 0x71c   : > { %v1505_v5 = vadd.f32 %v1750_v4, %v1636_v2  ;;  %v1496_v7 = vpop.f32.mrb[13].mxu0 }
 0x71d   : > { %v1497_v9 = vadd.f32 %v1636_v2, %v1496_v7  ;;  %v1751_v12 = vpop.f32.mrb[14].mxu0 }
 0x71e   : > { %v1513_v13 = vadd.f32 %v1505_v5, %v2030_v3  ;;  %v1508_v15 = vadd.f32 %v1751_v12, %v1636_v2  ;;  %v1499_v16 = vpop.f32.mrb[15].mxu0 }
 0x71f   : > { %v1511_v18 = vadd.f32 %v1497_v9, %v2032_v6  ;;  %v1500_v19 = vadd.f32 %v1636_v2, %v1499_v16 }
 0x720   : > { %1517 = vst.msk [vmem:[%s548_s19 + $0x10] sm:$0xff] %vm989_vm1, %v1513_v13  ;;  %v1514_v20 = vadd.f32 %v1508_v15, %v2034_v8 }
 0x721   : > { %1515 = vst.msk [vmem:[%s548_s19] sm:$0xff] %vm989_vm1, %v1511_v18  ;;  %v1512_v22 = vadd.f32 %v1500_v19, %v2038_v10 }
 0x722   : > { %1518 = vst.msk [vmem:[%s548_s19 + $0x18] sm:$0xff] %vm989_vm1, %v1514_v20 }
 0x723   : > { %1516 = vst.msk [vmem:[%s548_s19 + $0x8] sm:$0xff] %vm989_vm1, %v1512_v22 }
 0x724 PF: > { %s2176_s25 = sld [smem:[#allocation2_spill]] }
 0x72a   : > { %s27_s24 = sadd.s32 1, %s2176_s25  }
 0x72b   : > { %p24_p4 = scmp.ge.s32.totalorder %s27_s24, 4  }
 0x72d   :  { %26 = sbr.rel (!%p24_p4) target bundleno = 3 (0x3), region = 118 }

// kernel: forward.7
= control target key start
LH: loop header
LB: loop body
LE: loop exit
PB: predicated region body
PF: predicated region fallthrough
CT: control target
= control target key end

     0   :  { %s3066_s27 = smov 0   ;;  %s3629_s0 = inlined_call_operand.vmem [shape: bf16[2,64,34], index: 0, kind: input, shape index: {}]   ;;  %s3630_s1 = inlined_call_operand.vmem [shape: bf16[34,32], index: 1, kind: input, shape index: {}]   ;;  %s3631_s2 = inlined_call_operand.vmem [shape: f32[1,32], index: 2, kind: input, shape index: {}]   ;;  %s3632_s3 = inlined_call_operand.vmem [shape: bf16[32,32], index: 3, kind: input, shape index: {}]   ;;  %s3633_s4 = inlined_call_operand.vmem [shape: f32[1,32], index: 4, kind: input, shape index: {}]   ;;  %s3634_s5 = inlined_call_operand.vmem [shape: bf16[32,16], index: 5, kind: input, shape index: {}]   ;;  %s3635_s6 = inlined_call_operand.vmem [shape: f32[1,16], index: 6, kind: input, shape index: {}]   ;;  %s3636_s7 = inlined_call_operand.vmem [shape: f32[1,16], index: 7, kind: input, shape index: {}]   ;;  %s3637_s8 = inlined_call_operand.vmem [shape: f32[1,16], index: 8, kind: input, shape index: {}]   ;;  %s3638_s9 = inlined_call_operand.vmem [shape: bf16[16,8], index: 9, kind: input, shape index: {}]   ;;  %s3639_s10 = inlined_call_operand.vmem [shape: f32[1,8], index: 10, kind: input, shape index: {}]   ;;  %s3640_s11 = inlined_call_operand.vmem [shape: bf16[16,8], index: 11, kind: input, shape index: {}]   ;;  %s3641_s12 = inlined_call_operand.vmem [shape: f32[1,8], index: 12, kind: input, shape index: {}]   ;;  %s3642_s13 = inlined_call_operand.vmem [shape: f32[1,8], index: 13, kind: input, shape index: {}]   ;;  %s3643_s14 = inlined_call_operand.vmem [shape: f32[1,8], index: 14, kind: input, shape index: {}]   ;;  %s3644_s15 = inlined_call_operand.vmem [shape: bf16[64,64], index: 15, kind: input, shape index: {}]   ;;  %s3645_s16 = inlined_call_operand.vmem [shape: f32[64,1], index: 16, kind: input, shape index: {}]   ;;  %s3646_s17 = inlined_call_operand.vmem [shape: bf16[8,16], index: 17, kind: input, shape index: {}]   ;;  %s3647_s18 = inlined_call_operand.vmem [shape: f32[1,16], index: 18, kind: input, shape index: {}]   ;;  %s3648_s19 = inlined_call_operand.vmem [shape: bf16[16,32], index: 19, kind: input, shape index: {}]   ;;  %s3649_s20 = inlined_call_operand.vmem [shape: f32[1,32], index: 20, kind: input, shape index: {}]   ;;  %s3650_s21 = inlined_call_operand.vmem [shape: bf16[32,128], index: 21, kind: input, shape index: {}]   ;;  %s3651_s22 = inlined_call_operand.vmem [shape: f32[1,128], index: 22, kind: input, shape index: {}]   ;;  %s3652_s23 = inlined_call_operand.vmem [shape: bf16[32,128], index: 23, kind: input, shape index: {}]   ;;  %s3653_s24 = inlined_call_operand.vmem [shape: f32[1,128], index: 24, kind: input, shape index: {}]   ;;  %s3654_s25 = inlined_call_operand.vmem [shape: f32[2,64,128], index: 25, kind: output, shape index: {0}]   ;;  %s3655_s26 = inlined_call_operand.vmem [shape: f32[2,64,128], index: 26, kind: output, shape index: {1}]  }
   0x1   :  { %3659 = sst [smem:[#allocation2_spill]] %s3629_s0 }
   0x2   :  { %3660 = sst [smem:[#allocation3_spill]] %s3630_s1 }
   0x3   :  { %3661 = sst [smem:[#allocation4_spill]] %s3631_s2 }
   0x4   :  { %3662 = sst [smem:[#allocation5_spill]] %s3632_s3 }
   0x5   :  { %3663 = sst [smem:[#allocation6_spill]] %s3633_s4 }
   0x6   :  { %3664 = sst [smem:[#allocation7_spill]] %s3634_s5 }
   0x7   :  { %3665 = sst [smem:[#allocation8_spill]] %s3635_s6 }
   0x8   :  { %3666 = sst [smem:[#allocation9_spill]] %s3636_s7 }
   0x9   :  { %3667 = sst [smem:[#allocation10_spill]] %s3637_s8 }
   0xa   :  { %3668 = sst [smem:[#allocation11_spill]] %s3638_s9 }
   0xb   :  { %3669 = sst [smem:[#allocation12_spill]] %s3639_s10 }
   0xc LB: > { %s2523_s3 = sadd.s32 4294967295, %s2928_s27   ;;  %p2527_p0 = scmp.ge.s32.totalorder %s2928_s27, 1  ;;  %s2928_s27 = sphi %s3066_s27, %s37_s27  }
   0xd   : > { %p715_p1 = scmp.lt.s32.totalorder %s2928_s27, 3 }
   0xf   : > { %p716_p2 = pnand %p2527_p0, %p715_p1 }
  0x10   : > { %s3670_s8 = sld [smem:[#allocation3_spill]] (!%p716_p2)  ;;  %p790_p3 = scmp.lt.s32.totalorder (!%p716_p2), %s2523_s3, 1  ;;  %vm902_vm0 = vcmask (!%p716_p2), 1040384   ;;  %vm889_vm1 = vcmask (!%p716_p2), 277504   ;;  %vm1006_vm2 = vcmask (!%p716_p2), 261120   ;;  %vm1204_vm3 = vcmask (!%p716_p2), 130048  }
  0x11   : > { %719 = sbr.rel (%p716_p2) target bundleno = 2808 (0xaf8), region = 120  ;;  %s3671_s10 = sld [smem:[#allocation2_spill]] (!%p716_p2)  ;;  %vm1652_vm4 = vcmask (!%p716_p2), 64512   ;;  %vm1850_vm5 = vcmask (!%p716_p2), 523264   ;;  %vm1958_vm6 = vcmask (!%p716_p2), 1043456  }
  0x12   : > { %s3672_s28 = sld [smem:[#allocation5_spill]] (!%p716_p2)  ;;  %s3675_s29 = sld [smem:[#allocation6_spill]] (!%p716_p2) }
  0x13   : > { %s3676_s2 = sld [smem:[#allocation8_spill]] (!%p716_p2)  ;;  %s3677_s7 = sld [smem:[#allocation11_spill]] (!%p716_p2) }
  0x14   : > { %s3678_s0 = sld [smem:[#allocation9_spill]] (!%p716_p2)  ;;  %s3679_s5 = sld [smem:[#allocation10_spill]] (!%p716_p2) }
  0x16   : > { %v2804_v0 = vld [vmem:[%s3670_s8] sm:$0xff] (!%p716_p2)   ;;  %v2805_v1 = vld [vmem:[%s3670_s8 + $0x8] sm:$0xff] (!%p716_p2)   ;;  %v2806_v2 = vld [vmem:[%s3670_s8 + $0x10] ss:$0 sps:$4 sm:$0x11] (!%p716_p2)  }
  0x17   : > { %2673 = vmatprep.subr.bf16.mxu0 (!%p716_p2), %v2804_v0  ;;  %v904_v4 = vsel (!%p716_p2), %vm902_vm0, %v2806_v2, 0 }
  0x18   : > { %2674 = vmatpush3.bf16.msra.mxu0 %v2804_v0  ;;  %s3682_s3 = smov (!%p790_p3, %s2523_s3), 1  ;;  %v2811_v8 = vld [vmem:[%s3672_s28] sm:$0xff]   ;;  %v2812_v9 = vld [vmem:[%s3672_s28 + $0x8] sm:$0xff]  }
  0x19   : > { %2675 = vmatprep.subr.bf16.mxu0 %v2805_v1  ;;  %s2611_s30 = sshll.u32 %s3682_s3, 5  ;;  %2687 = vmatprep.subr.bf16.mxu1 %v2811_v8  ;;  %v2546_v41 = vld [vmem:[%s3675_s29] ss:$0 sm:$0xff] }
  0x1a   : > { %s794_s6 = scalar_lea.vmem %s3671_s10, %s2611_s30  ;;  %2688 = vmatpush3.bf16.msra.mxu1 %v2811_v8  ;;  %s3673_s30 = sld [smem:[#allocation7_spill]] }
  0x1b   : > { %v2807_v3 = vld [vmem:[%s794_s6] sm:$0xff]   ;;  %v2808_v5 = vld [vmem:[%s794_s6 + $0x8] sm:$0xff]   ;;  %v2809_v6 = vld [vmem:[%s794_s6 + $0x10] sm:$0xff]   ;;  %2689 = vmatprep.subr.bf16.mxu1 %v2812_v9  ;;  %s3674_s10 = sld [smem:[#allocation4_spill]] }
  0x1c   : > { %2676 = vmatpush3.bf16.msra.mxu0 %v2805_v1  ;;  %2679 = vmatprep.mubr.msk.bf16.mxu0 %vm889_vm1, %v2807_v3  ;;  %v2810_v7 = vld [vmem:[%s794_s6 + $0x18] sm:$0xff]  }
  0x1d   : > { %2791 = vmatprep.subr.msk.bf16.mxu0 %vm902_vm0, %v2806_v2 }
  0x1e   : > { %2690 = vmatpush3.bf16.msra.mxu1 %v2812_v9 }
  0x20   : > { %2678 = vmatpush3.bf16.msra.mxu0 %v904_v4  ;;  %v2813_v10 = vld [vmem:[%s3673_s30] sm:$0xff]   ;;  %v2814_v40 = vld [vmem:[%s3673_s30 + $0x8] sm:$0xff]  }
  0x21   : > { %2699 = vmatprep.subr.bf16.mxu1 %v2813_v10  ;;  %v2534_v11 = vld [vmem:[%s3674_s10] ss:$0 sm:$0xff] }
  0x23   : > { %2680 = vmatmul.mubr.msk.bf16.vlgmr.msra.gmra.mrb[0].mxu0 %vm889_vm1, %v2808_v5 }
  0x24   : > { %2683 = vmatprep.mubr.msk.bf16.mxu0 %vm889_vm1, %v2809_v6  ;;  %v2553_v6 = vld [vmem:[%s3676_s2] ss:$0 sm:$0xff] }
  0x2b   : > { %2684 = vmatmul.mubr.msk.bf16.gmra.mrb[4].mxu0 %vm889_vm1, %v2810_v7 }
  0xf6   : > { %v2681_v12 = vpop.f32.mrb[0].mxu0 }
  0xf7   : > { %v949_v13 = vadd.f32 %v2681_v12, %v2534_v11  ;;  %v940_v14 = vpop.f32.mrb[1].mxu0 }
  0xf8   : > { %v941_v15 = vadd.f32 %v2534_v11, %v940_v14  ;;  %v2682_v16 = vpop.f32.mrb[2].mxu0 }
  0xf9   : > { %v952_v17 = vadd.f32 %v2682_v16, %v2534_v11  ;;  %v943_v18 = vpop.f32.mrb[3].mxu0  ;;  %v973_v20 = vmax.f32 %v949_v13, 0.0 }
  0xfa   : > { %v944_v19 = vadd.f32 %v2534_v11, %v943_v18  ;;  %v971_v22 = vmax.f32 %v941_v15, 0.0 }
  0xfb   : > { %v974_v21 = vmax.f32 %v952_v17, 0.0 }
  0xfc   : > { %v972_v23 = vmax.f32 %v944_v19, 0.0 }
  0xfd   : > { %v985_v24 = vpack.c.bf16 %v974_v21, %v973_v20 }
  0xfe   : > { %v2685_v25 = vpop.f32.mrb[4].mxu0  ;;  %v984_v26 = vpack.c.bf16 %v972_v23, %v971_v22 }
  0xff   : > { %v965_v27 = vadd.f32 %v2685_v25, %v2534_v11  ;;  %v956_v28 = vpop.f32.mrb[5].mxu0 }
 0x100   : > { %v957_v29 = vadd.f32 %v2534_v11, %v956_v28  ;;  %v2686_v30 = vpop.f32.mrb[6].mxu0  ;;  %2691 = vmatprep.mubr.msk.bf16.mxu1 %vm1006_vm2, %v984_v26 }
 0x101   : > { %v977_v31 = vmax.f32 %v965_v27, 0.0  ;;  %v968_v32 = vadd.f32 %v2686_v30, %v2534_v11  ;;  %v959_v33 = vpop.f32.mrb[7].mxu0  ;;  %2692 = vmatmul.mubr.msk.bf16.vlgmr.msra.gmra.mrb[0].mxu1 %vm1006_vm2, %v985_v24 }
 0x102   : > { %v975_v34 = vmax.f32 %v957_v29, 0.0  ;;  %v960_v35 = vadd.f32 %v2534_v11, %v959_v33  ;;  %2700 = vmatpush3.bf16.msra.mxu1 %v2813_v10 }
 0x103   : > { %v978_v36 = vmax.f32 %v968_v32, 0.0  ;;  %2701 = vmatprep.subr.bf16.mxu1 %v2814_v40 }
 0x104   : > { %v976_v37 = vmax.f32 %v960_v35, 0.0 }
 0x105   : > { %v987_v38 = vpack.c.bf16 %v978_v36, %v977_v31 }
 0x106   : > { %v986_v39 = vpack.c.bf16 %v976_v37, %v975_v34  ;;  %2702 = vmatpush3.bf16.msra.mxu1 %v2814_v40 }
 0x108   : > { %2695 = vmatprep.mubr.msk.bf16.mxu1 %vm1006_vm2, %v986_v39 }
 0x109   : > { %2696 = vmatmul.mubr.msk.bf16.gmra.mrb[4].mxu1 %vm1006_vm2, %v987_v38 }
 0x1d4   : > { %v2693_v42 = vpop.f32.mrb[0].mxu1 }
 0x1d5   : > { %v1062_v43 = vadd.f32 %v2693_v42, %v2546_v41  ;;  %v1053_v44 = vpop.f32.mrb[1].mxu1 }
 0x1d6   : > { %v1054_v45 = vadd.f32 %v2546_v41, %v1053_v44  ;;  %v2694_v46 = vpop.f32.mrb[2].mxu1 }
 0x1d7   : > { %v1065_v47 = vadd.f32 %v2694_v46, %v2546_v41  ;;  %v1056_v48 = vpop.f32.mrb[3].mxu1  ;;  %v1086_v50 = vmax.f32 %v1062_v43, 0.0 }
 0x1d8   : > { %v1057_v49 = vadd.f32 %v2546_v41, %v1056_v48  ;;  %v1084_v52 = vmax.f32 %v1054_v45, 0.0 }
 0x1d9   : > { %v1087_v51 = vmax.f32 %v1065_v47, 0.0 }
 0x1da   : > { %v1085_v53 = vmax.f32 %v1057_v49, 0.0 }
 0x1db   : > { %v1098_v54 = vpack.c.bf16 %v1087_v51, %v1086_v50 }
 0x1dc   : > { %v1097_v55 = vpack.c.bf16 %v1085_v53, %v1084_v52  ;;  %v2697_v56 = vpop.f32.mrb[4].mxu1 }
 0x1dd   : > { %v1078_v57 = vadd.f32 %v2697_v56, %v2546_v41  ;;  %v1069_v58 = vpop.f32.mrb[5].mxu1 }
 0x1de   : > { %v1070_v59 = vadd.f32 %v2546_v41, %v1069_v58  ;;  %v2698_v60 = vpop.f32.mrb[6].mxu1  ;;  %2703 = vmatprep.mubr.msk.bf16.mxu1 %vm1006_vm2, %v1097_v55 }
 0x1df   : > { %v1081_v61 = vadd.f32 %v2698_v60, %v2546_v41  ;;  %v1072_v62 = vpop.f32.mrb[7].mxu1  ;;  %2704 = vmatmul.mubr.msk.bf16.vlgmr.msra.gmra.mrb[8].mxu1 %vm1006_vm2, %v1098_v54  ;;  %v1090_v0 = vmax.f32 %v1078_v57, 0.0 }
 0x1e0   : > { %v1073_v63 = vadd.f32 %v2546_v41, %v1072_v62  ;;  %v1088_v2 = vmax.f32 %v1070_v59, 0.0 }
 0x1e1   : > { %v1091_v1 = vmax.f32 %v1081_v61, 0.0 }
 0x1e2   : > { %v1089_v3 = vmax.f32 %v1073_v63, 0.0 }
 0x1e3   : > { %v1100_v4 = vpack.c.bf16 %v1091_v1, %v1090_v0 }
 0x1e4   : > { %v1099_v5 = vpack.c.bf16 %v1089_v3, %v1088_v2 }
 0x1e6   : > { %2707 = vmatprep.mubr.msk.bf16.mxu1 %vm1006_vm2, %v1099_v5 }
 0x1e7   : > { %2708 = vmatmul.mubr.msk.bf16.gmra.mrb[12].mxu1 %vm1006_vm2, %v1100_v4 }
 0x2b2   : > { %v2705_v7 = vpop.f32.mrb[8].mxu1 }
 0x2b3   : > { %v1174_v8 = vadd.f32 %v2705_v7, %v2553_v6  ;;  %v1165_v9 = vpop.f32.mrb[9].mxu1 }
 0x2b4   : > { %v1166_v10 = vadd.f32 %v2553_v6, %v1165_v9  ;;  %v2706_v11 = vpop.f32.mrb[10].mxu1 }
 0x2b5   : > { %v3118_v12 = vmax.f32 %v1174_v8, 0.0  ;;  %v1177_v13 = vadd.f32 %v2706_v11, %v2553_v6  ;;  %v1168_v14 = vpop.f32.mrb[11].mxu1 }
 0x2b6   : > { %v3120_v15 = vmax.f32 %v1166_v10, 0.0  ;;  %v1169_v16 = vadd.f32 %v2553_v6, %v1168_v14 }
 0x2b7   : > { %v3122_v17 = vmax.f32 %v1177_v13, 0.0  ;;  %v1211_v18 = vsel %vm1204_vm3, %v3118_v12, 0.0 }
 0x2b8   : > { %v3126_v19 = vmax.f32 %v1169_v16, 0.0  ;;  %1212 = vadd.xlane.f32.xlu1 %v1211_v18  ;;  %v1205_v20 = vsel %vm1204_vm3, %v3120_v15, 0.0  ;;  %v2815_v18 = vld [vmem:[%s3640_s11] sm:$0xff]  }
 0x2b9   : > { %1206 = vadd.xlane.f32.xlu0 %v1205_v20  ;;  %v1214_v23 = vsel %vm1204_vm3, %v3122_v17, 0.0  ;;  %v2816_v20 = vld [vmem:[%s3677_s7] sm:$0xff]   ;;  %2721 = vmatprep.subr.bf16.mxu1 %v2815_v18 }
 0x2ba   : > { %v2709_v21 = vpop.f32.mrb[12].mxu1  ;;  %v1208_v27 = vsel %vm1204_vm3, %v3126_v19, 0.0  ;;  %2711 = vmatprep.subr.bf16.mxu0 %v2816_v20  ;;  %2722 = vmatpush3.bf16.msra.mxu1 %v2815_v18 }
 0x2bb   : > { %v1181_v22 = vpop.f32.mrb[13].mxu1  ;;  %v1190_v24 = vadd.f32 %v2709_v21, %v2553_v6  ;;  %2712 = vmatpush3.bf16.msra.mxu0 %v2816_v20 }
 0x2bc   : > { %v1182_v25 = vadd.f32 %v2553_v6, %v1181_v22  ;;  %1215 = vadd.xlane.f32.xlu1 %v1214_v23  ;;  %v2710_v26 = vpop.f32.mrb[14].mxu1 }
 0x2bd   : > { %v1184_v28 = vpop.f32.mrb[15].mxu1  ;;  %1209 = vadd.xlane.f32.xlu0 %v1208_v27  ;;  %v1193_v30 = vadd.f32 %v2710_v26, %v2553_v6  ;;  %v3136_v32 = vmax.f32 %v1190_v24, 0.0 }
 0x2be   : > { %v3134_v29 = vmax.f32 %v1182_v25, 0.0  ;;  %v1185_v31 = vadd.f32 %v2553_v6, %v1184_v28 }
 0x2bf   : > { %v3142_v35 = vmax.f32 %v1193_v30, 0.0  ;;  %v1223_v37 = vsel %vm1204_vm3, %v3136_v32, 0.0 }
 0x2c0   : > { %v3138_v33 = vmax.f32 %v1185_v31, 0.0  ;;  %v1217_v34 = vsel %vm1204_vm3, %v3134_v29, 0.0 }
 0x2c1   : > { %1218 = vadd.xlane.f32.xlu0 %v1217_v34  ;;  %v1226_v38 = vsel %vm1204_vm3, %v3142_v35, 0.0 }
 0x2c2   : > { %v1220_v36 = vsel %vm1204_vm3, %v3138_v33, 0.0 }
 0x2c3   : > { %1221 = vadd.xlane.f32.xlu1 %v1220_v36 }
 0x2c5   : > { %1224 = vadd.xlane.f32.xlu0 %v1223_v37 }
 0x2c7   : > { %1227 = vadd.xlane.f32.xlu1 %v1226_v38 }
 0x345   : > { %v1213_v39 = vpop.xlane.xlu1 %1212 }
 0x346   : > { %v1232_v40 = vmul.f32 0.0625, %v1213_v39  ;;  %v1207_v41 = vpop.xlane.xlu0 %1206 }
 0x347   : > { %v1230_v42 = vmul.f32 0.0625, %v1207_v41 }
 0x348   : > { %v3151_v43 = vsub.f32 %v3118_v12, %v1232_v40 }
 0x349   : > { %v3154_v44 = vsub.f32 %v3120_v15, %v1230_v42  ;;  %v1216_v45 = vpop.xlane.xlu1 %1215 }
 0x34a   : > { %v1233_v46 = vmul.f32 0.0625, %v1216_v45  ;;  %v1210_v47 = vpop.xlane.xlu0 %1209  ;;  %v1248_v53 = vmul.f32 %v3151_v43, %v3151_v43 }
 0x34b   : > { %v1231_v48 = vmul.f32 0.0625, %v1210_v47  ;;  %v1246_v49 = vmul.f32 %v3154_v44, %v3154_v44 }
 0x34c   : > { %v3159_v50 = vsub.f32 %v3122_v17, %v1233_v46  ;;  %v1260_v61 = vsel %vm1204_vm3, %v1248_v53, 0.0  ;;  %v2560_v53 = vld [vmem:[%s3678_s0] ss:$0 sm:$0xff]  ;;  %s3680_s0 = sld [smem:[#allocation12_spill]] }
 0x34d   : > { %v3162_v51 = vsub.f32 %v3126_v19, %v1231_v48  ;;  %v1254_v52 = vsel %vm1204_vm3, %v1246_v49, 0.0 }
 0x34e   : > { %1255 = vadd.xlane.f32.xlu0 %v1254_v52  ;;  %v1219_v54 = vpop.xlane.xlu0 %1218  ;;  %v1249_v58 = vmul.f32 %v3159_v50, %v3159_v50 }
 0x34f   : > { %v1234_v55 = vmul.f32 0.0625, %v1219_v54  ;;  %v1247_v56 = vmul.f32 %v3162_v51, %v3162_v51 }
 0x350   : > { %v1222_v57 = vpop.xlane.xlu1 %1221  ;;  %v1263_v4 = vsel %vm1204_vm3, %v1249_v58, 0.0 }
 0x351   : > { %v3172_v59 = vsub.f32 %v3134_v29, %v1234_v55  ;;  %v1235_v60 = vmul.f32 0.0625, %v1222_v57  ;;  %v1257_v62 = vsel %vm1204_vm3, %v1247_v56, 0.0 }
 0x352   : > { %1261 = vadd.xlane.f32.xlu0 %v1260_v61  ;;  %1258 = vadd.xlane.f32.xlu1 %v1257_v62  ;;  %v1225_v63 = vpop.xlane.xlu0 %1224  ;;  %v2561_v61 = vld [vmem:[%s3679_s5] ss:$0 sm:$0xff]  ;;  %s2612_s5 = sshll.u32 %s3682_s3, 6 }
 0x353   : > { %v3177_v0 = vsub.f32 %v3138_v33, %v1235_v60  ;;  %v1236_v1 = vmul.f32 0.0625, %v1225_v63  ;;  %v1250_v2 = vmul.f32 %v3172_v59, %v3172_v59  ;;  %s3601_s10 = scalar_lea.vmem %s3654_s25, %s2612_s5 }
 0x354   : > { %v1228_v3 = vpop.xlane.xlu1 %1227 }
 0x355   : > { %v3183_v5 = vsub.f32 %v3136_v32, %v1236_v1  ;;  %v1237_v6 = vmul.f32 0.0625, %v1228_v3  ;;  %v1266_v7 = vsel %vm1204_vm3, %v1250_v2, 0.0  ;;  %v1251_v8 = vmul.f32 %v3177_v0, %v3177_v0 }
 0x356   : > { %1264 = vadd.xlane.f32.xlu1 %v1263_v4  ;;  %1267 = vadd.xlane.f32.xlu0 %v1266_v7 }
 0x357   : > { %v3189_v9 = vsub.f32 %v3142_v35, %v1237_v6  ;;  %v1252_v10 = vmul.f32 %v3183_v5, %v3183_v5  ;;  %v1269_v11 = vsel %vm1204_vm3, %v1251_v8, 0.0 }
 0x359   : > { %v1272_v13 = vsel %vm1204_vm3, %v1252_v10, 0.0  ;;  %v1253_v14 = vmul.f32 %v3189_v9, %v3189_v9 }
 0x35a   : > { %1270 = vadd.xlane.f32.xlu1 %v1269_v11  ;;  %1273 = vadd.xlane.f32.xlu0 %v1272_v13 }
 0x35b   : > { %v1275_v16 = vsel %vm1204_vm3, %v1253_v14, 0.0 }
 0x35e   : > { %1276 = vadd.xlane.f32.xlu1 %v1275_v16 }
 0x3db   : > { %v1256_v21 = vpop.xlane.xlu0 %1255 }
 0x3dc   : > { %v1278_v22 = vmul.f32 0.0625, %v1256_v21 }
 0x3de   : > { %v1286_v23 = vadd.f32 1e-05, %v1278_v22 }
 0x3df   : > { %v1259_v24 = vpop.xlane.xlu1 %1258  ;;  %v1262_v25 = vpop.xlane.xlu0 %1261 }
 0x3e0   : > { %2826 = vrsqrt.f32 %v1286_v23  ;;  %v1279_v26 = vmul.f32 0.0625, %v1259_v24  ;;  %v1280_v27 = vmul.f32 0.0625, %v1262_v25 }
 0x3e2   : > { %v1287_v28 = vadd.f32 1e-05, %v1279_v26  ;;  %v1288_v30 = vadd.f32 1e-05, %v1280_v27 }
 0x3e3   : > { %v1265_v31 = vpop.xlane.xlu1 %1264  ;;  %v1268_v34 = vpop.xlane.xlu0 %1267 }
 0x3e4   : > { %2828 = vrsqrt.f32 %v1287_v28  ;;  %v1281_v36 = vmul.f32 0.0625, %v1265_v31  ;;  %v1282_v37 = vmul.f32 0.0625, %v1268_v34 }
 0x3e5   : > { %2830 = vrsqrt.f32 %v1288_v30 }
 0x3e6   : > { %v1289_v38 = vadd.f32 1e-05, %v1281_v36  ;;  %v1290_v39 = vadd.f32 1e-05, %v1282_v37 }
 0x3e7   : > { %v1271_v40 = vpop.xlane.xlu1 %1270  ;;  %v1274_v41 = vpop.xlane.xlu0 %1273 }
 0x3e8   : > { %2832 = vrsqrt.f32 %v1289_v38  ;;  %v1283_v42 = vmul.f32 0.0625, %v1271_v40  ;;  %v1284_v45 = vmul.f32 0.0625, %v1274_v41 }
 0x3e9   : > { %2834 = vrsqrt.f32 %v1290_v39 }
 0x3ea   : > { %v2827_v46 = vpop.eup %2826  ;;  %v1291_v47 = vadd.f32 1e-05, %v1283_v42  ;;  %v1292_v48 = vadd.f32 1e-05, %v1284_v45 }
 0x3eb   : > { %v1302_v49 = vmul.f32 %v2827_v46, %v3154_v44  ;;  %v1277_v52 = vpop.xlane.xlu1 %1276 }
 0x3ec   : > { %2836 = vrsqrt.f32 %v1291_v47  ;;  %v1285_v54 = vmul.f32 0.0625, %v1277_v52 }
 0x3ed   : > { %2838 = vrsqrt.f32 %v1292_v48  ;;  %v1316_v60 = vmul.f32 %v2560_v53, %v1302_v49 }
 0x3ee   : > { %v2829_v55 = vpop.eup %2828  ;;  %v1293_v56 = vadd.f32 1e-05, %v1285_v54 }
 0x3ef   : > { %v2831_v57 = vpop.eup %2830  ;;  %v1303_v58 = vmul.f32 %v2829_v55, %v3162_v51  ;;  %v1330_v4 = vadd.f32 %v2561_v61, %v1316_v60 }
 0x3f0   : > { %v1304_v44 = vmul.f32 %v2831_v57, %v3151_v43  ;;  %2840 = vrsqrt.f32 %v1293_v56 }
 0x3f1   : > { %v1317_v62 = vmul.f32 %v2560_v53, %v1303_v58 }
 0x3f2   : > { %v2833_v63 = vpop.eup %2832  ;;  %v1318_v2 = vmul.f32 %v2560_v53, %v1304_v44 }
 0x3f3   : > { %v2835_v1 = vpop.eup %2834  ;;  %v1305_v3 = vmul.f32 %v2833_v63, %v3159_v50  ;;  %v1331_v6 = vadd.f32 %v2561_v61, %v1317_v62 }
 0x3f4   : > { %v1306_v7 = vmul.f32 %v2835_v1, %v3172_v59  ;;  %v1332_v14 = vadd.f32 %v2561_v61, %v1318_v2 }
 0x3f5   : > { %v1319_v8 = vmul.f32 %v2560_v53, %v1305_v3  ;;  %v1338_v51 = vpack.c.bf16 %v1331_v6, %v1330_v4 }
 0x3f6   : > { %v2837_v10 = vpop.eup %2836  ;;  %v1320_v11 = vmul.f32 %v2560_v53, %v1306_v7 }
 0x3f7   : > { %v2839_v13 = vpop.eup %2838  ;;  %v1333_v16 = vadd.f32 %v2561_v61, %v1319_v8  ;;  %v1307_v43 = vmul.f32 %v2837_v10, %v3177_v0  ;;  %2713 = vmatprep.mubr.msk.bf16.mxu0 %vm1204_vm3, %v1338_v51  ;;  %2723 = vmatprep.mubr.msk.bf16.mxu1 %vm1204_vm3, %v1338_v51 }
 0x3f8   : > { %v1308_v18 = vmul.f32 %v2839_v13, %v3183_v5  ;;  %v1334_v22 = vadd.f32 %v2561_v61, %v1320_v11 }
 0x3f9   : > { %v1339_v50 = vpack.c.bf16 %v1333_v16, %v1332_v14  ;;  %v1321_v20 = vmul.f32 %v2560_v53, %v1307_v43 }
 0x3fa   : > { %v2841_v21 = vpop.eup %2840  ;;  %v1322_v24 = vmul.f32 %v2560_v53, %v1308_v18 }
 0x3fb   : > { %v1309_v59 = vmul.f32 %v2841_v21, %v3189_v9  ;;  %2714 = vmatmul.mubr.msk.bf16.vlgmr.msra.gmra.mrb[8].mxu0 %vm1204_vm3, %v1339_v50  ;;  %2724 = vmatmul.mubr.msk.bf16.vlgmr.msra.gmra.mrb[16].mxu1 %vm1204_vm3, %v1339_v50  ;;  %v1335_v23 = vadd.f32 %v2561_v61, %v1321_v20  ;;  %v2568_v9 = vld [vmem:[%s3641_s12] ss:$0 sm:$0xff] }
 0x3fc   : > { %v1336_v26 = vadd.f32 %v2561_v61, %v1322_v24 }
 0x3fd   : > { %v1340_v25 = vpack.c.bf16 %v1335_v23, %v1334_v22  ;;  %v1323_v0 = vmul.f32 %v2560_v53, %v1309_v59 }
 0x3ff   : > { %2717 = vmatprep.mubr.msk.bf16.mxu0 %vm1204_vm3, %v1340_v25  ;;  %2727 = vmatprep.mubr.msk.bf16.mxu1 %vm1204_vm3, %v1340_v25  ;;  %v1337_v5 = vadd.f32 %v2561_v61, %v1323_v0 }
 0x401   : > { %v1341_v27 = vpack.c.bf16 %v1337_v5, %v1336_v26 }
 0x403   : > { %2718 = vmatmul.mubr.msk.bf16.gmra.mrb[12].mxu0 %vm1204_vm3, %v1341_v27  ;;  %2728 = vmatmul.mubr.msk.bf16.gmra.mrb[20].mxu1 %vm1204_vm3, %v1341_v27 }
 0x4ce   : > { %v3229_v28 = vpop.f32.mrb[8].mxu0  ;;  %v2725_v30 = vpop.f32.mrb[16].mxu1 }
 0x4cf   : > { %v3231_v31 = vpop.f32.mrb[9].mxu0  ;;  %v1549_v34 = vpop.f32.mrb[17].mxu1  ;;  %v3241_v42 = vadd.f32 %v2725_v30, %v2568_v9 }
 0x4d0   : > { %v3233_v36 = vadd.f32 %v2568_v9, %v1549_v34  ;;  %v3235_v37 = vpop.f32.mrb[10].mxu0  ;;  %v2726_v38 = vpop.f32.mrb[18].mxu1 }
 0x4d1   : > { %v3237_v39 = vpop.f32.mrb[11].mxu0  ;;  %v1552_v40 = vpop.f32.mrb[19].mxu1  ;;  %v3243_v45 = vadd.f32 %v2726_v38, %v2568_v9  ;;  %v1582_v52 = vmul.f32 %v3241_v42, %v3241_v42 }
 0x4d2   : > { %v3239_v41 = vadd.f32 %v2568_v9, %v1552_v40  ;;  %v1580_v46 = vmul.f32 %v3233_v36, %v3233_v36 }
 0x4d3   : > { %v1583_v53 = vmul.f32 %v3243_v45, %v3243_v45  ;;  %v1590_v63 = vmul.f32 %v1582_v52, %v3241_v42 }
 0x4d4   : > { %v1581_v47 = vmul.f32 %v3239_v41, %v3239_v41  ;;  %v1588_v56 = vmul.f32 %v1580_v46, %v3233_v36 }
 0x4d5   : > { %v1591_v1 = vmul.f32 %v1583_v53, %v3243_v45  ;;  %v1598_v51 = vmul.f32 0.044715, %v1590_v63 }
 0x4d6   : > { %v3249_v48 = vpop.f32.mrb[12].mxu0  ;;  %v2729_v49 = vpop.f32.mrb[20].mxu1  ;;  %v1589_v44 = vmul.f32 %v1581_v47, %v3239_v41  ;;  %v1596_v2 = vmul.f32 0.044715, %v1588_v56 }
 0x4d7   : > { %v3255_v54 = vpop.f32.mrb[13].mxu0  ;;  %v1565_v55 = vpop.f32.mrb[21].mxu1  ;;  %v3263_v62 = vadd.f32 %v2729_v49, %v2568_v9  ;;  %v1599_v10 = vmul.f32 0.044715, %v1591_v1  ;;  %v1606_v22 = vadd.f32 %v1598_v51, %v3241_v42 }
 0x4d8   : > { %v3258_v57 = vpop.f32.mrb[14].mxu0  ;;  %v2730_v58 = vpop.f32.mrb[22].mxu1  ;;  %v3269_v4 = vadd.f32 %v2568_v9, %v1565_v55  ;;  %v1597_v6 = vmul.f32 0.044715, %v1589_v44  ;;  %v1604_v13 = vadd.f32 %v1596_v2, %v3233_v36 }
 0x4d9   : > { %v3260_v60 = vpop.f32.mrb[15].mxu0  ;;  %v1568_v61 = vpop.f32.mrb[23].mxu1  ;;  %v1586_v3 = vmul.f32 %v3263_v62, %v3263_v62  ;;  %v3273_v8 = vadd.f32 %v2730_v58, %v2568_v9  ;;  %v1607_v23 = vadd.f32 %v1599_v10, %v3243_v45  ;;  %v1614_v30 = vmul.f32 0.7978846, %v1606_v22 }
 0x4da   : > { %v1584_v7 = vmul.f32 %v3269_v4, %v3269_v4  ;;  %v3280_v43 = vadd.f32 %v2568_v9, %v1568_v61  ;;  %v1605_v18 = vadd.f32 %v1597_v6, %v3239_v41  ;;  %v1612_v0 = vmul.f32 0.7978846, %v1604_v13 }
 0x4db   : > { %v1594_v11 = vmul.f32 %v1586_v3, %v3263_v62  ;;  %v1587_v16 = vmul.f32 %v3273_v8, %v3273_v8  ;;  %v1615_v40 = vmul.f32 0.7978846, %v1607_v23 }
 0x4dc   : > { %v1592_v14 = vmul.f32 %v1584_v7, %v3269_v4  ;;  %v1585_v21 = vmul.f32 %v3280_v43, %v3280_v43  ;;  %2842 = vtanh.f32 %v1612_v0  ;;  %v1613_v27 = vmul.f32 0.7978846, %v1605_v18 }
 0x4dd   : > { %v1595_v20 = vmul.f32 %v1587_v16, %v3273_v8  ;;  %v1602_v59 = vmul.f32 0.044715, %v1594_v11 }
 0x4de   : > { %v1600_v50 = vmul.f32 0.044715, %v1592_v14  ;;  %v1593_v25 = vmul.f32 %v1585_v21, %v3280_v43  ;;  %2844 = vtanh.f32 %v1613_v27 }
 0x4df   : > { %v1603_v24 = vmul.f32 0.044715, %v1595_v20  ;;  %v1610_v9 = vadd.f32 %v1602_v59, %v3263_v62  ;;  %2846 = vtanh.f32 %v1614_v30 }
 0x4e0   : > { %v1608_v26 = vadd.f32 %v1600_v50, %v3269_v4  ;;  %v1601_v5 = vmul.f32 0.044715, %v1593_v25  ;;  %2848 = vtanh.f32 %v1615_v40 }
 0x4e1   : > { %v1611_v34 = vadd.f32 %v1603_v24, %v3273_v8  ;;  %v1618_v49 = vmul.f32 0.7978846, %v1610_v9 }
 0x4e2   : > { %v1609_v38 = vadd.f32 %v1601_v5, %v3280_v43  ;;  %v1616_v46 = vmul.f32 0.7978846, %v1608_v26 }
 0x4e3   : > { %v1619_v52 = vmul.f32 0.7978846, %v1611_v34 }
 0x4e4   : > { %v1617_v47 = vmul.f32 0.7978846, %v1609_v38  ;;  %2850 = vtanh.f32 %v1616_v46 }
 0x4e6   : > { %2852 = vtanh.f32 %v1617_v47  ;;  %v2843_v53 = vpop.eup %2842 }
 0x4e7   : > { %2854 = vtanh.f32 %v1618_v49  ;;  %v1628_v55 = vadd.f32 1.0, %v2843_v53 }
 0x4e8   : > { %2856 = vtanh.f32 %v1619_v52  ;;  %v2845_v56 = vpop.eup %2844 }
 0x4e9   : > { %v1636_v58 = vmul.f32 0.5, %v1628_v55  ;;  %v1629_v61 = vadd.f32 1.0, %v2845_v56  ;;  %v2847_v44 = vpop.eup %2846 }
 0x4ea   : > { %v1630_v2 = vadd.f32 1.0, %v2847_v44  ;;  %v2849_v3 = vpop.eup %2848 }
 0x4eb   : > { %v1644_v63 = vmul.f32 %v1636_v58, %v3233_v36  ;;  %v1637_v1 = vmul.f32 0.5, %v1629_v61  ;;  %v1631_v11 = vadd.f32 1.0, %v2849_v3 }
 0x4ec   : > { %v1638_v10 = vmul.f32 0.5, %v1630_v2 }
 0x4ed   : > { %v1653_v7 = vsel %vm1652_vm4, %v1644_v63, 0.0  ;;  %v1645_v51 = vmul.f32 %v1637_v1, %v3239_v41  ;;  %v1639_v20 = vmul.f32 0.5, %v1631_v11 }
 0x4ee   : > { %v2851_v6 = vpop.eup %2850  ;;  %1654 = vadd.xlane.f32.xlu0 %v1653_v7  ;;  %v1646_v50 = vmul.f32 %v1638_v10, %v3241_v42 }
 0x4ef   : > { %v1632_v14 = vadd.f32 1.0, %v2851_v6  ;;  %v1656_v18 = vsel %vm1652_vm4, %v1645_v51, 0.0  ;;  %v1647_v41 = vmul.f32 %v1639_v20, %v3243_v45 }
 0x4f0   : > { %v2853_v13 = vpop.eup %2852  ;;  %1657 = vadd.xlane.f32.xlu1 %v1656_v18  ;;  %v1659_v23 = vsel %vm1652_vm4, %v1646_v50, 0.0 }
 0x4f1   : > { %v2855_v16 = vpop.eup %2854  ;;  %v1633_v36 = vadd.f32 1.0, %v2853_v13  ;;  %v1640_v22 = vmul.f32 0.5, %v1632_v14  ;;  %v1662_v5 = vsel %vm1652_vm4, %v1647_v41, 0.0 }
 0x4f2   : > { %v2857_v21 = vpop.eup %2856  ;;  %v1634_v59 = vadd.f32 1.0, %v2855_v16  ;;  %1660 = vadd.xlane.f32.xlu0 %v1659_v23 }
 0x4f3   : > { %v1641_v24 = vmul.f32 0.5, %v1633_v36  ;;  %v1635_v25 = vadd.f32 1.0, %v2857_v21  ;;  %v1648_v0 = vmul.f32 %v1640_v22, %v3269_v4 }
 0x4f4   : > { %v1642_v26 = vmul.f32 0.5, %v1634_v59  ;;  %1663 = vadd.xlane.f32.xlu1 %v1662_v5 }
 0x4f5   : > { %v1649_v42 = vmul.f32 %v1641_v24, %v3280_v43  ;;  %v1643_v27 = vmul.f32 0.5, %v1635_v25  ;;  %v1665_v9 = vsel %vm1652_vm4, %v1648_v0, 0.0 }
 0x4f6   : > { %v1650_v34 = vmul.f32 %v1642_v26, %v3263_v62  ;;  %1666 = vadd.xlane.f32.xlu0 %v1665_v9  ;;  %v2930_v9 = vmov 0  }
 0x4f7   : > { %v1668_v30 = vsel %vm1652_vm4, %v1649_v42, 0.0  ;;  %v1651_v45 = vmul.f32 %v1643_v27, %v3273_v8  ;;  %v825_v27 = vld [vmem:[%s3645_s16 + $0x8] sm:$0xff]  ;;  %2803 = vset.pattern.permute.xlu1 %v2930_v9  ;;  %2802 = vset.pattern.permute.xlu0 %v2930_v9 }
 0x4f8   : > { %1669 = vadd.xlane.f32.xlu1 %v1668_v30  ;;  %v1671_v38 = vsel %vm1652_vm4, %v1650_v34, 0.0  ;;  %v824_v30 = vld [vmem:[%s3645_s16] sm:$0xff] }
 0x4f9   : > { %v1674_v4 = vsel %vm1652_vm4, %v1651_v45, 0.0 }
 0x4fa   : > { %1672 = vadd.xlane.f32.xlu0 %v1671_v38  ;;  %v828_v38 = vld [vmem:[%s3645_s16 + $0x20] sm:$0xff] }
 0x4fc   : > { %1675 = vadd.xlane.f32.xlu1 %v1674_v4  ;;  %v829_v4 = vld [vmem:[%s3645_s16 + $0x28] sm:$0xff] }
 0x57b   : > { %v1655_v40 = vpop.xlane.xlu0 %1654 }
 0x57c   : > { %v1678_v43 = vmul.f32 0.125, %v1655_v40  ;;  %v830_v40 = vld [vmem:[%s3645_s16 + $0x30] sm:$0xff] }
 0x57d   : > { %v1658_v46 = vpop.xlane.xlu1 %1657 }
 0x57e   : > { %v3309_v47 = vsub.f32 %v1644_v63, %v1678_v43  ;;  %v1679_v49 = vmul.f32 0.125, %v1658_v46  ;;  %v831_v43 = vld [vmem:[%s3645_s16 + $0x38] sm:$0xff]  ;;  %v832_v46 = vld [vmem:[%s3646_s17] sm:$0xf] }
 0x57f   : > { %v1661_v52 = vpop.xlane.xlu0 %1660  ;;  %2792 = vmatprep.subr.msk.bf16.mxu1 %vm1958_vm6, %v832_v46 }
 0x580   : > { %v3311_v53 = vsub.f32 %v1645_v51, %v1679_v49  ;;  %v1680_v62 = vmul.f32 0.125, %v1661_v52  ;;  %v1694_v8 = vmul.f32 %v3309_v47, %v3309_v47  ;;  %v1960_v49 = vsel %vm1958_vm6, %v832_v46, 0 }
 0x581   : > { %v1664_v55 = vpop.xlane.xlu1 %1663  ;;  %2748 = vmatpush3.bf16.msra.mxu1 %v1960_v49 }
 0x582   : > { %v3315_v56 = vsub.f32 %v1646_v50, %v1680_v62  ;;  %v1681_v58 = vmul.f32 0.125, %v1664_v55  ;;  %v1702_v61 = vsel %vm1652_vm4, %v1694_v8, 0.0  ;;  %v1695_v44 = vmul.f32 %v3311_v53, %v3311_v53 }
 0x583   : > { %1703 = vadd.xlane.f32.xlu0 %v1702_v61  ;;  %v1667_v63 = vpop.xlane.xlu0 %1666 }
 0x584   : > { %v3320_v1 = vsub.f32 %v1647_v41, %v1681_v58  ;;  %v1682_v2 = vmul.f32 0.125, %v1667_v63  ;;  %v1705_v3 = vsel %vm1652_vm4, %v1695_v44, 0.0  ;;  %v1696_v6 = vmul.f32 %v3315_v56, %v3315_v56 }
 0x585   : > { %1706 = vadd.xlane.f32.xlu1 %v1705_v3  ;;  %v1670_v7 = vpop.xlane.xlu1 %1669 }
 0x586   : > { %v3325_v51 = vsub.f32 %v1648_v0, %v1682_v2  ;;  %v1683_v10 = vmul.f32 0.125, %v1670_v7  ;;  %v1708_v11 = vsel %vm1652_vm4, %v1696_v6, 0.0  ;;  %v1697_v13 = vmul.f32 %v3320_v1, %v3320_v1 }
 0x587   : > { %1709 = vadd.xlane.f32.xlu0 %v1708_v11  ;;  %v1673_v14 = vpop.xlane.xlu0 %1672 }
 0x588   : > { %v3330_v16 = vsub.f32 %v1649_v42, %v1683_v10  ;;  %v1684_v18 = vmul.f32 0.125, %v1673_v14  ;;  %v1711_v50 = vsel %vm1652_vm4, %v1697_v13, 0.0  ;;  %v1698_v20 = vmul.f32 %v3325_v51, %v3325_v51  ;;  %v2817_v42 = vld [vmem:[%s3644_s15] sm:$0xff]  }
 0x589   : > { %1712 = vadd.xlane.f32.xlu1 %v1711_v50  ;;  %v1676_v36 = vpop.xlane.xlu1 %1675  ;;  %2739 = vmatprep.mubr.msk.bf16.mxu0 %vm1850_vm5, %v2817_v42 }
 0x58a   : > { %v3335_v21 = vsub.f32 %v1650_v34, %v1684_v18  ;;  %v1685_v22 = vmul.f32 0.125, %v1676_v36  ;;  %v1714_v59 = vsel %vm1652_vm4, %v1698_v20, 0.0  ;;  %v1699_v23 = vmul.f32 %v3330_v16, %v3330_v16  ;;  %v826_v34 = vld [vmem:[%s3645_s16 + $0x10] sm:$0xff] }
 0x58b   : > { %1715 = vadd.xlane.f32.xlu0 %v1714_v59 }
 0x58c   : > { %v3340_v41 = vsub.f32 %v1651_v45, %v1685_v22  ;;  %v1717_v24 = vsel %vm1652_vm4, %v1699_v23, 0.0  ;;  %v1700_v25 = vmul.f32 %v3335_v21, %v3335_v21  ;;  %v827_v45 = vld [vmem:[%s3645_s16 + $0x18] sm:$0xff] }
 0x58d   : > { %1718 = vadd.xlane.f32.xlu1 %v1717_v24 }
 0x58e   : > { %v1720_v0 = vsel %vm1652_vm4, %v1700_v25, 0.0  ;;  %v1701_v26 = vmul.f32 %v3340_v41, %v3340_v41  ;;  %v2574_v25 = vld [vmem:[%s3642_s13] ss:$0 sm:$0xff] }
 0x58f   : > { %1721 = vadd.xlane.f32.xlu0 %v1720_v0 }
 0x590   : > { %v1723_v5 = vsel %vm1652_vm4, %v1701_v26, 0.0 }
 0x591   : > { %1724 = vadd.xlane.f32.xlu1 %v1723_v5 }
 0x5a2   : > { %1797 = vperm.xlu1 %2803, %v825_v27  }
 0x5a5   : > { %1792 = vperm.xlu0 %2802, %v824_v30   ;;  %v2575_v30 = vld [vmem:[%s3643_s14] ss:$0 sm:$0xff] }
 0x5a6   : > { %1802 = vperm.xlu1 %2803, %v826_v34  }
 0x5aa   : > { %1807 = vperm.xlu1 %2803, %v827_v45  }
 0x5ae   : > { %1812 = vperm.xlu1 %2803, %v828_v38  }
 0x5b2   : > { %1817 = vperm.xlu1 %2803, %v829_v4  }
 0x5b6   : > { %1822 = vperm.xlu1 %2803, %v830_v40  }
 0x5ba   : > { %1827 = vperm.xlu1 %2803, %v831_v43  }
 0x610   : > { %v1704_v52 = vpop.xlane.xlu0 %1703 }
 0x611   : > { %v1726_v62 = vmul.f32 0.125, %v1704_v52 }
 0x612   : > { %v1707_v8 = vpop.xlane.xlu1 %1706 }
 0x613   : > { %v1734_v55 = vadd.f32 1e-05, %v1726_v62  ;;  %v1727_v58 = vmul.f32 0.125, %v1707_v8 }
 0x614   : > { %v1710_v61 = vpop.xlane.xlu0 %1709 }
 0x615   : > { %2858 = vrsqrt.f32 %v1734_v55  ;;  %v1735_v44 = vadd.f32 1e-05, %v1727_v58  ;;  %v1728_v63 = vmul.f32 0.125, %v1710_v61 }
 0x616   : > { %v1713_v2 = vpop.xlane.xlu1 %1712 }
 0x617   : > { %2860 = vrsqrt.f32 %v1735_v44  ;;  %v1736_v3 = vadd.f32 1e-05, %v1728_v63  ;;  %v1729_v6 = vmul.f32 0.125, %v1713_v2 }
 0x618   : > { %v1716_v7 = vpop.xlane.xlu0 %1715 }
 0x619   : > { %2862 = vrsqrt.f32 %v1736_v3  ;;  %v1737_v10 = vadd.f32 1e-05, %v1729_v6  ;;  %v1730_v11 = vmul.f32 0.125, %v1716_v7 }
 0x61a   : > { %v1719_v13 = vpop.xlane.xlu1 %1718 }
 0x61b   : > { %2864 = vrsqrt.f32 %v1737_v10  ;;  %v1738_v14 = vadd.f32 1e-05, %v1730_v11  ;;  %v1731_v18 = vmul.f32 0.125, %v1719_v13 }
 0x61c   : > { %v1722_v50 = vpop.xlane.xlu0 %1721 }
 0x61d   : > { %2866 = vrsqrt.f32 %v1738_v14  ;;  %v1739_v20 = vadd.f32 1e-05, %v1731_v18  ;;  %v1732_v36 = vmul.f32 0.125, %v1722_v50  ;;  %v2819_v18 = vld [vmem:[%s3644_s15 + $0x10] sm:$0xff]   ;;  %v2821_v50 = vld [vmem:[%s3648_s19] sm:$0xff]  }
 0x61e   : > { %v1725_v22 = vpop.xlane.xlu1 %1724 }
 0x61f   : > { %v2859_v59 = vpop.eup %2858  ;;  %2868 = vrsqrt.f32 %v1739_v20  ;;  %v1740_v23 = vadd.f32 1e-05, %v1732_v36  ;;  %v1733_v24 = vmul.f32 0.125, %v1725_v22  ;;  %v2562_v20 = vld [vmem:[%s3680_s0] ss:$0 sm:$0xff]  ;;  %s3533_s0 = scalar_lea.vmem %s3655_s26, %s2612_s5 }
 0x620   : > { %v1750_v0 = vmul.f32 %v2859_v59, %v3309_v47  ;;  %v3413_v36 = vadd.f32 %v3229_v28, %v2562_v20  ;;  %v3416_v22 = vadd.f32 %v2562_v20, %v3231_v31  ;;  %v3419_v59 = vadd.f32 %v3235_v37, %v2562_v20 }
 0x621   : > { %v2861_v26 = vpop.eup %2860  ;;  %2870 = vrsqrt.f32 %v1740_v23  ;;  %v1741_v5 = vadd.f32 1e-05, %v1733_v24  ;;  %v3422_v23 = vadd.f32 %v2562_v20, %v3237_v39  ;;  %v3434_v37 = vadd.f32 %v3249_v48, %v2562_v20 }
 0x622   : > { %v1751_v42 = vmul.f32 %v2861_v26, %v3311_v53  ;;  %v1764_v27 = vmul.f32 %v2574_v25, %v1750_v0  ;;  %v1433_v24 = vmul.f32 %v3413_v36, %v3413_v36  ;;  %v1434_v0 = vmul.f32 %v3419_v59, %v3419_v59 }
 0x623   : > { %v2863_v9 = vpop.eup %2862  ;;  %2872 = vrsqrt.f32 %v1741_v5  ;;  %v1432_v28 = vmul.f32 %v3422_v23, %v3422_v23  ;;  %v3438_v26 = vadd.f32 %v2562_v20, %v3255_v54  ;;  %v1437_v48 = vmul.f32 %v3434_v37, %v3434_v37 }
 0x624   : > { %v1765_v34 = vmul.f32 %v2574_v25, %v1751_v42  ;;  %v1752_v45 = vmul.f32 %v2863_v9, %v3315_v56  ;;  %v1778_v4 = vadd.f32 %v2575_v30, %v1764_v27  ;;  %v1441_v31 = vmul.f32 %v1433_v24, %v3413_v36 }
 0x625   : > { %v2865_v38 = vpop.eup %2864  ;;  %v1442_v5 = vmul.f32 %v1434_v0, %v3419_v59  ;;  %v3442_v42 = vadd.f32 %v3258_v57, %v2562_v20  ;;  %v1440_v27 = vmul.f32 %v1432_v28, %v3422_v23  ;;  %v3446_v9 = vadd.f32 %v2562_v20, %v3260_v60 }
 0x626   : > { %v1779_v40 = vadd.f32 %v2575_v30, %v1765_v34  ;;  %v1753_v47 = vmul.f32 %v2865_v38, %v3320_v1  ;;  %v1766_v43 = vmul.f32 %v2574_v25, %v1752_v45  ;;  %v1435_v45 = vmul.f32 %v3438_v26, %v3438_v26 }
 0x627   : > { %v2867_v46 = vpop.eup %2866  ;;  %v1450_v54 = vmul.f32 0.044715, %v1442_v5  ;;  %v1438_v38 = vmul.f32 %v3442_v42, %v3442_v42  ;;  %v1436_v57 = vmul.f32 %v3446_v9, %v3446_v9  ;;  %v1445_v60 = vmul.f32 %v1437_v48, %v3434_v37  ;;  %v1793_v48 = vpop.permute.xlu0 %1792 }
 0x628   : > { %v1786_v49 = vpack.c.bf16 %v1779_v40, %v1778_v4  ;;  %v1767_v52 = vmul.f32 %v2574_v25, %v1753_v47  ;;  %v1754_v53 = vmul.f32 %v2867_v46, %v3325_v51  ;;  %v1780_v8 = vadd.f32 %v2575_v30, %v1766_v43 }
 0x629   : > { %v2869_v62 = vpop.eup %2868  ;;  %v1448_v4 = vmul.f32 0.044715, %v1440_v27  ;;  %v1443_v43 = vmul.f32 %v1435_v45, %v3438_v26  ;;  %v1458_v46 = vadd.f32 %v1450_v54, %v3419_v59 }
 0x62a   : > { %2731 = vmatprep.subr.bf16.mxu0 %v1786_v49  ;;  %v1781_v55 = vadd.f32 %v2575_v30, %v1767_v52  ;;  %v1755_v58 = vmul.f32 %v2869_v62, %v3330_v16  ;;  %v1768_v61 = vmul.f32 %v2574_v25, %v1754_v53  ;;  %v3462_v52 = vpop.permute.xlu1 %1797  ;;  %v1444_v62 = vmul.f32 %v1436_v57, %v3446_v9 }
 0x62b   : > { %v2871_v44 = vpop.eup %2870  ;;  %2732 = vmatpush3.bf16.msra.mxu0 %v1786_v49  ;;  %v1446_v49 = vmul.f32 %v1438_v38, %v3442_v42  ;;  %v1456_v53 = vadd.f32 %v1448_v4, %v3422_v23 }
 0x62c   : > { %v1787_v56 = vpack.c.bf16 %v1781_v55, %v1780_v8  ;;  %v1769_v63 = vmul.f32 %v2574_v25, %v1755_v58  ;;  %v1756_v2 = vmul.f32 %v2871_v44, %v3335_v21  ;;  %v1782_v3 = vadd.f32 %v2575_v30, %v1768_v61  ;;  %v2818_v21 = vld [vmem:[%s3644_s15 + $0x8] sm:$0xff]  }
 0x62d   : > { %v2873_v1 = vpop.eup %2872  ;;  %v1453_v55 = vmul.f32 0.044715, %v1445_v60  ;;  %v1451_v61 = vmul.f32 0.044715, %v1443_v43  ;;  %v1466_v44 = vmul.f32 0.7978846, %v1458_v46 }
 0x62e   : > { %2733 = vmatprep.subr.bf16.mxu0 %v1787_v56  ;;  %v1783_v6 = vadd.f32 %v2575_v30, %v1769_v63  ;;  %v1757_v7 = vmul.f32 %v2873_v1, %v3340_v41  ;;  %v1770_v51 = vmul.f32 %v2574_v25, %v1756_v2  ;;  %v2820_v41 = vld [vmem:[%s3644_s15 + $0x18] sm:$0xff]   ;;  %v1464_v63 = vmul.f32 0.7978846, %v1456_v53 }
 0x62f   : > { %2734 = vmatpush3.bf16.msra.mxu0 %v1787_v56  ;;  %v1454_v56 = vmul.f32 0.044715, %v1446_v49  ;;  %v1452_v2 = vmul.f32 0.044715, %v1444_v62  ;;  %v1461_v1 = vadd.f32 %v1453_v55, %v3434_v37 }
 0x630   : > { %v1788_v10 = vpack.c.bf16 %v1783_v6, %v1782_v3  ;;  %v1771_v11 = vmul.f32 %v2574_v25, %v1757_v7  ;;  %v1784_v13 = vadd.f32 %v2575_v30, %v1770_v51  ;;  %v1431_v25 = vmul.f32 %v3416_v22, %v3416_v22  ;;  %v1803_v3 = vpop.permute.xlu1 %1802 }
 0x631   : > { %v1459_v6 = vadd.f32 %v1451_v61, %v3438_v26  ;;  %v1462_v7 = vadd.f32 %v1454_v56, %v3442_v42  ;;  %v1460_v51 = vadd.f32 %v1452_v2, %v3446_v9 }
 0x632   : > { %2735 = vmatprep.subr.bf16.mxu0 %v1788_v10  ;;  %v1785_v16 = vadd.f32 %v2575_v30, %v1771_v11  ;;  %v1439_v39 = vmul.f32 %v1431_v25, %v3416_v22  ;;  %v1449_v30 = vmul.f32 0.044715, %v1441_v31 }
 0x633   : > { %2736 = vmatpush3.bf16.msra.mxu0 %v1788_v10  ;;  %v1469_v10 = vmul.f32 0.7978846, %v1461_v1  ;;  %v1467_v11 = vmul.f32 0.7978846, %v1459_v6 }
 0x634   : > { %v1789_v14 = vpack.c.bf16 %v1785_v16, %v1784_v13  ;;  %v1447_v34 = vmul.f32 0.044715, %v1439_v39  ;;  %v1457_v40 = vadd.f32 %v1449_v30, %v3413_v36  ;;  %v1470_v13 = vmul.f32 0.7978846, %v1462_v7  ;;  %v1808_v16 = vpop.permute.xlu1 %1807 }
 0x636   : > { %2737 = vmatprep.subr.bf16.mxu0 %v1789_v14  ;;  %v1455_v47 = vadd.f32 %v1447_v34, %v3416_v22  ;;  %v1465_v8 = vmul.f32 0.7978846, %v1457_v40 }
 0x637   : > { %2738 = vmatpush3.bf16.msra.mxu0 %v1789_v14  ;;  %v1468_v14 = vmul.f32 0.7978846, %v1460_v51 }
 0x638   : > { %2757 = vmatprep.subr.bf16.mxu0 %v2821_v50  ;;  %v1463_v58 = vmul.f32 0.7978846, %v1455_v47  ;;  %2874 = vtanh.f32 %v1465_v8 }
 0x63a   : > { %2740 = vmatmul.mubr.msk.bf16.vlgmr.msra.gmra.mrb[16].mxu0 %vm1850_vm5, %v2818_v21  ;;  %2876 = vtanh.f32 %v1463_v58 }
 0x63b   : > { %2743 = vmatprep.mubr.msk.bf16.mxu0 %vm1850_vm5, %v2819_v18  ;;  %2758 = vmatpush3.bf16.msra.mxu0 %v2821_v50  ;;  %2878 = vtanh.f32 %v1466_v44  ;;  %v1813_v50 = vpop.permute.xlu1 %1812 }
 0x63c   : > { %2880 = vtanh.f32 %v1464_v63 }
 0x63d   : > { %2882 = vtanh.f32 %v1469_v10 }
 0x63e   : > { %2884 = vtanh.f32 %v1467_v11 }
 0x63f   : > { %2886 = vtanh.f32 %v1470_v13  ;;  %v1818_v5 = vpop.permute.xlu1 %1817 }
 0x640   : > { %2888 = vtanh.f32 %v1468_v14 }
 0x642   : > { %2744 = vmatmul.mubr.msk.bf16.gmra.mrb[20].mxu0 %vm1850_vm5, %v2820_v41  ;;  %v2875_v21 = vpop.eup %2874 }
 0x643   : > { %v1481_v24 = vadd.f32 1.0, %v2875_v21  ;;  %v1823_v44 = vpop.permute.xlu1 %1822 }
 0x644   : > { %v2877_v18 = vpop.eup %2876 }
 0x645   : > { %v2879_v41 = vpop.eup %2878  ;;  %v1479_v25 = vadd.f32 1.0, %v2877_v18  ;;  %v1489_v31 = vmul.f32 0.5, %v1481_v24 }
 0x646   : > { %v2881_v20 = vpop.eup %2880  ;;  %v1482_v0 = vadd.f32 1.0, %v2879_v41 }
 0x647   : > { %v1480_v28 = vadd.f32 1.0, %v2881_v20  ;;  %v2883_v39 = vpop.eup %2882  ;;  %v1487_v27 = vmul.f32 0.5, %v1479_v25  ;;  %v1497_v57 = vmul.f32 %v1489_v31, %v3413_v36  ;;  %v1828_v21 = vpop.permute.xlu1 %1827 }
 0x648   : > { %v2885_v30 = vpop.eup %2884  ;;  %v1490_v34 = vmul.f32 0.5, %v1482_v0  ;;  %v1485_v47 = vadd.f32 1.0, %v2883_v39 }
 0x649   : > { %v2887_v45 = vpop.eup %2886  ;;  %v1488_v38 = vmul.f32 0.5, %v1480_v28  ;;  %v1495_v43 = vmul.f32 %v1487_v27, %v3416_v22  ;;  %v1483_v53 = vadd.f32 1.0, %v2885_v30 }
 0x64a   : > { %v2889_v4 = vpop.eup %2888  ;;  %v1498_v8 = vmul.f32 %v1490_v34, %v3419_v59  ;;  %v1486_v61 = vadd.f32 1.0, %v2887_v45 }
 0x64b   : > { %v1496_v63 = vmul.f32 %v1488_v38, %v3422_v23  ;;  %v1484_v2 = vadd.f32 1.0, %v2889_v4  ;;  %v1491_v22 = vmul.f32 0.5, %v1483_v53 }
 0x64c   : > { %v1494_v51 = vmul.f32 0.5, %v1486_v61 }
 0x64d   : > { %v1492_v13 = vmul.f32 0.5, %v1484_v2  ;;  %v1499_v18 = vmul.f32 %v1491_v22, %v3438_v26  ;;  %v2822_v26 = vld [vmem:[%s3650_s21] sm:$0xff]  }
 0x64e   : > { %v1502_v20 = vmul.f32 %v1494_v51, %v3442_v42  ;;  %2767 = vmatprep.subr.bf16.mxu1 %v2822_v26  ;;  %v2584_v42 = vld [vmem:[%s3647_s18] ss:$0 sm:$0xff] }
 0x64f   : > { %v1500_v28 = vmul.f32 %v1492_v13, %v3446_v9 }
 0x70d   : > { %v2741_v54 = vpop.f32.mrb[16].mxu0 }
 0x70e   : > { %v1906_v40 = vadd.f32 %v2741_v54, %v1803_v3  ;;  %v1897_v60 = vpop.f32.mrb[17].mxu0  ;;  %v1493_v3 = vmul.f32 0.5, %v1485_v47 }
 0x70f   : > { %v1898_v46 = vadd.f32 %v1897_v60, %v1793_v48  ;;  %v2742_v49 = vpop.f32.mrb[18].mxu0 }
 0x710   : > { %v1930_v62 = vmul.f32 %v1906_v40, %v1497_v57  ;;  %v1909_v55 = vadd.f32 %v2742_v49, %v1808_v16  ;;  %v1900_v58 = vpop.f32.mrb[19].mxu0  ;;  %v1501_v59 = vmul.f32 %v1493_v3, %v3434_v37 }
 0x711   : > { %v1928_v56 = vmul.f32 %v1898_v46, %v1495_v43  ;;  %v1901_v36 = vadd.f32 %v1900_v58, %v3462_v52 }
 0x712   : > { %v1931_v1 = vmul.f32 %v1909_v55, %v1498_v8 }
 0x713   : > { %v1929_v6 = vmul.f32 %v1901_v36, %v1496_v63  ;;  %v2824_v63 = vld [vmem:[%s3652_s23] sm:$0xff]  }
 0x714   : > { %v1937_v7 = vpack.c.bf16 %v1931_v1, %v1930_v62  ;;  %2779 = vmatprep.subr.bf16.mxu0 %v2824_v63 }
 0x715   : > { %v1936_v10 = vpack.c.bf16 %v1929_v6, %v1928_v56  ;;  %v2745_v11 = vpop.f32.mrb[20].mxu0 }
 0x716   : > { %v1922_v16 = vadd.f32 %v2745_v11, %v1823_v44  ;;  %v1913_v14 = vpop.f32.mrb[21].mxu0 }
 0x717   : > { %v1914_v23 = vadd.f32 %v1913_v14, %v1813_v50  ;;  %v2746_v41 = vpop.f32.mrb[22].mxu0  ;;  %2749 = vmatprep.mubr.msk.bf16.mxu1 %vm1652_vm4, %v1936_v10 }
 0x718   : > { %v1934_v52 = vmul.f32 %v1922_v16, %v1501_v59  ;;  %v1925_v24 = vadd.f32 %v2746_v41, %v1828_v21  ;;  %v1916_v25 = vpop.f32.mrb[23].mxu0  ;;  %2750 = vmatmul.mubr.msk.bf16.vlgmr.msra.gmra.mrb[24].mxu1 %vm1652_vm4, %v1937_v7 }
 0x719   : > { %v1932_v0 = vmul.f32 %v1914_v23, %v1499_v18  ;;  %v1917_v37 = vadd.f32 %v1916_v25, %v1818_v5  ;;  %2768 = vmatpush3.bf16.msra.mxu1 %v2822_v26 }
 0x71a   : > { %v1935_v31 = vmul.f32 %v1925_v24, %v1502_v20 }
 0x71b   : > { %v1933_v39 = vmul.f32 %v1917_v37, %v1500_v28 }
 0x71c   : > { %v1939_v27 = vpack.c.bf16 %v1935_v31, %v1934_v52 }
 0x71d   : > { %v1938_v30 = vpack.c.bf16 %v1933_v39, %v1932_v0 }
 0x71f   : > { %2753 = vmatprep.mubr.msk.bf16.mxu1 %vm1652_vm4, %v1938_v30  ;;  %v2602_v30 = vld [vmem:[%s3653_s24] ss:$0 sm:$0xff] }
 0x720   : > { %2754 = vmatmul.mubr.msk.bf16.gmra.mrb[28].mxu1 %vm1652_vm4, %v1939_v27  ;;  %v2595_v27 = vld [vmem:[%s3651_s22] ss:$0 sm:$0xff] }
 0x7eb   : > { %v2751_v9 = vpop.f32.mrb[24].mxu1 }
 0x7ec   : > { %v2005_v50 = vadd.f32 %v2751_v9, %v2584_v42  ;;  %v1996_v5 = vpop.f32.mrb[25].mxu1 }
 0x7ed   : > { %v1997_v48 = vadd.f32 %v2584_v42, %v1996_v5  ;;  %v2752_v34 = vpop.f32.mrb[26].mxu1 }
 0x7ee   : > { %v2008_v45 = vadd.f32 %v2752_v34, %v2584_v42  ;;  %v1999_v54 = vpop.f32.mrb[27].mxu1  ;;  %v2029_v4 = vadd.f32 %v2005_v50, %v3118_v12 }
 0x7ef   : > { %v2000_v38 = vadd.f32 %v2584_v42, %v1999_v54  ;;  %v2027_v40 = vadd.f32 %v1997_v48, %v3120_v15 }
 0x7f0   : > { %v2030_v57 = vadd.f32 %v2008_v45, %v3122_v17 }
 0x7f1   : > { %v2028_v60 = vadd.f32 %v2000_v38, %v3126_v19 }
 0x7f2   : > { %v2036_v47 = vpack.c.bf16 %v2030_v57, %v2029_v4 }
 0x7f3   : > { %v2035_v43 = vpack.c.bf16 %v2028_v60, %v2027_v40  ;;  %v2755_v46 = vpop.f32.mrb[28].mxu1 }
 0x7f4   : > { %v2021_v49 = vadd.f32 %v2755_v46, %v2584_v42  ;;  %v2012_v53 = vpop.f32.mrb[29].mxu1 }
 0x7f5   : > { %v2013_v62 = vadd.f32 %v2584_v42, %v2012_v53  ;;  %v2756_v8 = vpop.f32.mrb[30].mxu1  ;;  %2759 = vmatprep.mubr.msk.bf16.mxu0 %vm1204_vm3, %v2035_v43 }
 0x7f6   : > { %v2024_v55 = vadd.f32 %v2756_v8, %v2584_v42  ;;  %v2015_v58 = vpop.f32.mrb[31].mxu1  ;;  %2760 = vmatmul.mubr.msk.bf16.vlgmr.msra.gmra.mrb[24].mxu0 %vm1204_vm3, %v2036_v47  ;;  %v2033_v17 = vadd.f32 %v2021_v49, %v3136_v32  ;;  %v2823_v32 = vld [vmem:[%s3650_s21 + $0x8] sm:$0xff]  }
 0x7f7   : > { %v2016_v12 = vadd.f32 %v2584_v42, %v2015_v58  ;;  %v2031_v19 = vadd.f32 %v2013_v62, %v3134_v29  ;;  %v2825_v29 = vld [vmem:[%s3652_s23 + $0x8] sm:$0xff]   ;;  %2780 = vmatpush3.bf16.msra.mxu0 %v2824_v63  ;;  %2769 = vmatprep.subr.bf16.mxu1 %v2823_v32 }
 0x7f8   : > { %v2034_v15 = vadd.f32 %v2024_v55, %v3142_v35  ;;  %2781 = vmatprep.subr.bf16.mxu0 %v2825_v29  ;;  %2770 = vmatpush3.bf16.msra.mxu1 %v2823_v32 }
 0x7f9   : > { %v2032_v61 = vadd.f32 %v2016_v12, %v3138_v33  ;;  %v2589_v33 = vld [vmem:[%s3649_s20] ss:$0 sm:$0xff] }
 0x7fa   : > { %v2038_v44 = vpack.c.bf16 %v2034_v15, %v2033_v17 }
 0x7fb   : > { %v2037_v56 = vpack.c.bf16 %v2032_v61, %v2031_v19  ;;  %2782 = vmatpush3.bf16.msra.mxu0 %v2825_v29 }
 0x7fd   : > { %2763 = vmatprep.mubr.msk.bf16.mxu0 %vm1204_vm3, %v2037_v56 }
 0x7fe   : > { %2764 = vmatmul.mubr.msk.bf16.gmra.mrb[28].mxu0 %vm1204_vm3, %v2038_v44 }
 0x8c9   : > { %v2761_v35 = vpop.f32.mrb[24].mxu0 }
 0x8ca   : > { %v2109_v36 = vadd.f32 %v2761_v35, %v2589_v33  ;;  %v2100_v2 = vpop.f32.mrb[25].mxu0 }
 0x8cb   : > { %v2101_v1 = vadd.f32 %v2589_v33, %v2100_v2  ;;  %v2762_v3 = vpop.f32.mrb[26].mxu0 }
 0x8cc   : > { %v2112_v6 = vadd.f32 %v2762_v3, %v2589_v33  ;;  %v2103_v22 = vpop.f32.mrb[27].mxu0  ;;  %v2133_v51 = vmax.f32 %v2109_v36, 0.0 }
 0x8cd   : > { %v2104_v7 = vadd.f32 %v2589_v33, %v2103_v22  ;;  %v2131_v11 = vmax.f32 %v2101_v1, 0.0 }
 0x8ce   : > { %v2134_v10 = vmax.f32 %v2112_v6, 0.0 }
 0x8cf   : > { %v2132_v13 = vmax.f32 %v2104_v7, 0.0 }
 0x8d0   : > { %v2140_v59 = vpack.c.bf16 %v2134_v10, %v2133_v51 }
 0x8d1   : > { %v2139_v16 = vpack.c.bf16 %v2132_v13, %v2131_v11  ;;  %v2765_v14 = vpop.f32.mrb[28].mxu0 }
 0x8d2   : > { %v2125_v21 = vadd.f32 %v2765_v14, %v2589_v33  ;;  %v2116_v18 = vpop.f32.mrb[29].mxu0 }
 0x8d3   : > { %v2117_v23 = vadd.f32 %v2589_v33, %v2116_v18  ;;  %v2766_v41 = vpop.f32.mrb[30].mxu0  ;;  %2771 = vmatprep.mubr.msk.bf16.mxu1 %vm1006_vm2, %v2139_v16  ;;  %2783 = vmatprep.mubr.msk.bf16.mxu0 %vm1006_vm2, %v2139_v16 }
 0x8d4   : > { %v2128_v52 = vadd.f32 %v2766_v41, %v2589_v33  ;;  %v2119_v20 = vpop.f32.mrb[31].mxu0  ;;  %2772 = vmatmul.mubr.msk.bf16.vlgmr.msra.gmra.mrb[32].mxu1 %vm1006_vm2, %v2140_v59  ;;  %2784 = vmatmul.mubr.msk.bf16.vlgmr.msra.gmra.mrb[32].mxu0 %vm1006_vm2, %v2140_v59  ;;  %v2137_v25 = vmax.f32 %v2125_v21, 0.0 }
 0x8d5   : > { %v2120_v24 = vadd.f32 %v2589_v33, %v2119_v20  ;;  %v2135_v28 = vmax.f32 %v2117_v23, 0.0 }
 0x8d6   : > { %v2138_v0 = vmax.f32 %v2128_v52, 0.0 }
 0x8d7   : > { %v2136_v37 = vmax.f32 %v2120_v24, 0.0 }
 0x8d8   : > { %v2142_v31 = vpack.c.bf16 %v2138_v0, %v2137_v25 }
 0x8d9   : > { %v2141_v39 = vpack.c.bf16 %v2136_v37, %v2135_v28 }
 0x8db   : > { %2775 = vmatprep.mubr.msk.bf16.mxu1 %vm1006_vm2, %v2141_v39  ;;  %2787 = vmatprep.mubr.msk.bf16.mxu0 %vm1006_vm2, %v2141_v39 }
 0x8dc   : > { %2776 = vmatmul.mubr.msk.bf16.gmra.mrb[36].mxu1 %vm1006_vm2, %v2142_v31  ;;  %2788 = vmatmul.mubr.msk.bf16.gmra.mrb[36].mxu0 %vm1006_vm2, %v2142_v31 }
 0x9a7   : > { %v2773_v26 = vpop.f32.mrb[32].mxu1  ;;  %v2785_v42 = vpop.f32.mrb[32].mxu0 }
 0x9a8   : > { %v3535_v9 = vadd.f32 %v2773_v26, %v2595_v27  ;;  %v2405_v50 = vadd.f32 %v2785_v42, %v2602_v30  ;;  %v2212_v5 = vpop.f32.mrb[33].mxu1  ;;  %v2396_v48 = vpop.f32.mrb[33].mxu0 }
 0x9a9   : > { %v3537_v34 = vadd.f32 %v2595_v27, %v2212_v5  ;;  %v2397_v45 = vadd.f32 %v2602_v30, %v2396_v48  ;;  %v2774_v54 = vpop.f32.mrb[34].mxu1  ;;  %v2786_v38 = vpop.f32.mrb[34].mxu0 }
 0x9aa   : > { %2429 = vst [vmem:[%s3533_s0 + $0x10] sm:$0xff] %v2405_v50  ;;  %v2408_v4 = vadd.f32 %v2786_v38, %v2602_v30  ;;  %v2399_v57 = vpop.f32.mrb[35].mxu0  ;;  %2247 = vmax.xlane.f32.xlu0 %v3535_v9  ;;  %v2215_v40 = vpop.f32.mrb[35].mxu1  ;;  %v3546_v43 = vadd.f32 %v2774_v54, %v2595_v27 }
 0x9ab   : > { %2427 = vst [vmem:[%s3533_s0] sm:$0xff] %v2397_v45  ;;  %v2400_v60 = vadd.f32 %v2602_v30, %v2399_v57  ;;  %v3542_v47 = vadd.f32 %v2595_v27, %v2215_v40  ;;  %2243 = vmax.xlane.f32.xlu1 %v3537_v34 }
 0x9ac   : > { %2430 = vst [vmem:[%s3533_s0 + $0x18] sm:$0xff] %v2408_v4 }
 0x9ad   : > { %2428 = vst [vmem:[%s3533_s0 + $0x8] sm:$0xff] %v2400_v60 }
 0x9ae   : > { %2245 = vmax.xlane.f32.xlu0 %v3542_v47 }
 0x9af   : > { %v2777_v46 = vpop.f32.mrb[36].mxu1  ;;  %v2789_v49 = vpop.f32.mrb[36].mxu0  ;;  %2249 = vmax.xlane.f32.xlu1 %v3546_v43 }
 0x9b0   : > { %v2421_v53 = vadd.f32 %v2789_v49, %v2602_v30  ;;  %v2228_v62 = vpop.f32.mrb[37].mxu1  ;;  %v2412_v8 = vpop.f32.mrb[37].mxu0  ;;  %v3559_v63 = vadd.f32 %v2777_v46, %v2595_v27 }
 0x9b1   : > { %v3551_v55 = vadd.f32 %v2595_v27, %v2228_v62  ;;  %v2413_v58 = vadd.f32 %v2602_v30, %v2412_v8  ;;  %v2778_v12 = vpop.f32.mrb[38].mxu1  ;;  %v2790_v17 = vpop.f32.mrb[38].mxu0 }
 0x9b2   : > { %2433 = vst [vmem:[%s3533_s0 + $0x30] sm:$0xff] %v2421_v53  ;;  %v2424_v15 = vadd.f32 %v2790_v17, %v2602_v30  ;;  %v2231_v19 = vpop.f32.mrb[39].mxu1  ;;  %v2415_v61 = vpop.f32.mrb[39].mxu0  ;;  %v3563_v32 = vadd.f32 %v2778_v12, %v2595_v27 }
 0x9b3   : > { %2431 = vst [vmem:[%s3533_s0 + $0x20] sm:$0xff] %v2413_v58  ;;  %v3555_v44 = vadd.f32 %v2595_v27, %v2231_v19  ;;  %v2416_v56 = vadd.f32 %v2602_v30, %v2415_v61  ;;  %2251 = vmax.xlane.f32.xlu0 %v3551_v55 }
 0x9b4   : > { %2434 = vst [vmem:[%s3533_s0 + $0x38] sm:$0xff] %v2424_v15 }
 0x9b5   : > { %2432 = vst [vmem:[%s3533_s0 + $0x28] sm:$0xff] %v2416_v56  ;;  %2253 = vmax.xlane.f32.xlu1 %v3555_v44 }
 0x9b7   : > { %2255 = vmax.xlane.f32.xlu0 %v3559_v63 }
 0x9b9   : > { %2257 = vmax.xlane.f32.xlu1 %v3563_v32 }
 0xa37   : > { %v2248_v29 = vpop.xlane.xlu0 %2247 }
 0xa38   : > { %v2261_v33 = vsub.f32 %v3535_v9, %v2248_v29  ;;  %v3568_v35 = vpop.xlane.xlu1 %2243 }
 0xa39   : > { %v2259_v36 = vsub.f32 %v3537_v34, %v3568_v35 }
 0xa3a   : > { %v2271_v2 = vmul.f32 1.442695, %v2261_v33 }
 0xa3b   : > { %v3572_v1 = vpop.xlane.xlu0 %2245  ;;  %v2267_v3 = vmul.f32 1.442695, %v2259_v36 }
 0xa3c   : > { %2890 = vpow2.f32 %v2271_v2  ;;  %v2260_v6 = vsub.f32 %v3542_v47, %v3572_v1  ;;  %v3576_v22 = vpop.xlane.xlu1 %2249 }
 0xa3d   : > { %v2262_v7 = vsub.f32 %v3546_v43, %v3576_v22  ;;  %2892 = vpow2.f32 %v2267_v3 }
 0xa3e   : > { %v2269_v10 = vmul.f32 1.442695, %v2260_v6 }
 0xa3f   : > { %v2273_v51 = vmul.f32 1.442695, %v2262_v7 }
 0xa40   : > { %v3580_v11 = vpop.xlane.xlu0 %2251 }
 0xa41   : > { %2894 = vpow2.f32 %v2273_v51  ;;  %v2263_v13 = vsub.f32 %v3551_v55, %v3580_v11 }
 0xa42   : > { %v3584_v59 = vpop.xlane.xlu1 %2253  ;;  %2896 = vpow2.f32 %v2269_v10 }
 0xa43   : > { %v2275_v16 = vmul.f32 1.442695, %v2263_v13  ;;  %v2264_v14 = vsub.f32 %v3555_v44, %v3584_v59 }
 0xa44   : > { %v3588_v21 = vpop.xlane.xlu0 %2255 }
 0xa45   : > { %2898 = vpow2.f32 %v2275_v16  ;;  %v2277_v18 = vmul.f32 1.442695, %v2264_v14  ;;  %v2265_v23 = vsub.f32 %v3559_v63, %v3588_v21 }
 0xa46   : > { %v2891_v41 = vpop.eup %2890  ;;  %v3592_v52 = vpop.xlane.xlu1 %2257 }
 0xa47   : > { %v2279_v20 = vmul.f32 1.442695, %v2265_v23  ;;  %v2266_v24 = vsub.f32 %v3563_v32, %v3592_v52  ;;  %2287 = vadd.xlane.f32.xlu0 %v2891_v41  ;;  %2900 = vpow2.f32 %v2277_v18  ;;  %v2893_v0 = vpop.eup %2892 }
 0xa49   : > { %2902 = vpow2.f32 %v2279_v20  ;;  %v2281_v25 = vmul.f32 1.442695, %v2266_v24 }
 0xa4b   : > { %v2895_v28 = vpop.eup %2894  ;;  %2283 = vadd.xlane.f32.xlu0 %v2893_v0  ;;  %2904 = vpow2.f32 %v2281_v25 }
 0xa4c   : > { %2289 = vadd.xlane.f32.xlu1 %v2895_v28  ;;  %v2897_v37 = vpop.eup %2896 }
 0xa4f   : > { %v2899_v31 = vpop.eup %2898 }
 0xa50   : > { %2291 = vadd.xlane.f32.xlu0 %v2899_v31  ;;  %2285 = vadd.xlane.f32.xlu1 %v2897_v37 }
 0xa51   : > { %v2901_v39 = vpop.eup %2900 }
 0xa53   : > { %v2903_v27 = vpop.eup %2902 }
 0xa54   : > { %2295 = vadd.xlane.f32.xlu0 %v2903_v27  ;;  %2293 = vadd.xlane.f32.xlu1 %v2901_v39 }
 0xa55   : > { %v2905_v30 = vpop.eup %2904 }
 0xa58   : > { %2297 = vadd.xlane.f32.xlu1 %v2905_v30 }
 0xad4   : > { %v2288_v26 = vpop.xlane.xlu0 %2287 }
 0xad5   : > { %2906 = vlog2.f32 %v2288_v26 }
 0xad8   : > { %v2284_v42 = vpop.xlane.xlu0 %2283 }
 0xad9   : > { %2908 = vlog2.f32 %v2284_v42  ;;  %v2290_v50 = vpop.xlane.xlu1 %2289 }
 0xada   : > { %2910 = vlog2.f32 %v2290_v50 }
 0xadd   : > { %v2292_v5 = vpop.xlane.xlu0 %2291  ;;  %v2286_v48 = vpop.xlane.xlu1 %2285 }
 0xade   : > { %2912 = vlog2.f32 %v2292_v5 }
 0xadf   : > { %v2907_v45 = vpop.eup %2906  ;;  %2914 = vlog2.f32 %v2286_v48 }
 0xae0   : > { %v2304_v54 = vmul.f32 0.6931472, %v2907_v45 }
 0xae1   : > { %v2296_v38 = vpop.xlane.xlu0 %2295  ;;  %v2294_v4 = vpop.xlane.xlu1 %2293 }
 0xae2   : > { %v2317_v57 = vadd.f32 %v2304_v54, %v2248_v29  ;;  %2916 = vlog2.f32 %v2296_v38 }
 0xae3   : > { %v2909_v40 = vpop.eup %2908  ;;  %2918 = vlog2.f32 %v2294_v4 }
 0xae4   : > { %v2911_v60 = vpop.eup %2910  ;;  %v2325_v46 = vsub.f32 %v3535_v9, %v2317_v57  ;;  %v2300_v49 = vmul.f32 0.6931472, %v2909_v40 }
 0xae5   : > { %v2306_v53 = vmul.f32 0.6931472, %v2911_v60  ;;  %v2298_v62 = vpop.xlane.xlu1 %2297 }
 0xae6   : > { %2333 = vst [vmem:[%s3601_s10 + $0x10] sm:$0xff] %v2325_v46  ;;  %v2315_v8 = vadd.f32 %v2300_v49, %v3568_v35  ;;  %2920 = vlog2.f32 %v2298_v62 }
 0xae7   : > { %v2318_v58 = vadd.f32 %v2306_v53, %v3576_v22 }
 0xae8   : > { %v2913_v12 = vpop.eup %2912  ;;  %v2323_v17 = vsub.f32 %v3537_v34, %v2315_v8 }
 0xae9   : > { %v2915_v15 = vpop.eup %2914  ;;  %v2326_v19 = vsub.f32 %v3546_v43, %v2318_v58  ;;  %v2308_v61 = vmul.f32 0.6931472, %v2913_v12 }
 0xaea   : > { %2331 = vst [vmem:[%s3601_s10] sm:$0xff] %v2323_v17  ;;  %v2302_v9 = vmul.f32 0.6931472, %v2915_v15 }
 0xaeb   : > { %2334 = vst [vmem:[%s3601_s10 + $0x18] sm:$0xff] %v2326_v19  ;;  %v2319_v56 = vadd.f32 %v2308_v61, %v3580_v11 }
 0xaec   : > { %v2917_v29 = vpop.eup %2916  ;;  %v2316_v33 = vadd.f32 %v2302_v9, %v3572_v1 }
 0xaed   : > { %v2919_v35 = vpop.eup %2918  ;;  %v2327_v36 = vsub.f32 %v3551_v55, %v2319_v56  ;;  %v2312_v34 = vmul.f32 0.6931472, %v2917_v29 }
 0xaee   : > { %v2324_v2 = vsub.f32 %v3542_v47, %v2316_v33  ;;  %v2310_v43 = vmul.f32 0.6931472, %v2919_v35 }
 0xaef   : > { %2335 = vst [vmem:[%s3601_s10 + $0x20] sm:$0xff] %v2327_v36  ;;  %v2321_v3 = vadd.f32 %v2312_v34, %v3588_v21 }
 0xaf0   : > { %v2921_v6 = vpop.eup %2920  ;;  %2332 = vst [vmem:[%s3601_s10 + $0x8] sm:$0xff] %v2324_v2  ;;  %v2320_v22 = vadd.f32 %v2310_v43, %v3584_v59 }
 0xaf1   : > { %v2329_v7 = vsub.f32 %v3559_v63, %v2321_v3  ;;  %v2314_v51 = vmul.f32 0.6931472, %v2921_v6 }
 0xaf2   : > { %v2328_v1 = vsub.f32 %v3555_v44, %v2320_v22 }
 0xaf3   : > { %2337 = vst [vmem:[%s3601_s10 + $0x30] sm:$0xff] %v2329_v7  ;;  %v2322_v55 = vadd.f32 %v2314_v51, %v3592_v52 }
 0xaf4   : > { %2336 = vst [vmem:[%s3601_s10 + $0x28] sm:$0xff] %v2328_v1 }
 0xaf5   : > { %v2330_v10 = vsub.f32 %v3563_v32, %v2322_v55 }
 0xaf7   : > { %2338 = vst [vmem:[%s3601_s10 + $0x38] sm:$0xff] %v2330_v10 }
 0xaf8 PF: > { %s37_s27 = sadd.s32 1, %s2928_s27  }
 0xaf9   : > { %p34_p4 = scmp.ge.s32.totalorder %s37_s27, 4  }
 0xafb   :  { %36 = sbr.rel (!%p34_p4) target bundleno = 12 (0xc), region = 162 }

</bundles_post_ra>
